<compile_context>
chip_gen: v7x
topology: tpu7x:2x2x1
jax: 0.10.0
libtpu: 0.0.40
codegen_flags: <defaults>
</compile_context>

<pallas_src>
import functools
import math

import jax
import jax.numpy as jnp
from jax.experimental import pallas as pl
from jax.experimental.pallas import tpu as pltpu

_VMEM_LIMIT = 64 * 1024 * 1024


# ----------------------------------------------------------------------------
# Kernel 1: fused multi-segment 1x1 conv    out = silu(sum_i X_i @ W_i + b)
# ----------------------------------------------------------------------------
def _make_pointwise_kernel(nseg):
    def kernel(*refs):
        xs = refs[:nseg]
        ws = refs[nseg:2 * nseg]
        b_ref = refs[2 * nseg]
        o_ref = refs[2 * nseg + 1]
        acc = jnp.dot(xs[0][...], ws[0][...], preferred_element_type=jnp.float32)
        for i in range(1, nseg):
            acc = acc + jnp.dot(xs[i][...], ws[i][...],
                                preferred_element_type=jnp.float32)
        acc = acc + b_ref[...]                                   # (TM,TN)+(1,TN)
        o_ref[...] = (acc * jax.nn.sigmoid(acc)).astype(o_ref.dtype)   # SiLU
    return kernel


def _pick_tile(dim, candidates=(512, 256, 128)):
    for c in candidates:
        if dim % c == 0:
            return c
    return dim      # full-dim block (exempt from the (8,128) divisibility rule)


def fused_pointwise(xs, ws, bias):
    """xs[i]: (M, K_i) bf16, ws[i]: (K_i, N) bf16, bias: (1, N) f32 -> (M, N) bf16."""
    nseg = len(xs)
    M = int(xs[0].shape[0])
    N = int(ws[0].shape[1])
    TM = _pick_tile(M, candidates=(1024, 512, 256, 128))
    TN = _pick_tile(N)
    grid = (M // TM, N // TN)

    in_specs = (
        [pl.BlockSpec((TM, int(x.shape[1])), lambda i, j: (i, 0)) for x in xs]
        + [pl.BlockSpec((int(w.shape[0]), TN), lambda i, j: (0, j)) for w in ws]
        + [pl.BlockSpec((1, TN), lambda i, j: (0, j))]
    )
    K_total = sum(int(x.shape[1]) for x in xs)
    cost = pl.CostEstimate(
        flops=2 * M * K_total * N,
        transcendentals=M * N,
        bytes_accessed=2 * M * K_total + 2 * K_total * N + 4 * N + 2 * M * N,
    )
    return pl.pallas_call(
        _make_pointwise_kernel(nseg),
        out_shape=jax.ShapeDtypeStruct((M, N), jnp.bfloat16),
        grid=grid,
        in_specs=in_specs,
        out_specs=pl.BlockSpec((TM, TN), lambda i, j: (i, j)),
        compiler_params=pltpu.CompilerParams(
            dimension_semantics=("parallel", "parallel"),
            vmem_limit_bytes=_VMEM_LIMIT),
        cost_estimate=cost,
    )(*xs, *ws, bias)


# ----------------------------------------------------------------------------
# Kernel 2: fused 3x3 conv (stride 1 or 2) + folded-BN bias + SiLU
# ----------------------------------------------------------------------------
def _conv3x3_kernel(x_ref, w_ref, b_ref, o_ref, *, k, s, Wo, HoWo):
    # x_ref: (s, 1, Hph*Wo, k*Cin) bf16  (one image, all row phases, in VMEM)
    # w_ref: (k, k*Cin, TN) bf16;  b_ref: (1, TN) f32;  o_ref: (1, HoWo, TN)
    acc = None
    for ky in range(k):                       # unrolled row taps, static offsets
        ph = ky % s
        off = (ky // s) * Wo
        x = x_ref[ph, 0, pl.ds(off, HoWo), :]            # (Ho*Wo, k*Cin) bf16
        part = jnp.dot(x, w_ref[ky], preferred_element_type=jnp.float32)
        acc = part if acc is None else acc + part
    acc = acc + b_ref[...]                               # f32 bias add
    o_ref[0, :, :] = (acc * jax.nn.sigmoid(acc)).astype(o_ref.dtype)


def conv3x3_apply(params, x, s):
    """x: (N,H,W,Cin) bf16 NHWC -> silu(conv3x3_stride_s(x) + b): NHWC bf16."""
    k, p = 3, 1
    Nb, H, W, Cin = (int(d) for d in x.shape)
    Cout = int(params["wrow"].shape[-1])
    Ho = (H + 2 * p - k) // s + 1
    Wo = (W + 2 * p - k) // s + 1
    Kc = k * Cin
    HoWo = Ho * Wo

    xp = jnp.pad(x, ((0, 0), (p, p), (p, p), (0, 0)))
    Hp = H + 2 * p
    # width (kx) im2col only -> (N, Hp, Wo, k*Cin); the ky taps stay on-chip.
    cols = [xp[:, :, kx: kx + (Wo - 1) * s + 1: s, :] for kx in range(k)]
    xw = jnp.concatenate(cols, axis=-1)

    # split rows into `s` phases so the in-kernel row windows are unit-stride.
    if s == 1:
        Hph = Hp
        xph = xw[None]                                    # (1, N, Hp, Wo, Kc)
    else:
        Hp2 = ((Hp + s - 1) // s) * s
        if Hp2 > Hp:
            xw = jnp.pad(xw, ((0, 0), (0, Hp2 - Hp), (0, 0), (0, 0)))
        Hph = Hp2 // s
        xph = jnp.transpose(
            xw.reshape(Nb, Hph, s, Wo, Kc), (2, 0, 1, 3, 4))  # (s,N,Hph,Wo,Kc)
    need = (k - 1) // s + Ho
    if Hph < need:                                        # safety padding
        xph = jnp.pad(xph, ((0, 0), (0, 0), (0, need - Hph), (0, 0), (0, 0)))
        Hph = need
    xflat = xph.reshape(s, Nb, Hph * Wo, Kc)

    TN = _pick_tile(Cout)
    grid = (Nb, Cout // TN)
    kern = functools.partial(_conv3x3_kernel, k=k, s=s, Wo=Wo, HoWo=HoWo)
    cost = pl.CostEstimate(
        flops=2 * Nb * HoWo * Kc * Cout,
        transcendentals=Nb * HoWo * Cout,
        bytes_accessed=2 * int(xflat.size) + 2 * int(params["wrow"].size)
        + 4 * Cout + 2 * Nb * HoWo * Cout,
    )
    # TODO(synk): at production feature-map sizes, additionally tile Ho (rows)
    #             with overlapping row windows and fold the nearest upsample +
    #             remaining kx im2col into index_maps.
    out = pl.pallas_call(
        kern,
        out_shape=jax.ShapeDtypeStruct((Nb, HoWo, Cout), jnp.bfloat16),
        grid=grid,
        in_specs=[
            pl.BlockSpec((s, 1, Hph * Wo, Kc), lambda n, j: (0, n, 0, 0)),
            pl.BlockSpec((k, Kc, TN), lambda n, j: (0, 0, j)),
            pl.BlockSpec((1, TN), lambda n, j: (0, j)),
        ],
        out_specs=pl.BlockSpec((1, HoWo, TN), lambda n, j: (n, 0, j)),
        compiler_params=pltpu.CompilerParams(
            dimension_semantics=("parallel", "parallel"),
            vmem_limit_bytes=_VMEM_LIMIT),
        cost_estimate=cost,
    )(xflat, params["wrow"], params["b"])
    return out.reshape(Nb, Ho, Wo, Cout)


# ----------------------------------------------------------------------------
# Parameter init (Conv2d + BatchNorm folded, laid out for the kernels above)
# ----------------------------------------------------------------------------
def init_qbwconv(key, in_ch, out_ch, k):
    k1, k2, k3, k4, k5 = jax.random.split(key, 5)
    w = jax.random.normal(k1, (out_ch, in_ch, k, k), jnp.float32)
    w = w * (1.0 / math.sqrt(in_ch * k * k))
    gamma = 1.0 + 0.1 * jax.random.normal(k2, (out_ch,), jnp.float32)
    beta = 0.1 * jax.random.normal(k3, (out_ch,), jnp.float32)
    mean = 0.1 * jax.random.normal(k4, (out_ch,), jnp.float32)
    var = 1.0 + 0.1 * jnp.abs(jax.random.normal(k5, (out_ch,), jnp.float32))
    scale = gamma / jnp.sqrt(var + 1e-5)
    w_folded = w * scale[:, None, None, None]
    bias = (beta - mean * scale).reshape(1, out_ch).astype(jnp.float32)
    if k == 1:
        wmat = jnp.transpose(w_folded[:, :, 0, 0]).astype(jnp.bfloat16)  # (Cin,Cout)
        return {"w": wmat, "b": bias}
    # (Cout,Cin,kH,kW) -> (kH, kW*Cin, Cout): row tap ky, columns kx*Cin + c
    wrow = jnp.transpose(w_folded, (2, 3, 1, 0)).reshape(k, k * in_ch, out_ch)
    return {"wrow": wrow.astype(jnp.bfloat16), "b": bias}


def init_residual(key, ch):
    k1, k2 = jax.random.split(key)
    return {"c1": init_qbwconv(k1, ch, ch, 3), "c2": init_qbwconv(k2, ch, ch, 3)}


def init_csp(key, in_ch, out_ch, n):
    keys = jax.random.split(key, 3 + n)
    c1 = init_qbwconv(keys[0], in_ch, out_ch // 2, 1)
    c2 = init_qbwconv(keys[1], in_ch, out_ch // 2, 1)
    return {
        # conv1 & conv2 fused along N at init (output channel order [y1 | y2])
        "stem_w": jnp.concatenate([c1["w"], c2["w"]], axis=1),
        "stem_b": jnp.concatenate([c1["b"], c2["b"]], axis=1),
        "conv3": init_qbwconv(keys[2], (2 + n) * out_ch // 2, out_ch, 1),
        "res": [init_residual(keys[3 + i], out_ch // 2) for i in range(n)],
    }


def init_darkfpn(key, width, depth):
    ks = jax.random.split(key, 6)
    return {
        "h1": init_csp(ks[0], width[4] + width[5], width[4], depth[0]),
        "h2": init_csp(ks[1], width[3] + width[4], width[3], depth[0]),
        "h3": init_qbwconv(ks[2], width[3], width[3], 3),
        "h4": init_csp(ks[3], width[3] + width[4], width[4], depth[0]),
        "h5": init_qbwconv(ks[4], width[4], width[4], 3),
        "h6": init_csp(ks[5], width[4] + width[5], width[5], depth[0]),
    }


# ----------------------------------------------------------------------------
# Model application (QBWConv / QBWResidual / QBWCSP / QBWDarkFPN)
# ----------------------------------------------------------------------------
def _split_rows(w, sizes):
    offs = [0]
    for c in sizes:
        offs.append(offs[-1] + c)
    return [w[offs[i]:offs[i + 1], :] for i in range(len(sizes))]


def pointwise_over_segments(w, b, segments):
    """1x1 conv over the *virtual* channel-concat of NHWC `segments`."""
    Nb, H, W = (int(d) for d in segments[0].shape[:3])
    xs = [seg.reshape(-1, int(seg.shape[-1])) for seg in segments]
    ws = _split_rows(w, [int(x.shape[1]) for x in xs])
    out2d = fused_pointwise(xs, ws, b)
    return out2d.reshape(Nb, H, W, -1)


def residual_apply(p, x, add):
    # TODO(synk): fuse the two back-to-back 3x3 convs into one kernel so the
    #             intermediate activation never leaves VMEM.
    y = conv3x3_apply(p["c1"], x, 1)
    y = conv3x3_apply(p["c2"], y, 1)
    if add:  # not used by QBWDarkFPN (all CSPs have add=False)
        y = (y.astype(jnp.float32) + x.astype(jnp.float32)).astype(jnp.bfloat16)
    return y


def csp_apply(p, segments, add):
    out_ch = int(p["stem_w"].shape[1])
    half = out_ch // 2
    # fused conv1+conv2 over the un-materialized channel concat of `segments`
    stem = pointwise_over_segments(p["stem_w"], p["stem_b"], segments)
    branch = [stem]                              # channel order [y1 | y2]
    last = stem[..., half:]                      # y2 feeds the residual chain
    for r in p["res"]:
        last = residual_apply(r, last, add)
        branch.append(last)
    # conv3 over the un-materialized concat [y1, y2, r1, ..., rn]
    return pointwise_over_segments(p["conv3"]["w"], p["conv3"]["b"], branch)


def upsample2_nearest(x):
    # torch.nn.Upsample(scale_factor=2), mode='nearest', NHWC layout.
    # TODO(synk): fold into the consuming 1x1 conv's index_map instead of
    #             materializing the 4x tensor in HBM.
    n, h, w, c = (int(d) for d in x.shape)
    y = jnp.broadcast_to(x[:, :, None, :, None, :], (n, h, 2, w, 2, c))
    return y.reshape(n, 2 * h, 2 * w, c)


def darkfpn_apply(params, p3, p4, p5):
    """p3/p4/p5: NHWC bf16.  Returns (h2, h4, h6) in NHWC f32."""
    h1 = csp_apply(params["h1"], [upsample2_nearest(p5), p4], add=False)
    h2 = csp_apply(params["h2"], [upsample2_nearest(h1), p3], add=False)
    h3 = conv3x3_apply(params["h3"], h2, 2)
    h4 = csp_apply(params["h4"], [h3, h1], add=False)
    h5 = conv3x3_apply(params["h5"], h4, 2)
    h6 = csp_apply(params["h6"], [h5, p5], add=False)
    return (h2.astype(jnp.float32), h4.astype(jnp.float32),
            h6.astype(jnp.float32))


# ----------------------------------------------------------------------------
if __name__ == "__main__":
    # Small synthetic config: only width[3:6] and depth[0] are used by the FPN.
    width = [3, 8, 16, 16, 32, 64]   # w3=16, w4=32, w5=64
    depth = [1, 1, 1]

    key = jax.random.PRNGKey(0)
    kp, k3, k4, k5 = jax.random.split(key, 4)
    params = init_darkfpn(kp, width, depth)

    B = 2
    # PyTorch-style NCHW inputs
    p3_nchw = jax.random.normal(k3, (B, width[3], 16, 16), jnp.float32)
    p4_nchw = jax.random.normal(k4, (B, width[4], 8, 8), jnp.float32)
    p5_nchw = jax.random.normal(k5, (B, width[5], 4, 4), jnp.float32)

    # NCHW -> NHWC (and bf16) at the boundary
    to_nhwc = lambda t: jnp.transpose(t, (0, 2, 3, 1)).astype(jnp.bfloat16)

    fpn = jax.jit(darkfpn_apply)
    h2, h4, h6 = fpn(params, to_nhwc(p3_nchw), to_nhwc(p4_nchw), to_nhwc(p5_nchw))
    jax.block_until_ready((h2, h4, h6))

    # Shape sanity (matches the PyTorch module, modulo NHWC layout)
    assert h2.shape == (B, 16, 16, width[3])
    assert h4.shape == (B, 8, 8, width[4])
    assert h6.shape == (B, 4, 4, width[5])

    print("KERNEL_OK")
</pallas_src>

<mosaic_0001>
module attributes {stable_mosaic.version = 11 : i64} {
  func.func @kernel(%arg0: i32, %arg1: i32, %arg2: memref<128x64xbf16, #tpu.memory_space<vmem>>, %arg3: memref<128x32xbf16, #tpu.memory_space<vmem>>, %arg4: memref<64x32xbf16, #tpu.memory_space<vmem>>, %arg5: memref<32x32xbf16, #tpu.memory_space<vmem>>, %arg6: memref<1x32xf32, #tpu.memory_space<vmem>>, %arg7: memref<128x32xbf16, #tpu.memory_space<vmem>>) attributes {dimension_semantics = [#tpu.dimension_semantics<parallel>, #tpu.dimension_semantics<parallel>], iteration_bounds = array<i64: 1, 1>, scalar_prefetch = 0 : i64, scratch_operands = 0 : i64, tpu.core_type = #tpu.core_type<tc>, window_params = [{transform_indices = @transform_0, window_bounds = array<i64: 128, 64>}, {transform_indices = @transform_1, window_bounds = array<i64: 128, 32>}, {transform_indices = @transform_2, window_bounds = array<i64: 64, 32>}, {transform_indices = @transform_3, window_bounds = array<i64: 32, 32>}, {transform_indices = @transform_4, window_bounds = array<i64: 1, 32>}, {transform_indices = @transform_5, window_bounds = array<i64: 128, 32>}]} {
    %c0 = arith.constant 0 : index
    %c0_0 = arith.constant 0 : index
    %0 = vector.load %arg2[%c0, %c0_0] : memref<128x64xbf16, #tpu.memory_space<vmem>>, vector<128x64xbf16>
    %c0_1 = arith.constant 0 : index
    %c0_2 = arith.constant 0 : index
    %1 = vector.load %arg4[%c0_1, %c0_2] : memref<64x32xbf16, #tpu.memory_space<vmem>>, vector<64x32xbf16>
    %cst = arith.constant dense<0.000000e+00> : vector<128x32xf32>
    %2 = tpu.matmul %0, %1, %cst {dimension_numbers = #tpu.dot_dimension_numbers<[1], [0], [0], [1], [0, 0, 1, 1], [], []>} : vector<128x64xbf16>, vector<64x32xbf16>, vector<128x32xf32> -> vector<128x32xf32>
    %c0_3 = arith.constant 0 : index
    %c0_4 = arith.constant 0 : index
    %3 = vector.load %arg3[%c0_3, %c0_4] : memref<128x32xbf16, #tpu.memory_space<vmem>>, vector<128x32xbf16>
    %c0_5 = arith.constant 0 : index
    %c0_6 = arith.constant 0 : index
    %4 = vector.load %arg5[%c0_5, %c0_6] : memref<32x32xbf16, #tpu.memory_space<vmem>>, vector<32x32xbf16>
    %cst_7 = arith.constant dense<0.000000e+00> : vector<128x32xf32>
    %5 = tpu.matmul %3, %4, %cst_7 {dimension_numbers = #tpu.dot_dimension_numbers<[1], [0], [0], [1], [0, 0, 1, 1], [], []>} : vector<128x32xbf16>, vector<32x32xbf16>, vector<128x32xf32> -> vector<128x32xf32>
    %6 = arith.addf %2, %5 : vector<128x32xf32>
    %c0_8 = arith.constant 0 : index
    %c0_9 = arith.constant 0 : index
    %7 = vector.load %arg6[%c0_8, %c0_9] : memref<1x32xf32, #tpu.memory_space<vmem>>, vector<1x32xf32>
    %8 = vector.broadcast %7 : vector<1x32xf32> to vector<128x32xf32>
    %9 = arith.addf %6, %8 : vector<128x32xf32>
    %10 = arith.negf %9 : vector<128x32xf32>
    %11 = math.exp %10 : vector<128x32xf32>
    %cst_10 = arith.constant 1.000000e+00 : f32
    %12 = vector.broadcast %cst_10 : f32 to vector<128x32xf32>
    %13 = arith.addf %12, %11 : vector<128x32xf32>
    %14 = arith.divf %12, %13 : vector<128x32xf32>
    %15 = arith.mulf %9, %14 : vector<128x32xf32>
    %16 = arith.truncf %15 : vector<128x32xf32> to vector<128x32xbf16>
    %c0_11 = arith.constant 0 : index
    %c0_12 = arith.constant 0 : index
    %17 = vector.load %arg7[%c0_11, %c0_12] : memref<128x32xbf16, #tpu.memory_space<vmem>>, vector<128x32xbf16>
    tpu.vector_store %arg7[%c0_11, %c0_12], %16 {strides = array<i32>} : memref<128x32xbf16, #tpu.memory_space<vmem>>, vector<128x32xbf16>,
    return
  }
  func.func @transform_0(%arg0: i32, %arg1: i32) -> (i32, i32) {
    %c0_i32 = arith.constant 0 : i32
    %c0_i32_0 = arith.constant 0 : i32
    return %arg0, %c0_i32 : i32, i32
  }
  func.func @transform_1(%arg0: i32, %arg1: i32) -> (i32, i32) {
    %c0_i32 = arith.constant 0 : i32
    %c0_i32_0 = arith.constant 0 : i32
    return %arg0, %c0_i32 : i32, i32
  }
  func.func @transform_2(%arg0: i32, %arg1: i32) -> (i32, i32) {
    %c0_i32 = arith.constant 0 : i32
    %c0_i32_0 = arith.constant 0 : i32
    return %c0_i32, %arg1 : i32, i32
  }
  func.func @transform_3(%arg0: i32, %arg1: i32) -> (i32, i32) {
    %c0_i32 = arith.constant 0 : i32
    %c0_i32_0 = arith.constant 0 : i32
    return %c0_i32, %arg1 : i32, i32
  }
  func.func @transform_4(%arg0: i32, %arg1: i32) -> (i32, i32) {
    %c0_i32 = arith.constant 0 : i32
    %c0_i32_0 = arith.constant 0 : i32
    return %c0_i32, %arg1 : i32, i32
  }
  func.func @transform_5(%arg0: i32, %arg1: i32) -> (i32, i32) {
    %c0_i32 = arith.constant 0 : i32
    return %arg0, %arg1 : i32, i32
  }
}

module attributes {stable_mosaic.version = 11 : i64} {
  func.func @_conv3x3_kernel(%arg0: i32, %arg1: i32, %arg2: memref<1x1x80x48xbf16, #tpu.memory_space<vmem>>, %arg3: memref<3x48x16xbf16, #tpu.memory_space<vmem>>, %arg4: memref<1x16xf32, #tpu.memory_space<vmem>>, %arg5: memref<1x64x16xbf16, #tpu.memory_space<vmem>>) attributes {dimension_semantics = [#tpu.dimension_semantics<parallel>, #tpu.dimension_semantics<parallel>], iteration_bounds = array<i64: 2, 1>, scalar_prefetch = 0 : i64, scratch_operands = 0 : i64, tpu.core_type = #tpu.core_type<tc>, window_params = [{transform_indices = @transform_0, window_bounds = array<i64: 1, 1, 80, 48>}, {transform_indices = @transform_1, window_bounds = array<i64: 3, 48, 16>}, {transform_indices = @transform_2, window_bounds = array<i64: 1, 16>}, {transform_indices = @transform_3, window_bounds = array<i64: 1, 64, 16>}]} {
    %c0 = arith.constant 0 : index
    %c0_0 = arith.constant 0 : index
    %c0_1 = arith.constant 0 : index
    %c0_2 = arith.constant 0 : index
    %0 = vector.load %arg2[%c0, %c0_0, %c0_1, %c0_2] : memref<1x1x80x48xbf16, #tpu.memory_space<vmem>>, vector<1x1x64x48xbf16>
    %1 = vector.shape_cast %0 : vector<1x1x64x48xbf16> to vector<64x48xbf16>
    %c0_3 = arith.constant 0 : index
    %c0_4 = arith.constant 0 : index
    %c0_5 = arith.constant 0 : index
    %2 = vector.load %arg3[%c0_3, %c0_4, %c0_5] : memref<3x48x16xbf16, #tpu.memory_space<vmem>>, vector<1x48x16xbf16>
    %3 = vector.shape_cast %2 : vector<1x48x16xbf16> to vector<48x16xbf16>
    %cst = arith.constant dense<0.000000e+00> : vector<64x16xf32>
    %4 = tpu.matmul %1, %3, %cst {dimension_numbers = #tpu.dot_dimension_numbers<[1], [0], [0], [1], [0, 0, 1, 1], [], []>} : vector<64x48xbf16>, vector<48x16xbf16>, vector<64x16xf32> -> vector<64x16xf32>
    %c0_6 = arith.constant 0 : index
    %c0_7 = arith.constant 0 : index
    %c8 = arith.constant 8 : index
    %c0_8 = arith.constant 0 : index
    %5 = vector.load %arg2[%c0_6, %c0_7, %c8, %c0_8] : memref<1x1x80x48xbf16, #tpu.memory_space<vmem>>, vector<1x1x64x48xbf16>
    %6 = vector.shape_cast %5 : vector<1x1x64x48xbf16> to vector<64x48xbf16>
    %c1 = arith.constant 1 : index
    %c0_9 = arith.constant 0 : index
    %c0_10 = arith.constant 0 : index
    %7 = vector.load %arg3[%c1, %c0_9, %c0_10] : memref<3x48x16xbf16, #tpu.memory_space<vmem>>, vector<1x48x16xbf16>
    %8 = vector.shape_cast %7 : vector<1x48x16xbf16> to vector<48x16xbf16>
    %cst_11 = arith.constant dense<0.000000e+00> : vector<64x16xf32>
    %9 = tpu.matmul %6, %8, %cst_11 {dimension_numbers = #tpu.dot_dimension_numbers<[1], [0], [0], [1], [0, 0, 1, 1], [], []>} : vector<64x48xbf16>, vector<48x16xbf16>, vector<64x16xf32> -> vector<64x16xf32>
    %10 = arith.addf %4, %9 : vector<64x16xf32>
    %c0_12 = arith.constant 0 : index
    %c0_13 = arith.constant 0 : index
    %c16 = arith.constant 16 : index
    %c0_14 = arith.constant 0 : index
    %11 = vector.load %arg2[%c0_12, %c0_13, %c16, %c0_14] : memref<1x1x80x48xbf16, #tpu.memory_space<vmem>>, vector<1x1x64x48xbf16>
    %12 = vector.shape_cast %11 : vector<1x1x64x48xbf16> to vector<64x48xbf16>
    %c2 = arith.constant 2 : index
    %c0_15 = arith.constant 0 : index
    %c0_16 = arith.constant 0 : index
    %13 = vector.load %arg3[%c2, %c0_15, %c0_16] : memref<3x48x16xbf16, #tpu.memory_space<vmem>>, vector<1x48x16xbf16>
    %14 = vector.shape_cast %13 : vector<1x48x16xbf16> to vector<48x16xbf16>
    %cst_17 = arith.constant dense<0.000000e+00> : vector<64x16xf32>
    %15 = tpu.matmul %12, %14, %cst_17 {dimension_numbers = #tpu.dot_dimension_numbers<[1], [0], [0], [1], [0, 0, 1, 1], [], []>} : vector<64x48xbf16>, vector<48x16xbf16>, vector<64x16xf32> -> vector<64x16xf32>
    %16 = arith.addf %10, %15 : vector<64x16xf32>
    %c0_18 = arith.constant 0 : index
    %c0_19 = arith.constant 0 : index
    %17 = vector.load %arg4[%c0_18, %c0_19] : memref<1x16xf32, #tpu.memory_space<vmem>>, vector<1x16xf32>
    %18 = vector.broadcast %17 : vector<1x16xf32> to vector<64x16xf32>
    %19 = arith.addf %16, %18 : vector<64x16xf32>
    %20 = arith.negf %19 : vector<64x16xf32>
    %21 = math.exp %20 : vector<64x16xf32>
    %cst_20 = arith.constant 1.000000e+00 : f32
    %22 = vector.broadcast %cst_20 : f32 to vector<64x16xf32>
    %23 = arith.addf %22, %21 : vector<64x16xf32>
    %24 = arith.divf %22, %23 : vector<64x16xf32>
    %25 = arith.mulf %19, %24 : vector<64x16xf32>
    %26 = arith.truncf %25 : vector<64x16xf32> to vector<64x16xbf16>
    %c0_21 = arith.constant 0 : index
    %c0_22 = arith.constant 0 : index
    %c0_23 = arith.constant 0 : index
    %27 = vector.load %arg5[%c0_21, %c0_22, %c0_23] : memref<1x64x16xbf16, #tpu.memory_space<vmem>>, vector<1x64x16xbf16>
    %28 = vector.shape_cast %27 : vector<1x64x16xbf16> to vector<64x16xbf16>
    %29 = vector.shape_cast %26 : vector<64x16xbf16> to vector<1x64x16xbf16>
    tpu.vector_store %arg5[%c0_21, %c0_22, %c0_23], %29 {strides = array<i32>} : memref<1x64x16xbf16, #tpu.memory_space<vmem>>, vector<1x64x16xbf16>,
    return
  }
  func.func @transform_0(%arg0: i32, %arg1: i32) -> (i32, i32, i32, i32) {
    %c0_i32 = arith.constant 0 : i32
    %c0_i32_0 = arith.constant 0 : i32
    %c0_i32_1 = arith.constant 0 : i32
    %c0_i32_2 = arith.constant 0 : i32
    return %c0_i32, %arg0, %c0_i32_0, %c0_i32_1 : i32, i32, i32, i32
  }
  func.func @transform_1(%arg0: i32, %arg1: i32) -> (i32, i32, i32) {
    %c0_i32 = arith.constant 0 : i32
    %c0_i32_0 = arith.constant 0 : i32
    %c0_i32_1 = arith.constant 0 : i32
    return %c0_i32, %c0_i32_0, %arg1 : i32, i32, i32
  }
  func.func @transform_2(%arg0: i32, %arg1: i32) -> (i32, i32) {
    %c0_i32 = arith.constant 0 : i32
    %c0_i32_0 = arith.constant 0 : i32
    return %c0_i32, %arg1 : i32, i32
  }
  func.func @transform_3(%arg0: i32, %arg1: i32) -> (i32, i32, i32) {
    %c0_i32 = arith.constant 0 : i32
    %c0_i32_0 = arith.constant 0 : i32
    return %arg0, %c0_i32, %arg1 : i32, i32, i32
  }
}

module attributes {stable_mosaic.version = 11 : i64} {
  func.func @kernel(%arg0: i32, %arg1: i32, %arg2: memref<128x32xbf16, #tpu.memory_space<vmem>>, %arg3: memref<128x16xbf16, #tpu.memory_space<vmem>>, %arg4: memref<32x32xbf16, #tpu.memory_space<vmem>>, %arg5: memref<16x32xbf16, #tpu.memory_space<vmem>>, %arg6: memref<1x32xf32, #tpu.memory_space<vmem>>, %arg7: memref<128x32xbf16, #tpu.memory_space<vmem>>) attributes {dimension_semantics = [#tpu.dimension_semantics<parallel>, #tpu.dimension_semantics<parallel>], iteration_bounds = array<i64: 1, 1>, scalar_prefetch = 0 : i64, scratch_operands = 0 : i64, tpu.core_type = #tpu.core_type<tc>, window_params = [{transform_indices = @transform_0, window_bounds = array<i64: 128, 32>}, {transform_indices = @transform_1, window_bounds = array<i64: 128, 16>}, {transform_indices = @transform_2, window_bounds = array<i64: 32, 32>}, {transform_indices = @transform_3, window_bounds = array<i64: 16, 32>}, {transform_indices = @transform_4, window_bounds = array<i64: 1, 32>}, {transform_indices = @transform_5, window_bounds = array<i64: 128, 32>}]} {
    %c0 = arith.constant 0 : index
    %c0_0 = arith.constant 0 : index
    %0 = vector.load %arg2[%c0, %c0_0] : memref<128x32xbf16, #tpu.memory_space<vmem>>, vector<128x32xbf16>
    %c0_1 = arith.constant 0 : index
    %c0_2 = arith.constant 0 : index
    %1 = vector.load %arg4[%c0_1, %c0_2] : memref<32x32xbf16, #tpu.memory_space<vmem>>, vector<32x32xbf16>
    %cst = arith.constant dense<0.000000e+00> : vector<128x32xf32>
    %2 = tpu.matmul %0, %1, %cst {dimension_numbers = #tpu.dot_dimension_numbers<[1], [0], [0], [1], [0, 0, 1, 1], [], []>} : vector<128x32xbf16>, vector<32x32xbf16>, vector<128x32xf32> -> vector<128x32xf32>
    %c0_3 = arith.constant 0 : index
    %c0_4 = arith.constant 0 : index
    %3 = vector.load %arg3[%c0_3, %c0_4] : memref<128x16xbf16, #tpu.memory_space<vmem>>, vector<128x16xbf16>
    %c0_5 = arith.constant 0 : index
    %c0_6 = arith.constant 0 : index
    %4 = vector.load %arg5[%c0_5, %c0_6] : memref<16x32xbf16, #tpu.memory_space<vmem>>, vector<16x32xbf16>
    %cst_7 = arith.constant dense<0.000000e+00> : vector<128x32xf32>
    %5 = tpu.matmul %3, %4, %cst_7 {dimension_numbers = #tpu.dot_dimension_numbers<[1], [0], [0], [1], [0, 0, 1, 1], [], []>} : vector<128x16xbf16>, vector<16x32xbf16>, vector<128x32xf32> -> vector<128x32xf32>
    %6 = arith.addf %2, %5 : vector<128x32xf32>
    %c0_8 = arith.constant 0 : index
    %c0_9 = arith.constant 0 : index
    %7 = vector.load %arg6[%c0_8, %c0_9] : memref<1x32xf32, #tpu.memory_space<vmem>>, vector<1x32xf32>
    %8 = vector.broadcast %7 : vector<1x32xf32> to vector<128x32xf32>
    %9 = arith.addf %6, %8 : vector<128x32xf32>
    %10 = arith.negf %9 : vector<128x32xf32>
    %11 = math.exp %10 : vector<128x32xf32>
    %cst_10 = arith.constant 1.000000e+00 : f32
    %12 = vector.broadcast %cst_10 : f32 to vector<128x32xf32>
    %13 = arith.addf %12, %11 : vector<128x32xf32>
    %14 = arith.divf %12, %13 : vector<128x32xf32>
    %15 = arith.mulf %9, %14 : vector<128x32xf32>
    %16 = arith.truncf %15 : vector<128x32xf32> to vector<128x32xbf16>
    %c0_11 = arith.constant 0 : index
    %c0_12 = arith.constant 0 : index
    %17 = vector.load %arg7[%c0_11, %c0_12] : memref<128x32xbf16, #tpu.memory_space<vmem>>, vector<128x32xbf16>
    tpu.vector_store %arg7[%c0_11, %c0_12], %16 {strides = array<i32>} : memref<128x32xbf16, #tpu.memory_space<vmem>>, vector<128x32xbf16>,
    return
  }
  func.func @transform_0(%arg0: i32, %arg1: i32) -> (i32, i32) {
    %c0_i32 = arith.constant 0 : i32
    %c0_i32_0 = arith.constant 0 : i32
    return %arg0, %c0_i32 : i32, i32
  }
  func.func @transform_1(%arg0: i32, %arg1: i32) -> (i32, i32) {
    %c0_i32 = arith.constant 0 : i32
    %c0_i32_0 = arith.constant 0 : i32
    return %arg0, %c0_i32 : i32, i32
  }
  func.func @transform_2(%arg0: i32, %arg1: i32) -> (i32, i32) {
    %c0_i32 = arith.constant 0 : i32
    %c0_i32_0 = arith.constant 0 : i32
    return %c0_i32, %arg1 : i32, i32
  }
  func.func @transform_3(%arg0: i32, %arg1: i32) -> (i32, i32) {
    %c0_i32 = arith.constant 0 : i32
    %c0_i32_0 = arith.constant 0 : i32
    return %c0_i32, %arg1 : i32, i32
  }
  func.func @transform_4(%arg0: i32, %arg1: i32) -> (i32, i32) {
    %c0_i32 = arith.constant 0 : i32
    %c0_i32_0 = arith.constant 0 : i32
    return %c0_i32, %arg1 : i32, i32
  }
  func.func @transform_5(%arg0: i32, %arg1: i32) -> (i32, i32) {
    %c0_i32 = arith.constant 0 : i32
    return %arg0, %arg1 : i32, i32
  }
}

module attributes {stable_mosaic.version = 11 : i64} {
  func.func @kernel(%arg0: i32, %arg1: i32, %arg2: memref<512x32xbf16, #tpu.memory_space<vmem>>, %arg3: memref<512x16xbf16, #tpu.memory_space<vmem>>, %arg4: memref<32x16xbf16, #tpu.memory_space<vmem>>, %arg5: memref<16x16xbf16, #tpu.memory_space<vmem>>, %arg6: memref<1x16xf32, #tpu.memory_space<vmem>>, %arg7: memref<512x16xbf16, #tpu.memory_space<vmem>>) attributes {dimension_semantics = [#tpu.dimension_semantics<parallel>, #tpu.dimension_semantics<parallel>], iteration_bounds = array<i64: 1, 1>, scalar_prefetch = 0 : i64, scratch_operands = 0 : i64, tpu.core_type = #tpu.core_type<tc>, window_params = [{transform_indices = @transform_0, window_bounds = array<i64: 512, 32>}, {transform_indices = @transform_1, window_bounds = array<i64: 512, 16>}, {transform_indices = @transform_2, window_bounds = array<i64: 32, 16>}, {transform_indices = @transform_3, window_bounds = array<i64: 16, 16>}, {transform_indices = @transform_4, window_bounds = array<i64: 1, 16>}, {transform_indices = @transform_5, window_bounds = array<i64: 512, 16>}]} {
    %c0 = arith.constant 0 : index
    %c0_0 = arith.constant 0 : index
    %0 = vector.load %arg2[%c0, %c0_0] : memref<512x32xbf16, #tpu.memory_space<vmem>>, vector<512x32xbf16>
    %c0_1 = arith.constant 0 : index
    %c0_2 = arith.constant 0 : index
    %1 = vector.load %arg4[%c0_1, %c0_2] : memref<32x16xbf16, #tpu.memory_space<vmem>>, vector<32x16xbf16>
    %cst = arith.constant dense<0.000000e+00> : vector<512x16xf32>
    %2 = tpu.matmul %0, %1, %cst {dimension_numbers = #tpu.dot_dimension_numbers<[1], [0], [0], [1], [0, 0, 1, 1], [], []>} : vector<512x32xbf16>, vector<32x16xbf16>, vector<512x16xf32> -> vector<512x16xf32>
    %c0_3 = arith.constant 0 : index
    %c0_4 = arith.constant 0 : index
    %3 = vector.load %arg3[%c0_3, %c0_4] : memref<512x16xbf16, #tpu.memory_space<vmem>>, vector<512x16xbf16>
    %c0_5 = arith.constant 0 : index
    %c0_6 = arith.constant 0 : index
    %4 = vector.load %arg5[%c0_5, %c0_6] : memref<16x16xbf16, #tpu.memory_space<vmem>>, vector<16x16xbf16>
    %cst_7 = arith.constant dense<0.000000e+00> : vector<512x16xf32>
    %5 = tpu.matmul %3, %4, %cst_7 {dimension_numbers = #tpu.dot_dimension_numbers<[1], [0], [0], [1], [0, 0, 1, 1], [], []>} : vector<512x16xbf16>, vector<16x16xbf16>, vector<512x16xf32> -> vector<512x16xf32>
    %6 = arith.addf %2, %5 : vector<512x16xf32>
    %c0_8 = arith.constant 0 : index
    %c0_9 = arith.constant 0 : index
    %7 = vector.load %arg6[%c0_8, %c0_9] : memref<1x16xf32, #tpu.memory_space<vmem>>, vector<1x16xf32>
    %8 = vector.broadcast %7 : vector<1x16xf32> to vector<512x16xf32>
    %9 = arith.addf %6, %8 : vector<512x16xf32>
    %10 = arith.negf %9 : vector<512x16xf32>
    %11 = math.exp %10 : vector<512x16xf32>
    %cst_10 = arith.constant 1.000000e+00 : f32
    %12 = vector.broadcast %cst_10 : f32 to vector<512x16xf32>
    %13 = arith.addf %12, %11 : vector<512x16xf32>
    %14 = arith.divf %12, %13 : vector<512x16xf32>
    %15 = arith.mulf %9, %14 : vector<512x16xf32>
    %16 = arith.truncf %15 : vector<512x16xf32> to vector<512x16xbf16>
    %c0_11 = arith.constant 0 : index
    %c0_12 = arith.constant 0 : index
    %17 = vector.load %arg7[%c0_11, %c0_12] : memref<512x16xbf16, #tpu.memory_space<vmem>>, vector<512x16xbf16>
    tpu.vector_store %arg7[%c0_11, %c0_12], %16 {strides = array<i32>} : memref<512x16xbf16, #tpu.memory_space<vmem>>, vector<512x16xbf16>,
    return
  }
  func.func @transform_0(%arg0: i32, %arg1: i32) -> (i32, i32) {
    %c0_i32 = arith.constant 0 : i32
    %c0_i32_0 = arith.constant 0 : i32
    return %arg0, %c0_i32 : i32, i32
  }
  func.func @transform_1(%arg0: i32, %arg1: i32) -> (i32, i32) {
    %c0_i32 = arith.constant 0 : i32
    %c0_i32_0 = arith.constant 0 : i32
    return %arg0, %c0_i32 : i32, i32
  }
  func.func @transform_2(%arg0: i32, %arg1: i32) -> (i32, i32) {
    %c0_i32 = arith.constant 0 : i32
    %c0_i32_0 = arith.constant 0 : i32
    return %c0_i32, %arg1 : i32, i32
  }
  func.func @transform_3(%arg0: i32, %arg1: i32) -> (i32, i32) {
    %c0_i32 = arith.constant 0 : i32
    %c0_i32_0 = arith.constant 0 : i32
    return %c0_i32, %arg1 : i32, i32
  }
  func.func @transform_4(%arg0: i32, %arg1: i32) -> (i32, i32) {
    %c0_i32 = arith.constant 0 : i32
    %c0_i32_0 = arith.constant 0 : i32
    return %c0_i32, %arg1 : i32, i32
  }
  func.func @transform_5(%arg0: i32, %arg1: i32) -> (i32, i32) {
    %c0_i32 = arith.constant 0 : i32
    return %arg0, %arg1 : i32, i32
  }
}

module attributes {stable_mosaic.version = 11 : i64} {
  func.func @_conv3x3_kernel(%arg0: i32, %arg1: i32, %arg2: memref<1x1x288x24xbf16, #tpu.memory_space<vmem>>, %arg3: memref<3x24x8xbf16, #tpu.memory_space<vmem>>, %arg4: memref<1x8xf32, #tpu.memory_space<vmem>>, %arg5: memref<1x256x8xbf16, #tpu.memory_space<vmem>>) attributes {dimension_semantics = [#tpu.dimension_semantics<parallel>, #tpu.dimension_semantics<parallel>], iteration_bounds = array<i64: 2, 1>, scalar_prefetch = 0 : i64, scratch_operands = 0 : i64, tpu.core_type = #tpu.core_type<tc>, window_params = [{transform_indices = @transform_0, window_bounds = array<i64: 1, 1, 288, 24>}, {transform_indices = @transform_1, window_bounds = array<i64: 3, 24, 8>}, {transform_indices = @transform_2, window_bounds = array<i64: 1, 8>}, {transform_indices = @transform_3, window_bounds = array<i64: 1, 256, 8>}]} {
    %c0 = arith.constant 0 : index
    %c0_0 = arith.constant 0 : index
    %c0_1 = arith.constant 0 : index
    %c0_2 = arith.constant 0 : index
    %0 = vector.load %arg2[%c0, %c0_0, %c0_1, %c0_2] : memref<1x1x288x24xbf16, #tpu.memory_space<vmem>>, vector<1x1x256x24xbf16>
    %1 = vector.shape_cast %0 : vector<1x1x256x24xbf16> to vector<256x24xbf16>
    %c0_3 = arith.constant 0 : index
    %c0_4 = arith.constant 0 : index
    %c0_5 = arith.constant 0 : index
    %2 = vector.load %arg3[%c0_3, %c0_4, %c0_5] : memref<3x24x8xbf16, #tpu.memory_space<vmem>>, vector<1x24x8xbf16>
    %3 = vector.shape_cast %2 : vector<1x24x8xbf16> to vector<24x8xbf16>
    %cst = arith.constant dense<0.000000e+00> : vector<256x8xf32>
    %4 = tpu.matmul %1, %3, %cst {dimension_numbers = #tpu.dot_dimension_numbers<[1], [0], [0], [1], [0, 0, 1, 1], [], []>} : vector<256x24xbf16>, vector<24x8xbf16>, vector<256x8xf32> -> vector<256x8xf32>
    %c0_6 = arith.constant 0 : index
    %c0_7 = arith.constant 0 : index
    %c16 = arith.constant 16 : index
    %c0_8 = arith.constant 0 : index
    %5 = vector.load %arg2[%c0_6, %c0_7, %c16, %c0_8] : memref<1x1x288x24xbf16, #tpu.memory_space<vmem>>, vector<1x1x256x24xbf16>
    %6 = vector.shape_cast %5 : vector<1x1x256x24xbf16> to vector<256x24xbf16>
    %c1 = arith.constant 1 : index
    %c0_9 = arith.constant 0 : index
    %c0_10 = arith.constant 0 : index
    %7 = vector.load %arg3[%c1, %c0_9, %c0_10] : memref<3x24x8xbf16, #tpu.memory_space<vmem>>, vector<1x24x8xbf16>
    %8 = vector.shape_cast %7 : vector<1x24x8xbf16> to vector<24x8xbf16>
    %cst_11 = arith.constant dense<0.000000e+00> : vector<256x8xf32>
    %9 = tpu.matmul %6, %8, %cst_11 {dimension_numbers = #tpu.dot_dimension_numbers<[1], [0], [0], [1], [0, 0, 1, 1], [], []>} : vector<256x24xbf16>, vector<24x8xbf16>, vector<256x8xf32> -> vector<256x8xf32>
    %10 = arith.addf %4, %9 : vector<256x8xf32>
    %c0_12 = arith.constant 0 : index
    %c0_13 = arith.constant 0 : index
    %c32 = arith.constant 32 : index
    %c0_14 = arith.constant 0 : index
    %11 = vector.load %arg2[%c0_12, %c0_13, %c32, %c0_14] : memref<1x1x288x24xbf16, #tpu.memory_space<vmem>>, vector<1x1x256x24xbf16>
    %12 = vector.shape_cast %11 : vector<1x1x256x24xbf16> to vector<256x24xbf16>
    %c2 = arith.constant 2 : index
    %c0_15 = arith.constant 0 : index
    %c0_16 = arith.constant 0 : index
    %13 = vector.load %arg3[%c2, %c0_15, %c0_16] : memref<3x24x8xbf16, #tpu.memory_space<vmem>>, vector<1x24x8xbf16>
    %14 = vector.shape_cast %13 : vector<1x24x8xbf16> to vector<24x8xbf16>
    %cst_17 = arith.constant dense<0.000000e+00> : vector<256x8xf32>
    %15 = tpu.matmul %12, %14, %cst_17 {dimension_numbers = #tpu.dot_dimension_numbers<[1], [0], [0], [1], [0, 0, 1, 1], [], []>} : vector<256x24xbf16>, vector<24x8xbf16>, vector<256x8xf32> -> vector<256x8xf32>
    %16 = arith.addf %10, %15 : vector<256x8xf32>
    %c0_18 = arith.constant 0 : index
    %c0_19 = arith.constant 0 : index
    %17 = vector.load %arg4[%c0_18, %c0_19] : memref<1x8xf32, #tpu.memory_space<vmem>>, vector<1x8xf32>
    %18 = vector.broadcast %17 : vector<1x8xf32> to vector<256x8xf32>
    %19 = arith.addf %16, %18 : vector<256x8xf32>
    %20 = arith.negf %19 : vector<256x8xf32>
    %21 = math.exp %20 : vector<256x8xf32>
    %cst_20 = arith.constant 1.000000e+00 : f32
    %22 = vector.broadcast %cst_20 : f32 to vector<256x8xf32>
    %23 = arith.addf %22, %21 : vector<256x8xf32>
    %24 = arith.divf %22, %23 : vector<256x8xf32>
    %25 = arith.mulf %19, %24 : vector<256x8xf32>
    %26 = arith.truncf %25 : vector<256x8xf32> to vector<256x8xbf16>
    %c0_21 = arith.constant 0 : index
    %c0_22 = arith.constant 0 : index
    %c0_23 = arith.constant 0 : index
    %27 = vector.load %arg5[%c0_21, %c0_22, %c0_23] : memref<1x256x8xbf16, #tpu.memory_space<vmem>>, vector<1x256x8xbf16>
    %28 = vector.shape_cast %27 : vector<1x256x8xbf16> to vector<256x8xbf16>
    %29 = vector.shape_cast %26 : vector<256x8xbf16> to vector<1x256x8xbf16>
    tpu.vector_store %arg5[%c0_21, %c0_22, %c0_23], %29 {strides = array<i32>} : memref<1x256x8xbf16, #tpu.memory_space<vmem>>, vector<1x256x8xbf16>,
    return
  }
  func.func @transform_0(%arg0: i32, %arg1: i32) -> (i32, i32, i32, i32) {
    %c0_i32 = arith.constant 0 : i32
    %c0_i32_0 = arith.constant 0 : i32
    %c0_i32_1 = arith.constant 0 : i32
    %c0_i32_2 = arith.constant 0 : i32
    return %c0_i32, %arg0, %c0_i32_0, %c0_i32_1 : i32, i32, i32, i32
  }
  func.func @transform_1(%arg0: i32, %arg1: i32) -> (i32, i32, i32) {
    %c0_i32 = arith.constant 0 : i32
    %c0_i32_0 = arith.constant 0 : i32
    %c0_i32_1 = arith.constant 0 : i32
    return %c0_i32, %c0_i32_0, %arg1 : i32, i32, i32
  }
  func.func @transform_2(%arg0: i32, %arg1: i32) -> (i32, i32) {
    %c0_i32 = arith.constant 0 : i32
    %c0_i32_0 = arith.constant 0 : i32
    return %c0_i32, %arg1 : i32, i32
  }
  func.func @transform_3(%arg0: i32, %arg1: i32) -> (i32, i32, i32) {
    %c0_i32 = arith.constant 0 : i32
    %c0_i32_0 = arith.constant 0 : i32
    return %arg0, %c0_i32, %arg1 : i32, i32, i32
  }
}

module attributes {stable_mosaic.version = 11 : i64} {
  func.func @kernel(%arg0: i32, %arg1: i32, %arg2: memref<512x16xbf16, #tpu.memory_space<vmem>>, %arg3: memref<512x8xbf16, #tpu.memory_space<vmem>>, %arg4: memref<16x16xbf16, #tpu.memory_space<vmem>>, %arg5: memref<8x16xbf16, #tpu.memory_space<vmem>>, %arg6: memref<1x16xf32, #tpu.memory_space<vmem>>, %arg7: memref<512x16xbf16, #tpu.memory_space<vmem>>) attributes {dimension_semantics = [#tpu.dimension_semantics<parallel>, #tpu.dimension_semantics<parallel>], iteration_bounds = array<i64: 1, 1>, scalar_prefetch = 0 : i64, scratch_operands = 0 : i64, tpu.core_type = #tpu.core_type<tc>, window_params = [{transform_indices = @transform_0, window_bounds = array<i64: 512, 16>}, {transform_indices = @transform_1, window_bounds = array<i64: 512, 8>}, {transform_indices = @transform_2, window_bounds = array<i64: 16, 16>}, {transform_indices = @transform_3, window_bounds = array<i64: 8, 16>}, {transform_indices = @transform_4, window_bounds = array<i64: 1, 16>}, {transform_indices = @transform_5, window_bounds = array<i64: 512, 16>}]} {
    %c0 = arith.constant 0 : index
    %c0_0 = arith.constant 0 : index
    %0 = vector.load %arg2[%c0, %c0_0] : memref<512x16xbf16, #tpu.memory_space<vmem>>, vector<512x16xbf16>
    %c0_1 = arith.constant 0 : index
    %c0_2 = arith.constant 0 : index
    %1 = vector.load %arg4[%c0_1, %c0_2] : memref<16x16xbf16, #tpu.memory_space<vmem>>, vector<16x16xbf16>
    %cst = arith.constant dense<0.000000e+00> : vector<512x16xf32>
    %2 = tpu.matmul %0, %1, %cst {dimension_numbers = #tpu.dot_dimension_numbers<[1], [0], [0], [1], [0, 0, 1, 1], [], []>} : vector<512x16xbf16>, vector<16x16xbf16>, vector<512x16xf32> -> vector<512x16xf32>
    %c0_3 = arith.constant 0 : index
    %c0_4 = arith.constant 0 : index
    %3 = vector.load %arg3[%c0_3, %c0_4] : memref<512x8xbf16, #tpu.memory_space<vmem>>, vector<512x8xbf16>
    %c0_5 = arith.constant 0 : index
    %c0_6 = arith.constant 0 : index
    %4 = vector.load %arg5[%c0_5, %c0_6] : memref<8x16xbf16, #tpu.memory_space<vmem>>, vector<8x16xbf16>
    %cst_7 = arith.constant dense<0.000000e+00> : vector<512x16xf32>
    %5 = tpu.matmul %3, %4, %cst_7 {dimension_numbers = #tpu.dot_dimension_numbers<[1], [0], [0], [1], [0, 0, 1, 1], [], []>} : vector<512x8xbf16>, vector<8x16xbf16>, vector<512x16xf32> -> vector<512x16xf32>
    %6 = arith.addf %2, %5 : vector<512x16xf32>
    %c0_8 = arith.constant 0 : index
    %c0_9 = arith.constant 0 : index
    %7 = vector.load %arg6[%c0_8, %c0_9] : memref<1x16xf32, #tpu.memory_space<vmem>>, vector<1x16xf32>
    %8 = vector.broadcast %7 : vector<1x16xf32> to vector<512x16xf32>
    %9 = arith.addf %6, %8 : vector<512x16xf32>
    %10 = arith.negf %9 : vector<512x16xf32>
    %11 = math.exp %10 : vector<512x16xf32>
    %cst_10 = arith.constant 1.000000e+00 : f32
    %12 = vector.broadcast %cst_10 : f32 to vector<512x16xf32>
    %13 = arith.addf %12, %11 : vector<512x16xf32>
    %14 = arith.divf %12, %13 : vector<512x16xf32>
    %15 = arith.mulf %9, %14 : vector<512x16xf32>
    %16 = arith.truncf %15 : vector<512x16xf32> to vector<512x16xbf16>
    %c0_11 = arith.constant 0 : index
    %c0_12 = arith.constant 0 : index
    %17 = vector.load %arg7[%c0_11, %c0_12] : memref<512x16xbf16, #tpu.memory_space<vmem>>, vector<512x16xbf16>
    tpu.vector_store %arg7[%c0_11, %c0_12], %16 {strides = array<i32>} : memref<512x16xbf16, #tpu.memory_space<vmem>>, vector<512x16xbf16>,
    return
  }
  func.func @transform_0(%arg0: i32, %arg1: i32) -> (i32, i32) {
    %c0_i32 = arith.constant 0 : i32
    %c0_i32_0 = arith.constant 0 : i32
    return %arg0, %c0_i32 : i32, i32
  }
  func.func @transform_1(%arg0: i32, %arg1: i32) -> (i32, i32) {
    %c0_i32 = arith.constant 0 : i32
    %c0_i32_0 = arith.constant 0 : i32
    return %arg0, %c0_i32 : i32, i32
  }
  func.func @transform_2(%arg0: i32, %arg1: i32) -> (i32, i32) {
    %c0_i32 = arith.constant 0 : i32
    %c0_i32_0 = arith.constant 0 : i32
    return %c0_i32, %arg1 : i32, i32
  }
  func.func @transform_3(%arg0: i32, %arg1: i32) -> (i32, i32) {
    %c0_i32 = arith.constant 0 : i32
    %c0_i32_0 = arith.constant 0 : i32
    return %c0_i32, %arg1 : i32, i32
  }
  func.func @transform_4(%arg0: i32, %arg1: i32) -> (i32, i32) {
    %c0_i32 = arith.constant 0 : i32
    %c0_i32_0 = arith.constant 0 : i32
    return %c0_i32, %arg1 : i32, i32
  }
  func.func @transform_5(%arg0: i32, %arg1: i32) -> (i32, i32) {
    %c0_i32 = arith.constant 0 : i32
    return %arg0, %arg1 : i32, i32
  }
}

module attributes {stable_mosaic.version = 11 : i64} {
  func.func @_conv3x3_kernel(%arg0: i32, %arg1: i32, %arg2: memref<2x1x72x48xbf16, #tpu.memory_space<vmem>>, %arg3: memref<3x48x16xbf16, #tpu.memory_space<vmem>>, %arg4: memref<1x16xf32, #tpu.memory_space<vmem>>, %arg5: memref<1x64x16xbf16, #tpu.memory_space<vmem>>) attributes {dimension_semantics = [#tpu.dimension_semantics<parallel>, #tpu.dimension_semantics<parallel>], iteration_bounds = array<i64: 2, 1>, scalar_prefetch = 0 : i64, scratch_operands = 0 : i64, tpu.core_type = #tpu.core_type<tc>, window_params = [{transform_indices = @transform_0, window_bounds = array<i64: 2, 1, 72, 48>}, {transform_indices = @transform_1, window_bounds = array<i64: 3, 48, 16>}, {transform_indices = @transform_2, window_bounds = array<i64: 1, 16>}, {transform_indices = @transform_3, window_bounds = array<i64: 1, 64, 16>}]} {
    %c0 = arith.constant 0 : index
    %c0_0 = arith.constant 0 : index
    %c0_1 = arith.constant 0 : index
    %c0_2 = arith.constant 0 : index
    %0 = vector.load %arg2[%c0, %c0_0, %c0_1, %c0_2] : memref<2x1x72x48xbf16, #tpu.memory_space<vmem>>, vector<1x1x64x48xbf16>
    %1 = vector.shape_cast %0 : vector<1x1x64x48xbf16> to vector<64x48xbf16>
    %c0_3 = arith.constant 0 : index
    %c0_4 = arith.constant 0 : index
    %c0_5 = arith.constant 0 : index
    %2 = vector.load %arg3[%c0_3, %c0_4, %c0_5] : memref<3x48x16xbf16, #tpu.memory_space<vmem>>, vector<1x48x16xbf16>
    %3 = vector.shape_cast %2 : vector<1x48x16xbf16> to vector<48x16xbf16>
    %cst = arith.constant dense<0.000000e+00> : vector<64x16xf32>
    %4 = tpu.matmul %1, %3, %cst {dimension_numbers = #tpu.dot_dimension_numbers<[1], [0], [0], [1], [0, 0, 1, 1], [], []>} : vector<64x48xbf16>, vector<48x16xbf16>, vector<64x16xf32> -> vector<64x16xf32>
    %c1 = arith.constant 1 : index
    %c0_6 = arith.constant 0 : index
    %c0_7 = arith.constant 0 : index
    %c0_8 = arith.constant 0 : index
    %5 = vector.load %arg2[%c1, %c0_6, %c0_7, %c0_8] : memref<2x1x72x48xbf16, #tpu.memory_space<vmem>>, vector<1x1x64x48xbf16>
    %6 = vector.shape_cast %5 : vector<1x1x64x48xbf16> to vector<64x48xbf16>
    %c1_9 = arith.constant 1 : index
    %c0_10 = arith.constant 0 : index
    %c0_11 = arith.constant 0 : index
    %7 = vector.load %arg3[%c1_9, %c0_10, %c0_11] : memref<3x48x16xbf16, #tpu.memory_space<vmem>>, vector<1x48x16xbf16>
    %8 = vector.shape_cast %7 : vector<1x48x16xbf16> to vector<48x16xbf16>
    %cst_12 = arith.constant dense<0.000000e+00> : vector<64x16xf32>
    %9 = tpu.matmul %6, %8, %cst_12 {dimension_numbers = #tpu.dot_dimension_numbers<[1], [0], [0], [1], [0, 0, 1, 1], [], []>} : vector<64x48xbf16>, vector<48x16xbf16>, vector<64x16xf32> -> vector<64x16xf32>
    %10 = arith.addf %4, %9 : vector<64x16xf32>
    %c0_13 = arith.constant 0 : index
    %c0_14 = arith.constant 0 : index
    %c8 = arith.constant 8 : index
    %c0_15 = arith.constant 0 : index
    %11 = vector.load %arg2[%c0_13, %c0_14, %c8, %c0_15] : memref<2x1x72x48xbf16, #tpu.memory_space<vmem>>, vector<1x1x64x48xbf16>
    %12 = vector.shape_cast %11 : vector<1x1x64x48xbf16> to vector<64x48xbf16>
    %c2 = arith.constant 2 : index
    %c0_16 = arith.constant 0 : index
    %c0_17 = arith.constant 0 : index
    %13 = vector.load %arg3[%c2, %c0_16, %c0_17] : memref<3x48x16xbf16, #tpu.memory_space<vmem>>, vector<1x48x16xbf16>
    %14 = vector.shape_cast %13 : vector<1x48x16xbf16> to vector<48x16xbf16>
    %cst_18 = arith.constant dense<0.000000e+00> : vector<64x16xf32>
    %15 = tpu.matmul %12, %14, %cst_18 {dimension_numbers = #tpu.dot_dimension_numbers<[1], [0], [0], [1], [0, 0, 1, 1], [], []>} : vector<64x48xbf16>, vector<48x16xbf16>, vector<64x16xf32> -> vector<64x16xf32>
    %16 = arith.addf %10, %15 : vector<64x16xf32>
    %c0_19 = arith.constant 0 : index
    %c0_20 = arith.constant 0 : index
    %17 = vector.load %arg4[%c0_19, %c0_20] : memref<1x16xf32, #tpu.memory_space<vmem>>, vector<1x16xf32>
    %18 = vector.broadcast %17 : vector<1x16xf32> to vector<64x16xf32>
    %19 = arith.addf %16, %18 : vector<64x16xf32>
    %20 = arith.negf %19 : vector<64x16xf32>
    %21 = math.exp %20 : vector<64x16xf32>
    %cst_21 = arith.constant 1.000000e+00 : f32
    %22 = vector.broadcast %cst_21 : f32 to vector<64x16xf32>
    %23 = arith.addf %22, %21 : vector<64x16xf32>
    %24 = arith.divf %22, %23 : vector<64x16xf32>
    %25 = arith.mulf %19, %24 : vector<64x16xf32>
    %26 = arith.truncf %25 : vector<64x16xf32> to vector<64x16xbf16>
    %c0_22 = arith.constant 0 : index
    %c0_23 = arith.constant 0 : index
    %c0_24 = arith.constant 0 : index
    %27 = vector.load %arg5[%c0_22, %c0_23, %c0_24] : memref<1x64x16xbf16, #tpu.memory_space<vmem>>, vector<1x64x16xbf16>
    %28 = vector.shape_cast %27 : vector<1x64x16xbf16> to vector<64x16xbf16>
    %29 = vector.shape_cast %26 : vector<64x16xbf16> to vector<1x64x16xbf16>
    tpu.vector_store %arg5[%c0_22, %c0_23, %c0_24], %29 {strides = array<i32>} : memref<1x64x16xbf16, #tpu.memory_space<vmem>>, vector<1x64x16xbf16>,
    return
  }
  func.func @transform_0(%arg0: i32, %arg1: i32) -> (i32, i32, i32, i32) {
    %c0_i32 = arith.constant 0 : i32
    %c0_i32_0 = arith.constant 0 : i32
    %c0_i32_1 = arith.constant 0 : i32
    %c0_i32_2 = arith.constant 0 : i32
    return %c0_i32, %arg0, %c0_i32_0, %c0_i32_1 : i32, i32, i32, i32
  }
  func.func @transform_1(%arg0: i32, %arg1: i32) -> (i32, i32, i32) {
    %c0_i32 = arith.constant 0 : i32
    %c0_i32_0 = arith.constant 0 : i32
    %c0_i32_1 = arith.constant 0 : i32
    return %c0_i32, %c0_i32_0, %arg1 : i32, i32, i32
  }
  func.func @transform_2(%arg0: i32, %arg1: i32) -> (i32, i32) {
    %c0_i32 = arith.constant 0 : i32
    %c0_i32_0 = arith.constant 0 : i32
    return %c0_i32, %arg1 : i32, i32
  }
  func.func @transform_3(%arg0: i32, %arg1: i32) -> (i32, i32, i32) {
    %c0_i32 = arith.constant 0 : i32
    %c0_i32_0 = arith.constant 0 : i32
    return %arg0, %c0_i32, %arg1 : i32, i32, i32
  }
}

module attributes {stable_mosaic.version = 11 : i64} {
  func.func @kernel(%arg0: i32, %arg1: i32, %arg2: memref<128x16xbf16, #tpu.memory_space<vmem>>, %arg3: memref<128x32xbf16, #tpu.memory_space<vmem>>, %arg4: memref<16x32xbf16, #tpu.memory_space<vmem>>, %arg5: memref<32x32xbf16, #tpu.memory_space<vmem>>, %arg6: memref<1x32xf32, #tpu.memory_space<vmem>>, %arg7: memref<128x32xbf16, #tpu.memory_space<vmem>>) attributes {dimension_semantics = [#tpu.dimension_semantics<parallel>, #tpu.dimension_semantics<parallel>], iteration_bounds = array<i64: 1, 1>, scalar_prefetch = 0 : i64, scratch_operands = 0 : i64, tpu.core_type = #tpu.core_type<tc>, window_params = [{transform_indices = @transform_0, window_bounds = array<i64: 128, 16>}, {transform_indices = @transform_1, window_bounds = array<i64: 128, 32>}, {transform_indices = @transform_2, window_bounds = array<i64: 16, 32>}, {transform_indices = @transform_3, window_bounds = array<i64: 32, 32>}, {transform_indices = @transform_4, window_bounds = array<i64: 1, 32>}, {transform_indices = @transform_5, window_bounds = array<i64: 128, 32>}]} {
    %c0 = arith.constant 0 : index
    %c0_0 = arith.constant 0 : index
    %0 = vector.load %arg2[%c0, %c0_0] : memref<128x16xbf16, #tpu.memory_space<vmem>>, vector<128x16xbf16>
    %c0_1 = arith.constant 0 : index
    %c0_2 = arith.constant 0 : index
    %1 = vector.load %arg4[%c0_1, %c0_2] : memref<16x32xbf16, #tpu.memory_space<vmem>>, vector<16x32xbf16>
    %cst = arith.constant dense<0.000000e+00> : vector<128x32xf32>
    %2 = tpu.matmul %0, %1, %cst {dimension_numbers = #tpu.dot_dimension_numbers<[1], [0], [0], [1], [0, 0, 1, 1], [], []>} : vector<128x16xbf16>, vector<16x32xbf16>, vector<128x32xf32> -> vector<128x32xf32>
    %c0_3 = arith.constant 0 : index
    %c0_4 = arith.constant 0 : index
    %3 = vector.load %arg3[%c0_3, %c0_4] : memref<128x32xbf16, #tpu.memory_space<vmem>>, vector<128x32xbf16>
    %c0_5 = arith.constant 0 : index
    %c0_6 = arith.constant 0 : index
    %4 = vector.load %arg5[%c0_5, %c0_6] : memref<32x32xbf16, #tpu.memory_space<vmem>>, vector<32x32xbf16>
    %cst_7 = arith.constant dense<0.000000e+00> : vector<128x32xf32>
    %5 = tpu.matmul %3, %4, %cst_7 {dimension_numbers = #tpu.dot_dimension_numbers<[1], [0], [0], [1], [0, 0, 1, 1], [], []>} : vector<128x32xbf16>, vector<32x32xbf16>, vector<128x32xf32> -> vector<128x32xf32>
    %6 = arith.addf %2, %5 : vector<128x32xf32>
    %c0_8 = arith.constant 0 : index
    %c0_9 = arith.constant 0 : index
    %7 = vector.load %arg6[%c0_8, %c0_9] : memref<1x32xf32, #tpu.memory_space<vmem>>, vector<1x32xf32>
    %8 = vector.broadcast %7 : vector<1x32xf32> to vector<128x32xf32>
    %9 = arith.addf %6, %8 : vector<128x32xf32>
    %10 = arith.negf %9 : vector<128x32xf32>
    %11 = math.exp %10 : vector<128x32xf32>
    %cst_10 = arith.constant 1.000000e+00 : f32
    %12 = vector.broadcast %cst_10 : f32 to vector<128x32xf32>
    %13 = arith.addf %12, %11 : vector<128x32xf32>
    %14 = arith.divf %12, %13 : vector<128x32xf32>
    %15 = arith.mulf %9, %14 : vector<128x32xf32>
    %16 = arith.truncf %15 : vector<128x32xf32> to vector<128x32xbf16>
    %c0_11 = arith.constant 0 : index
    %c0_12 = arith.constant 0 : index
    %17 = vector.load %arg7[%c0_11, %c0_12] : memref<128x32xbf16, #tpu.memory_space<vmem>>, vector<128x32xbf16>
    tpu.vector_store %arg7[%c0_11, %c0_12], %16 {strides = array<i32>} : memref<128x32xbf16, #tpu.memory_space<vmem>>, vector<128x32xbf16>,
    return
  }
  func.func @transform_0(%arg0: i32, %arg1: i32) -> (i32, i32) {
    %c0_i32 = arith.constant 0 : i32
    %c0_i32_0 = arith.constant 0 : i32
    return %arg0, %c0_i32 : i32, i32
  }
  func.func @transform_1(%arg0: i32, %arg1: i32) -> (i32, i32) {
    %c0_i32 = arith.constant 0 : i32
    %c0_i32_0 = arith.constant 0 : i32
    return %arg0, %c0_i32 : i32, i32
  }
  func.func @transform_2(%arg0: i32, %arg1: i32) -> (i32, i32) {
    %c0_i32 = arith.constant 0 : i32
    %c0_i32_0 = arith.constant 0 : i32
    return %c0_i32, %arg1 : i32, i32
  }
  func.func @transform_3(%arg0: i32, %arg1: i32) -> (i32, i32) {
    %c0_i32 = arith.constant 0 : i32
    %c0_i32_0 = arith.constant 0 : i32
    return %c0_i32, %arg1 : i32, i32
  }
  func.func @transform_4(%arg0: i32, %arg1: i32) -> (i32, i32) {
    %c0_i32 = arith.constant 0 : i32
    %c0_i32_0 = arith.constant 0 : i32
    return %c0_i32, %arg1 : i32, i32
  }
  func.func @transform_5(%arg0: i32, %arg1: i32) -> (i32, i32) {
    %c0_i32 = arith.constant 0 : i32
    return %arg0, %arg1 : i32, i32
  }
}

module attributes {stable_mosaic.version = 11 : i64} {
  func.func @_conv3x3_kernel(%arg0: i32, %arg1: i32, %arg2: memref<2x1x20x96xbf16, #tpu.memory_space<vmem>>, %arg3: memref<3x96x32xbf16, #tpu.memory_space<vmem>>, %arg4: memref<1x32xf32, #tpu.memory_space<vmem>>, %arg5: memref<1x16x32xbf16, #tpu.memory_space<vmem>>) attributes {dimension_semantics = [#tpu.dimension_semantics<parallel>, #tpu.dimension_semantics<parallel>], iteration_bounds = array<i64: 2, 1>, scalar_prefetch = 0 : i64, scratch_operands = 0 : i64, tpu.core_type = #tpu.core_type<tc>, window_params = [{transform_indices = @transform_0, window_bounds = array<i64: 2, 1, 20, 96>}, {transform_indices = @transform_1, window_bounds = array<i64: 3, 96, 32>}, {transform_indices = @transform_2, window_bounds = array<i64: 1, 32>}, {transform_indices = @transform_3, window_bounds = array<i64: 1, 16, 32>}]} {
    %c0 = arith.constant 0 : index
    %c0_0 = arith.constant 0 : index
    %c0_1 = arith.constant 0 : index
    %c0_2 = arith.constant 0 : index
    %0 = vector.load %arg2[%c0, %c0_0, %c0_1, %c0_2] : memref<2x1x20x96xbf16, #tpu.memory_space<vmem>>, vector<1x1x16x96xbf16>
    %1 = vector.shape_cast %0 : vector<1x1x16x96xbf16> to vector<16x96xbf16>
    %c0_3 = arith.constant 0 : index
    %c0_4 = arith.constant 0 : index
    %c0_5 = arith.constant 0 : index
    %2 = vector.load %arg3[%c0_3, %c0_4, %c0_5] : memref<3x96x32xbf16, #tpu.memory_space<vmem>>, vector<1x96x32xbf16>
    %3 = vector.shape_cast %2 : vector<1x96x32xbf16> to vector<96x32xbf16>
    %cst = arith.constant dense<0.000000e+00> : vector<16x32xf32>
    %4 = tpu.matmul %1, %3, %cst {dimension_numbers = #tpu.dot_dimension_numbers<[1], [0], [0], [1], [0, 0, 1, 1], [], []>} : vector<16x96xbf16>, vector<96x32xbf16>, vector<16x32xf32> -> vector<16x32xf32>
    %c1 = arith.constant 1 : index
    %c0_6 = arith.constant 0 : index
    %c0_7 = arith.constant 0 : index
    %c0_8 = arith.constant 0 : index
    %5 = vector.load %arg2[%c1, %c0_6, %c0_7, %c0_8] : memref<2x1x20x96xbf16, #tpu.memory_space<vmem>>, vector<1x1x16x96xbf16>
    %6 = vector.shape_cast %5 : vector<1x1x16x96xbf16> to vector<16x96xbf16>
    %c1_9 = arith.constant 1 : index
    %c0_10 = arith.constant 0 : index
    %c0_11 = arith.constant 0 : index
    %7 = vector.load %arg3[%c1_9, %c0_10, %c0_11] : memref<3x96x32xbf16, #tpu.memory_space<vmem>>, vector<1x96x32xbf16>
    %8 = vector.shape_cast %7 : vector<1x96x32xbf16> to vector<96x32xbf16>
    %cst_12 = arith.constant dense<0.000000e+00> : vector<16x32xf32>
    %9 = tpu.matmul %6, %8, %cst_12 {dimension_numbers = #tpu.dot_dimension_numbers<[1], [0], [0], [1], [0, 0, 1, 1], [], []>} : vector<16x96xbf16>, vector<96x32xbf16>, vector<16x32xf32> -> vector<16x32xf32>
    %10 = arith.addf %4, %9 : vector<16x32xf32>
    %c0_13 = arith.constant 0 : index
    %c0_14 = arith.constant 0 : index
    %c4 = arith.constant 4 : index
    %c0_15 = arith.constant 0 : index
    %11 = vector.load %arg2[%c0_13, %c0_14, %c4, %c0_15] : memref<2x1x20x96xbf16, #tpu.memory_space<vmem>>, vector<1x1x16x96xbf16>
    %12 = vector.shape_cast %11 : vector<1x1x16x96xbf16> to vector<16x96xbf16>
    %c2 = arith.constant 2 : index
    %c0_16 = arith.constant 0 : index
    %c0_17 = arith.constant 0 : index
    %13 = vector.load %arg3[%c2, %c0_16, %c0_17] : memref<3x96x32xbf16, #tpu.memory_space<vmem>>, vector<1x96x32xbf16>
    %14 = vector.shape_cast %13 : vector<1x96x32xbf16> to vector<96x32xbf16>
    %cst_18 = arith.constant dense<0.000000e+00> : vector<16x32xf32>
    %15 = tpu.matmul %12, %14, %cst_18 {dimension_numbers = #tpu.dot_dimension_numbers<[1], [0], [0], [1], [0, 0, 1, 1], [], []>} : vector<16x96xbf16>, vector<96x32xbf16>, vector<16x32xf32> -> vector<16x32xf32>
    %16 = arith.addf %10, %15 : vector<16x32xf32>
    %c0_19 = arith.constant 0 : index
    %c0_20 = arith.constant 0 : index
    %17 = vector.load %arg4[%c0_19, %c0_20] : memref<1x32xf32, #tpu.memory_space<vmem>>, vector<1x32xf32>
    %18 = vector.broadcast %17 : vector<1x32xf32> to vector<16x32xf32>
    %19 = arith.addf %16, %18 : vector<16x32xf32>
    %20 = arith.negf %19 : vector<16x32xf32>
    %21 = math.exp %20 : vector<16x32xf32>
    %cst_21 = arith.constant 1.000000e+00 : f32
    %22 = vector.broadcast %cst_21 : f32 to vector<16x32xf32>
    %23 = arith.addf %22, %21 : vector<16x32xf32>
    %24 = arith.divf %22, %23 : vector<16x32xf32>
    %25 = arith.mulf %19, %24 : vector<16x32xf32>
    %26 = arith.truncf %25 : vector<16x32xf32> to vector<16x32xbf16>
    %c0_22 = arith.constant 0 : index
    %c0_23 = arith.constant 0 : index
    %c0_24 = arith.constant 0 : index
    %27 = vector.load %arg5[%c0_22, %c0_23, %c0_24] : memref<1x16x32xbf16, #tpu.memory_space<vmem>>, vector<1x16x32xbf16>
    %28 = vector.shape_cast %27 : vector<1x16x32xbf16> to vector<16x32xbf16>
    %29 = vector.shape_cast %26 : vector<16x32xbf16> to vector<1x16x32xbf16>
    tpu.vector_store %arg5[%c0_22, %c0_23, %c0_24], %29 {strides = array<i32>} : memref<1x16x32xbf16, #tpu.memory_space<vmem>>, vector<1x16x32xbf16>,
    return
  }
  func.func @transform_0(%arg0: i32, %arg1: i32) -> (i32, i32, i32, i32) {
    %c0_i32 = arith.constant 0 : i32
    %c0_i32_0 = arith.constant 0 : i32
    %c0_i32_1 = arith.constant 0 : i32
    %c0_i32_2 = arith.constant 0 : i32
    return %c0_i32, %arg0, %c0_i32_0, %c0_i32_1 : i32, i32, i32, i32
  }
  func.func @transform_1(%arg0: i32, %arg1: i32) -> (i32, i32, i32) {
    %c0_i32 = arith.constant 0 : i32
    %c0_i32_0 = arith.constant 0 : i32
    %c0_i32_1 = arith.constant 0 : i32
    return %c0_i32, %c0_i32_0, %arg1 : i32, i32, i32
  }
  func.func @transform_2(%arg0: i32, %arg1: i32) -> (i32, i32) {
    %c0_i32 = arith.constant 0 : i32
    %c0_i32_0 = arith.constant 0 : i32
    return %c0_i32, %arg1 : i32, i32
  }
  func.func @transform_3(%arg0: i32, %arg1: i32) -> (i32, i32, i32) {
    %c0_i32 = arith.constant 0 : i32
    %c0_i32_0 = arith.constant 0 : i32
    return %arg0, %c0_i32, %arg1 : i32, i32, i32
  }
}

module attributes {stable_mosaic.version = 11 : i64} {
  func.func @kernel(%arg0: i32, %arg1: i32, %arg2: memref<32x32xbf16, #tpu.memory_space<vmem>>, %arg3: memref<32x64xbf16, #tpu.memory_space<vmem>>, %arg4: memref<32x64xbf16, #tpu.memory_space<vmem>>, %arg5: memref<64x64xbf16, #tpu.memory_space<vmem>>, %arg6: memref<1x64xf32, #tpu.memory_space<vmem>>, %arg7: memref<32x64xbf16, #tpu.memory_space<vmem>>) attributes {dimension_semantics = [#tpu.dimension_semantics<parallel>, #tpu.dimension_semantics<parallel>], iteration_bounds = array<i64: 1, 1>, scalar_prefetch = 0 : i64, scratch_operands = 0 : i64, tpu.core_type = #tpu.core_type<tc>, window_params = [{transform_indices = @transform_0, window_bounds = array<i64: 32, 32>}, {transform_indices = @transform_1, window_bounds = array<i64: 32, 64>}, {transform_indices = @transform_2, window_bounds = array<i64: 32, 64>}, {transform_indices = @transform_3, window_bounds = array<i64: 64, 64>}, {transform_indices = @transform_4, window_bounds = array<i64: 1, 64>}, {transform_indices = @transform_5, window_bounds = array<i64: 32, 64>}]} {
    %c0 = arith.constant 0 : index
    %c0_0 = arith.constant 0 : index
    %0 = vector.load %arg2[%c0, %c0_0] : memref<32x32xbf16, #tpu.memory_space<vmem>>, vector<32x32xbf16>
    %c0_1 = arith.constant 0 : index
    %c0_2 = arith.constant 0 : index
    %1 = vector.load %arg4[%c0_1, %c0_2] : memref<32x64xbf16, #tpu.memory_space<vmem>>, vector<32x64xbf16>
    %cst = arith.constant dense<0.000000e+00> : vector<32x64xf32>
    %2 = tpu.matmul %0, %1, %cst {dimension_numbers = #tpu.dot_dimension_numbers<[1], [0], [0], [1], [0, 0, 1, 1], [], []>} : vector<32x32xbf16>, vector<32x64xbf16>, vector<32x64xf32> -> vector<32x64xf32>
    %c0_3 = arith.constant 0 : index
    %c0_4 = arith.constant 0 : index
    %3 = vector.load %arg3[%c0_3, %c0_4] : memref<32x64xbf16, #tpu.memory_space<vmem>>, vector<32x64xbf16>
    %c0_5 = arith.constant 0 : index
    %c0_6 = arith.constant 0 : index
    %4 = vector.load %arg5[%c0_5, %c0_6] : memref<64x64xbf16, #tpu.memory_space<vmem>>, vector<64x64xbf16>
    %cst_7 = arith.constant dense<0.000000e+00> : vector<32x64xf32>
    %5 = tpu.matmul %3, %4, %cst_7 {dimension_numbers = #tpu.dot_dimension_numbers<[1], [0], [0], [1], [0, 0, 1, 1], [], []>} : vector<32x64xbf16>, vector<64x64xbf16>, vector<32x64xf32> -> vector<32x64xf32>
    %6 = arith.addf %2, %5 : vector<32x64xf32>
    %c0_8 = arith.constant 0 : index
    %c0_9 = arith.constant 0 : index
    %7 = vector.load %arg6[%c0_8, %c0_9] : memref<1x64xf32, #tpu.memory_space<vmem>>, vector<1x64xf32>
    %8 = vector.broadcast %7 : vector<1x64xf32> to vector<32x64xf32>
    %9 = arith.addf %6, %8 : vector<32x64xf32>
    %10 = arith.negf %9 : vector<32x64xf32>
    %11 = math.exp %10 : vector<32x64xf32>
    %cst_10 = arith.constant 1.000000e+00 : f32
    %12 = vector.broadcast %cst_10 : f32 to vector<32x64xf32>
    %13 = arith.addf %12, %11 : vector<32x64xf32>
    %14 = arith.divf %12, %13 : vector<32x64xf32>
    %15 = arith.mulf %9, %14 : vector<32x64xf32>
    %16 = arith.truncf %15 : vector<32x64xf32> to vector<32x64xbf16>
    %c0_11 = arith.constant 0 : index
    %c0_12 = arith.constant 0 : index
    %17 = vector.load %arg7[%c0_11, %c0_12] : memref<32x64xbf16, #tpu.memory_space<vmem>>, vector<32x64xbf16>
    tpu.vector_store %arg7[%c0_11, %c0_12], %16 {strides = array<i32>} : memref<32x64xbf16, #tpu.memory_space<vmem>>, vector<32x64xbf16>,
    return
  }
  func.func @transform_0(%arg0: i32, %arg1: i32) -> (i32, i32) {
    %c0_i32 = arith.constant 0 : i32
    %c0_i32_0 = arith.constant 0 : i32
    return %arg0, %c0_i32 : i32, i32
  }
  func.func @transform_1(%arg0: i32, %arg1: i32) -> (i32, i32) {
    %c0_i32 = arith.constant 0 : i32
    %c0_i32_0 = arith.constant 0 : i32
    return %arg0, %c0_i32 : i32, i32
  }
  func.func @transform_2(%arg0: i32, %arg1: i32) -> (i32, i32) {
    %c0_i32 = arith.constant 0 : i32
    %c0_i32_0 = arith.constant 0 : i32
    return %c0_i32, %arg1 : i32, i32
  }
  func.func @transform_3(%arg0: i32, %arg1: i32) -> (i32, i32) {
    %c0_i32 = arith.constant 0 : i32
    %c0_i32_0 = arith.constant 0 : i32
    return %c0_i32, %arg1 : i32, i32
  }
  func.func @transform_4(%arg0: i32, %arg1: i32) -> (i32, i32) {
    %c0_i32 = arith.constant 0 : i32
    %c0_i32_0 = arith.constant 0 : i32
    return %c0_i32, %arg1 : i32, i32
  }
  func.func @transform_5(%arg0: i32, %arg1: i32) -> (i32, i32) {
    %c0_i32 = arith.constant 0 : i32
    return %arg0, %arg1 : i32, i32
  }
}

module attributes {stable_mosaic.version = 11 : i64} {
  func.func @_conv3x3_kernel(%arg0: i32, %arg1: i32, %arg2: memref<1x1x24x96xbf16, #tpu.memory_space<vmem>>, %arg3: memref<3x96x32xbf16, #tpu.memory_space<vmem>>, %arg4: memref<1x32xf32, #tpu.memory_space<vmem>>, %arg5: memref<1x16x32xbf16, #tpu.memory_space<vmem>>) attributes {dimension_semantics = [#tpu.dimension_semantics<parallel>, #tpu.dimension_semantics<parallel>], iteration_bounds = array<i64: 2, 1>, scalar_prefetch = 0 : i64, scratch_operands = 0 : i64, tpu.core_type = #tpu.core_type<tc>, window_params = [{transform_indices = @transform_0, window_bounds = array<i64: 1, 1, 24, 96>}, {transform_indices = @transform_1, window_bounds = array<i64: 3, 96, 32>}, {transform_indices = @transform_2, window_bounds = array<i64: 1, 32>}, {transform_indices = @transform_3, window_bounds = array<i64: 1, 16, 32>}]} {
    %c0 = arith.constant 0 : index
    %c0_0 = arith.constant 0 : index
    %c0_1 = arith.constant 0 : index
    %c0_2 = arith.constant 0 : index
    %0 = vector.load %arg2[%c0, %c0_0, %c0_1, %c0_2] : memref<1x1x24x96xbf16, #tpu.memory_space<vmem>>, vector<1x1x16x96xbf16>
    %1 = vector.shape_cast %0 : vector<1x1x16x96xbf16> to vector<16x96xbf16>
    %c0_3 = arith.constant 0 : index
    %c0_4 = arith.constant 0 : index
    %c0_5 = arith.constant 0 : index
    %2 = vector.load %arg3[%c0_3, %c0_4, %c0_5] : memref<3x96x32xbf16, #tpu.memory_space<vmem>>, vector<1x96x32xbf16>
    %3 = vector.shape_cast %2 : vector<1x96x32xbf16> to vector<96x32xbf16>
    %cst = arith.constant dense<0.000000e+00> : vector<16x32xf32>
    %4 = tpu.matmul %1, %3, %cst {dimension_numbers = #tpu.dot_dimension_numbers<[1], [0], [0], [1], [0, 0, 1, 1], [], []>} : vector<16x96xbf16>, vector<96x32xbf16>, vector<16x32xf32> -> vector<16x32xf32>
    %c0_6 = arith.constant 0 : index
    %c0_7 = arith.constant 0 : index
    %c4 = arith.constant 4 : index
    %c0_8 = arith.constant 0 : index
    %5 = vector.load %arg2[%c0_6, %c0_7, %c4, %c0_8] : memref<1x1x24x96xbf16, #tpu.memory_space<vmem>>, vector<1x1x16x96xbf16>
    %6 = vector.shape_cast %5 : vector<1x1x16x96xbf16> to vector<16x96xbf16>
    %c1 = arith.constant 1 : index
    %c0_9 = arith.constant 0 : index
    %c0_10 = arith.constant 0 : index
    %7 = vector.load %arg3[%c1, %c0_9, %c0_10] : memref<3x96x32xbf16, #tpu.memory_space<vmem>>, vector<1x96x32xbf16>
    %8 = vector.shape_cast %7 : vector<1x96x32xbf16> to vector<96x32xbf16>
    %cst_11 = arith.constant dense<0.000000e+00> : vector<16x32xf32>
    %9 = tpu.matmul %6, %8, %cst_11 {dimension_numbers = #tpu.dot_dimension_numbers<[1], [0], [0], [1], [0, 0, 1, 1], [], []>} : vector<16x96xbf16>, vector<96x32xbf16>, vector<16x32xf32> -> vector<16x32xf32>
    %10 = arith.addf %4, %9 : vector<16x32xf32>
    %c0_12 = arith.constant 0 : index
    %c0_13 = arith.constant 0 : index
    %c8 = arith.constant 8 : index
    %c0_14 = arith.constant 0 : index
    %11 = vector.load %arg2[%c0_12, %c0_13, %c8, %c0_14] : memref<1x1x24x96xbf16, #tpu.memory_space<vmem>>, vector<1x1x16x96xbf16>
    %12 = vector.shape_cast %11 : vector<1x1x16x96xbf16> to vector<16x96xbf16>
    %c2 = arith.constant 2 : index
    %c0_15 = arith.constant 0 : index
    %c0_16 = arith.constant 0 : index
    %13 = vector.load %arg3[%c2, %c0_15, %c0_16] : memref<3x96x32xbf16, #tpu.memory_space<vmem>>, vector<1x96x32xbf16>
    %14 = vector.shape_cast %13 : vector<1x96x32xbf16> to vector<96x32xbf16>
    %cst_17 = arith.constant dense<0.000000e+00> : vector<16x32xf32>
    %15 = tpu.matmul %12, %14, %cst_17 {dimension_numbers = #tpu.dot_dimension_numbers<[1], [0], [0], [1], [0, 0, 1, 1], [], []>} : vector<16x96xbf16>, vector<96x32xbf16>, vector<16x32xf32> -> vector<16x32xf32>
    %16 = arith.addf %10, %15 : vector<16x32xf32>
    %c0_18 = arith.constant 0 : index
    %c0_19 = arith.constant 0 : index
    %17 = vector.load %arg4[%c0_18, %c0_19] : memref<1x32xf32, #tpu.memory_space<vmem>>, vector<1x32xf32>
    %18 = vector.broadcast %17 : vector<1x32xf32> to vector<16x32xf32>
    %19 = arith.addf %16, %18 : vector<16x32xf32>
    %20 = arith.negf %19 : vector<16x32xf32>
    %21 = math.exp %20 : vector<16x32xf32>
    %cst_20 = arith.constant 1.000000e+00 : f32
    %22 = vector.broadcast %cst_20 : f32 to vector<16x32xf32>
    %23 = arith.addf %22, %21 : vector<16x32xf32>
    %24 = arith.divf %22, %23 : vector<16x32xf32>
    %25 = arith.mulf %19, %24 : vector<16x32xf32>
    %26 = arith.truncf %25 : vector<16x32xf32> to vector<16x32xbf16>
    %c0_21 = arith.constant 0 : index
    %c0_22 = arith.constant 0 : index
    %c0_23 = arith.constant 0 : index
    %27 = vector.load %arg5[%c0_21, %c0_22, %c0_23] : memref<1x16x32xbf16, #tpu.memory_space<vmem>>, vector<1x16x32xbf16>
    %28 = vector.shape_cast %27 : vector<1x16x32xbf16> to vector<16x32xbf16>
    %29 = vector.shape_cast %26 : vector<16x32xbf16> to vector<1x16x32xbf16>
    tpu.vector_store %arg5[%c0_21, %c0_22, %c0_23], %29 {strides = array<i32>} : memref<1x16x32xbf16, #tpu.memory_space<vmem>>, vector<1x16x32xbf16>,
    return
  }
  func.func @transform_0(%arg0: i32, %arg1: i32) -> (i32, i32, i32, i32) {
    %c0_i32 = arith.constant 0 : i32
    %c0_i32_0 = arith.constant 0 : i32
    %c0_i32_1 = arith.constant 0 : i32
    %c0_i32_2 = arith.constant 0 : i32
    return %c0_i32, %arg0, %c0_i32_0, %c0_i32_1 : i32, i32, i32, i32
  }
  func.func @transform_1(%arg0: i32, %arg1: i32) -> (i32, i32, i32) {
    %c0_i32 = arith.constant 0 : i32
    %c0_i32_0 = arith.constant 0 : i32
    %c0_i32_1 = arith.constant 0 : i32
    return %c0_i32, %c0_i32_0, %arg1 : i32, i32, i32
  }
  func.func @transform_2(%arg0: i32, %arg1: i32) -> (i32, i32) {
    %c0_i32 = arith.constant 0 : i32
    %c0_i32_0 = arith.constant 0 : i32
    return %c0_i32, %arg1 : i32, i32
  }
  func.func @transform_3(%arg0: i32, %arg1: i32) -> (i32, i32, i32) {
    %c0_i32 = arith.constant 0 : i32
    %c0_i32_0 = arith.constant 0 : i32
    return %arg0, %c0_i32, %arg1 : i32, i32, i32
  }
}

module attributes {stable_mosaic.version = 11 : i64} {
  func.func @kernel(%arg0: i32, %arg1: i32, %arg2: memref<32x64xbf16, #tpu.memory_space<vmem>>, %arg3: memref<32x32xbf16, #tpu.memory_space<vmem>>, %arg4: memref<64x64xbf16, #tpu.memory_space<vmem>>, %arg5: memref<32x64xbf16, #tpu.memory_space<vmem>>, %arg6: memref<1x64xf32, #tpu.memory_space<vmem>>, %arg7: memref<32x64xbf16, #tpu.memory_space<vmem>>) attributes {dimension_semantics = [#tpu.dimension_semantics<parallel>, #tpu.dimension_semantics<parallel>], iteration_bounds = array<i64: 1, 1>, scalar_prefetch = 0 : i64, scratch_operands = 0 : i64, tpu.core_type = #tpu.core_type<tc>, window_params = [{transform_indices = @transform_0, window_bounds = array<i64: 32, 64>}, {transform_indices = @transform_1, window_bounds = array<i64: 32, 32>}, {transform_indices = @transform_2, window_bounds = array<i64: 64, 64>}, {transform_indices = @transform_3, window_bounds = array<i64: 32, 64>}, {transform_indices = @transform_4, window_bounds = array<i64: 1, 64>}, {transform_indices = @transform_5, window_bounds = array<i64: 32, 64>}]} {
    %c0 = arith.constant 0 : index
    %c0_0 = arith.constant 0 : index
    %0 = vector.load %arg2[%c0, %c0_0] : memref<32x64xbf16, #tpu.memory_space<vmem>>, vector<32x64xbf16>
    %c0_1 = arith.constant 0 : index
    %c0_2 = arith.constant 0 : index
    %1 = vector.load %arg4[%c0_1, %c0_2] : memref<64x64xbf16, #tpu.memory_space<vmem>>, vector<64x64xbf16>
    %cst = arith.constant dense<0.000000e+00> : vector<32x64xf32>
    %2 = tpu.matmul %0, %1, %cst {dimension_numbers = #tpu.dot_dimension_numbers<[1], [0], [0], [1], [0, 0, 1, 1], [], []>} : vector<32x64xbf16>, vector<64x64xbf16>, vector<32x64xf32> -> vector<32x64xf32>
    %c0_3 = arith.constant 0 : index
    %c0_4 = arith.constant 0 : index
    %3 = vector.load %arg3[%c0_3, %c0_4] : memref<32x32xbf16, #tpu.memory_space<vmem>>, vector<32x32xbf16>
    %c0_5 = arith.constant 0 : index
    %c0_6 = arith.constant 0 : index
    %4 = vector.load %arg5[%c0_5, %c0_6] : memref<32x64xbf16, #tpu.memory_space<vmem>>, vector<32x64xbf16>
    %cst_7 = arith.constant dense<0.000000e+00> : vector<32x64xf32>
    %5 = tpu.matmul %3, %4, %cst_7 {dimension_numbers = #tpu.dot_dimension_numbers<[1], [0], [0], [1], [0, 0, 1, 1], [], []>} : vector<32x32xbf16>, vector<32x64xbf16>, vector<32x64xf32> -> vector<32x64xf32>
    %6 = arith.addf %2, %5 : vector<32x64xf32>
    %c0_8 = arith.constant 0 : index
    %c0_9 = arith.constant 0 : index
    %7 = vector.load %arg6[%c0_8, %c0_9] : memref<1x64xf32, #tpu.memory_space<vmem>>, vector<1x64xf32>
    %8 = vector.broadcast %7 : vector<1x64xf32> to vector<32x64xf32>
    %9 = arith.addf %6, %8 : vector<32x64xf32>
    %10 = arith.negf %9 : vector<32x64xf32>
    %11 = math.exp %10 : vector<32x64xf32>
    %cst_10 = arith.constant 1.000000e+00 : f32
    %12 = vector.broadcast %cst_10 : f32 to vector<32x64xf32>
    %13 = arith.addf %12, %11 : vector<32x64xf32>
    %14 = arith.divf %12, %13 : vector<32x64xf32>
    %15 = arith.mulf %9, %14 : vector<32x64xf32>
    %16 = arith.truncf %15 : vector<32x64xf32> to vector<32x64xbf16>
    %c0_11 = arith.constant 0 : index
    %c0_12 = arith.constant 0 : index
    %17 = vector.load %arg7[%c0_11, %c0_12] : memref<32x64xbf16, #tpu.memory_space<vmem>>, vector<32x64xbf16>
    tpu.vector_store %arg7[%c0_11, %c0_12], %16 {strides = array<i32>} : memref<32x64xbf16, #tpu.memory_space<vmem>>, vector<32x64xbf16>,
    return
  }
  func.func @transform_0(%arg0: i32, %arg1: i32) -> (i32, i32) {
    %c0_i32 = arith.constant 0 : i32
    %c0_i32_0 = arith.constant 0 : i32
    return %arg0, %c0_i32 : i32, i32
  }
  func.func @transform_1(%arg0: i32, %arg1: i32) -> (i32, i32) {
    %c0_i32 = arith.constant 0 : i32
    %c0_i32_0 = arith.constant 0 : i32
    return %arg0, %c0_i32 : i32, i32
  }
  func.func @transform_2(%arg0: i32, %arg1: i32) -> (i32, i32) {
    %c0_i32 = arith.constant 0 : i32
    %c0_i32_0 = arith.constant 0 : i32
    return %c0_i32, %arg1 : i32, i32
  }
  func.func @transform_3(%arg0: i32, %arg1: i32) -> (i32, i32) {
    %c0_i32 = arith.constant 0 : i32
    %c0_i32_0 = arith.constant 0 : i32
    return %c0_i32, %arg1 : i32, i32
  }
  func.func @transform_4(%arg0: i32, %arg1: i32) -> (i32, i32) {
    %c0_i32 = arith.constant 0 : i32
    %c0_i32_0 = arith.constant 0 : i32
    return %c0_i32, %arg1 : i32, i32
  }
  func.func @transform_5(%arg0: i32, %arg1: i32) -> (i32, i32) {
    %c0_i32 = arith.constant 0 : i32
    return %arg0, %arg1 : i32, i32
  }
}

</mosaic_0001>

<bundles_post_ra>
// kernel: darkfpn_apply.19
= control target key start
LH: loop header
LB: loop body
LE: loop exit
PB: predicated region body
PF: predicated region fallthrough
CT: control target
= control target key end

     0   :  { %8 = vsyncpa [#allocation3], 0  ;;  %s1668_s0 = inlined_call_operand.hbm [shape: bf16[1,2,80,48], index: 0, kind: input, shape index: {}]   ;;  %s1669_s1 = inlined_call_operand.hbm [shape: bf16[3,48,16], index: 1, kind: input, shape index: {}]   ;;  %s1670_s2 = inlined_call_operand.hbm [shape: f32[1,16], index: 2, kind: input, shape index: {}]   ;;  %s1671_s3 = inlined_call_operand.hbm [shape: bf16[2,64,16], index: 3, kind: output, shape index: {}]  }
   0x1   :  { %10 = vsyncpa [#allocation3 + $0x1], 0 }
   0x2   :  { %11 = vsyncpa [#allocation6], 0 }
   0x3   :  { %12 = vsyncpa [#allocation4], 0 }
   0x4   :  { %14 = vsyncpa [#allocation4 + $0x1], 0  ;;  %s1360_s12 = smov 0   ;;  %s1362_s13 = smov 0  }
   0x5   :  { %s1364_s14 = smov 0   ;;  %s1366_s15 = smov 0  }
   0x6   :  { %s1368_s16 = smov 0   ;;  %s1370_s17 = smov 0  }
   0x7 LB: > { %s855_s18 = sadd.s32 4294967295, %s1330_s17   ;;  %s856_s19 = sadd.s32 4294967294, %s1330_s17   ;;  %s1330_s17 = sphi %s1370_s17, %s20_s17   ;;  %s1326_s16 = sphi %s1368_s16, %s1693_s16   ;;  %s1322_s15 = sphi %s1366_s15, %s1692_s15   ;;  %s1318_s14 = sphi %s1364_s14, %s1691_s14   ;;  %s1314_s13 = sphi %s1362_s13, %s1690_s13   ;;  %s1310_s12 = sphi %s1360_s12, %s1689_s12  }
   0x8   : > { %p52_p0 = scmp.ne.s32.totalorder %s1314_s13, %s1310_s12  ;;  %p1394_p1 = scmp.eq.s32.totalorder %s855_s18, 0 }
   0x9   : > { %p1398_p2 = scmp.eq.s32.totalorder %s855_s18, 1  ;;  %p136_p3 = scmp.eq.s32.totalorder %s856_s19, 1 }
   0xa   : > { %s1676_s20 = scalar_select %p1394_p1, 1, 0 }
   0xb   : > { %p1404_p4 = por %p1394_p1, %p52_p0  ;;  %p857_p5 = scmp.ge.s32.totalorder %s1330_s17, 1 }
   0xc   : > { %p1409_p6 = por %p136_p3, %p52_p0  ;;  %p143_p7 = scmp.lt.s32.totalorder %s1330_s17, 3 }
   0xd   : > { %s1678_s22 = scalar_select %p1404_p4, 1, 0 }
   0xe   : > { %s1679_s23 = scalar_select %p1409_p6, 1, 0 }
   0xf   : > { %p1414_p8 = pnand %p857_p5, %p143_p7  ;;  %s1332_s25 = smov [#allocation5]  }
  0x10   : > { %s157_s26 = sshll.u32 %s1332_s25, 4  ;;  %s1333_s28 = smov [#allocation7]   ;;  %s1418_s26 = int_to_ptr.vmem [resolvable:$true] %s157_s26 }
  0x11   : > { %p1030_p9 = pneg %p1414_p8  ;;  %s173_s29 = sshll.u32 %s1333_s28, 4  ;;  %s1429_s29 = int_to_ptr.vmem [resolvable:$true] %s173_s29 }
  0x12   : > { %s1158_s5 = scalar_lea.hbm %s1669_s1, 1152 }
  0x13   : > { %p1425_p11 = pnand %p1030_p9, %p1394_p1  ;;  %p1159_p12 = scmp.ne.s32.totalorder %s1669_s1, %s1158_s5 }
  0x14   : > { %p1165_p5 = scmp.lt.u32.totalorder %s1158_s5, %s1669_s1 }
  0x15   : > { %p1160_p13 = pneg %p1425_p11 }
  0x17   : > { %p1161_p0 = pnand %p1160_p13, %p1159_p12 }
  0x19   : > { %p1162_p3 = pneg %p1161_p0 }
  0x1b   : > { %p1167_p7 = pnand %p1165_p5, %p1162_p3 }
  0x1d   : > { %1170 = shalt.err (!%p1167_p7)
}
  0x1e   : > { %s1171_s10 = scalar_lea.vmem %s1418_s26, 1152  ;;  %p1179_p1 = scmp.lt.s32.totalorder %s1418_s26, %s1418_s26 }
  0x1f   : > { %p1172_p9 = scmp.ne.s32.totalorder %s1418_s26, %s1171_s10  ;;  %p1180_p12 = scmp.lt.s32.totalorder %s1171_s10, %s1171_s10 }
  0x21   : > { %p1174_p10 = pnand %p1172_p9, %p1160_p13  ;;  %p1181_p0 = por %p1180_p12, %p1179_p1 }
  0x23   : > { %p1175_p6 = pneg %p1174_p10 }
  0x25   : > { %p1182_p4 = pnand %p1181_p0, %p1175_p6 }
  0x27   : > { %1185 = shalt.err (!%p1182_p4)
}
  0x28   : > { %s1334_s11 = smov 64   ;;  %s1335_s18 = smov 4  }
  0x29   : > { %1033 = dma.hbm_to_vmem [thread:$0]  (!%p1425_p11), %s1669_s1, 1152, %s1418_s26, [#allocation6], %s1334_s11, %s1334_s11, %s1335_s18  }
  0x2a   : > { %s1186_s4 = scalar_lea.hbm %s1670_s2, 16 }
  0x2b   : > { %p1187_p1 = scmp.ne.s32.totalorder %s1670_s2, %s1186_s4  ;;  %p1193_p10 = scmp.lt.u32.totalorder %s1186_s4, %s1670_s2 }
  0x2d   : > { %p1189_p4 = pnand %p1187_p1, %p1160_p13 }
  0x2f   : > { %p1190_p6 = pneg %p1189_p4 }
  0x31   : > { %p1195_p3 = pnand %p1193_p10, %p1190_p6 }
  0x33   : > { %1198 = shalt.err (!%p1195_p3)
}
  0x34   : > { %s1199_s26 = scalar_lea.vmem %s1429_s29, 16  ;;  %s1206_s9 = scalar_lea.vmem %s1429_s29, 32 }
  0x35   : > { %p1200_p5 = scmp.ne.s32.totalorder %s1429_s29, %s1199_s26  ;;  %p1207_p12 = scmp.lt.s32.totalorder %s1429_s29, %s1429_s29 }
  0x36   : > { %p1208_p0 = scmp.lt.s32.totalorder %s1206_s9, %s1199_s26 }
  0x37   : > { %p1202_p7 = pnand %p1200_p5, %p1160_p13 }
  0x38   : > { %p1209_p1 = por %p1208_p0, %p1207_p12 }
  0x39   : > { %p1203_p9 = pneg %p1202_p7 }
  0x3b   : > { %p1210_p4 = pnand %p1209_p1, %p1203_p9 }
  0x3d   : > { %1213 = shalt.err (!%p1210_p4)
}
  0x3e   : > { %1036 = dma.hbm_to_vmem [thread:$0]  (!%p1425_p11), %s1670_s2, 16, %s1429_s29, [#allocation6]  }
  0x3f   : > { %s32_s25 = sadd.s32 1, %s1326_s16  ;;  %s39_s28 = sadd.s32 1, %s1318_s14 }
  0x40   : > { %p34_p13 = scmp.ge.s32.totalorder %s32_s25, 2  ;;  %p46_p6 = scmp.ne.s32.totalorder %s1318_s14, %s1314_s13 }
  0x41   : > { %p47_p10 = scmp.eq.s32.totalorder %s1330_s17, 0  ;;  %p1047_p3 = scmp.lt.s32.totalorder %s1330_s17, 2 }
  0x42   : > { %s1695_s25 = smov (%p34_p13, %s32_s25), 0  ;;  %p1497_p7 = por %p1398_p2, %p46_p6 }
  0x43   : > { %p48_p5 = por %p47_p10, %p46_p6  ;;  %s36_s30 = ssub.s32 %s1326_s16, %s1695_s25 }
  0x44   : > { %s1682_s27 = scalar_select %p1497_p7, 1, 0 }
  0x45   : > { %s184_s4 = sand.u32 1, %s1318_s14   ;;  %p37_p9 = scmp.eq.s32.totalorder %s36_s30, 0 }
  0x46   : > { %s1015_s29 = smul.u32 40, %s184_s4  ;;  %p1504_p11 = pnand %p1047_p3, %p48_p5 }
  0x47   : > { %s1509_s6 = scalar_select %p37_p9, %s1318_s14, %s39_s28  }
  0x48   : > { %s1016_s7 = smul.u32 640, %s1326_s16  ;;  %s188_s8 = scalar_lea.vmem [#allocation2], %s1015_s29 }
  0x49   : > { %s195_s26 = sshll.u32 %s188_s8, 4  ;;  %s1519_s19 = scalar_lea.sflag [#allocation3], %s184_s4  ;;  %s1517_s26 = int_to_ptr.vmem [resolvable:$true] %s195_s26 }
  0x4a   : > { %s1515_s10 = scalar_lea.hbm %s1668_s0, %s1016_s7  ;;  %p1216_p12 = pneg %p1504_p11 }
  0x4b   : > { %s1214_s30 = scalar_lea.hbm %s1515_s10, 640  ;;  %s1219_s7 = scalar_lea.hbm %s1668_s0, 1280 }
  0x4c   : > { %p1215_p2 = scmp.ne.s32.totalorder %s1515_s10, %s1214_s30  ;;  %p1220_p4 = scmp.lt.u32.totalorder %s1515_s10, %s1668_s0 }
  0x4d   : > { %p1221_p13 = scmp.lt.u32.totalorder %s1219_s7, %s1214_s30  ;;  %p1223_p10 = scmp.lt.u32.totalorder %s1214_s30, %s1515_s10 }
  0x4e   : > { %p1217_p0 = pnand %p1216_p12, %p1215_p2 }
  0x4f   : > { %p1222_p6 = por %p1221_p13, %p1220_p4 }
  0x50   : > { %p1218_p1 = pneg %p1217_p0 }
  0x51   : > { %p1224_p3 = por %p1223_p10, %p1222_p6 }
  0x53   : > { %p1225_p5 = pnand %p1224_p3, %p1218_p1 }
  0x55   : > { %1228 = shalt.err (!%p1225_p5)
}
  0x56   : > { %s1229_s4 = scalar_lea.vmem %s1517_s26, 640  ;;  %s1336_s9 = smov [#allocation2]  }
  0x57   : > { %p1230_p9 = scmp.ne.s32.totalorder %s1517_s26, %s1229_s4  ;;  %s1234_s28 = sshll.u32 %s1336_s9, 4  ;;  %s1235_s28 = int_to_ptr.vmem [resolvable:$false] %s1234_s28 }
  0x58   : > { %s1236_s29 = scalar_lea.vmem %s1235_s28, 1280  ;;  %p1237_p7 = scmp.lt.s32.totalorder %s1517_s26, %s1235_s28 }
  0x59   : > { %p1232_p2 = pnand %p1230_p9, %p1216_p12  ;;  %p1238_p4 = scmp.lt.s32.totalorder %s1236_s29, %s1229_s4 }
  0x5b   : > { %p1233_p0 = pneg %p1232_p2  ;;  %p1239_p13 = por %p1238_p4, %p1237_p7 }
  0x5d   : > { %p1240_p6 = pnand %p1239_p13, %p1233_p0 }
  0x5f   : > { %1243 = shalt.err (!%p1240_p6)
}
  0x60   : > { %1040 = dma.hbm_to_vmem [thread:$0]  (!%p1504_p11), %s1515_s10, 640, %s1517_s26, %s1519_s19, %s1334_s11, %s1334_s11, %s1335_s18  }
  0x61   : > { %207 = sbr.rel (%p1414_p8) target bundleno = 405 (0x195), region = 32  ;;  %s1553_s30 = sand.u32 (!%p1414_p8), 1, %s1314_s13  }
  0x62   : > { %s1017_s7 = smul.u32 (!%p1414_p8), 40, %s1553_s30  ;;  %s210_s8 = scalar_lea.sflag (!%p1414_p8), [#allocation3], %s1553_s30 }
  0x63   : > { %p1684_p7 = scmp.ne.s32.totalorder (!%p1414_p8), %s1678_s22, 0 }
  0x64   : > { %s1557_s21 = scalar_lea.vmem (!%p1414_p8), [#allocation2], %s1017_s7 }
  0x68   : > { %1297 = dma.done.wait (%p1684_p7), %s210_s8, 640  }
  0x69   : > { %1299 = vsyncadd (%p1684_p7), %s210_s8, 4294966656  ;;  %p1685_p11 = scmp.ne.s32.totalorder %s1676_s20, 0 }
  0x6b   : > { %1301 = dma.done.wait (%p1685_p11), [#allocation6], 1168  }
  0x6c   : > { %1303 = vsyncadd (%p1685_p11), [#allocation6], 4294966128  ;;  %v1105_v0 = vld [vmem:[#allocation5 + $0x18] sm:$0xff]   ;;  %v1106_v1 = vld [vmem:[#allocation5] sm:$0xff]   ;;  %vm305_vm0 = vcmask 392192   ;;  %s865_s20 = sshll.u32 %s1553_s30, 5 }
  0x6d   : > { %951 = vmatprep.subr.bf16.mxu1 %v1105_v0  ;;  %v1107_v2 = vld [vmem:[#allocation5 + $0x20] sm:$0xff]   ;;  %965 = vmatprep.subr.bf16.mxu0 %v1106_v1  ;;  %v1108_v3 = vld [vmem:[#allocation5 + $0x8] sm:$0xff]   ;;  %v1110_v5 = vld [vmem:[#allocation5 + $0x10] sm:$0xff]   ;;  %vm725_vm1 = vcmask 125952   ;;  %s243_s22 = scalar_lea.vmem [#allocation8], %s865_s20  ;;  %s929_s24 = sshll.u32 %s1322_s15, 9 }
  0x6e   : > { %952 = vmatpush3.bf16.msra.mxu1 %v1105_v0  ;;  %966 = vmatpush3.bf16.msra.mxu0 %v1106_v1  ;;  %v1109_v4 = vld [vmem:[#allocation5 + $0x28] sm:$0xff]   ;;  %v246_v6 = vld [vmem:[%s1557_s21 + $0x4] sm:$0xf]  ;;  %v247_v7 = vld [vmem:[%s1557_s21 + $0x8] sm:$0xf]  ;;  %s749_s11 = sshll.u32 %s243_s22, 4  ;;  %s1614_s15 = scalar_lea.hbm %s1671_s3, %s929_s24  ;;  %s1616_s11 = int_to_ptr.vmem [resolvable:$true] %s749_s11 }
  0x6f   : > { %953 = vmatprep.subr.bf16.mxu1 %v1107_v2  ;;  %967 = vmatprep.subr.bf16.mxu0 %v1108_v3  ;;  %v248_v8 = vld [vmem:[%s1557_s21 + $0xc] sm:$0xf]  ;;  %v249_v9 = vld [vmem:[%s1557_s21 + $0x10] sm:$0xf]  ;;  %v866_v10 = vcombine.low %v246_v6, %v247_v7  ;;  %v245_v11 = vld [vmem:[%s1557_s21] sm:$0xf] }
  0x70   : > { %v877_v12 = vcombine.low %v245_v11, %v246_v6  ;;  %v1115_v13 = vld [vmem:[#allocation5 + $0x30] sm:$0xff]   ;;  %v867_v14 = vcombine.low %v248_v8, %v249_v9  ;;  %v250_v15 = vld [vmem:[%s1557_s21 + $0x14] sm:$0xf]  ;;  %v878_v17 = vcombine.low %v247_v7, %v248_v8  ;;  %v1116_v18 = vld [vmem:[#allocation5 + $0x38] sm:$0xff]   ;;  %s735_s26 = scalar_lea.sflag [#allocation4], %s1553_s30  ;;  %s1244_s10 = scalar_lea.vmem %s1616_s11, 512 }
  0x71   : > { %957 = vmatprep.mubr.msk.bf16.mxu1 %vm305_vm0, %v866_v10  ;;  %v251_v16 = vld [vmem:[%s1557_s21 + $0x18] sm:$0xf]  ;;  %v879_v20 = vcombine.low %v249_v9, %v250_v15  ;;  %v252_v21 = vld [vmem:[%s1557_s21 + $0x1c] sm:$0xf]  ;;  %v259_v22 = vld [vmem:[%s1557_s21 + $0x20] sm:$0xf]  ;;  %p1245_p8 = scmp.ne.s32.totalorder %s1616_s11, %s1244_s10 }
  0x72   : > { %954 = vmatpush3.bf16.msra.mxu1 %v1107_v2  ;;  %968 = vmatpush3.bf16.msra.mxu0 %v1108_v3  ;;  %v868_v19 = vcombine.low %v250_v15, %v251_v16  ;;  %v1121_v23 = vld [vmem:[#allocation5 + $0x40] sm:$0xff]   ;;  %v869_v24 = vcombine.low %v252_v21, %v259_v22  ;;  %v880_v25 = vcombine.low %v251_v16, %v252_v21  ;;  %v1123_v27 = vld [vmem:[%s1557_s21 + $0x18] sm:$0xff]   ;;  %v1125_v28 = vld [vmem:[%s1557_s21 + $0x20] sm:$0xff]   ;;  %p1686_p12 = scmp.ne.s32.totalorder %s1682_s27, 0  ;;  %s1337_s19 = smov [#allocation8]  }
  0x73   : > { %955 = vmatprep.subr.bf16.mxu1 %v1109_v4  ;;  %969 = vmatprep.subr.bf16.mxu0 %v1110_v5  ;;  %v1122_v26 = vld [vmem:[%s1557_s21 + $0x8] sm:$0xff]   ;;  %v1124_v29 = vld [vmem:[%s1557_s21 + $0x10] sm:$0xff]   ;;  %s1248_s4 = sshll.u32 %s1337_s19, 4  ;;  %s1249_s4 = int_to_ptr.vmem [resolvable:$false] %s1248_s4 }
  0x74   : > { %971 = vmatprep.mubr.msk.bf16.mxu0 %vm305_vm0, %v877_v12  ;;  %v899_v46 = vld [vmem:[#allocation7] ss:$0 sm:$0xff]  ;;  %p1246_p1 = pnand %p1245_p8, %p1686_p12  ;;  %s1250_s9 = scalar_lea.vmem %s1249_s4, 1024 }
  0x75   : > { %p1251_p3 = scmp.lt.s32.totalorder %s1616_s11, %s1249_s4  ;;  %p1252_p5 = scmp.lt.s32.totalorder %s1250_s9, %s1244_s10 }
  0x76   : > { %956 = vmatpush3.bf16.msra.mxu1 %v1109_v4  ;;  %970 = vmatpush3.bf16.msra.mxu0 %v1110_v5  ;;  %p1247_p10 = pneg %p1246_p1 }
  0x77   : > { %993 = vmatprep.subr.bf16.mxu1 %v1115_v13  ;;  %979 = vmatprep.subr.bf16.mxu0 %v1115_v13  ;;  %p1253_p9 = por %p1252_p5, %p1251_p3 }
  0x79   : > { %958 = vmatmul.mubr.msk.bf16.vlgmr.msra.gmra.mrb[0].mxu1 %vm305_vm0, %v867_v14  ;;  %972 = vmatmul.mubr.msk.bf16.vlgmr.msra.gmra.mrb[0].mxu0 %vm305_vm0, %v878_v17  ;;  %p1254_p2 = pnand %p1253_p9, %p1247_p10 }
  0x7a   : > { %996 = vmatpush3.bf16.msra.mxu1 %v1115_v13  ;;  %980 = vmatpush3.bf16.msra.mxu0 %v1115_v13 }
  0x7b   : > { %994 = vmatprep.subr.bf16.mxu1 %v1116_v18  ;;  %981 = vmatprep.subr.bf16.mxu0 %v1116_v18 }
  0x7c   : > { %961 = vmatprep.mubr.msk.bf16.mxu1 %vm305_vm0, %v868_v19  ;;  %975 = vmatprep.mubr.msk.bf16.mxu0 %vm305_vm0, %v879_v20 }
  0x7e   : > { %997 = vmatpush3.bf16.msra.mxu1 %v1116_v18  ;;  %982 = vmatpush3.bf16.msra.mxu0 %v1116_v18 }
  0x7f   : > { %995 = vmatprep.subr.bf16.mxu1 %v1121_v23  ;;  %983 = vmatprep.subr.bf16.mxu0 %v1121_v23 }
  0x81   : > { %962 = vmatmul.mubr.msk.bf16.gmra.mrb[4].mxu1 %vm305_vm0, %v869_v24  ;;  %976 = vmatmul.mubr.msk.bf16.gmra.mrb[4].mxu0 %vm305_vm0, %v880_v25 }
  0x82   : > { %998 = vmatpush3.bf16.msra.mxu1 %v1121_v23  ;;  %984 = vmatpush3.bf16.msra.mxu0 %v1121_v23 }
  0x83   : > { %985 = vmatprep.mubr.msk.bf16.mxu0 %vm305_vm0, %v1122_v26  ;;  %989 = vmatprep.mubr.msk.bf16.mxu1 %vm305_vm0, %v1123_v27 }
  0x89   : > { %990 = vmatmul.mubr.msk.bf16.vlgmr.msra.gmra.mrb[8].mxu1 %vm305_vm0, %v1125_v28  ;;  %986 = vmatmul.mubr.msk.bf16.vlgmr.msra.gmra.mrb[0].mxu0 %vm305_vm0, %v1124_v29 }
 0x14c   : > { %v959_v30 = vpop.f32.mrb[0].mxu1 }
 0x14d   : > { %v352_v31 = vpop.f32.mrb[1].mxu1 }
 0x14e   : > { %v960_v32 = vpop.f32.mrb[2].mxu1 }
 0x14f   : > { %v355_v33 = vpop.f32.mrb[3].mxu1 }
 0x154   : > { %v963_v34 = vpop.f32.mrb[4].mxu1  ;;  %v977_v35 = vpop.f32.mrb[4].mxu0 }
 0x155   : > { %v368_v36 = vpop.f32.mrb[5].mxu1  ;;  %v478_v37 = vadd.f32 %v977_v35, %v963_v34  ;;  %v469_v38 = vpop.f32.mrb[5].mxu0 }
 0x156   : > { %v964_v39 = vpop.f32.mrb[6].mxu1  ;;  %v470_v40 = vadd.f32 %v469_v38, %v368_v36  ;;  %v978_v41 = vpop.f32.mrb[6].mxu0 }
 0x157   : > { %v371_v42 = vpop.f32.mrb[7].mxu1  ;;  %v481_v43 = vadd.f32 %v978_v41, %v964_v39  ;;  %v472_v44 = vpop.f32.mrb[7].mxu0 }
 0x158   : > { %v473_v45 = vadd.f32 %v472_v44, %v371_v42 }
 0x15c   : > { %v991_v47 = vpop.f32.mrb[8].mxu1  ;;  %v987_v48 = vpop.f32.mrb[0].mxu0 }
 0x15d   : > { %v620_v49 = vadd.f32 %v991_v47, %v478_v37  ;;  %v599_v50 = vpop.f32.mrb[9].mxu1  ;;  %v999_v51 = vadd.f32 %v987_v48, %v959_v30  ;;  %v583_v52 = vpop.f32.mrb[1].mxu0 }
 0x15e   : > { %v618_v53 = vadd.f32 %v599_v50, %v470_v40  ;;  %v992_v54 = vpop.f32.mrb[10].mxu1  ;;  %v1000_v56 = vadd.f32 %v583_v52, %v352_v31  ;;  %v988_v57 = vpop.f32.mrb[2].mxu0 }
 0x15f   : > { %v635_v55 = vadd.f32 %v899_v46, %v620_v49  ;;  %v621_v58 = vadd.f32 %v992_v54, %v481_v43  ;;  %v602_v59 = vpop.f32.mrb[11].mxu1  ;;  %v631_v60 = vadd.f32 %v999_v51, %v899_v46  ;;  %v1001_v62 = vadd.f32 %v988_v57, %v960_v32  ;;  %v586_v63 = vpop.f32.mrb[3].mxu0 }
 0x160   : > { %v633_v61 = vadd.f32 %v899_v46, %v618_v53  ;;  %v619_v0 = vadd.f32 %v602_v59, %v473_v45  ;;  %v629_v2 = vadd.f32 %v1000_v56, %v899_v46  ;;  %v1002_v4 = vadd.f32 %v586_v63, %v355_v33 }
 0x161   : > { %v906_v1 = vmul.f32 -1.442695, %v635_v55  ;;  %v1592_v3 = vadd.f32 %v899_v46, %v621_v58  ;;  %v902_v5 = vmul.f32 -1.442695, %v631_v60  ;;  %v632_v7 = vadd.f32 %v1001_v62, %v899_v46 }
 0x162   : > { %v904_v6 = vmul.f32 -1.442695, %v633_v61  ;;  %v1594_v8 = vadd.f32 %v899_v46, %v619_v0  ;;  %v900_v9 = vmul.f32 -1.442695, %v629_v2  ;;  %v1596_v10 = vadd.f32 %v1002_v4, %v899_v46 }
 0x163   : > { %1126 = vpow2.f32 %v906_v1  ;;  %v903_v11 = vmul.f32 -1.442695, %v632_v7  ;;  %v907_v12 = vmul.f32 -1.442695, %v1592_v3 }
 0x164   : > { %1128 = vpow2.f32 %v902_v5  ;;  %v901_v13 = vmul.f32 -1.442695, %v1596_v10  ;;  %v905_v14 = vmul.f32 -1.442695, %v1594_v8 }
 0x165   : > { %1130 = vpow2.f32 %v900_v9 }
 0x166   : > { %1132 = vpow2.f32 %v904_v6 }
 0x167   : > { %1134 = vpow2.f32 %v903_v11 }
 0x168   : > { %1136 = vpow2.f32 %v907_v12 }
 0x169   : > { %1138 = vpow2.f32 %v901_v13 }
 0x16a   : > { %1140 = vpow2.f32 %v905_v14 }
 0x16d   : > { %v1127_v15 = vpop.eup %1126 }
 0x16e   : > { %v1129_v16 = vpop.eup %1128  ;;  %v667_v17 = vadd.f32 1.0, %v1127_v15 }
 0x16f   : > { %v1131_v18 = vpop.eup %1130  ;;  %v663_v19 = vadd.f32 1.0, %v1129_v16 }
 0x170   : > { %v1133_v20 = vpop.eup %1132  ;;  %1142 = vrcp.f32 %v667_v17  ;;  %v661_v21 = vadd.f32 1.0, %v1131_v18 }
 0x171   : > { %v1135_v22 = vpop.eup %1134  ;;  %1144 = vrcp.f32 %v663_v19  ;;  %v665_v23 = vadd.f32 1.0, %v1133_v20 }
 0x172   : > { %v1137_v24 = vpop.eup %1136  ;;  %1146 = vrcp.f32 %v661_v21  ;;  %v664_v25 = vadd.f32 1.0, %v1135_v22 }
 0x173   : > { %v1139_v26 = vpop.eup %1138  ;;  %1148 = vrcp.f32 %v665_v23  ;;  %v668_v27 = vadd.f32 1.0, %v1137_v24 }
 0x174   : > { %v1141_v28 = vpop.eup %1140  ;;  %1150 = vrcp.f32 %v664_v25  ;;  %v662_v29 = vadd.f32 1.0, %v1139_v26 }
 0x175   : > { %1152 = vrcp.f32 %v668_v27  ;;  %v666_v30 = vadd.f32 1.0, %v1141_v28 }
 0x176   : > { %1154 = vrcp.f32 %v662_v29 }
 0x177   : > { %1156 = vrcp.f32 %v666_v30 }
 0x17a   : > { %v1143_v31 = vpop.eup %1142 }
 0x17b   : > { %v1145_v32 = vpop.eup %1144  ;;  %v691_v33 = vmul.f32 %v1143_v31, %v635_v55 }
 0x17c   : > { %v1147_v34 = vpop.eup %1146  ;;  %v687_v35 = vmul.f32 %v1145_v32, %v631_v60 }
 0x17d   : > { %v1149_v36 = vpop.eup %1148  ;;  %v927_v37 = vpack.c.bf16 %v691_v33, %v691_v33  ;;  %v685_v38 = vmul.f32 %v1147_v34, %v629_v2 }
 0x17e   : > { %v1151_v39 = vpop.eup %1150  ;;  %v923_v40 = vpack.c.bf16 %v687_v35, %v687_v35  ;;  %v689_v41 = vmul.f32 %v1149_v36, %v633_v61 }
 0x17f   : > { %v1153_v42 = vpop.eup %1152  ;;  %732 = vst.msk [vmem:[%s243_s22 + $0x18] sm:$0xf] %vm725_vm1, %v927_v37  ;;  %v921_v43 = vpack.c.bf16 %v685_v38, %v685_v38  ;;  %v688_v44 = vmul.f32 %v1151_v39, %v632_v7 }
 0x180   : > { %v1155_v45 = vpop.eup %1154  ;;  %728 = vst.msk [vmem:[%s243_s22 + $0x8] sm:$0xf] %vm725_vm1, %v923_v40  ;;  %v925_v46 = vpack.c.bf16 %v689_v41, %v689_v41  ;;  %v692_v47 = vmul.f32 %v1153_v42, %v1592_v3 }
 0x181   : > { %v1157_v48 = vpop.eup %1156  ;;  %726 = vst.msk [vmem:[%s243_s22] sm:$0xf] %vm725_vm1, %v921_v43  ;;  %v924_v49 = vpack.c.bf16 %v688_v44, %v688_v44  ;;  %v686_v50 = vmul.f32 %v1155_v45, %v1596_v10 }
 0x182   : > { %730 = vst.msk [vmem:[%s243_s22 + $0x10] sm:$0xf] %vm725_vm1, %v925_v46  ;;  %v928_v51 = vpack.c.bf16 %v692_v47, %v692_v47  ;;  %v690_v52 = vmul.f32 %v1157_v48, %v1594_v8 }
 0x183   : > { %729 = vst.msk [vmem:[%s243_s22 + $0xc] sm:$0xf] %vm725_vm1, %v924_v49  ;;  %v922_v53 = vpack.c.bf16 %v686_v50, %v686_v50 }
 0x184   : > { %733 = vst.msk [vmem:[%s243_s22 + $0x1c] sm:$0xf] %vm725_vm1, %v928_v51  ;;  %v926_v54 = vpack.c.bf16 %v690_v52, %v690_v52 }
 0x185   : > { %727 = vst.msk [vmem:[%s243_s22 + $0x4] sm:$0xf] %vm725_vm1, %v922_v53 }
 0x186   : > { %731 = vst.msk [vmem:[%s243_s22 + $0x14] sm:$0xf] %vm725_vm1, %v926_v54 }
 0x187   : > { %1257 = shalt.err (!%p1254_p2)
}
 0x188   : > { %s1258_s28 = scalar_lea.hbm %s1614_s15, 512  ;;  %s1262_s8 = scalar_lea.hbm %s1671_s3, 1024 }
 0x189   : > { %p1259_p0 = scmp.ne.s32.totalorder %s1614_s15, %s1258_s28  ;;  %p1263_p6 = scmp.lt.u32.totalorder %s1614_s15, %s1671_s3 }
 0x18a   : > { %p1264_p7 = scmp.lt.u32.totalorder %s1262_s8, %s1258_s28  ;;  %p1266_p8 = scmp.lt.u32.totalorder %s1258_s28, %s1614_s15 }
 0x18b   : > { %p1260_p4 = pnand %p1259_p0, %p1686_p12 }
 0x18c   : > { %p1265_p11 = por %p1264_p7, %p1263_p6 }
 0x18d   : > { %p1261_p13 = pneg %p1260_p4 }
 0x18e   : > { %p1267_p1 = por %p1266_p8, %p1265_p11 }
 0x190   : > { %p1268_p10 = pnand %p1267_p1, %p1261_p13 }
 0x192   : > { %1271 = shalt.err (!%p1268_p10)
}
 0x193   : > { %s1338_s22 = smov 64   ;;  %s1339_s24 = smov 4  }
 0x194   : > { %1028 = dma.vmem_to_hbm [thread:$0]  (%p1686_p12), %s1616_s11, 512, %s1614_s15, %s735_s26, %s1338_s22, %s1338_s22, %s1339_s24  }
 0x195 PF: > { %s764_s18 = sand.u32 1, %s1310_s12   ;;  %p1687_p3 = scmp.ne.s32.totalorder %s1679_s23, 0 }
 0x196   : > { %p1688_p5 = scmp.ge.s32.totalorder %s1330_s17, 2  ;;  %s765_s5 = scalar_lea.sflag [#allocation4], %s764_s18 }
 0x198   : > { %p1042_p9 = pnand %p1688_p5, %p1687_p3 }
 0x19a   : > { %1305 = dma.done.wait (!%p1042_p9), %s765_s5, 512  }
 0x19b   : > { %1307 = vsyncadd (!%p1042_p9), %s765_s5, 4294966784  ;;  %s20_s17 = sadd.s32 1, %s1330_s17   ;;  %s1689_s12 = smov %s1314_s13 }
 0x19c   : > { %p17_p2 = scmp.ge.s32.totalorder %s20_s17, 4   ;;  %s1690_s13 = smov %s1318_s14 }
 0x19d   : > { %s1691_s14 = smov %s1509_s6  ;;  %s1692_s15 = smov %s1326_s16 }
 0x19e   : > { %s1693_s16 = smov %s1695_s25  ;;  %19 = sbr.rel (!%p17_p2) target bundleno = 7 (0x7), region = 89 }
 0x1a5   :  { %770 = vsyncpa [#allocation3], 1 }
 0x1a6   :  { %772 = vsyncpa [#allocation3 + $0x1], 1 }
 0x1a7   :  { %773 = vsyncpa [#allocation6], 1 }
 0x1a8   :  { %774 = vsyncpa [#allocation4], 1 }
 0x1a9   :  { %776 = vsyncpa [#allocation4 + $0x1], 1 }

// kernel: darkfpn_apply.18
= control target key start
LH: loop header
LB: loop body
LE: loop exit
PB: predicated region body
PF: predicated region fallthrough
CT: control target
= control target key end

     0   :  { %10 = vsyncpa [#allocation3], 0  ;;  %s1383_s0 = inlined_call_operand.hbm [shape: bf16[128,64], index: 0, kind: input, shape index: {}]   ;;  %s1384_s1 = inlined_call_operand.hbm [shape: bf16[128,32], index: 1, kind: input, shape index: {}]   ;;  %s1385_s2 = inlined_call_operand.hbm [shape: bf16[64,32], index: 2, kind: input, shape index: {}]   ;;  %s1386_s3 = inlined_call_operand.hbm [shape: bf16[32,32], index: 3, kind: input, shape index: {}]   ;;  %s1387_s4 = inlined_call_operand.hbm [shape: f32[1,32], index: 4, kind: input, shape index: {}]   ;;  %s1388_s5 = inlined_call_operand.hbm [shape: bf16[128,32], index: 5, kind: output, shape index: {}]  }
   0x1   :  { %11 = vsyncpa [#allocation6], 0 }
   0x2   :  { %12 = vsyncpa [#allocation9], 0 }
   0x3   :  { %13 = vsyncpa [#allocation4], 0  ;;  %s1130_s18 = smov [#allocation5]   ;;  %s1131_s20 = smov [#allocation8]  }
   0x4   :  { %s31_s19 = sshll.u32 %s1130_s18, 4  ;;  %s55_s21 = sshll.u32 %s1131_s20, 4  ;;  %s32_s19 = int_to_ptr.vmem [resolvable:$true] %s31_s19  ;;  %s1168_s21 = int_to_ptr.vmem [resolvable:$true] %s55_s21 }
   0x5   :  { %s990_s24 = scalar_lea.hbm %s1384_s1, 1024 }
   0x6   :  { %p991_p0 = scmp.ne.s32.totalorder %s1384_s1, %s990_s24  ;;  %p994_p1 = scmp.lt.u32.totalorder %s990_s24, %s1384_s1 }
   0x8   :  { %p996_p2 = pnand %p994_p1, %p991_p0 }
   0xa   :  { %999 = shalt.err (!%p996_p2)
}
   0xb   :  { %s1000_s29 = scalar_lea.vmem %s32_s19, 1024  ;;  %p1005_p4 = scmp.lt.s32.totalorder %s32_s19, %s32_s19 }
   0xc   :  { %p1001_p3 = scmp.ne.s32.totalorder %s32_s19, %s1000_s29  ;;  %p1006_p5 = scmp.lt.s32.totalorder %s1000_s29, %s1000_s29 }
   0xe   :  { %p1007_p6 = por %p1006_p5, %p1005_p4 }
  0x10   :  { %p1008_p7 = pnand %p1007_p6, %p1001_p3 }
  0x12   :  { %1011 = shalt.err (!%p1008_p7)
}
  0x13   :  { %s1132_s30 = smov 64   ;;  %s1133_s6 = smov 4  }
  0x14   :  { %37 = dma.hbm_to_vmem [thread:$0]  %s1384_s1, 1024, %s32_s19, [#allocation6], %s1132_s30, %s1132_s30, %s1133_s6  }
  0x15   :  { %s1012_s11 = scalar_lea.hbm %s1386_s3, 256 }
  0x16   :  { %p1013_p8 = scmp.ne.s32.totalorder %s1386_s3, %s1012_s11  ;;  %p1016_p9 = scmp.lt.u32.totalorder %s1012_s11, %s1386_s3 }
  0x18   :  { %p1018_p10 = pnand %p1016_p9, %p1013_p8 }
  0x1a   :  { %1021 = shalt.err (!%p1018_p10)
}
  0x1b   :  { %s1022_s16 = scalar_lea.vmem %s1168_s21, 256  ;;  %p1027_p12 = scmp.lt.s32.totalorder %s1168_s21, %s1168_s21 }
  0x1c   :  { %p1023_p11 = scmp.ne.s32.totalorder %s1168_s21, %s1022_s16  ;;  %p1028_p13 = scmp.lt.s32.totalorder %s1022_s16, %s1022_s16 }
  0x1e   :  { %p1029_p0 = por %p1028_p13, %p1027_p12 }
  0x20   :  { %p1030_p1 = pnand %p1029_p0, %p1023_p11 }
  0x22   :  { %1033 = shalt.err (!%p1030_p1)
}
  0x23   :  { %61 = dma.hbm_to_vmem [thread:$0]  %s1386_s3, 256, %s1168_s21, [#allocation9], %s1132_s30, %s1132_s30, %s1133_s6  }
  0x24   :  { %s1134_s18 = smov [#allocation2]   ;;  %s1135_s20 = smov [#allocation7]  }
  0x25   :  { %s19_s19 = sshll.u32 %s1134_s18, 4  ;;  %s43_s22 = sshll.u32 %s1135_s20, 4  ;;  %s20_s19 = int_to_ptr.vmem [resolvable:$true] %s19_s19  ;;  %s1205_s22 = int_to_ptr.vmem [resolvable:$true] %s43_s22 }
  0x26   :  { %s1034_s25 = scalar_lea.hbm %s1383_s0, 1024 }
  0x27   :  { %p1035_p2 = scmp.ne.s32.totalorder %s1383_s0, %s1034_s25  ;;  %p1038_p3 = scmp.lt.u32.totalorder %s1034_s25, %s1383_s0 }
  0x29   :  { %p1040_p4 = pnand %p1038_p3, %p1035_p2 }
  0x2b   :  { %1043 = shalt.err (!%p1040_p4)
}
  0x2c   :  { %s1044_s3 = scalar_lea.vmem %s20_s19, 1024  ;;  %p1049_p6 = scmp.lt.s32.totalorder %s20_s19, %s20_s19 }
  0x2d   :  { %p1045_p5 = scmp.ne.s32.totalorder %s20_s19, %s1044_s3  ;;  %p1050_p7 = scmp.lt.s32.totalorder %s1044_s3, %s1044_s3 }
  0x2f   :  { %p1051_p8 = por %p1050_p7, %p1049_p6 }
  0x31   :  { %p1052_p9 = pnand %p1051_p8, %p1045_p5 }
  0x33   :  { %1055 = shalt.err (!%p1052_p9)
}
  0x34   :  { %25 = dma.hbm_to_vmem [thread:$0]  %s1383_s0, 1024, %s20_s19, [#allocation3], %s1132_s30, %s1132_s30, %s1133_s6  }
  0x35   :  { %s1056_s10 = scalar_lea.hbm %s1385_s2, 512 }
  0x36   :  { %p1057_p10 = scmp.ne.s32.totalorder %s1385_s2, %s1056_s10  ;;  %p1060_p11 = scmp.lt.u32.totalorder %s1056_s10, %s1385_s2 }
  0x38   :  { %p1062_p12 = pnand %p1060_p11, %p1057_p10 }
  0x3a   :  { %1065 = shalt.err (!%p1062_p12)
}
  0x3b   :  { %s1066_s15 = scalar_lea.vmem %s1205_s22, 512  ;;  %p1071_p0 = scmp.lt.s32.totalorder %s1205_s22, %s1205_s22 }
  0x3c   :  { %p1067_p13 = scmp.ne.s32.totalorder %s1205_s22, %s1066_s15  ;;  %p1072_p1 = scmp.lt.s32.totalorder %s1066_s15, %s1066_s15 }
  0x3e   :  { %p1073_p2 = por %p1072_p1, %p1071_p0 }
  0x40   :  { %p1074_p3 = pnand %p1073_p2, %p1067_p13 }
  0x42   :  { %1077 = shalt.err (!%p1074_p3)
}
  0x43   :  { %49 = dma.hbm_to_vmem [thread:$0]  %s1385_s2, 512, %s1205_s22, [#allocation6], %s1132_s30, %s1132_s30, %s1133_s6  }
  0x44   :  { %s1136_s1 = smov [#allocation10]   ;;  %s1078_s20 = scalar_lea.hbm %s1387_s4, 16 }
  0x45   :  { %s68_s17 = sshll.u32 %s1136_s1, 4  ;;  %p1079_p4 = scmp.ne.s32.totalorder %s1387_s4, %s1078_s20  ;;  %s69_s17 = int_to_ptr.vmem [resolvable:$true] %s68_s17 }
  0x46   :  { %p1082_p5 = scmp.lt.u32.totalorder %s1078_s20, %s1387_s4 }
  0x48   :  { %p1084_p6 = pnand %p1082_p5, %p1079_p4 }
  0x4a   :  { %1087 = shalt.err (!%p1084_p6)
}
  0x4b   :  { %s1088_s27 = scalar_lea.vmem %s69_s17, 16  ;;  %s1092_s2 = scalar_lea.vmem %s69_s17, 32 }
  0x4c   :  { %p1089_p7 = scmp.ne.s32.totalorder %s69_s17, %s1088_s27  ;;  %p1093_p8 = scmp.lt.s32.totalorder %s69_s17, %s69_s17 }
  0x4d   :  { %p1094_p9 = scmp.lt.s32.totalorder %s1092_s2, %s1088_s27 }
  0x4f   :  { %p1095_p10 = por %p1094_p9, %p1093_p8 }
  0x51   :  { %p1096_p11 = pnand %p1095_p10, %p1089_p7 }
  0x53   :  { %1099 = shalt.err (!%p1096_p11)
}
  0x54   :  { %71 = dma.hbm_to_vmem [thread:$0]  %s1387_s4, 16, %s69_s17, [#allocation9]  }
  0x55   :  { %1122 = dma.done.wait [#allocation3], 1024  }
  0x56   :  { %1123 = vsyncadd [#allocation3], 4294966272 }
  0x57   :  { %1124 = dma.done.wait [#allocation6], 1536  }
  0x58   :  { %1125 = vsyncadd [#allocation6], 4294965760 }
  0x59   :  { %1126 = dma.done.wait [#allocation9], 272  }
  0x5a   :  { %1127 = vsyncadd [#allocation9], 4294967024  ;;  %v904_v0 = vld [vmem:[#allocation7] sm:$0xff]   ;;  %v905_v1 = vld [vmem:[#allocation7 + $0x8] sm:$0xff]   ;;  %vm184_vm0 = vcmask 261120   ;;  %vm370_vm1 = vcmask 523264  }
  0x5b   :  { %856 = vmatprep.subr.bf16.mxu0 %v904_v0  ;;  %v906_v2 = vld [vmem:[#allocation8] sm:$0xff]   ;;  %v907_v3 = vld [vmem:[#allocation7 + $0x10] sm:$0xff]   ;;  %v908_v4 = vld [vmem:[#allocation8 + $0x8] sm:$0xff]   ;;  %vm691_vm2 = vcmask 257024   ;;  %s1137_s4 = smov [#allocation11]  }
  0x5c   :  { %857 = vmatpush3.bf16.msra.mxu0 %v904_v0  ;;  %836 = vmatprep.subr.bf16.mxu1 %v906_v2  ;;  %v909_v5 = vld [vmem:[#allocation5] sm:$0xff]   ;;  %v910_v6 = vld [vmem:[#allocation7 + $0x18] sm:$0xff]   ;;  %v911_v7 = vld [vmem:[#allocation5 + $0x8] sm:$0xff]   ;;  %s713_s29 = sshll.u32 %s1137_s4, 4  ;;  %s714_s29 = int_to_ptr.vmem [resolvable:$true] %s713_s29 }
  0x5d   :  { %858 = vmatprep.subr.bf16.mxu0 %v905_v1  ;;  %837 = vmatpush3.bf16.msra.mxu1 %v906_v2  ;;  %v912_v8 = vld [vmem:[#allocation2] sm:$0xff]   ;;  %v914_v9 = vld [vmem:[#allocation5 + $0x10] sm:$0xff]   ;;  %v913_v10 = vld [vmem:[#allocation2 + $0x8] sm:$0xff]   ;;  %s1100_s3 = scalar_lea.vmem %s714_s29, 1024  ;;  %p1105_p13 = scmp.lt.s32.totalorder %s714_s29, %s714_s29 }
  0x5e   :  { %838 = vmatprep.subr.bf16.mxu1 %v908_v4  ;;  %840 = vmatprep.mubr.msk.bf16.mxu1 %vm184_vm0, %v909_v5  ;;  %v916_v11 = vld [vmem:[#allocation2 + $0x10] sm:$0xff]   ;;  %v915_v12 = vld [vmem:[#allocation5 + $0x18] sm:$0xff]   ;;  %v918_v13 = vld [vmem:[#allocation5 + $0x20] sm:$0xff]   ;;  %p1101_p12 = scmp.ne.s32.totalorder %s714_s29, %s1100_s3  ;;  %p1106_p0 = scmp.lt.s32.totalorder %s1100_s3, %s1100_s3 }
  0x5f   :  { %864 = vmatprep.mubr.msk.bf16.mxu0 %vm370_vm1, %v912_v8  ;;  %v917_v14 = vld [vmem:[#allocation2 + $0x18] sm:$0xff]   ;;  %v920_v15 = vld [vmem:[#allocation2 + $0x20] sm:$0xff]   ;;  %v919_v16 = vld [vmem:[#allocation5 + $0x28] sm:$0xff]  }
  0x60   :  { %859 = vmatpush3.bf16.msra.mxu0 %v905_v1  ;;  %v922_v17 = vld [vmem:[#allocation5 + $0x30] sm:$0xff]   ;;  %v921_v18 = vld [vmem:[#allocation2 + $0x28] sm:$0xff]   ;;  %v923_v20 = vld [vmem:[#allocation5 + $0x38] sm:$0xff]   ;;  %p1107_p1 = por %p1106_p0, %p1105_p13 }
  0x61   :  { %860 = vmatprep.subr.bf16.mxu0 %v907_v3  ;;  %839 = vmatpush3.bf16.msra.mxu1 %v908_v4  ;;  %v924_v19 = vld [vmem:[#allocation2 + $0x30] sm:$0xff]   ;;  %v925_v21 = vld [vmem:[#allocation2 + $0x38] sm:$0xff]  }
  0x62   :  { %v1270_v27 = vld [vmem:[#allocation10] ss:$0 sm:$0xff]  ;;  %p1108_p2 = pnand %p1107_p1, %p1101_p12 }
  0x64   :  { %861 = vmatpush3.bf16.msra.mxu0 %v907_v3  ;;  %841 = vmatmul.mubr.msk.bf16.vlgmr.msra.gmra.mrb[0].mxu1 %vm184_vm0, %v911_v7 }
  0x65   :  { %862 = vmatprep.subr.bf16.mxu0 %v910_v6  ;;  %844 = vmatprep.mubr.msk.bf16.mxu1 %vm184_vm0, %v914_v9 }
  0x68   :  { %863 = vmatpush3.bf16.msra.mxu0 %v910_v6 }
  0x6b   :  { %865 = vmatmul.mubr.msk.bf16.vlgmr.msra.gmra.mrb[0].mxu0 %vm370_vm1, %v913_v10 }
  0x6c   :  { %868 = vmatprep.mubr.msk.bf16.mxu0 %vm370_vm1, %v916_v11  ;;  %845 = vmatmul.mubr.msk.bf16.gmra.mrb[4].mxu1 %vm184_vm0, %v915_v12 }
  0x6d   :  { %848 = vmatprep.mubr.msk.bf16.mxu1 %vm184_vm0, %v918_v13 }
  0x73   :  { %869 = vmatmul.mubr.msk.bf16.gmra.mrb[4].mxu0 %vm370_vm1, %v917_v14 }
  0x74   :  { %872 = vmatprep.mubr.msk.bf16.mxu0 %vm370_vm1, %v920_v15  ;;  %849 = vmatmul.mubr.msk.bf16.gmra.mrb[8].mxu1 %vm184_vm0, %v919_v16 }
  0x75   :  { %852 = vmatprep.mubr.msk.bf16.mxu1 %vm184_vm0, %v922_v17 }
  0x7b   :  { %873 = vmatmul.mubr.msk.bf16.gmra.mrb[8].mxu0 %vm370_vm1, %v921_v18 }
  0x7c   :  { %876 = vmatprep.mubr.msk.bf16.mxu0 %vm370_vm1, %v924_v19  ;;  %853 = vmatmul.mubr.msk.bf16.gmra.mrb[12].mxu1 %vm184_vm0, %v923_v20 }
  0x83   :  { %877 = vmatmul.mubr.msk.bf16.gmra.mrb[12].mxu0 %vm370_vm1, %v925_v21 }
 0x137   :  { %v842_v22 = vpop.f32.mrb[0].mxu1 }
 0x138   :  { %v243_v23 = vpop.f32.mrb[1].mxu1 }
 0x139   :  { %v843_v24 = vpop.f32.mrb[2].mxu1 }
 0x13a   :  { %v246_v25 = vpop.f32.mrb[3].mxu1 }
 0x13e   :  { %v866_v26 = vpop.f32.mrb[0].mxu0 }
 0x13f   :  { %v438_v28 = vadd.f32 %v866_v26, %v842_v22  ;;  %v429_v29 = vpop.f32.mrb[1].mxu0  ;;  %v846_v32 = vpop.f32.mrb[4].mxu1 }
 0x140   :  { %v430_v30 = vadd.f32 %v429_v29, %v243_v23  ;;  %v867_v31 = vpop.f32.mrb[2].mxu0  ;;  %v259_v36 = vpop.f32.mrb[5].mxu1 }
 0x141   :  { %v1273_v33 = vadd.f32 %v1270_v27, %v438_v28  ;;  %v441_v34 = vadd.f32 %v867_v31, %v843_v24  ;;  %v432_v35 = vpop.f32.mrb[3].mxu0  ;;  %v847_v39 = vpop.f32.mrb[6].mxu1 }
 0x142   :  { %v1276_v37 = vadd.f32 %v1270_v27, %v430_v30  ;;  %v433_v38 = vadd.f32 %v432_v35, %v246_v25  ;;  %v262_v42 = vpop.f32.mrb[7].mxu1 }
 0x143   :  { %v768_v40 = vmul.f32 -1.442695, %v1273_v33  ;;  %v1280_v41 = vadd.f32 %v1270_v27, %v441_v34 }
 0x144   :  { %v766_v43 = vmul.f32 -1.442695, %v1276_v37  ;;  %v1284_v44 = vadd.f32 %v1270_v27, %v433_v38 }
 0x145   :  { %926 = vpow2.f32 %v768_v40  ;;  %v769_v45 = vmul.f32 -1.442695, %v1280_v41 }
 0x146   :  { %928 = vpow2.f32 %v766_v43  ;;  %v767_v46 = vmul.f32 -1.442695, %v1284_v44  ;;  %v870_v47 = vpop.f32.mrb[4].mxu0 }
 0x147   :  { %930 = vpow2.f32 %v769_v45  ;;  %v454_v48 = vadd.f32 %v870_v47, %v846_v32  ;;  %v445_v49 = vpop.f32.mrb[5].mxu0  ;;  %v850_v52 = vpop.f32.mrb[8].mxu1 }
 0x148   :  { %932 = vpow2.f32 %v767_v46  ;;  %v446_v50 = vadd.f32 %v445_v49, %v259_v36  ;;  %v871_v51 = vpop.f32.mrb[6].mxu0  ;;  %v275_v56 = vpop.f32.mrb[9].mxu1 }
 0x149   :  { %v1289_v53 = vadd.f32 %v1270_v27, %v454_v48  ;;  %v457_v54 = vadd.f32 %v871_v51, %v847_v39  ;;  %v448_v55 = vpop.f32.mrb[7].mxu0  ;;  %v851_v59 = vpop.f32.mrb[10].mxu1 }
 0x14a   :  { %v1292_v57 = vadd.f32 %v1270_v27, %v446_v50  ;;  %v449_v58 = vadd.f32 %v448_v55, %v262_v42  ;;  %v278_v62 = vpop.f32.mrb[11].mxu1 }
 0x14b   :  { %v772_v60 = vmul.f32 -1.442695, %v1289_v53  ;;  %v1296_v61 = vadd.f32 %v1270_v27, %v457_v54 }
 0x14c   :  { %v770_v63 = vmul.f32 -1.442695, %v1292_v57  ;;  %v1300_v0 = vadd.f32 %v1270_v27, %v449_v58 }
 0x14d   :  { %934 = vpow2.f32 %v772_v60  ;;  %v773_v1 = vmul.f32 -1.442695, %v1296_v61 }
 0x14e   :  { %936 = vpow2.f32 %v770_v63  ;;  %v771_v2 = vmul.f32 -1.442695, %v1300_v0  ;;  %v874_v3 = vpop.f32.mrb[8].mxu0 }
 0x14f   :  { %v927_v4 = vpop.eup %926  ;;  %938 = vpow2.f32 %v773_v1  ;;  %v470_v5 = vadd.f32 %v874_v3, %v850_v52  ;;  %v461_v6 = vpop.f32.mrb[9].mxu0 }
 0x150   :  { %v929_v7 = vpop.eup %928  ;;  %v565_v8 = vadd.f32 1.0, %v927_v4  ;;  %940 = vpow2.f32 %v771_v2  ;;  %v462_v9 = vadd.f32 %v461_v6, %v275_v56  ;;  %v875_v10 = vpop.f32.mrb[10].mxu0 }
 0x151   :  { %v854_v11 = vpop.f32.mrb[12].mxu1  ;;  %v931_v12 = vpop.eup %930  ;;  %v563_v13 = vadd.f32 1.0, %v929_v7  ;;  %v1305_v14 = vadd.f32 %v1270_v27, %v470_v5  ;;  %v473_v15 = vadd.f32 %v875_v10, %v851_v59 }
 0x152   :  { %v464_v16 = vpop.f32.mrb[11].mxu0  ;;  %v291_v17 = vpop.f32.mrb[13].mxu1  ;;  %942 = vrcp.f32 %v565_v8  ;;  %v566_v19 = vadd.f32 1.0, %v931_v12  ;;  %v1308_v20 = vadd.f32 %v1270_v27, %v462_v9 }
 0x153   :  { %v933_v18 = vpop.eup %932  ;;  %v465_v21 = vadd.f32 %v464_v16, %v278_v62  ;;  %v855_v22 = vpop.f32.mrb[14].mxu1  ;;  %944 = vrcp.f32 %v563_v13  ;;  %v776_v24 = vmul.f32 -1.442695, %v1305_v14  ;;  %v1312_v25 = vadd.f32 %v1270_v27, %v473_v15 }
 0x154   :  { %v564_v23 = vadd.f32 1.0, %v933_v18  ;;  %v294_v26 = vpop.f32.mrb[15].mxu1  ;;  %946 = vrcp.f32 %v566_v19  ;;  %v774_v28 = vmul.f32 -1.442695, %v1308_v20 }
 0x155   :  { %v1316_v29 = vadd.f32 %v1270_v27, %v465_v21  ;;  %v777_v30 = vmul.f32 -1.442695, %v1312_v25 }
 0x156   :  { %948 = vrcp.f32 %v564_v23  ;;  %v878_v32 = vpop.f32.mrb[12].mxu0 }
 0x157   :  { %950 = vpow2.f32 %v776_v24  ;;  %v775_v31 = vmul.f32 -1.442695, %v1316_v29  ;;  %v935_v34 = vpop.eup %934  ;;  %v486_v35 = vadd.f32 %v878_v32, %v854_v11  ;;  %v477_v36 = vpop.f32.mrb[13].mxu0 }
 0x158   :  { %952 = vpow2.f32 %v774_v28  ;;  %v937_v38 = vpop.eup %936  ;;  %v569_v39 = vadd.f32 1.0, %v935_v34  ;;  %v478_v40 = vadd.f32 %v477_v36, %v291_v17  ;;  %v879_v42 = vpop.f32.mrb[14].mxu0 }
 0x159   :  { %954 = vpow2.f32 %v777_v30  ;;  %v939_v43 = vpop.eup %938  ;;  %v567_v45 = vadd.f32 1.0, %v937_v38  ;;  %v1321_v46 = vadd.f32 %v1270_v27, %v486_v35  ;;  %v489_v47 = vadd.f32 %v879_v42, %v855_v22  ;;  %v480_v48 = vpop.f32.mrb[15].mxu0 }
 0x15a   :  { %956 = vpow2.f32 %v775_v31  ;;  %v941_v49 = vpop.eup %940  ;;  %v570_v50 = vadd.f32 1.0, %v939_v43  ;;  %v1324_v51 = vadd.f32 %v1270_v27, %v478_v40  ;;  %v481_v52 = vadd.f32 %v480_v48, %v294_v26 }
 0x15b   :  { %958 = vrcp.f32 %v569_v39  ;;  %v568_v54 = vadd.f32 1.0, %v941_v49  ;;  %v780_v55 = vmul.f32 -1.442695, %v1321_v46  ;;  %v1328_v56 = vadd.f32 %v1270_v27, %v489_v47 }
 0x15c   :  { %960 = vrcp.f32 %v567_v45  ;;  %v943_v58 = vpop.eup %942  ;;  %v778_v59 = vmul.f32 -1.442695, %v1324_v51  ;;  %v1332_v60 = vadd.f32 %v1270_v27, %v481_v52 }
 0x15d   :  { %962 = vrcp.f32 %v570_v50  ;;  %v945_v62 = vpop.eup %944  ;;  %v613_v63 = vmul.f32 %v943_v58, %v1273_v33  ;;  %v781_v1 = vmul.f32 -1.442695, %v1328_v56 }
 0x15e   :  { %964 = vrcp.f32 %v568_v54  ;;  %v947_v2 = vpop.eup %946  ;;  %v611_v3 = vmul.f32 %v945_v62, %v1276_v37  ;;  %v779_v4 = vmul.f32 -1.442695, %v1332_v60 }
 0x15f   :  { %966 = vpow2.f32 %v780_v55  ;;  %v800_v6 = vpack.c.bf16 %v613_v63, %v613_v63  ;;  %v614_v7 = vmul.f32 %v947_v2, %v1280_v41 }
 0x160   :  { %v949_v5 = vpop.eup %948  ;;  %968 = vpow2.f32 %v778_v59  ;;  %v798_v8 = vpack.c.bf16 %v611_v3, %v611_v3 }
 0x161   :  { %v951_v27 = vpop.eup %950  ;;  %v612_v9 = vmul.f32 %v949_v5, %v1284_v44  ;;  %970 = vpow2.f32 %v781_v1  ;;  %694 = vst.msk [vmem:[#allocation11 + $0x8] sm:$0xf] %vm691_vm2, %v800_v6  ;;  %v801_v10 = vpack.c.bf16 %v614_v7, %v614_v7 }
 0x162   :  { %v953_v33 = vpop.eup %952  ;;  %v573_v11 = vadd.f32 1.0, %v951_v27  ;;  %972 = vpow2.f32 %v779_v4  ;;  %692 = vst.msk [vmem:[#allocation11] sm:$0xf] %vm691_vm2, %v798_v8 }
 0x163   :  { %v955_v37 = vpop.eup %954  ;;  %v799_v12 = vpack.c.bf16 %v612_v9, %v612_v9  ;;  %v571_v13 = vadd.f32 1.0, %v953_v33  ;;  %695 = vst.msk [vmem:[#allocation11 + $0xc] sm:$0xf] %vm691_vm2, %v801_v10 }
 0x164   :  { %v957_v15 = vpop.eup %956  ;;  %974 = vrcp.f32 %v573_v11  ;;  %v574_v41 = vadd.f32 1.0, %v955_v37 }
 0x165   :  { %v959_v16 = vpop.eup %958  ;;  %693 = vst.msk [vmem:[#allocation11 + $0x4] sm:$0xf] %vm691_vm2, %v799_v12  ;;  %976 = vrcp.f32 %v571_v13  ;;  %v572_v44 = vadd.f32 1.0, %v957_v15 }
 0x166   :  { %v961_v17 = vpop.eup %960  ;;  %v617_v18 = vmul.f32 %v959_v16, %v1289_v53  ;;  %978 = vrcp.f32 %v574_v41 }
 0x167   :  { %v963_v19 = vpop.eup %962  ;;  %v615_v21 = vmul.f32 %v961_v17, %v1292_v57  ;;  %980 = vrcp.f32 %v572_v44 }
 0x168   :  { %v965_v22 = vpop.eup %964  ;;  %v804_v23 = vpack.c.bf16 %v617_v18, %v617_v18  ;;  %v618_v24 = vmul.f32 %v963_v19, %v1296_v61 }
 0x169   :  { %v967_v26 = vpop.eup %966  ;;  %v802_v28 = vpack.c.bf16 %v615_v21, %v615_v21  ;;  %v616_v30 = vmul.f32 %v965_v22, %v1300_v0 }
 0x16a   :  { %v969_v31 = vpop.eup %968  ;;  %698 = vst.msk [vmem:[#allocation11 + $0x18] sm:$0xf] %vm691_vm2, %v804_v23  ;;  %v805_v32 = vpack.c.bf16 %v618_v24, %v618_v24  ;;  %v577_v34 = vadd.f32 1.0, %v967_v26 }
 0x16b   :  { %v971_v35 = vpop.eup %970  ;;  %696 = vst.msk [vmem:[#allocation11 + $0x10] sm:$0xf] %vm691_vm2, %v802_v28  ;;  %v803_v53 = vpack.c.bf16 %v616_v30, %v616_v30  ;;  %v575_v36 = vadd.f32 1.0, %v969_v31 }
 0x16c   :  { %v973_v57 = vpop.eup %972  ;;  %699 = vst.msk [vmem:[#allocation11 + $0x1c] sm:$0xf] %vm691_vm2, %v805_v32  ;;  %982 = vrcp.f32 %v577_v34  ;;  %v578_v38 = vadd.f32 1.0, %v971_v35 }
 0x16d   :  { %697 = vst.msk [vmem:[#allocation11 + $0x14] sm:$0xf] %vm691_vm2, %v803_v53  ;;  %984 = vrcp.f32 %v575_v36  ;;  %v576_v61 = vadd.f32 1.0, %v973_v57 }
 0x16e   :  { %v975_v0 = vpop.eup %974  ;;  %986 = vrcp.f32 %v578_v38 }
 0x16f   :  { %v977_v39 = vpop.eup %976  ;;  %v621_v40 = vmul.f32 %v975_v0, %v1305_v14  ;;  %988 = vrcp.f32 %v576_v61 }
 0x170   :  { %v979_v42 = vpop.eup %978  ;;  %v619_v43 = vmul.f32 %v977_v39, %v1308_v20 }
 0x171   :  { %v981_v45 = vpop.eup %980  ;;  %v808_v47 = vpack.c.bf16 %v621_v40, %v621_v40  ;;  %v622_v48 = vmul.f32 %v979_v42, %v1312_v25 }
 0x172   :  { %v806_v49 = vpack.c.bf16 %v619_v43, %v619_v43  ;;  %v620_v50 = vmul.f32 %v981_v45, %v1316_v29 }
 0x173   :  { %702 = vst.msk [vmem:[#allocation11 + $0x28] sm:$0xf] %vm691_vm2, %v808_v47  ;;  %v809_v52 = vpack.c.bf16 %v622_v48, %v622_v48 }
 0x174   :  { %700 = vst.msk [vmem:[#allocation11 + $0x20] sm:$0xf] %vm691_vm2, %v806_v49  ;;  %v807_v54 = vpack.c.bf16 %v620_v50, %v620_v50 }
 0x175   :  { %703 = vst.msk [vmem:[#allocation11 + $0x2c] sm:$0xf] %vm691_vm2, %v809_v52 }
 0x176   :  { %v983_v14 = vpop.eup %982  ;;  %701 = vst.msk [vmem:[#allocation11 + $0x24] sm:$0xf] %vm691_vm2, %v807_v54 }
 0x177   :  { %v985_v55 = vpop.eup %984  ;;  %v625_v20 = vmul.f32 %v983_v14, %v1321_v46 }
 0x178   :  { %v987_v58 = vpop.eup %986  ;;  %v623_v25 = vmul.f32 %v985_v55, %v1324_v51 }
 0x179   :  { %v989_v59 = vpop.eup %988  ;;  %v812_v62 = vpack.c.bf16 %v625_v20, %v625_v20  ;;  %v626_v29 = vmul.f32 %v987_v58, %v1328_v56 }
 0x17a   :  { %v810_v63 = vpack.c.bf16 %v623_v25, %v623_v25  ;;  %v624_v1 = vmul.f32 %v989_v59, %v1332_v60 }
 0x17b   :  { %706 = vst.msk [vmem:[#allocation11 + $0x38] sm:$0xf] %vm691_vm2, %v812_v62  ;;  %v813_v2 = vpack.c.bf16 %v626_v29, %v626_v29 }
 0x17c   :  { %704 = vst.msk [vmem:[#allocation11 + $0x30] sm:$0xf] %vm691_vm2, %v810_v63  ;;  %v811_v3 = vpack.c.bf16 %v624_v1, %v624_v1 }
 0x17d   :  { %707 = vst.msk [vmem:[#allocation11 + $0x3c] sm:$0xf] %vm691_vm2, %v813_v2 }
 0x17e   :  { %705 = vst.msk [vmem:[#allocation11 + $0x34] sm:$0xf] %vm691_vm2, %v811_v3 }
 0x17f   :  { %1111 = shalt.err (!%p1108_p2)
}
 0x180   :  { %s1112_s8 = scalar_lea.hbm %s1388_s5, 1024 }
 0x181   :  { %p1113_p3 = scmp.ne.s32.totalorder %s1388_s5, %s1112_s8  ;;  %p1116_p4 = scmp.lt.u32.totalorder %s1112_s8, %s1388_s5 }
 0x183   :  { %p1118_p5 = pnand %p1116_p4, %p1113_p3 }
 0x185   :  { %1121 = shalt.err (!%p1118_p5)
}
 0x186   :  { %719 = dma.vmem_to_hbm [thread:$0]  %s714_s29, 1024, %s1388_s5, [#allocation4], %s1132_s30, %s1132_s30, %s1133_s6  }
 0x187   :  { %1128 = dma.done.wait [#allocation4], 1024  }
 0x188   :  { %1129 = vsyncadd [#allocation4], 4294966272 }
 0x189   :  { %723 = vsyncpa [#allocation3], 1 }
 0x18a   :  { %724 = vsyncpa [#allocation6], 1 }
 0x18b   :  { %725 = vsyncpa [#allocation9], 1 }
 0x18c   :  { %726 = vsyncpa [#allocation4], 1 }

// kernel: darkfpn_apply.21
= control target key start
LH: loop header
LB: loop body
LE: loop exit
PB: predicated region body
PF: predicated region fallthrough
CT: control target
= control target key end

     0   :  { %10 = vsyncpa [#allocation3], 0  ;;  %s1344_s0 = inlined_call_operand.hbm [shape: bf16[128,32], index: 0, kind: input, shape index: {}]   ;;  %s1345_s1 = inlined_call_operand.hbm [shape: bf16[128,16], index: 1, kind: input, shape index: {}]   ;;  %s1346_s2 = inlined_call_operand.hbm [shape: bf16[32,32], index: 2, kind: input, shape index: {}]   ;;  %s1347_s3 = inlined_call_operand.hbm [shape: bf16[16,32], index: 3, kind: input, shape index: {}]   ;;  %s1348_s4 = inlined_call_operand.hbm [shape: f32[1,32], index: 4, kind: input, shape index: {}]   ;;  %s1349_s5 = inlined_call_operand.hbm [shape: bf16[128,32], index: 5, kind: output, shape index: {}]  }
   0x1   :  { %11 = vsyncpa [#allocation6], 0 }
   0x2   :  { %12 = vsyncpa [#allocation9], 0 }
   0x3   :  { %13 = vsyncpa [#allocation4], 0  ;;  %s1091_s18 = smov [#allocation5]   ;;  %s1092_s20 = smov [#allocation8]  }
   0x4   :  { %s31_s19 = sshll.u32 %s1091_s18, 4  ;;  %s55_s21 = sshll.u32 %s1092_s20, 4  ;;  %s32_s19 = int_to_ptr.vmem [resolvable:$true] %s31_s19  ;;  %s1129_s21 = int_to_ptr.vmem [resolvable:$true] %s55_s21 }
   0x5   :  { %s951_s24 = scalar_lea.hbm %s1345_s1, 1024 }
   0x6   :  { %p952_p0 = scmp.ne.s32.totalorder %s1345_s1, %s951_s24  ;;  %p955_p1 = scmp.lt.u32.totalorder %s951_s24, %s1345_s1 }
   0x8   :  { %p957_p2 = pnand %p955_p1, %p952_p0 }
   0xa   :  { %960 = shalt.err (!%p957_p2)
}
   0xb   :  { %s961_s29 = scalar_lea.vmem %s32_s19, 1024  ;;  %p966_p4 = scmp.lt.s32.totalorder %s32_s19, %s32_s19 }
   0xc   :  { %p962_p3 = scmp.ne.s32.totalorder %s32_s19, %s961_s29  ;;  %p967_p5 = scmp.lt.s32.totalorder %s961_s29, %s961_s29 }
   0xe   :  { %p968_p6 = por %p967_p5, %p966_p4 }
  0x10   :  { %p969_p7 = pnand %p968_p6, %p962_p3 }
  0x12   :  { %972 = shalt.err (!%p969_p7)
}
  0x13   :  { %s1093_s30 = smov 64   ;;  %s1094_s6 = smov 4  }
  0x14   :  { %37 = dma.hbm_to_vmem [thread:$0]  %s1345_s1, 1024, %s32_s19, [#allocation6], %s1093_s30, %s1093_s30, %s1094_s6  }
  0x15   :  { %s973_s11 = scalar_lea.hbm %s1347_s3, 128 }
  0x16   :  { %p974_p8 = scmp.ne.s32.totalorder %s1347_s3, %s973_s11  ;;  %p977_p9 = scmp.lt.u32.totalorder %s973_s11, %s1347_s3 }
  0x18   :  { %p979_p10 = pnand %p977_p9, %p974_p8 }
  0x1a   :  { %982 = shalt.err (!%p979_p10)
}
  0x1b   :  { %s983_s16 = scalar_lea.vmem %s1129_s21, 128  ;;  %p988_p12 = scmp.lt.s32.totalorder %s1129_s21, %s1129_s21 }
  0x1c   :  { %p984_p11 = scmp.ne.s32.totalorder %s1129_s21, %s983_s16  ;;  %p989_p13 = scmp.lt.s32.totalorder %s983_s16, %s983_s16 }
  0x1e   :  { %p990_p0 = por %p989_p13, %p988_p12 }
  0x20   :  { %p991_p1 = pnand %p990_p0, %p984_p11 }
  0x22   :  { %994 = shalt.err (!%p991_p1)
}
  0x23   :  { %61 = dma.hbm_to_vmem [thread:$0]  %s1347_s3, 128, %s1129_s21, [#allocation9], %s1093_s30, %s1093_s30, %s1094_s6  }
  0x24   :  { %s1095_s18 = smov [#allocation2]   ;;  %s1096_s20 = smov [#allocation7]  }
  0x25   :  { %s19_s19 = sshll.u32 %s1095_s18, 4  ;;  %s43_s22 = sshll.u32 %s1096_s20, 4  ;;  %s20_s19 = int_to_ptr.vmem [resolvable:$true] %s19_s19  ;;  %s1166_s22 = int_to_ptr.vmem [resolvable:$true] %s43_s22 }
  0x26   :  { %s995_s25 = scalar_lea.hbm %s1344_s0, 1024 }
  0x27   :  { %p996_p2 = scmp.ne.s32.totalorder %s1344_s0, %s995_s25  ;;  %p999_p3 = scmp.lt.u32.totalorder %s995_s25, %s1344_s0 }
  0x29   :  { %p1001_p4 = pnand %p999_p3, %p996_p2 }
  0x2b   :  { %1004 = shalt.err (!%p1001_p4)
}
  0x2c   :  { %s1005_s3 = scalar_lea.vmem %s20_s19, 1024  ;;  %p1010_p6 = scmp.lt.s32.totalorder %s20_s19, %s20_s19 }
  0x2d   :  { %p1006_p5 = scmp.ne.s32.totalorder %s20_s19, %s1005_s3  ;;  %p1011_p7 = scmp.lt.s32.totalorder %s1005_s3, %s1005_s3 }
  0x2f   :  { %p1012_p8 = por %p1011_p7, %p1010_p6 }
  0x31   :  { %p1013_p9 = pnand %p1012_p8, %p1006_p5 }
  0x33   :  { %1016 = shalt.err (!%p1013_p9)
}
  0x34   :  { %25 = dma.hbm_to_vmem [thread:$0]  %s1344_s0, 1024, %s20_s19, [#allocation3], %s1093_s30, %s1093_s30, %s1094_s6  }
  0x35   :  { %s1017_s10 = scalar_lea.hbm %s1346_s2, 256 }
  0x36   :  { %p1018_p10 = scmp.ne.s32.totalorder %s1346_s2, %s1017_s10  ;;  %p1021_p11 = scmp.lt.u32.totalorder %s1017_s10, %s1346_s2 }
  0x38   :  { %p1023_p12 = pnand %p1021_p11, %p1018_p10 }
  0x3a   :  { %1026 = shalt.err (!%p1023_p12)
}
  0x3b   :  { %s1027_s15 = scalar_lea.vmem %s1166_s22, 256  ;;  %p1032_p0 = scmp.lt.s32.totalorder %s1166_s22, %s1166_s22 }
  0x3c   :  { %p1028_p13 = scmp.ne.s32.totalorder %s1166_s22, %s1027_s15  ;;  %p1033_p1 = scmp.lt.s32.totalorder %s1027_s15, %s1027_s15 }
  0x3e   :  { %p1034_p2 = por %p1033_p1, %p1032_p0 }
  0x40   :  { %p1035_p3 = pnand %p1034_p2, %p1028_p13 }
  0x42   :  { %1038 = shalt.err (!%p1035_p3)
}
  0x43   :  { %49 = dma.hbm_to_vmem [thread:$0]  %s1346_s2, 256, %s1166_s22, [#allocation6], %s1093_s30, %s1093_s30, %s1094_s6  }
  0x44   :  { %s1097_s1 = smov [#allocation10]   ;;  %s1039_s20 = scalar_lea.hbm %s1348_s4, 16 }
  0x45   :  { %s68_s17 = sshll.u32 %s1097_s1, 4  ;;  %p1040_p4 = scmp.ne.s32.totalorder %s1348_s4, %s1039_s20  ;;  %s69_s17 = int_to_ptr.vmem [resolvable:$true] %s68_s17 }
  0x46   :  { %p1043_p5 = scmp.lt.u32.totalorder %s1039_s20, %s1348_s4 }
  0x48   :  { %p1045_p6 = pnand %p1043_p5, %p1040_p4 }
  0x4a   :  { %1048 = shalt.err (!%p1045_p6)
}
  0x4b   :  { %s1049_s27 = scalar_lea.vmem %s69_s17, 16  ;;  %s1053_s2 = scalar_lea.vmem %s69_s17, 32 }
  0x4c   :  { %p1050_p7 = scmp.ne.s32.totalorder %s69_s17, %s1049_s27  ;;  %p1054_p8 = scmp.lt.s32.totalorder %s69_s17, %s69_s17 }
  0x4d   :  { %p1055_p9 = scmp.lt.s32.totalorder %s1053_s2, %s1049_s27 }
  0x4f   :  { %p1056_p10 = por %p1055_p9, %p1054_p8 }
  0x51   :  { %p1057_p11 = pnand %p1056_p10, %p1050_p7 }
  0x53   :  { %1060 = shalt.err (!%p1057_p11)
}
  0x54   :  { %71 = dma.hbm_to_vmem [thread:$0]  %s1348_s4, 16, %s69_s17, [#allocation9]  }
  0x55   :  { %1083 = dma.done.wait [#allocation3], 1024  }
  0x56   :  { %1084 = vsyncadd [#allocation3], 4294966272 }
  0x57   :  { %1085 = dma.done.wait [#allocation6], 1280  }
  0x58   :  { %1086 = vsyncadd [#allocation6], 4294966016 }
  0x59   :  { %1087 = dma.done.wait [#allocation9], 144  }
  0x5a   :  { %1088 = vsyncadd [#allocation9], 4294967152  ;;  %v868_v0 = vld [vmem:[#allocation7] sm:$0xff]   ;;  %v869_v1 = vld [vmem:[#allocation8] sm:$0xff]   ;;  %vm172_vm0 = vcmask 130048   ;;  %vm346_vm1 = vcmask 261120  }
  0x5b   :  { %824 = vmatprep.subr.bf16.mxu0 %v868_v0  ;;  %v870_v2 = vld [vmem:[#allocation5] sm:$0xff]   ;;  %806 = vmatprep.subr.bf16.mxu1 %v869_v1  ;;  %v871_v3 = vld [vmem:[#allocation7 + $0x8] sm:$0xff]   ;;  %v875_v7 = vld [vmem:[#allocation5 + $0x10] sm:$0xff]   ;;  %vm667_vm2 = vcmask 257024   ;;  %s1098_s4 = smov [#allocation11]  }
  0x5c   :  { %825 = vmatpush3.bf16.msra.mxu0 %v868_v0  ;;  %807 = vmatpush3.bf16.msra.mxu1 %v869_v1  ;;  %v872_v4 = vld [vmem:[#allocation5 + $0x8] sm:$0xff]   ;;  %v873_v5 = vld [vmem:[#allocation2] sm:$0xff]   ;;  %v877_v8 = vld [vmem:[#allocation2 + $0x10] sm:$0xff]   ;;  %s689_s29 = sshll.u32 %s1098_s4, 4  ;;  %s690_s29 = int_to_ptr.vmem [resolvable:$true] %s689_s29 }
  0x5d   :  { %808 = vmatprep.mubr.msk.bf16.mxu1 %vm172_vm0, %v870_v2  ;;  %826 = vmatprep.subr.bf16.mxu0 %v871_v3  ;;  %v874_v6 = vld [vmem:[#allocation2 + $0x8] sm:$0xff]   ;;  %v876_v9 = vld [vmem:[#allocation5 + $0x18] sm:$0xff]   ;;  %v879_v10 = vld [vmem:[#allocation5 + $0x20] sm:$0xff]   ;;  %s1061_s3 = scalar_lea.vmem %s690_s29, 1024  ;;  %p1066_p13 = scmp.lt.s32.totalorder %s690_s29, %s690_s29 }
  0x5e   :  { %828 = vmatprep.mubr.msk.bf16.mxu0 %vm346_vm1, %v873_v5  ;;  %v878_v11 = vld [vmem:[#allocation2 + $0x18] sm:$0xff]   ;;  %v881_v12 = vld [vmem:[#allocation2 + $0x20] sm:$0xff]   ;;  %v880_v13 = vld [vmem:[#allocation5 + $0x28] sm:$0xff]   ;;  %p1062_p12 = scmp.ne.s32.totalorder %s690_s29, %s1061_s3  ;;  %p1067_p0 = scmp.lt.s32.totalorder %s1061_s3, %s1061_s3 }
  0x5f   :  { %809 = vmatmul.mubr.msk.bf16.vlgmr.msra.gmra.mrb[0].mxu1 %vm172_vm0, %v872_v4  ;;  %v883_v14 = vld [vmem:[#allocation5 + $0x30] sm:$0xff]   ;;  %v882_v15 = vld [vmem:[#allocation2 + $0x28] sm:$0xff]   ;;  %v884_v17 = vld [vmem:[#allocation5 + $0x38] sm:$0xff]  }
  0x60   :  { %827 = vmatpush3.bf16.msra.mxu0 %v871_v3  ;;  %812 = vmatprep.mubr.msk.bf16.mxu1 %vm172_vm0, %v875_v7  ;;  %v885_v16 = vld [vmem:[#allocation2 + $0x30] sm:$0xff]   ;;  %v886_v18 = vld [vmem:[#allocation2 + $0x38] sm:$0xff]   ;;  %p1068_p1 = por %p1067_p0, %p1066_p13 }
  0x61   :  { %v1231_v24 = vld [vmem:[#allocation10] ss:$0 sm:$0xff] }
  0x62   :  { %p1069_p2 = pnand %p1068_p1, %p1062_p12 }
  0x63   :  { %829 = vmatmul.mubr.msk.bf16.vlgmr.msra.gmra.mrb[0].mxu0 %vm346_vm1, %v874_v6 }
  0x64   :  { %832 = vmatprep.mubr.msk.bf16.mxu0 %vm346_vm1, %v877_v8 }
  0x67   :  { %813 = vmatmul.mubr.msk.bf16.gmra.mrb[4].mxu1 %vm172_vm0, %v876_v9 }
  0x68   :  { %816 = vmatprep.mubr.msk.bf16.mxu1 %vm172_vm0, %v879_v10 }
  0x6b   :  { %833 = vmatmul.mubr.msk.bf16.gmra.mrb[4].mxu0 %vm346_vm1, %v878_v11 }
  0x6c   :  { %836 = vmatprep.mubr.msk.bf16.mxu0 %vm346_vm1, %v881_v12 }
  0x6f   :  { %817 = vmatmul.mubr.msk.bf16.gmra.mrb[8].mxu1 %vm172_vm0, %v880_v13 }
  0x70   :  { %820 = vmatprep.mubr.msk.bf16.mxu1 %vm172_vm0, %v883_v14 }
  0x73   :  { %837 = vmatmul.mubr.msk.bf16.gmra.mrb[8].mxu0 %vm346_vm1, %v882_v15 }
  0x74   :  { %840 = vmatprep.mubr.msk.bf16.mxu0 %vm346_vm1, %v885_v16 }
  0x77   :  { %821 = vmatmul.mubr.msk.bf16.gmra.mrb[12].mxu1 %vm172_vm0, %v884_v17 }
  0x7b   :  { %841 = vmatmul.mubr.msk.bf16.gmra.mrb[12].mxu0 %vm346_vm1, %v886_v18 }
 0x132   :  { %v810_v19 = vpop.f32.mrb[0].mxu1 }
 0x133   :  { %v231_v20 = vpop.f32.mrb[1].mxu1 }
 0x134   :  { %v811_v21 = vpop.f32.mrb[2].mxu1 }
 0x135   :  { %v234_v22 = vpop.f32.mrb[3].mxu1 }
 0x136   :  { %v830_v23 = vpop.f32.mrb[0].mxu0 }
 0x137   :  { %v414_v25 = vadd.f32 %v830_v23, %v810_v19  ;;  %v405_v26 = vpop.f32.mrb[1].mxu0 }
 0x138   :  { %v406_v27 = vadd.f32 %v405_v26, %v231_v20  ;;  %v831_v28 = vpop.f32.mrb[2].mxu0 }
 0x139   :  { %v1234_v29 = vadd.f32 %v1231_v24, %v414_v25  ;;  %v417_v30 = vadd.f32 %v831_v28, %v811_v21  ;;  %v408_v31 = vpop.f32.mrb[3].mxu0 }
 0x13a   :  { %v1237_v32 = vadd.f32 %v1231_v24, %v406_v27  ;;  %v409_v33 = vadd.f32 %v408_v31, %v234_v22  ;;  %v814_v36 = vpop.f32.mrb[4].mxu1 }
 0x13b   :  { %v741_v34 = vmul.f32 -1.442695, %v1234_v29  ;;  %v1241_v35 = vadd.f32 %v1231_v24, %v417_v30  ;;  %v247_v39 = vpop.f32.mrb[5].mxu1 }
 0x13c   :  { %v739_v37 = vmul.f32 -1.442695, %v1237_v32  ;;  %v1245_v38 = vadd.f32 %v1231_v24, %v409_v33  ;;  %v815_v41 = vpop.f32.mrb[6].mxu1 }
 0x13d   :  { %887 = vpow2.f32 %v741_v34  ;;  %v742_v40 = vmul.f32 -1.442695, %v1241_v35  ;;  %v250_v43 = vpop.f32.mrb[7].mxu1 }
 0x13e   :  { %889 = vpow2.f32 %v739_v37  ;;  %v740_v42 = vmul.f32 -1.442695, %v1245_v38  ;;  %v834_v44 = vpop.f32.mrb[4].mxu0 }
 0x13f   :  { %891 = vpow2.f32 %v742_v40  ;;  %v430_v45 = vadd.f32 %v834_v44, %v814_v36  ;;  %v421_v46 = vpop.f32.mrb[5].mxu0 }
 0x140   :  { %893 = vpow2.f32 %v740_v42  ;;  %v422_v47 = vadd.f32 %v421_v46, %v247_v39  ;;  %v835_v48 = vpop.f32.mrb[6].mxu0 }
 0x141   :  { %v1250_v49 = vadd.f32 %v1231_v24, %v430_v45  ;;  %v433_v50 = vadd.f32 %v835_v48, %v815_v41  ;;  %v424_v51 = vpop.f32.mrb[7].mxu0 }
 0x142   :  { %v1253_v52 = vadd.f32 %v1231_v24, %v422_v47  ;;  %v425_v53 = vadd.f32 %v424_v51, %v250_v43  ;;  %v818_v56 = vpop.f32.mrb[8].mxu1 }
 0x143   :  { %v745_v54 = vmul.f32 -1.442695, %v1250_v49  ;;  %v1257_v55 = vadd.f32 %v1231_v24, %v433_v50  ;;  %v263_v59 = vpop.f32.mrb[9].mxu1 }
 0x144   :  { %v743_v57 = vmul.f32 -1.442695, %v1253_v52  ;;  %v1261_v58 = vadd.f32 %v1231_v24, %v425_v53  ;;  %v819_v61 = vpop.f32.mrb[10].mxu1 }
 0x145   :  { %895 = vpow2.f32 %v745_v54  ;;  %v746_v60 = vmul.f32 -1.442695, %v1257_v55  ;;  %v266_v63 = vpop.f32.mrb[11].mxu1 }
 0x146   :  { %897 = vpow2.f32 %v743_v57  ;;  %v744_v62 = vmul.f32 -1.442695, %v1261_v58  ;;  %v838_v0 = vpop.f32.mrb[8].mxu0 }
 0x147   :  { %v888_v1 = vpop.eup %887  ;;  %899 = vpow2.f32 %v746_v60  ;;  %v446_v2 = vadd.f32 %v838_v0, %v818_v56  ;;  %v437_v3 = vpop.f32.mrb[9].mxu0 }
 0x148   :  { %v890_v4 = vpop.eup %889  ;;  %v541_v5 = vadd.f32 1.0, %v888_v1  ;;  %901 = vpow2.f32 %v744_v62  ;;  %v438_v6 = vadd.f32 %v437_v3, %v263_v59  ;;  %v839_v7 = vpop.f32.mrb[10].mxu0 }
 0x149   :  { %v892_v8 = vpop.eup %891  ;;  %v539_v9 = vadd.f32 1.0, %v890_v4  ;;  %v1266_v10 = vadd.f32 %v1231_v24, %v446_v2  ;;  %v449_v11 = vadd.f32 %v839_v7, %v819_v61  ;;  %v440_v12 = vpop.f32.mrb[11].mxu0 }
 0x14a   :  { %v894_v13 = vpop.eup %893  ;;  %903 = vrcp.f32 %v541_v5  ;;  %v542_v14 = vadd.f32 1.0, %v892_v8  ;;  %v1269_v15 = vadd.f32 %v1231_v24, %v438_v6  ;;  %v441_v16 = vadd.f32 %v440_v12, %v266_v63  ;;  %v822_v20 = vpop.f32.mrb[12].mxu1 }
 0x14b   :  { %905 = vrcp.f32 %v539_v9  ;;  %v540_v17 = vadd.f32 1.0, %v894_v13  ;;  %v749_v18 = vmul.f32 -1.442695, %v1266_v10  ;;  %v1273_v19 = vadd.f32 %v1231_v24, %v449_v11  ;;  %v279_v23 = vpop.f32.mrb[13].mxu1 }
 0x14c   :  { %907 = vrcp.f32 %v542_v14  ;;  %v747_v21 = vmul.f32 -1.442695, %v1269_v15  ;;  %v1277_v22 = vadd.f32 %v1231_v24, %v441_v16  ;;  %v823_v26 = vpop.f32.mrb[14].mxu1 }
 0x14d   :  { %909 = vrcp.f32 %v540_v17  ;;  %v750_v25 = vmul.f32 -1.442695, %v1273_v19  ;;  %v282_v28 = vpop.f32.mrb[15].mxu1 }
 0x14e   :  { %911 = vpow2.f32 %v749_v18  ;;  %v748_v27 = vmul.f32 -1.442695, %v1277_v22  ;;  %v842_v30 = vpop.f32.mrb[12].mxu0 }
 0x14f   :  { %v896_v31 = vpop.eup %895  ;;  %913 = vpow2.f32 %v747_v21  ;;  %v462_v33 = vadd.f32 %v842_v30, %v822_v20  ;;  %v453_v34 = vpop.f32.mrb[13].mxu0 }
 0x150   :  { %v898_v36 = vpop.eup %897  ;;  %v545_v37 = vadd.f32 1.0, %v896_v31  ;;  %915 = vpow2.f32 %v750_v25  ;;  %v454_v39 = vadd.f32 %v453_v34, %v279_v23  ;;  %v843_v40 = vpop.f32.mrb[14].mxu0 }
 0x151   :  { %v900_v41 = vpop.eup %899  ;;  %v543_v42 = vadd.f32 1.0, %v898_v36  ;;  %917 = vpow2.f32 %v748_v27  ;;  %v1282_v43 = vadd.f32 %v1231_v24, %v462_v33  ;;  %v465_v44 = vadd.f32 %v843_v40, %v823_v26  ;;  %v456_v45 = vpop.f32.mrb[15].mxu0 }
 0x152   :  { %v902_v46 = vpop.eup %901  ;;  %919 = vrcp.f32 %v545_v37  ;;  %v546_v47 = vadd.f32 1.0, %v900_v41  ;;  %v1285_v48 = vadd.f32 %v1231_v24, %v454_v39  ;;  %v457_v50 = vadd.f32 %v456_v45, %v282_v28 }
 0x153   :  { %921 = vrcp.f32 %v543_v42  ;;  %v544_v51 = vadd.f32 1.0, %v902_v46  ;;  %v753_v53 = vmul.f32 -1.442695, %v1282_v43  ;;  %v1289_v54 = vadd.f32 %v1231_v24, %v465_v44 }
 0x154   :  { %v904_v56 = vpop.eup %903  ;;  %923 = vrcp.f32 %v546_v47  ;;  %v751_v57 = vmul.f32 -1.442695, %v1285_v48  ;;  %v1293_v59 = vadd.f32 %v1231_v24, %v457_v50 }
 0x155   :  { %v906_v60 = vpop.eup %905  ;;  %v589_v61 = vmul.f32 %v904_v56, %v1234_v29  ;;  %925 = vrcp.f32 %v544_v51  ;;  %v754_v62 = vmul.f32 -1.442695, %v1289_v54 }
 0x156   :  { %v908_v63 = vpop.eup %907  ;;  %v587_v0 = vmul.f32 %v906_v60, %v1237_v32  ;;  %927 = vpow2.f32 %v753_v53  ;;  %v752_v1 = vmul.f32 -1.442695, %v1293_v59 }
 0x157   :  { %v910_v2 = vpop.eup %909  ;;  %v773_v3 = vpack.c.bf16 %v589_v61, %v589_v61  ;;  %v590_v4 = vmul.f32 %v908_v63, %v1241_v35  ;;  %929 = vpow2.f32 %v751_v57 }
 0x158   :  { %v912_v24 = vpop.eup %911  ;;  %v771_v5 = vpack.c.bf16 %v587_v0, %v587_v0  ;;  %v588_v6 = vmul.f32 %v910_v2, %v1245_v38  ;;  %931 = vpow2.f32 %v754_v62 }
 0x159   :  { %v914_v29 = vpop.eup %913  ;;  %670 = vst.msk [vmem:[#allocation11 + $0x8] sm:$0xf] %vm667_vm2, %v773_v3  ;;  %v774_v7 = vpack.c.bf16 %v590_v4, %v590_v4  ;;  %v549_v8 = vadd.f32 1.0, %v912_v24  ;;  %933 = vpow2.f32 %v752_v1 }
 0x15a   :  { %v916_v32 = vpop.eup %915  ;;  %668 = vst.msk [vmem:[#allocation11] sm:$0xf] %vm667_vm2, %v771_v5  ;;  %v772_v9 = vpack.c.bf16 %v588_v6, %v588_v6  ;;  %v547_v11 = vadd.f32 1.0, %v914_v29 }
 0x15b   :  { %v918_v12 = vpop.eup %917  ;;  %671 = vst.msk [vmem:[#allocation11 + $0xc] sm:$0xf] %vm667_vm2, %v774_v7  ;;  %935 = vrcp.f32 %v549_v8  ;;  %v550_v35 = vadd.f32 1.0, %v916_v32 }
 0x15c   :  { %v920_v13 = vpop.eup %919  ;;  %669 = vst.msk [vmem:[#allocation11 + $0x4] sm:$0xf] %vm667_vm2, %v772_v9  ;;  %937 = vrcp.f32 %v547_v11  ;;  %v548_v38 = vadd.f32 1.0, %v918_v12 }
 0x15d   :  { %v922_v14 = vpop.eup %921  ;;  %v593_v16 = vmul.f32 %v920_v13, %v1250_v49  ;;  %939 = vrcp.f32 %v550_v35 }
 0x15e   :  { %v924_v17 = vpop.eup %923  ;;  %v591_v18 = vmul.f32 %v922_v14, %v1253_v52  ;;  %941 = vrcp.f32 %v548_v38 }
 0x15f   :  { %v926_v20 = vpop.eup %925  ;;  %v777_v21 = vpack.c.bf16 %v593_v16, %v593_v16  ;;  %v594_v23 = vmul.f32 %v924_v17, %v1257_v55 }
 0x160   :  { %v928_v25 = vpop.eup %927  ;;  %v775_v26 = vpack.c.bf16 %v591_v18, %v591_v18  ;;  %v592_v27 = vmul.f32 %v926_v20, %v1261_v58 }
 0x161   :  { %v930_v28 = vpop.eup %929  ;;  %674 = vst.msk [vmem:[#allocation11 + $0x18] sm:$0xf] %vm667_vm2, %v777_v21  ;;  %v778_v30 = vpack.c.bf16 %v594_v23, %v594_v23  ;;  %v553_v31 = vadd.f32 1.0, %v928_v25 }
 0x162   :  { %v932_v33 = vpop.eup %931  ;;  %672 = vst.msk [vmem:[#allocation11 + $0x10] sm:$0xf] %vm667_vm2, %v775_v26  ;;  %v776_v49 = vpack.c.bf16 %v592_v27, %v592_v27  ;;  %v551_v34 = vadd.f32 1.0, %v930_v28 }
 0x163   :  { %v934_v52 = vpop.eup %933  ;;  %675 = vst.msk [vmem:[#allocation11 + $0x1c] sm:$0xf] %vm667_vm2, %v778_v30  ;;  %943 = vrcp.f32 %v553_v31  ;;  %v554_v36 = vadd.f32 1.0, %v932_v33 }
 0x164   :  { %673 = vst.msk [vmem:[#allocation11 + $0x14] sm:$0xf] %vm667_vm2, %v776_v49  ;;  %945 = vrcp.f32 %v551_v34  ;;  %v552_v55 = vadd.f32 1.0, %v934_v52 }
 0x165   :  { %v936_v58 = vpop.eup %935  ;;  %947 = vrcp.f32 %v554_v36 }
 0x166   :  { %v938_v37 = vpop.eup %937  ;;  %v597_v39 = vmul.f32 %v936_v58, %v1266_v10  ;;  %949 = vrcp.f32 %v552_v55 }
 0x167   :  { %v940_v40 = vpop.eup %939  ;;  %v595_v41 = vmul.f32 %v938_v37, %v1269_v15 }
 0x168   :  { %v942_v42 = vpop.eup %941  ;;  %v781_v44 = vpack.c.bf16 %v597_v39, %v597_v39  ;;  %v598_v45 = vmul.f32 %v940_v40, %v1273_v19 }
 0x169   :  { %v779_v46 = vpack.c.bf16 %v595_v41, %v595_v41  ;;  %v596_v47 = vmul.f32 %v942_v42, %v1277_v22 }
 0x16a   :  { %678 = vst.msk [vmem:[#allocation11 + $0x28] sm:$0xf] %vm667_vm2, %v781_v44  ;;  %v782_v50 = vpack.c.bf16 %v598_v45, %v598_v45 }
 0x16b   :  { %676 = vst.msk [vmem:[#allocation11 + $0x20] sm:$0xf] %vm667_vm2, %v779_v46  ;;  %v780_v51 = vpack.c.bf16 %v596_v47, %v596_v47 }
 0x16c   :  { %679 = vst.msk [vmem:[#allocation11 + $0x2c] sm:$0xf] %vm667_vm2, %v782_v50 }
 0x16d   :  { %v944_v10 = vpop.eup %943  ;;  %677 = vst.msk [vmem:[#allocation11 + $0x24] sm:$0xf] %vm667_vm2, %v780_v51 }
 0x16e   :  { %v946_v53 = vpop.eup %945  ;;  %v601_v15 = vmul.f32 %v944_v10, %v1282_v43 }
 0x16f   :  { %v948_v56 = vpop.eup %947  ;;  %v599_v19 = vmul.f32 %v946_v53, %v1285_v48 }
 0x170   :  { %v950_v57 = vpop.eup %949  ;;  %v785_v60 = vpack.c.bf16 %v601_v15, %v601_v15  ;;  %v602_v22 = vmul.f32 %v948_v56, %v1289_v54 }
 0x171   :  { %v783_v61 = vpack.c.bf16 %v599_v19, %v599_v19  ;;  %v600_v62 = vmul.f32 %v950_v57, %v1293_v59 }
 0x172   :  { %682 = vst.msk [vmem:[#allocation11 + $0x38] sm:$0xf] %vm667_vm2, %v785_v60  ;;  %v786_v63 = vpack.c.bf16 %v602_v22, %v602_v22 }
 0x173   :  { %680 = vst.msk [vmem:[#allocation11 + $0x30] sm:$0xf] %vm667_vm2, %v783_v61  ;;  %v784_v0 = vpack.c.bf16 %v600_v62, %v600_v62 }
 0x174   :  { %683 = vst.msk [vmem:[#allocation11 + $0x3c] sm:$0xf] %vm667_vm2, %v786_v63 }
 0x175   :  { %681 = vst.msk [vmem:[#allocation11 + $0x34] sm:$0xf] %vm667_vm2, %v784_v0 }
 0x176   :  { %1072 = shalt.err (!%p1069_p2)
}
 0x177   :  { %s1073_s8 = scalar_lea.hbm %s1349_s5, 1024 }
 0x178   :  { %p1074_p3 = scmp.ne.s32.totalorder %s1349_s5, %s1073_s8  ;;  %p1077_p4 = scmp.lt.u32.totalorder %s1073_s8, %s1349_s5 }
 0x17a   :  { %p1079_p5 = pnand %p1077_p4, %p1074_p3 }
 0x17c   :  { %1082 = shalt.err (!%p1079_p5)
}
 0x17d   :  { %695 = dma.vmem_to_hbm [thread:$0]  %s690_s29, 1024, %s1349_s5, [#allocation4], %s1093_s30, %s1093_s30, %s1094_s6  }
 0x17e   :  { %1089 = dma.done.wait [#allocation4], 1024  }
 0x17f   :  { %1090 = vsyncadd [#allocation4], 4294966272 }
 0x180   :  { %699 = vsyncpa [#allocation3], 1 }
 0x181   :  { %700 = vsyncpa [#allocation6], 1 }
 0x182   :  { %701 = vsyncpa [#allocation9], 1 }
 0x183   :  { %702 = vsyncpa [#allocation4], 1 }

// kernel: darkfpn_apply.22
= control target key start
LH: loop header
LB: loop body
LE: loop exit
PB: predicated region body
PF: predicated region fallthrough
CT: control target
= control target key end

     0   :  { %10 = vsyncpa [#allocation3], 0  ;;  %s3843_s0 = inlined_call_operand.hbm [shape: bf16[512,32], index: 0, kind: input, shape index: {}]   ;;  %s3844_s1 = inlined_call_operand.hbm [shape: bf16[512,16], index: 1, kind: input, shape index: {}]   ;;  %s3845_s2 = inlined_call_operand.hbm [shape: bf16[32,16], index: 2, kind: input, shape index: {}]   ;;  %s3846_s3 = inlined_call_operand.hbm [shape: bf16[16,16], index: 3, kind: input, shape index: {}]   ;;  %s3847_s4 = inlined_call_operand.hbm [shape: f32[1,16], index: 4, kind: input, shape index: {}]   ;;  %s3848_s5 = inlined_call_operand.hbm [shape: bf16[512,16], index: 5, kind: output, shape index: {}]  }
   0x1   :  { %11 = vsyncpa [#allocation6], 0 }
   0x2   :  { %12 = vsyncpa [#allocation9], 0 }
   0x3   :  { %13 = vsyncpa [#allocation4], 0  ;;  %s3252_s18 = smov [#allocation5]   ;;  %s3253_s20 = smov [#allocation8]  }
   0x4   :  { %s31_s19 = sshll.u32 %s3252_s18, 4  ;;  %s55_s21 = sshll.u32 %s3253_s20, 4  ;;  %s32_s19 = int_to_ptr.vmem [resolvable:$true] %s31_s19  ;;  %s3290_s21 = int_to_ptr.vmem [resolvable:$true] %s55_s21 }
   0x5   :  { %s3112_s24 = scalar_lea.hbm %s3844_s1, 4096 }
   0x6   :  { %p3113_p0 = scmp.ne.s32.totalorder %s3844_s1, %s3112_s24  ;;  %p3116_p1 = scmp.lt.u32.totalorder %s3112_s24, %s3844_s1 }
   0x8   :  { %p3118_p2 = pnand %p3116_p1, %p3113_p0 }
   0xa   :  { %3121 = shalt.err (!%p3118_p2)
}
   0xb   :  { %s3122_s29 = scalar_lea.vmem %s32_s19, 4096  ;;  %p3127_p4 = scmp.lt.s32.totalorder %s32_s19, %s32_s19 }
   0xc   :  { %p3123_p3 = scmp.ne.s32.totalorder %s32_s19, %s3122_s29  ;;  %p3128_p5 = scmp.lt.s32.totalorder %s3122_s29, %s3122_s29 }
   0xe   :  { %p3129_p6 = por %p3128_p5, %p3127_p4 }
  0x10   :  { %p3130_p7 = pnand %p3129_p6, %p3123_p3 }
  0x12   :  { %3133 = shalt.err (!%p3130_p7)
}
  0x13   :  { %s3254_s30 = smov 64   ;;  %s3255_s6 = smov 4  }
  0x14   :  { %37 = dma.hbm_to_vmem [thread:$0]  %s3844_s1, 4096, %s32_s19, [#allocation6], %s3254_s30, %s3254_s30, %s3255_s6  }
  0x15   :  { %s3134_s11 = scalar_lea.hbm %s3846_s3, 128 }
  0x16   :  { %p3135_p8 = scmp.ne.s32.totalorder %s3846_s3, %s3134_s11  ;;  %p3138_p9 = scmp.lt.u32.totalorder %s3134_s11, %s3846_s3 }
  0x18   :  { %p3140_p10 = pnand %p3138_p9, %p3135_p8 }
  0x1a   :  { %3143 = shalt.err (!%p3140_p10)
}
  0x1b   :  { %s3144_s16 = scalar_lea.vmem %s3290_s21, 128  ;;  %p3149_p12 = scmp.lt.s32.totalorder %s3290_s21, %s3290_s21 }
  0x1c   :  { %p3145_p11 = scmp.ne.s32.totalorder %s3290_s21, %s3144_s16  ;;  %p3150_p13 = scmp.lt.s32.totalorder %s3144_s16, %s3144_s16 }
  0x1e   :  { %p3151_p0 = por %p3150_p13, %p3149_p12 }
  0x20   :  { %p3152_p1 = pnand %p3151_p0, %p3145_p11 }
  0x22   :  { %3155 = shalt.err (!%p3152_p1)
}
  0x23   :  { %61 = dma.hbm_to_vmem [thread:$0]  %s3846_s3, 128, %s3290_s21, [#allocation9], %s3254_s30, %s3254_s30, %s3255_s6  }
  0x24   :  { %s3256_s18 = smov [#allocation2]   ;;  %s3257_s20 = smov [#allocation7]  }
  0x25   :  { %s19_s19 = sshll.u32 %s3256_s18, 4  ;;  %s43_s22 = sshll.u32 %s3257_s20, 4  ;;  %s20_s19 = int_to_ptr.vmem [resolvable:$true] %s19_s19  ;;  %s3327_s22 = int_to_ptr.vmem [resolvable:$true] %s43_s22 }
  0x26   :  { %s3156_s25 = scalar_lea.hbm %s3843_s0, 4096 }
  0x27   :  { %p3157_p2 = scmp.ne.s32.totalorder %s3843_s0, %s3156_s25  ;;  %p3160_p3 = scmp.lt.u32.totalorder %s3156_s25, %s3843_s0 }
  0x29   :  { %p3162_p4 = pnand %p3160_p3, %p3157_p2 }
  0x2b   :  { %3165 = shalt.err (!%p3162_p4)
}
  0x2c   :  { %s3166_s3 = scalar_lea.vmem %s20_s19, 4096  ;;  %p3171_p6 = scmp.lt.s32.totalorder %s20_s19, %s20_s19 }
  0x2d   :  { %p3167_p5 = scmp.ne.s32.totalorder %s20_s19, %s3166_s3  ;;  %p3172_p7 = scmp.lt.s32.totalorder %s3166_s3, %s3166_s3 }
  0x2f   :  { %p3173_p8 = por %p3172_p7, %p3171_p6 }
  0x31   :  { %p3174_p9 = pnand %p3173_p8, %p3167_p5 }
  0x33   :  { %3177 = shalt.err (!%p3174_p9)
}
  0x34   :  { %25 = dma.hbm_to_vmem [thread:$0]  %s3843_s0, 4096, %s20_s19, [#allocation3], %s3254_s30, %s3254_s30, %s3255_s6  }
  0x35   :  { %s3178_s10 = scalar_lea.hbm %s3845_s2, 256 }
  0x36   :  { %p3179_p10 = scmp.ne.s32.totalorder %s3845_s2, %s3178_s10  ;;  %p3182_p11 = scmp.lt.u32.totalorder %s3178_s10, %s3845_s2 }
  0x38   :  { %p3184_p12 = pnand %p3182_p11, %p3179_p10 }
  0x3a   :  { %3187 = shalt.err (!%p3184_p12)
}
  0x3b   :  { %s3188_s15 = scalar_lea.vmem %s3327_s22, 256  ;;  %p3193_p0 = scmp.lt.s32.totalorder %s3327_s22, %s3327_s22 }
  0x3c   :  { %p3189_p13 = scmp.ne.s32.totalorder %s3327_s22, %s3188_s15  ;;  %p3194_p1 = scmp.lt.s32.totalorder %s3188_s15, %s3188_s15 }
  0x3e   :  { %p3195_p2 = por %p3194_p1, %p3193_p0 }
  0x40   :  { %p3196_p3 = pnand %p3195_p2, %p3189_p13 }
  0x42   :  { %3199 = shalt.err (!%p3196_p3)
}
  0x43   :  { %49 = dma.hbm_to_vmem [thread:$0]  %s3845_s2, 256, %s3327_s22, [#allocation6], %s3254_s30, %s3254_s30, %s3255_s6  }
  0x44   :  { %s3258_s1 = smov [#allocation10]   ;;  %s3200_s20 = scalar_lea.hbm %s3847_s4, 16 }
  0x45   :  { %s68_s17 = sshll.u32 %s3258_s1, 4  ;;  %p3201_p4 = scmp.ne.s32.totalorder %s3847_s4, %s3200_s20  ;;  %s69_s17 = int_to_ptr.vmem [resolvable:$true] %s68_s17 }
  0x46   :  { %p3204_p5 = scmp.lt.u32.totalorder %s3200_s20, %s3847_s4 }
  0x48   :  { %p3206_p6 = pnand %p3204_p5, %p3201_p4 }
  0x4a   :  { %3209 = shalt.err (!%p3206_p6)
}
  0x4b   :  { %s3210_s27 = scalar_lea.vmem %s69_s17, 16  ;;  %s3214_s2 = scalar_lea.vmem %s69_s17, 32 }
  0x4c   :  { %p3211_p7 = scmp.ne.s32.totalorder %s69_s17, %s3210_s27  ;;  %p3215_p8 = scmp.lt.s32.totalorder %s69_s17, %s69_s17 }
  0x4d   :  { %p3216_p9 = scmp.lt.s32.totalorder %s3214_s2, %s3210_s27 }
  0x4f   :  { %p3217_p10 = por %p3216_p9, %p3215_p8 }
  0x51   :  { %p3218_p11 = pnand %p3217_p10, %p3211_p7 }
  0x53   :  { %3221 = shalt.err (!%p3218_p11)
}
  0x54   :  { %71 = dma.hbm_to_vmem [thread:$0]  %s3847_s4, 16, %s69_s17, [#allocation9]  }
  0x55   :  { %3244 = dma.done.wait [#allocation3], 4096  }
  0x56   :  { %3245 = vsyncadd [#allocation3], 4294963200 }
  0x57   :  { %3246 = dma.done.wait [#allocation6], 4352  }
  0x58   :  { %3247 = vsyncadd [#allocation6], 4294962944 }
  0x59   :  { %3248 = dma.done.wait [#allocation9], 144  }
  0x5a   :  { %3249 = vsyncadd [#allocation9], 4294967152  ;;  %v2788_v0 = vld [vmem:[#allocation7] sm:$0xff]   ;;  %v2789_v1 = vld [vmem:[#allocation8] sm:$0xff]   ;;  %vm388_vm0 = vcmask 130048   ;;  %vm946_vm1 = vcmask 261120  }
  0x5b   :  { %2648 = vmatprep.subr.bf16.mxu0 %v2788_v0  ;;  %v2790_v2 = vld [vmem:[#allocation5] sm:$0xff]   ;;  %2582 = vmatprep.subr.bf16.mxu1 %v2789_v1  ;;  %v2791_v3 = vld [vmem:[#allocation7 + $0x8] sm:$0xff]   ;;  %v2795_v7 = vld [vmem:[#allocation5 + $0x10] sm:$0xff]   ;;  %vm2107_vm2 = vcmask 125952   ;;  %s3259_s4 = smov [#allocation11]  }
  0x5c   :  { %2649 = vmatpush3.bf16.msra.mxu0 %v2788_v0  ;;  %2583 = vmatpush3.bf16.msra.mxu1 %v2789_v1  ;;  %v2792_v4 = vld [vmem:[#allocation5 + $0x8] sm:$0xff]   ;;  %v2793_v5 = vld [vmem:[#allocation2] sm:$0xff]   ;;  %v2797_v8 = vld [vmem:[#allocation2 + $0x10] sm:$0xff]   ;;  %s2177_s29 = sshll.u32 %s3259_s4, 4  ;;  %s2178_s29 = int_to_ptr.vmem [resolvable:$true] %s2177_s29 }
  0x5d   :  { %2584 = vmatprep.mubr.msk.bf16.mxu1 %vm388_vm0, %v2790_v2  ;;  %2650 = vmatprep.subr.bf16.mxu0 %v2791_v3  ;;  %v2794_v6 = vld [vmem:[#allocation2 + $0x8] sm:$0xff]   ;;  %v2796_v9 = vld [vmem:[#allocation5 + $0x18] sm:$0xff]   ;;  %v2799_v10 = vld [vmem:[#allocation5 + $0x20] sm:$0xff]   ;;  %s3222_s3 = scalar_lea.vmem %s2178_s29, 4096  ;;  %p3227_p13 = scmp.lt.s32.totalorder %s2178_s29, %s2178_s29 }
  0x5e   :  { %2652 = vmatprep.mubr.msk.bf16.mxu0 %vm946_vm1, %v2793_v5  ;;  %v2798_v11 = vld [vmem:[#allocation2 + $0x18] sm:$0xff]   ;;  %v2801_v12 = vld [vmem:[#allocation2 + $0x20] sm:$0xff]   ;;  %v2800_v13 = vld [vmem:[#allocation5 + $0x28] sm:$0xff]   ;;  %p3223_p12 = scmp.ne.s32.totalorder %s2178_s29, %s3222_s3  ;;  %p3228_p0 = scmp.lt.s32.totalorder %s3222_s3, %s3222_s3 }
  0x5f   :  { %2585 = vmatmul.mubr.msk.bf16.vlgmr.msra.gmra.mrb[0].mxu1 %vm388_vm0, %v2792_v4  ;;  %v2803_v14 = vld [vmem:[#allocation5 + $0x30] sm:$0xff]   ;;  %v2802_v15 = vld [vmem:[#allocation2 + $0x28] sm:$0xff]   ;;  %v2804_v17 = vld [vmem:[#allocation5 + $0x38] sm:$0xff]  }
  0x60   :  { %2651 = vmatpush3.bf16.msra.mxu0 %v2791_v3  ;;  %2588 = vmatprep.mubr.msk.bf16.mxu1 %vm388_vm0, %v2795_v7  ;;  %v2805_v16 = vld [vmem:[#allocation2 + $0x30] sm:$0xff]   ;;  %v2807_v18 = vld [vmem:[#allocation5 + $0x40] sm:$0xff]   ;;  %v2806_v19 = vld [vmem:[#allocation2 + $0x38] sm:$0xff]   ;;  %p3229_p1 = por %p3228_p0, %p3227_p13 }
  0x61   :  { %v2809_v20 = vld [vmem:[#allocation2 + $0x40] sm:$0xff]   ;;  %v2808_v21 = vld [vmem:[#allocation5 + $0x48] sm:$0xff]   ;;  %v2811_v22 = vld [vmem:[#allocation5 + $0x50] sm:$0xff]  }
  0x62   :  { %v2810_v23 = vld [vmem:[#allocation2 + $0x48] sm:$0xff]   ;;  %v2813_v24 = vld [vmem:[#allocation2 + $0x50] sm:$0xff]   ;;  %v2812_v25 = vld [vmem:[#allocation5 + $0x58] sm:$0xff]   ;;  %p3230_p2 = pnand %p3229_p1, %p3223_p12 }
  0x63   :  { %2653 = vmatmul.mubr.msk.bf16.vlgmr.msra.gmra.mrb[0].mxu0 %vm946_vm1, %v2794_v6  ;;  %v2815_v26 = vld [vmem:[#allocation5 + $0x60] sm:$0xff]   ;;  %v2814_v27 = vld [vmem:[#allocation2 + $0x58] sm:$0xff]   ;;  %v2816_v29 = vld [vmem:[#allocation5 + $0x68] sm:$0xff]  }
  0x64   :  { %2656 = vmatprep.mubr.msk.bf16.mxu0 %vm946_vm1, %v2797_v8  ;;  %v2817_v28 = vld [vmem:[#allocation2 + $0x60] sm:$0xff]   ;;  %v2819_v30 = vld [vmem:[#allocation5 + $0x70] sm:$0xff]   ;;  %v2818_v31 = vld [vmem:[#allocation2 + $0x68] sm:$0xff]  }
  0x65   :  { %v2821_v32 = vld [vmem:[#allocation2 + $0x70] sm:$0xff]   ;;  %v2820_v33 = vld [vmem:[#allocation5 + $0x78] sm:$0xff]   ;;  %v2823_v34 = vld [vmem:[#allocation5 + $0x80] sm:$0xff]  }
  0x66   :  { %v2822_v35 = vld [vmem:[#allocation2 + $0x78] sm:$0xff]   ;;  %v2825_v36 = vld [vmem:[#allocation2 + $0x80] sm:$0xff]   ;;  %v2824_v37 = vld [vmem:[#allocation5 + $0x88] sm:$0xff]  }
  0x67   :  { %2589 = vmatmul.mubr.msk.bf16.gmra.mrb[4].mxu1 %vm388_vm0, %v2796_v9  ;;  %v2827_v38 = vld [vmem:[#allocation5 + $0x90] sm:$0xff]   ;;  %v2826_v39 = vld [vmem:[#allocation2 + $0x88] sm:$0xff]   ;;  %v2828_v41 = vld [vmem:[#allocation5 + $0x98] sm:$0xff]  }
  0x68   :  { %2592 = vmatprep.mubr.msk.bf16.mxu1 %vm388_vm0, %v2799_v10  ;;  %v2829_v40 = vld [vmem:[#allocation2 + $0x90] sm:$0xff]   ;;  %v2831_v42 = vld [vmem:[#allocation5 + $0xa0] sm:$0xff]   ;;  %v2830_v43 = vld [vmem:[#allocation2 + $0x98] sm:$0xff]  }
  0x69   :  { %v2833_v44 = vld [vmem:[#allocation2 + $0xa0] sm:$0xff]   ;;  %v2832_v45 = vld [vmem:[#allocation5 + $0xa8] sm:$0xff]   ;;  %v2835_v46 = vld [vmem:[#allocation5 + $0xb0] sm:$0xff]  }
  0x6a   :  { %v2834_v47 = vld [vmem:[#allocation2 + $0xa8] sm:$0xff]   ;;  %v2837_v48 = vld [vmem:[#allocation2 + $0xb0] sm:$0xff]   ;;  %v2836_v49 = vld [vmem:[#allocation5 + $0xb8] sm:$0xff]  }
  0x6b   :  { %2657 = vmatmul.mubr.msk.bf16.gmra.mrb[4].mxu0 %vm946_vm1, %v2798_v11  ;;  %v2839_v50 = vld [vmem:[#allocation5 + $0xc0] sm:$0xff]   ;;  %v2838_v51 = vld [vmem:[#allocation2 + $0xb8] sm:$0xff]   ;;  %v2840_v53 = vld [vmem:[#allocation5 + $0xc8] sm:$0xff]  }
  0x6c   :  { %2660 = vmatprep.mubr.msk.bf16.mxu0 %vm946_vm1, %v2801_v12  ;;  %v2841_v52 = vld [vmem:[#allocation2 + $0xc0] sm:$0xff]   ;;  %v2843_v54 = vld [vmem:[#allocation5 + $0xd0] sm:$0xff]   ;;  %v2842_v55 = vld [vmem:[#allocation2 + $0xc8] sm:$0xff]  }
  0x6d   :  { %v2845_v56 = vld [vmem:[#allocation2 + $0xd0] sm:$0xff]   ;;  %v2844_v57 = vld [vmem:[#allocation5 + $0xd8] sm:$0xff]   ;;  %v2847_v58 = vld [vmem:[#allocation5 + $0xe0] sm:$0xff]  }
  0x6e   :  { %v2846_v59 = vld [vmem:[#allocation2 + $0xd8] sm:$0xff]   ;;  %v2849_v60 = vld [vmem:[#allocation2 + $0xe0] sm:$0xff]   ;;  %v2848_v61 = vld [vmem:[#allocation5 + $0xe8] sm:$0xff]  }
  0x6f   :  { %2593 = vmatmul.mubr.msk.bf16.gmra.mrb[8].mxu1 %vm388_vm0, %v2800_v13  ;;  %v2851_v62 = vld [vmem:[#allocation5 + $0xf0] sm:$0xff]   ;;  %v2850_v63 = vld [vmem:[#allocation2 + $0xe8] sm:$0xff]   ;;  %v2852_v1 = vld [vmem:[#allocation5 + $0xf8] sm:$0xff]  }
  0x70   :  { %2596 = vmatprep.mubr.msk.bf16.mxu1 %vm388_vm0, %v2803_v14  ;;  %v2853_v0 = vld [vmem:[#allocation2 + $0xf0] sm:$0xff]   ;;  %v2854_v2 = vld [vmem:[#allocation2 + $0xf8] sm:$0xff]  }
  0x71   :  { %v3440_v8 = vld [vmem:[#allocation10] ss:$0 sm:$0xff] }
  0x73   :  { %2661 = vmatmul.mubr.msk.bf16.gmra.mrb[8].mxu0 %vm946_vm1, %v2802_v15 }
  0x74   :  { %2664 = vmatprep.mubr.msk.bf16.mxu0 %vm946_vm1, %v2805_v16 }
  0x77   :  { %2597 = vmatmul.mubr.msk.bf16.gmra.mrb[12].mxu1 %vm388_vm0, %v2804_v17 }
  0x78   :  { %2600 = vmatprep.mubr.msk.bf16.mxu1 %vm388_vm0, %v2807_v18 }
  0x7b   :  { %2665 = vmatmul.mubr.msk.bf16.gmra.mrb[12].mxu0 %vm946_vm1, %v2806_v19 }
  0x7c   :  { %2668 = vmatprep.mubr.msk.bf16.mxu0 %vm946_vm1, %v2809_v20 }
  0x7f   :  { %2601 = vmatmul.mubr.msk.bf16.gmra.mrb[16].mxu1 %vm388_vm0, %v2808_v21 }
  0x80   :  { %2604 = vmatprep.mubr.msk.bf16.mxu1 %vm388_vm0, %v2811_v22 }
  0x83   :  { %2669 = vmatmul.mubr.msk.bf16.gmra.mrb[16].mxu0 %vm946_vm1, %v2810_v23 }
  0x84   :  { %2672 = vmatprep.mubr.msk.bf16.mxu0 %vm946_vm1, %v2813_v24 }
  0x87   :  { %2605 = vmatmul.mubr.msk.bf16.gmra.mrb[20].mxu1 %vm388_vm0, %v2812_v25 }
  0x88   :  { %2608 = vmatprep.mubr.msk.bf16.mxu1 %vm388_vm0, %v2815_v26 }
  0x8b   :  { %2673 = vmatmul.mubr.msk.bf16.gmra.mrb[20].mxu0 %vm946_vm1, %v2814_v27 }
  0x8c   :  { %2676 = vmatprep.mubr.msk.bf16.mxu0 %vm946_vm1, %v2817_v28 }
  0x8f   :  { %2609 = vmatmul.mubr.msk.bf16.gmra.mrb[24].mxu1 %vm388_vm0, %v2816_v29 }
  0x90   :  { %2612 = vmatprep.mubr.msk.bf16.mxu1 %vm388_vm0, %v2819_v30 }
  0x93   :  { %2677 = vmatmul.mubr.msk.bf16.gmra.mrb[24].mxu0 %vm946_vm1, %v2818_v31 }
  0x94   :  { %2680 = vmatprep.mubr.msk.bf16.mxu0 %vm946_vm1, %v2821_v32 }
  0x97   :  { %2613 = vmatmul.mubr.msk.bf16.gmra.mrb[28].mxu1 %vm388_vm0, %v2820_v33 }
  0x98   :  { %2616 = vmatprep.mubr.msk.bf16.mxu1 %vm388_vm0, %v2823_v34 }
  0x9b   :  { %2681 = vmatmul.mubr.msk.bf16.gmra.mrb[28].mxu0 %vm946_vm1, %v2822_v35 }
  0x9c   :  { %2684 = vmatprep.mubr.msk.bf16.mxu0 %vm946_vm1, %v2825_v36 }
  0x9f   :  { %2617 = vmatmul.mubr.msk.bf16.gmra.mrb[32].mxu1 %vm388_vm0, %v2824_v37 }
  0xa0   :  { %2620 = vmatprep.mubr.msk.bf16.mxu1 %vm388_vm0, %v2827_v38 }
  0xa3   :  { %2685 = vmatmul.mubr.msk.bf16.gmra.mrb[32].mxu0 %vm946_vm1, %v2826_v39 }
  0xa4   :  { %2688 = vmatprep.mubr.msk.bf16.mxu0 %vm946_vm1, %v2829_v40 }
  0xa7   :  { %2621 = vmatmul.mubr.msk.bf16.gmra.mrb[36].mxu1 %vm388_vm0, %v2828_v41 }
  0xa8   :  { %2624 = vmatprep.mubr.msk.bf16.mxu1 %vm388_vm0, %v2831_v42 }
  0xab   :  { %2689 = vmatmul.mubr.msk.bf16.gmra.mrb[36].mxu0 %vm946_vm1, %v2830_v43 }
  0xac   :  { %2692 = vmatprep.mubr.msk.bf16.mxu0 %vm946_vm1, %v2833_v44 }
  0xaf   :  { %2625 = vmatmul.mubr.msk.bf16.gmra.mrb[40].mxu1 %vm388_vm0, %v2832_v45 }
  0xb0   :  { %2628 = vmatprep.mubr.msk.bf16.mxu1 %vm388_vm0, %v2835_v46 }
  0xb3   :  { %2693 = vmatmul.mubr.msk.bf16.gmra.mrb[40].mxu0 %vm946_vm1, %v2834_v47 }
  0xb4   :  { %2696 = vmatprep.mubr.msk.bf16.mxu0 %vm946_vm1, %v2837_v48 }
  0xb7   :  { %2629 = vmatmul.mubr.msk.bf16.gmra.mrb[44].mxu1 %vm388_vm0, %v2836_v49 }
  0xb8   :  { %2632 = vmatprep.mubr.msk.bf16.mxu1 %vm388_vm0, %v2839_v50 }
  0xbb   :  { %2697 = vmatmul.mubr.msk.bf16.gmra.mrb[44].mxu0 %vm946_vm1, %v2838_v51 }
  0xbc   :  { %2700 = vmatprep.mubr.msk.bf16.mxu0 %vm946_vm1, %v2841_v52 }
  0xbf   :  { %2633 = vmatmul.mubr.msk.bf16.gmra.mrb[48].mxu1 %vm388_vm0, %v2840_v53 }
  0xc0   :  { %2636 = vmatprep.mubr.msk.bf16.mxu1 %vm388_vm0, %v2843_v54 }
  0xc3   :  { %2701 = vmatmul.mubr.msk.bf16.gmra.mrb[48].mxu0 %vm946_vm1, %v2842_v55 }
  0xc4   :  { %2704 = vmatprep.mubr.msk.bf16.mxu0 %vm946_vm1, %v2845_v56 }
  0xc7   :  { %2637 = vmatmul.mubr.msk.bf16.gmra.mrb[52].mxu1 %vm388_vm0, %v2844_v57 }
  0xc8   :  { %2640 = vmatprep.mubr.msk.bf16.mxu1 %vm388_vm0, %v2847_v58 }
  0xcb   :  { %2705 = vmatmul.mubr.msk.bf16.gmra.mrb[52].mxu0 %vm946_vm1, %v2846_v59 }
  0xcc   :  { %2708 = vmatprep.mubr.msk.bf16.mxu0 %vm946_vm1, %v2849_v60 }
  0xcf   :  { %2641 = vmatmul.mubr.msk.bf16.gmra.mrb[56].mxu1 %vm388_vm0, %v2848_v61 }
  0xd0   :  { %2644 = vmatprep.mubr.msk.bf16.mxu1 %vm388_vm0, %v2851_v62 }
  0xd3   :  { %2709 = vmatmul.mubr.msk.bf16.gmra.mrb[56].mxu0 %vm946_vm1, %v2850_v63 }
  0xd4   :  { %2712 = vmatprep.mubr.msk.bf16.mxu0 %vm946_vm1, %v2853_v0 }
  0xd7   :  { %2645 = vmatmul.mubr.msk.bf16.gmra.mrb[60].mxu1 %vm388_vm0, %v2852_v1 }
  0xdb   :  { %2713 = vmatmul.mubr.msk.bf16.gmra.mrb[60].mxu0 %vm946_vm1, %v2854_v2 }
 0x132   :  { %v2586_v3 = vpop.f32.mrb[0].mxu1 }
 0x133   :  { %v519_v4 = vpop.f32.mrb[1].mxu1 }
 0x134   :  { %v2587_v5 = vpop.f32.mrb[2].mxu1 }
 0x135   :  { %v522_v6 = vpop.f32.mrb[3].mxu1 }
 0x136   :  { %v2654_v7 = vpop.f32.mrb[0].mxu0 }
 0x137   :  { %v1086_v9 = vadd.f32 %v2654_v7, %v2586_v3  ;;  %v1077_v10 = vpop.f32.mrb[1].mxu0 }
 0x138   :  { %v1078_v11 = vadd.f32 %v1077_v10, %v519_v4  ;;  %v2655_v12 = vpop.f32.mrb[2].mxu0 }
 0x139   :  { %v3443_v13 = vadd.f32 %v3440_v8, %v1086_v9  ;;  %v1089_v14 = vadd.f32 %v2655_v12, %v2587_v5  ;;  %v1080_v15 = vpop.f32.mrb[3].mxu0 }
 0x13a   :  { %v3446_v16 = vadd.f32 %v3440_v8, %v1078_v11  ;;  %v1081_v17 = vadd.f32 %v1080_v15, %v522_v6  ;;  %v2590_v20 = vpop.f32.mrb[4].mxu1 }
 0x13b   :  { %v2325_v18 = vmul.f32 -1.442695, %v3443_v13  ;;  %v3450_v19 = vadd.f32 %v3440_v8, %v1089_v14  ;;  %v535_v23 = vpop.f32.mrb[5].mxu1 }
 0x13c   :  { %v2323_v21 = vmul.f32 -1.442695, %v3446_v16  ;;  %v3454_v22 = vadd.f32 %v3440_v8, %v1081_v17  ;;  %v2591_v25 = vpop.f32.mrb[6].mxu1 }
 0x13d   :  { %2855 = vpow2.f32 %v2325_v18  ;;  %v2326_v24 = vmul.f32 -1.442695, %v3450_v19  ;;  %v538_v27 = vpop.f32.mrb[7].mxu1 }
 0x13e   :  { %2857 = vpow2.f32 %v2323_v21  ;;  %v2324_v26 = vmul.f32 -1.442695, %v3454_v22  ;;  %v2658_v28 = vpop.f32.mrb[4].mxu0 }
 0x13f   :  { %2859 = vpow2.f32 %v2326_v24  ;;  %v1102_v29 = vadd.f32 %v2658_v28, %v2590_v20  ;;  %v1093_v30 = vpop.f32.mrb[5].mxu0 }
 0x140   :  { %2861 = vpow2.f32 %v2324_v26  ;;  %v1094_v31 = vadd.f32 %v1093_v30, %v535_v23  ;;  %v2659_v32 = vpop.f32.mrb[6].mxu0 }
 0x141   :  { %v3459_v33 = vadd.f32 %v3440_v8, %v1102_v29  ;;  %v1105_v34 = vadd.f32 %v2659_v32, %v2591_v25  ;;  %v1096_v35 = vpop.f32.mrb[7].mxu0 }
 0x142   :  { %v3462_v36 = vadd.f32 %v3440_v8, %v1094_v31  ;;  %v1097_v37 = vadd.f32 %v1096_v35, %v538_v27  ;;  %v2594_v40 = vpop.f32.mrb[8].mxu1 }
 0x143   :  { %v2329_v38 = vmul.f32 -1.442695, %v3459_v33  ;;  %v3466_v39 = vadd.f32 %v3440_v8, %v1105_v34  ;;  %v551_v43 = vpop.f32.mrb[9].mxu1 }
 0x144   :  { %v2327_v41 = vmul.f32 -1.442695, %v3462_v36  ;;  %v3470_v42 = vadd.f32 %v3440_v8, %v1097_v37  ;;  %v2595_v45 = vpop.f32.mrb[10].mxu1 }
 0x145   :  { %2863 = vpow2.f32 %v2329_v38  ;;  %v2330_v44 = vmul.f32 -1.442695, %v3466_v39  ;;  %v554_v47 = vpop.f32.mrb[11].mxu1 }
 0x146   :  { %2865 = vpow2.f32 %v2327_v41  ;;  %v2328_v46 = vmul.f32 -1.442695, %v3470_v42  ;;  %v2662_v48 = vpop.f32.mrb[8].mxu0 }
 0x147   :  { %v2856_v49 = vpop.eup %2855  ;;  %2867 = vpow2.f32 %v2330_v44  ;;  %v1118_v50 = vadd.f32 %v2662_v48, %v2594_v40  ;;  %v1109_v51 = vpop.f32.mrb[9].mxu0 }
 0x148   :  { %v2858_v52 = vpop.eup %2857  ;;  %v1597_v53 = vadd.f32 1.0, %v2856_v49  ;;  %2869 = vpow2.f32 %v2328_v46  ;;  %v1110_v54 = vadd.f32 %v1109_v51, %v551_v43  ;;  %v2663_v55 = vpop.f32.mrb[10].mxu0 }
 0x149   :  { %v2860_v56 = vpop.eup %2859  ;;  %v1595_v57 = vadd.f32 1.0, %v2858_v52  ;;  %v3475_v58 = vadd.f32 %v3440_v8, %v1118_v50  ;;  %v1121_v59 = vadd.f32 %v2663_v55, %v2595_v45  ;;  %v1112_v60 = vpop.f32.mrb[11].mxu0 }
 0x14a   :  { %v2862_v61 = vpop.eup %2861  ;;  %2871 = vrcp.f32 %v1597_v53  ;;  %v1598_v62 = vadd.f32 1.0, %v2860_v56  ;;  %v3478_v63 = vadd.f32 %v3440_v8, %v1110_v54  ;;  %v1113_v0 = vadd.f32 %v1112_v60, %v554_v47  ;;  %v2598_v4 = vpop.f32.mrb[12].mxu1 }
 0x14b   :  { %2873 = vrcp.f32 %v1595_v57  ;;  %v1596_v1 = vadd.f32 1.0, %v2862_v61  ;;  %v2333_v2 = vmul.f32 -1.442695, %v3475_v58  ;;  %v3482_v3 = vadd.f32 %v3440_v8, %v1121_v59  ;;  %v567_v7 = vpop.f32.mrb[13].mxu1 }
 0x14c   :  { %2875 = vrcp.f32 %v1598_v62  ;;  %v2331_v5 = vmul.f32 -1.442695, %v3478_v63  ;;  %v3486_v6 = vadd.f32 %v3440_v8, %v1113_v0  ;;  %v2599_v10 = vpop.f32.mrb[14].mxu1 }
 0x14d   :  { %2877 = vrcp.f32 %v1596_v1  ;;  %v2334_v9 = vmul.f32 -1.442695, %v3482_v3  ;;  %v570_v12 = vpop.f32.mrb[15].mxu1 }
 0x14e   :  { %2879 = vpow2.f32 %v2333_v2  ;;  %v2332_v11 = vmul.f32 -1.442695, %v3486_v6  ;;  %v2666_v14 = vpop.f32.mrb[12].mxu0 }
 0x14f   :  { %v2864_v15 = vpop.eup %2863  ;;  %2881 = vpow2.f32 %v2331_v5  ;;  %v1134_v17 = vadd.f32 %v2666_v14, %v2598_v4  ;;  %v1125_v18 = vpop.f32.mrb[13].mxu0 }
 0x150   :  { %v2866_v20 = vpop.eup %2865  ;;  %v1601_v21 = vadd.f32 1.0, %v2864_v15  ;;  %2883 = vpow2.f32 %v2334_v9  ;;  %v1126_v23 = vadd.f32 %v1125_v18, %v567_v7  ;;  %v2667_v24 = vpop.f32.mrb[14].mxu0 }
 0x151   :  { %v2868_v25 = vpop.eup %2867  ;;  %v1599_v26 = vadd.f32 1.0, %v2866_v20  ;;  %2885 = vpow2.f32 %v2332_v11  ;;  %v3491_v27 = vadd.f32 %v3440_v8, %v1134_v17  ;;  %v1137_v28 = vadd.f32 %v2667_v24, %v2599_v10  ;;  %v1128_v29 = vpop.f32.mrb[15].mxu0 }
 0x152   :  { %v2870_v30 = vpop.eup %2869  ;;  %2887 = vrcp.f32 %v1601_v21  ;;  %v1602_v31 = vadd.f32 1.0, %v2868_v25  ;;  %v3494_v32 = vadd.f32 %v3440_v8, %v1126_v23  ;;  %v1129_v34 = vadd.f32 %v1128_v29, %v570_v12  ;;  %v2602_v40 = vpop.f32.mrb[16].mxu1 }
 0x153   :  { %2889 = vrcp.f32 %v1599_v26  ;;  %v1600_v35 = vadd.f32 1.0, %v2870_v30  ;;  %v2337_v37 = vmul.f32 -1.442695, %v3491_v27  ;;  %v3498_v38 = vadd.f32 %v3440_v8, %v1137_v28  ;;  %v583_v45 = vpop.f32.mrb[17].mxu1 }
 0x154   :  { %v2872_v41 = vpop.eup %2871  ;;  %2891 = vrcp.f32 %v1602_v31  ;;  %v2335_v43 = vmul.f32 -1.442695, %v3494_v32  ;;  %v3502_v44 = vadd.f32 %v3440_v8, %v1129_v34  ;;  %v2603_v49 = vpop.f32.mrb[18].mxu1 }
 0x155   :  { %v2874_v46 = vpop.eup %2873  ;;  %v1789_v47 = vmul.f32 %v2872_v41, %v3443_v13  ;;  %2893 = vrcp.f32 %v1600_v35  ;;  %v2338_v48 = vmul.f32 -1.442695, %v3498_v38  ;;  %v586_v53 = vpop.f32.mrb[19].mxu1 }
 0x156   :  { %v2876_v50 = vpop.eup %2875  ;;  %v1787_v51 = vmul.f32 %v2874_v46, %v3446_v16  ;;  %2895 = vpow2.f32 %v2337_v37  ;;  %v2336_v52 = vmul.f32 -1.442695, %v3502_v44  ;;  %v2670_v54 = vpop.f32.mrb[16].mxu0 }
 0x157   :  { %v2878_v55 = vpop.eup %2877  ;;  %v2453_v56 = vpack.c.bf16 %v1789_v47, %v1789_v47  ;;  %v1790_v57 = vmul.f32 %v2876_v50, %v3450_v19  ;;  %2897 = vpow2.f32 %v2335_v43  ;;  %v1150_v59 = vadd.f32 %v2670_v54, %v2602_v40  ;;  %v1141_v13 = vpop.f32.mrb[17].mxu0 }
 0x158   :  { %v2880_v60 = vpop.eup %2879  ;;  %v2451_v61 = vpack.c.bf16 %v1787_v51, %v1787_v51  ;;  %v1788_v62 = vmul.f32 %v2878_v55, %v3454_v22  ;;  %2899 = vpow2.f32 %v2338_v48  ;;  %v1142_v0 = vadd.f32 %v1141_v13, %v583_v45  ;;  %v2671_v1 = vpop.f32.mrb[18].mxu0 }
 0x159   :  { %v2882_v16 = vpop.eup %2881  ;;  %2110 = vst.msk [vmem:[#allocation11 + $0x8] sm:$0xf] %vm2107_vm2, %v2453_v56  ;;  %v2454_v2 = vpack.c.bf16 %v1790_v57, %v1790_v57  ;;  %v1605_v4 = vadd.f32 1.0, %v2880_v60  ;;  %2901 = vpow2.f32 %v2336_v52  ;;  %v3512_v5 = vadd.f32 %v3440_v8, %v1150_v59  ;;  %v1144_v19 = vpop.f32.mrb[19].mxu0 }
 0x15a   :  { %v2884_v7 = vpop.eup %2883  ;;  %2108 = vst.msk [vmem:[#allocation11] sm:$0xf] %vm2107_vm2, %v2451_v61  ;;  %v2452_v9 = vpack.c.bf16 %v1788_v62, %v1788_v62  ;;  %v1603_v10 = vadd.f32 1.0, %v2882_v16  ;;  %v3516_v22 = vadd.f32 %v3440_v8, %v1142_v0  ;;  %v1153_v11 = vadd.f32 %v2671_v1, %v2603_v49  ;;  %v2606_v18 = vpop.f32.mrb[20].mxu1 }
 0x15b   :  { %v2886_v12 = vpop.eup %2885  ;;  %2111 = vst.msk [vmem:[#allocation11 + $0xc] sm:$0xf] %vm2107_vm2, %v2454_v2  ;;  %2903 = vrcp.f32 %v1605_v4  ;;  %v1606_v14 = vadd.f32 1.0, %v2884_v7  ;;  %v2341_v15 = vmul.f32 -1.442695, %v3512_v5  ;;  %v1145_v17 = vadd.f32 %v1144_v19, %v586_v53  ;;  %v599_v25 = vpop.f32.mrb[21].mxu1 }
 0x15c   :  { %v2888_v20 = vpop.eup %2887  ;;  %2109 = vst.msk [vmem:[#allocation11 + $0x4] sm:$0xf] %vm2107_vm2, %v2452_v9  ;;  %2905 = vrcp.f32 %v1603_v10  ;;  %v1604_v21 = vadd.f32 1.0, %v2886_v12  ;;  %v2339_v23 = vmul.f32 -1.442695, %v3516_v22  ;;  %v3523_v24 = vadd.f32 %v3440_v8, %v1153_v11  ;;  %v2607_v30 = vpop.f32.mrb[22].mxu1 }
 0x15d   :  { %v2890_v26 = vpop.eup %2889  ;;  %v1793_v28 = vmul.f32 %v2888_v20, %v3459_v33  ;;  %2907 = vrcp.f32 %v1606_v14  ;;  %v3527_v29 = vadd.f32 %v3440_v8, %v1145_v17  ;;  %v602_v37 = vpop.f32.mrb[23].mxu1 }
 0x15e   :  { %v2892_v31 = vpop.eup %2891  ;;  %v1791_v34 = vmul.f32 %v2890_v26, %v3462_v36  ;;  %2909 = vrcp.f32 %v1604_v21  ;;  %v2342_v35 = vmul.f32 -1.442695, %v3523_v24  ;;  %v2674_v40 = vpop.f32.mrb[20].mxu0 }
 0x15f   :  { %v2894_v41 = vpop.eup %2893  ;;  %v2457_v43 = vpack.c.bf16 %v1793_v28, %v1793_v28  ;;  %v1794_v45 = vmul.f32 %v2892_v31, %v3466_v39  ;;  %2911 = vpow2.f32 %v2341_v15  ;;  %v2340_v33 = vmul.f32 -1.442695, %v3527_v29  ;;  %v1157_v46 = vpop.f32.mrb[21].mxu0 }
 0x160   :  { %v2896_v47 = vpop.eup %2895  ;;  %v2455_v48 = vpack.c.bf16 %v1791_v34, %v1791_v34  ;;  %v1792_v49 = vmul.f32 %v2894_v41, %v3470_v42  ;;  %2913 = vpow2.f32 %v2339_v23  ;;  %v1166_v50 = vadd.f32 %v2674_v40, %v2606_v18  ;;  %v2675_v36 = vpop.f32.mrb[22].mxu0 }
 0x161   :  { %v2898_v51 = vpop.eup %2897  ;;  %2114 = vst.msk [vmem:[#allocation11 + $0x18] sm:$0xf] %vm2107_vm2, %v2457_v43  ;;  %v2458_v52 = vpack.c.bf16 %v1794_v45, %v1794_v45  ;;  %v1609_v53 = vadd.f32 1.0, %v2896_v47  ;;  %2915 = vpow2.f32 %v2342_v35  ;;  %v1158_v54 = vadd.f32 %v1157_v46, %v599_v25  ;;  %v1160_v55 = vpop.f32.mrb[23].mxu0 }
 0x162   :  { %v2900_v39 = vpop.eup %2899  ;;  %2112 = vst.msk [vmem:[#allocation11 + $0x10] sm:$0xf] %vm2107_vm2, %v2455_v48  ;;  %v2456_v56 = vpack.c.bf16 %v1792_v49, %v1792_v49  ;;  %v1607_v57 = vadd.f32 1.0, %v2898_v51  ;;  %2917 = vpow2.f32 %v2340_v33  ;;  %v3537_v59 = vadd.f32 %v3440_v8, %v1166_v50  ;;  %v2610_v62 = vpop.f32.mrb[24].mxu1 }
 0x163   :  { %v2902_v42 = vpop.eup %2901  ;;  %2115 = vst.msk [vmem:[#allocation11 + $0x1c] sm:$0xf] %vm2107_vm2, %v2458_v52  ;;  %2919 = vrcp.f32 %v1609_v53  ;;  %v1610_v13 = vadd.f32 1.0, %v2900_v39  ;;  %v3541_v60 = vadd.f32 %v3440_v8, %v1158_v54  ;;  %v1169_v61 = vadd.f32 %v2675_v36, %v2607_v30  ;;  %v615_v2 = vpop.f32.mrb[25].mxu1 }
 0x164   :  { %2113 = vst.msk [vmem:[#allocation11 + $0x14] sm:$0xf] %vm2107_vm2, %v2456_v56  ;;  %2921 = vrcp.f32 %v1607_v57  ;;  %v1608_v0 = vadd.f32 1.0, %v2902_v42  ;;  %v2345_v1 = vmul.f32 -1.442695, %v3537_v59  ;;  %v1161_v16 = vadd.f32 %v1160_v55, %v602_v37  ;;  %v2611_v9 = vpop.f32.mrb[26].mxu1 }
 0x165   :  { %v2904_v4 = vpop.eup %2903  ;;  %2923 = vrcp.f32 %v1610_v13  ;;  %v2343_v19 = vmul.f32 -1.442695, %v3541_v60  ;;  %v3547_v7 = vadd.f32 %v3440_v8, %v1169_v61  ;;  %v618_v14 = vpop.f32.mrb[27].mxu1 }
 0x166   :  { %v2906_v10 = vpop.eup %2905  ;;  %v1797_v11 = vmul.f32 %v2904_v4, %v3475_v58  ;;  %2925 = vrcp.f32 %v1608_v0  ;;  %v3551_v12 = vadd.f32 %v3440_v8, %v1161_v16  ;;  %v2678_v15 = vpop.f32.mrb[24].mxu0 }
 0x167   :  { %v2908_v17 = vpop.eup %2907  ;;  %v1795_v18 = vmul.f32 %v2906_v10, %v3478_v63  ;;  %2927 = vpow2.f32 %v2345_v1  ;;  %v2346_v20 = vmul.f32 -1.442695, %v3547_v7  ;;  %v1182_v21 = vadd.f32 %v2678_v15, %v2610_v62  ;;  %v1173_v23 = vpop.f32.mrb[25].mxu0 }
 0x168   :  { %v2910_v25 = vpop.eup %2909  ;;  %v2461_v26 = vpack.c.bf16 %v1797_v11, %v1797_v11  ;;  %v1798_v28 = vmul.f32 %v2908_v17, %v3482_v3  ;;  %2929 = vpow2.f32 %v2343_v19  ;;  %v2344_v58 = vmul.f32 -1.442695, %v3551_v12  ;;  %v2679_v30 = vpop.f32.mrb[26].mxu0 }
 0x169   :  { %v2912_v31 = vpop.eup %2911  ;;  %v2459_v34 = vpack.c.bf16 %v1795_v18, %v1795_v18  ;;  %v1796_v35 = vmul.f32 %v2910_v25, %v3486_v6  ;;  %2931 = vpow2.f32 %v2346_v20  ;;  %v3559_v63 = vadd.f32 %v3440_v8, %v1182_v21  ;;  %v1176_v37 = vpop.f32.mrb[27].mxu0 }
 0x16a   :  { %v2914_v40 = vpop.eup %2913  ;;  %2118 = vst.msk [vmem:[#allocation11 + $0x28] sm:$0xf] %vm2107_vm2, %v2461_v26  ;;  %v2462_v41 = vpack.c.bf16 %v1798_v28, %v1798_v28  ;;  %v1613_v43 = vadd.f32 1.0, %v2912_v31  ;;  %2933 = vpow2.f32 %v2344_v58  ;;  %v1174_v3 = vadd.f32 %v1173_v23, %v615_v2  ;;  %v2614_v48 = vpop.f32.mrb[28].mxu1 }
 0x16b   :  { %v2916_v45 = vpop.eup %2915  ;;  %2116 = vst.msk [vmem:[#allocation11 + $0x20] sm:$0xf] %vm2107_vm2, %v2459_v34  ;;  %v2460_v33 = vpack.c.bf16 %v1796_v35, %v1796_v35  ;;  %v1611_v46 = vadd.f32 1.0, %v2914_v40  ;;  %v2349_v47 = vmul.f32 -1.442695, %v3559_v63  ;;  %v1185_v6 = vadd.f32 %v2679_v30, %v2611_v9  ;;  %v631_v52 = vpop.f32.mrb[29].mxu1 }
 0x16c   :  { %v2918_v49 = vpop.eup %2917  ;;  %2119 = vst.msk [vmem:[#allocation11 + $0x2c] sm:$0xf] %vm2107_vm2, %v2462_v41  ;;  %2935 = vrcp.f32 %v1613_v43  ;;  %v1614_v50 = vadd.f32 1.0, %v2916_v45  ;;  %v3566_v36 = vadd.f32 %v3440_v8, %v1174_v3  ;;  %v1177_v51 = vadd.f32 %v1176_v37, %v618_v14  ;;  %v2615_v39 = vpop.f32.mrb[30].mxu1 }
 0x16d   :  { %v2920_v53 = vpop.eup %2919  ;;  %2117 = vst.msk [vmem:[#allocation11 + $0x24] sm:$0xf] %vm2107_vm2, %v2460_v33  ;;  %2937 = vrcp.f32 %v1611_v46  ;;  %v1612_v54 = vadd.f32 1.0, %v2918_v49  ;;  %v3570_v55 = vadd.f32 %v3440_v8, %v1185_v6  ;;  %v634_v61 = vpop.f32.mrb[31].mxu1 }
 0x16e   :  { %v2922_v56 = vpop.eup %2921  ;;  %v1801_v57 = vmul.f32 %v2920_v53, %v3491_v27  ;;  %2939 = vrcp.f32 %v1614_v50  ;;  %v2347_v42 = vmul.f32 -1.442695, %v3566_v36  ;;  %v3575_v13 = vadd.f32 %v3440_v8, %v1177_v51  ;;  %v2682_v62 = vpop.f32.mrb[28].mxu0 }
 0x16f   :  { %v2924_v0 = vpop.eup %2923  ;;  %v1799_v1 = vmul.f32 %v2922_v56, %v3494_v32  ;;  %2941 = vrcp.f32 %v1612_v54  ;;  %v2350_v16 = vmul.f32 -1.442695, %v3570_v55  ;;  %v1198_v2 = vadd.f32 %v2682_v62, %v2614_v48  ;;  %v1189_v4 = vpop.f32.mrb[29].mxu0 }
 0x170   :  { %v2926_v19 = vpop.eup %2925  ;;  %v2465_v9 = vpack.c.bf16 %v1801_v57, %v1801_v57  ;;  %v1802_v27 = vmul.f32 %v2924_v0, %v3498_v38  ;;  %2943 = vpow2.f32 %v2349_v47  ;;  %v2348_v10 = vmul.f32 -1.442695, %v3575_v13  ;;  %v2683_v11 = vpop.f32.mrb[30].mxu0 }
 0x171   :  { %v2928_v14 = vpop.eup %2927  ;;  %v2463_v15 = vpack.c.bf16 %v1799_v1, %v1799_v1  ;;  %v1800_v17 = vmul.f32 %v2926_v19, %v3502_v44  ;;  %2945 = vpow2.f32 %v2347_v42  ;;  %v3583_v32 = vadd.f32 %v3440_v8, %v1198_v2  ;;  %v1192_v18 = vpop.f32.mrb[31].mxu0 }
 0x172   :  { %v2930_v20 = vpop.eup %2929  ;;  %2122 = vst.msk [vmem:[#allocation11 + $0x38] sm:$0xf] %vm2107_vm2, %v2465_v9  ;;  %v2466_v21 = vpack.c.bf16 %v1802_v27, %v1802_v27  ;;  %v1617_v23 = vadd.f32 1.0, %v2928_v14  ;;  %2947 = vpow2.f32 %v2350_v16  ;;  %v1190_v38 = vadd.f32 %v1189_v4, %v631_v52  ;;  %v2618_v58 = vpop.f32.mrb[32].mxu1 }
 0x173   :  { %v2932_v25 = vpop.eup %2931  ;;  %2120 = vst.msk [vmem:[#allocation11 + $0x30] sm:$0xf] %vm2107_vm2, %v2463_v15  ;;  %v2464_v26 = vpack.c.bf16 %v1800_v17, %v1800_v17  ;;  %v1615_v28 = vadd.f32 1.0, %v2930_v20  ;;  %2949 = vpow2.f32 %v2348_v10  ;;  %v2353_v44 = vmul.f32 -1.442695, %v3583_v32  ;;  %v647_v37 = vpop.f32.mrb[33].mxu1 }
 0x174   :  { %v2934_v30 = vpop.eup %2933  ;;  %2123 = vst.msk [vmem:[#allocation11 + $0x3c] sm:$0xf] %vm2107_vm2, %v2466_v21  ;;  %2951 = vrcp.f32 %v1617_v23  ;;  %v1618_v31 = vadd.f32 1.0, %v2932_v25  ;;  %v3590_v34 = vadd.f32 %v3440_v8, %v1190_v38  ;;  %v1201_v35 = vadd.f32 %v2683_v11, %v2615_v39  ;;  %v2619_v43 = vpop.f32.mrb[34].mxu1 }
 0x175   :  { %2121 = vst.msk [vmem:[#allocation11 + $0x34] sm:$0xf] %vm2107_vm2, %v2464_v26  ;;  %2953 = vrcp.f32 %v1615_v28  ;;  %v1616_v40 = vadd.f32 1.0, %v2934_v30  ;;  %v1193_v41 = vadd.f32 %v1192_v18, %v634_v61  ;;  %v650_v46 = vpop.f32.mrb[35].mxu1 }
 0x176   :  { %v2936_v3 = vpop.eup %2935  ;;  %2955 = vrcp.f32 %v1618_v31  ;;  %v2351_v45 = vmul.f32 -1.442695, %v3590_v34  ;;  %v3595_v33 = vadd.f32 %v3440_v8, %v1201_v35  ;;  %v2686_v47 = vpop.f32.mrb[32].mxu0 }
 0x177   :  { %v2938_v6 = vpop.eup %2937  ;;  %v1805_v48 = vmul.f32 %v2936_v3, %v3512_v5  ;;  %2957 = vrcp.f32 %v1616_v40  ;;  %v3599_v49 = vadd.f32 %v3440_v8, %v1193_v41  ;;  %v1214_v50 = vadd.f32 %v2686_v47, %v2618_v58  ;;  %v1205_v51 = vpop.f32.mrb[33].mxu0 }
 0x178   :  { %v2940_v52 = vpop.eup %2939  ;;  %v1803_v53 = vmul.f32 %v2938_v6, %v3516_v22  ;;  %2959 = vpow2.f32 %v2353_v44  ;;  %v2354_v54 = vmul.f32 -1.442695, %v3595_v33  ;;  %v1206_v39 = vadd.f32 %v1205_v51, %v647_v37  ;;  %v2687_v56 = vpop.f32.mrb[34].mxu0 }
 0x179   :  { %v2942_v57 = vpop.eup %2941  ;;  %v2469_v42 = vpack.c.bf16 %v1805_v48, %v1805_v48  ;;  %v1806_v61 = vmul.f32 %v2940_v52, %v3523_v24  ;;  %2961 = vpow2.f32 %v2351_v45  ;;  %v2352_v5 = vmul.f32 -1.442695, %v3599_v49  ;;  %v1208_v62 = vpop.f32.mrb[35].mxu0 }
 0x17a   :  { %v2944_v0 = vpop.eup %2943  ;;  %v2467_v1 = vpack.c.bf16 %v1803_v53, %v1803_v53  ;;  %v1804_v16 = vmul.f32 %v2942_v57, %v3527_v29  ;;  %2963 = vpow2.f32 %v2354_v54  ;;  %v3607_v22 = vadd.f32 %v3440_v8, %v1214_v50  ;;  %v2622_v9 = vpop.f32.mrb[36].mxu1 }
 0x17b   :  { %v2946_v2 = vpop.eup %2945  ;;  %2126 = vst.msk [vmem:[#allocation11 + $0x48] sm:$0xf] %vm2107_vm2, %v2469_v42  ;;  %v2470_v4 = vpack.c.bf16 %v1806_v61, %v1806_v61  ;;  %v1621_v19 = vadd.f32 1.0, %v2944_v0  ;;  %2965 = vpow2.f32 %v2352_v5  ;;  %v3611_v24 = vadd.f32 %v3440_v8, %v1206_v39  ;;  %v663_v14 = vpop.f32.mrb[37].mxu1 }
 0x17c   :  { %v2948_v27 = vpop.eup %2947  ;;  %2124 = vst.msk [vmem:[#allocation11 + $0x40] sm:$0xf] %vm2107_vm2, %v2467_v1  ;;  %v2468_v10 = vpack.c.bf16 %v1804_v16, %v1804_v16  ;;  %v1619_v11 = vadd.f32 1.0, %v2946_v2  ;;  %v1217_v29 = vadd.f32 %v2687_v56, %v2619_v43  ;;  %v2357_v18 = vmul.f32 -1.442695, %v3607_v22  ;;  %v2623_v21 = vpop.f32.mrb[38].mxu1 }
 0x17d   :  { %v2950_v15 = vpop.eup %2949  ;;  %2127 = vst.msk [vmem:[#allocation11 + $0x4c] sm:$0xf] %vm2107_vm2, %v2470_v4  ;;  %2967 = vrcp.f32 %v1621_v19  ;;  %v1622_v17 = vadd.f32 1.0, %v2948_v27  ;;  %v1209_v20 = vadd.f32 %v1208_v62, %v650_v46  ;;  %v2355_v25 = vmul.f32 -1.442695, %v3611_v24  ;;  %v666_v28 = vpop.f32.mrb[39].mxu1 }
 0x17e   :  { %v2952_v23 = vpop.eup %2951  ;;  %2125 = vst.msk [vmem:[#allocation11 + $0x44] sm:$0xf] %vm2107_vm2, %v2468_v10  ;;  %2969 = vrcp.f32 %v1619_v11  ;;  %v1620_v38 = vadd.f32 1.0, %v2950_v15  ;;  %v3619_v26 = vadd.f32 %v3440_v8, %v1217_v29  ;;  %v2690_v44 = vpop.f32.mrb[36].mxu0 }
 0x17f   :  { %v2954_v58 = vpop.eup %2953  ;;  %v1809_v30 = vmul.f32 %v2952_v23, %v3537_v59  ;;  %2971 = vrcp.f32 %v1622_v17  ;;  %v3623_v31 = vadd.f32 %v3440_v8, %v1209_v20  ;;  %v1230_v35 = vadd.f32 %v2690_v44, %v2622_v9  ;;  %v1221_v37 = vpop.f32.mrb[37].mxu0 }
 0x180   :  { %v2956_v40 = vpop.eup %2955  ;;  %v1807_v41 = vmul.f32 %v2954_v58, %v3541_v60  ;;  %2973 = vrcp.f32 %v1620_v38  ;;  %v2358_v43 = vmul.f32 -1.442695, %v3619_v26  ;;  %v1222_v3 = vadd.f32 %v1221_v37, %v663_v14  ;;  %v2691_v45 = vpop.f32.mrb[38].mxu0 }
 0x181   :  { %v2958_v46 = vpop.eup %2957  ;;  %v2473_v47 = vpack.c.bf16 %v1809_v30, %v1809_v30  ;;  %v1810_v6 = vmul.f32 %v2956_v40, %v3547_v7  ;;  %2975 = vpow2.f32 %v2357_v18  ;;  %v2356_v59 = vmul.f32 -1.442695, %v3623_v31  ;;  %v1224_v48 = vpop.f32.mrb[39].mxu0 }
 0x182   :  { %v2960_v50 = vpop.eup %2959  ;;  %v2471_v51 = vpack.c.bf16 %v1807_v41, %v1807_v41  ;;  %v1808_v52 = vmul.f32 %v2958_v46, %v3551_v12  ;;  %2977 = vpow2.f32 %v2355_v25  ;;  %v3631_v60 = vadd.f32 %v3440_v8, %v1230_v35  ;;  %v2626_v56 = vpop.f32.mrb[40].mxu1 }
 0x183   :  { %v2962_v53 = vpop.eup %2961  ;;  %2130 = vst.msk [vmem:[#allocation11 + $0x58] sm:$0xf] %vm2107_vm2, %v2473_v47  ;;  %v2474_v54 = vpack.c.bf16 %v1810_v6, %v1810_v6  ;;  %v1625_v39 = vadd.f32 1.0, %v2960_v50  ;;  %2979 = vpow2.f32 %v2358_v43  ;;  %v3635_v7 = vadd.f32 %v3440_v8, %v1222_v3  ;;  %v679_v12 = vpop.f32.mrb[41].mxu1 }
 0x184   :  { %v2964_v57 = vpop.eup %2963  ;;  %2128 = vst.msk [vmem:[#allocation11 + $0x50] sm:$0xf] %vm2107_vm2, %v2471_v51  ;;  %v2472_v42 = vpack.c.bf16 %v1808_v52, %v1808_v52  ;;  %v1623_v61 = vadd.f32 1.0, %v2962_v53  ;;  %2981 = vpow2.f32 %v2356_v59  ;;  %v2361_v0 = vmul.f32 -1.442695, %v3631_v60  ;;  %v2627_v16 = vpop.f32.mrb[42].mxu1 }
 0x185   :  { %v2966_v5 = vpop.eup %2965  ;;  %2131 = vst.msk [vmem:[#allocation11 + $0x5c] sm:$0xf] %vm2107_vm2, %v2474_v54  ;;  %2983 = vrcp.f32 %v1625_v39  ;;  %v1626_v62 = vadd.f32 1.0, %v2964_v57  ;;  %v1233_v1 = vadd.f32 %v2691_v45, %v2623_v21  ;;  %v2359_v4 = vmul.f32 -1.442695, %v3635_v7  ;;  %v682_v9 = vpop.f32.mrb[43].mxu1 }
 0x186   :  { %2129 = vst.msk [vmem:[#allocation11 + $0x54] sm:$0xf] %vm2107_vm2, %v2472_v42  ;;  %2985 = vrcp.f32 %v1623_v61  ;;  %v1624_v2 = vadd.f32 1.0, %v2966_v5  ;;  %v1225_v19 = vadd.f32 %v1224_v48, %v666_v28  ;;  %v2694_v27 = vpop.f32.mrb[40].mxu0 }
 0x187   :  { %v2968_v10 = vpop.eup %2967  ;;  %2987 = vrcp.f32 %v1626_v62  ;;  %v3643_v11 = vadd.f32 %v3440_v8, %v1233_v1  ;;  %v1246_v29 = vadd.f32 %v2694_v27, %v2626_v56  ;;  %v1237_v14 = vpop.f32.mrb[41].mxu0 }
 0x188   :  { %v2970_v15 = vpop.eup %2969  ;;  %v1813_v17 = vmul.f32 %v2968_v10, %v3559_v63  ;;  %2989 = vrcp.f32 %v1624_v2  ;;  %v3647_v18 = vadd.f32 %v3440_v8, %v1225_v19  ;;  %v1238_v20 = vadd.f32 %v1237_v14, %v679_v12  ;;  %v2695_v21 = vpop.f32.mrb[42].mxu0 }
 0x189   :  { %v2972_v23 = vpop.eup %2971  ;;  %v1811_v38 = vmul.f32 %v2970_v15, %v3566_v36  ;;  %2991 = vpow2.f32 %v2361_v0  ;;  %v2362_v25 = vmul.f32 -1.442695, %v3643_v11  ;;  %v3652_v28 = vadd.f32 %v3440_v8, %v1246_v29  ;;  %v1240_v44 = vpop.f32.mrb[43].mxu0 }
 0x18a   :  { %v2974_v58 = vpop.eup %2973  ;;  %v2477_v30 = vpack.c.bf16 %v1813_v17, %v1813_v17  ;;  %v1814_v63 = vmul.f32 %v2972_v23, %v3570_v55  ;;  %2993 = vpow2.f32 %v2359_v4  ;;  %v2360_v35 = vmul.f32 -1.442695, %v3647_v18  ;;  %v2630_v43 = vpop.f32.mrb[44].mxu1 }
 0x18b   :  { %v2976_v37 = vpop.eup %2975  ;;  %v2475_v40 = vpack.c.bf16 %v1811_v38, %v1811_v38  ;;  %v1812_v41 = vmul.f32 %v2974_v58, %v3575_v13  ;;  %2995 = vpow2.f32 %v2362_v25  ;;  %v2365_v36 = vmul.f32 -1.442695, %v3652_v28  ;;  %v695_v55 = vpop.f32.mrb[45].mxu1 }
 0x18c   :  { %v2978_v3 = vpop.eup %2977  ;;  %2134 = vst.msk [vmem:[#allocation11 + $0x68] sm:$0xf] %vm2107_vm2, %v2477_v30  ;;  %v2478_v45 = vpack.c.bf16 %v1814_v63, %v1814_v63  ;;  %v1629_v46 = vadd.f32 1.0, %v2976_v37  ;;  %2997 = vpow2.f32 %v2360_v35  ;;  %v3660_v47 = vadd.f32 %v3440_v8, %v1238_v20  ;;  %v2631_v50 = vpop.f32.mrb[46].mxu1 }
 0x18d   :  { %v2980_v6 = vpop.eup %2979  ;;  %2132 = vst.msk [vmem:[#allocation11 + $0x60] sm:$0xf] %vm2107_vm2, %v2475_v40  ;;  %v2476_v59 = vpack.c.bf16 %v1812_v41, %v1812_v41  ;;  %v1627_v48 = vadd.f32 1.0, %v2978_v3  ;;  %2999 = vpow2.f32 %v2365_v36  ;;  %v1249_v13 = vadd.f32 %v2695_v21, %v2627_v16  ;;  %v698_v39 = vpop.f32.mrb[47].mxu1 }
 0x18e   :  { %v2982_v51 = vpop.eup %2981  ;;  %2135 = vst.msk [vmem:[#allocation11 + $0x6c] sm:$0xf] %vm2107_vm2, %v2478_v45  ;;  %3001 = vrcp.f32 %v1629_v46  ;;  %v1630_v52 = vadd.f32 1.0, %v2980_v6  ;;  %v2363_v53 = vmul.f32 -1.442695, %v3660_v47  ;;  %v1241_v54 = vadd.f32 %v1240_v44, %v682_v9  ;;  %v2698_v56 = vpop.f32.mrb[44].mxu0 }
 0x18f   :  { %v2984_v57 = vpop.eup %2983  ;;  %2133 = vst.msk [vmem:[#allocation11 + $0x64] sm:$0xf] %vm2107_vm2, %v2476_v59  ;;  %3003 = vrcp.f32 %v1627_v48  ;;  %v1628_v42 = vadd.f32 1.0, %v2982_v51  ;;  %v3667_v61 = vadd.f32 %v3440_v8, %v1249_v13  ;;  %v1262_v12 = vadd.f32 %v2698_v56, %v2630_v43  ;;  %v1253_v5 = vpop.f32.mrb[45].mxu0 }
 0x190   :  { %v2986_v62 = vpop.eup %2985  ;;  %v1817_v0 = vmul.f32 %v2984_v57, %v3583_v32  ;;  %3005 = vrcp.f32 %v1630_v52  ;;  %v3671_v1 = vadd.f32 %v3440_v8, %v1241_v54  ;;  %v1254_v16 = vadd.f32 %v1253_v5, %v695_v55  ;;  %v2699_v2 = vpop.f32.mrb[46].mxu0  ;;  %v3690_v55 = vld [vmem:[#allocation10] ss:$0 sm:$0xff] }
 0x191   :  { %v2988_v4 = vpop.eup %2987  ;;  %v1815_v19 = vmul.f32 %v2986_v62, %v3590_v34  ;;  %3007 = vrcp.f32 %v1628_v42  ;;  %v2366_v9 = vmul.f32 -1.442695, %v3667_v61  ;;  %v3676_v27 = vadd.f32 %v3440_v8, %v1262_v12  ;;  %v1256_v10 = vpop.f32.mrb[47].mxu0 }
 0x192   :  { %v2990_v29 = vpop.eup %2989  ;;  %v2481_v14 = vpack.c.bf16 %v1817_v0, %v1817_v0  ;;  %v1818_v32 = vmul.f32 %v2988_v4, %v3595_v33  ;;  %3009 = vpow2.f32 %v2363_v53  ;;  %v2364_v15 = vmul.f32 -1.442695, %v3671_v1  ;;  %v2634_v23 = vpop.f32.mrb[48].mxu1 }
 0x193   :  { %v2992_v17 = vpop.eup %2991  ;;  %v2479_v20 = vpack.c.bf16 %v1815_v19, %v1815_v19  ;;  %v1816_v21 = vmul.f32 %v2990_v29, %v3599_v49  ;;  %3011 = vpow2.f32 %v2366_v9  ;;  %v2369_v34 = vmul.f32 -1.442695, %v3676_v27  ;;  %v711_v33 = vpop.f32.mrb[49].mxu1 }
 0x194   :  { %v2994_v38 = vpop.eup %2993  ;;  %2138 = vst.msk [vmem:[#allocation11 + $0x78] sm:$0xf] %vm2107_vm2, %v2481_v14  ;;  %v2482_v25 = vpack.c.bf16 %v1818_v32, %v1818_v32  ;;  %v1633_v44 = vadd.f32 1.0, %v2992_v17  ;;  %3013 = vpow2.f32 %v2364_v15  ;;  %v3684_v58 = vadd.f32 %v3440_v8, %v1254_v16  ;;  %v2635_v37 = vpop.f32.mrb[50].mxu1 }
 0x195   :  { %v2996_v30 = vpop.eup %2995  ;;  %2136 = vst.msk [vmem:[#allocation11 + $0x70] sm:$0xf] %vm2107_vm2, %v2479_v20  ;;  %v2480_v63 = vpack.c.bf16 %v1816_v21, %v1816_v21  ;;  %v1631_v35 = vadd.f32 1.0, %v2994_v38  ;;  %3015 = vpow2.f32 %v2369_v34  ;;  %v1265_v49 = vadd.f32 %v2699_v2, %v2631_v50  ;;  %v714_v3 = vpop.f32.mrb[51].mxu1 }
 0x196   :  { %v2998_v40 = vpop.eup %2997  ;;  %2139 = vst.msk [vmem:[#allocation11 + $0x7c] sm:$0xf] %vm2107_vm2, %v2482_v25  ;;  %3017 = vrcp.f32 %v1633_v44  ;;  %v1634_v41 = vadd.f32 1.0, %v2996_v30  ;;  %v2367_v36 = vmul.f32 -1.442695, %v3684_v58  ;;  %v1257_v43 = vadd.f32 %v1256_v10, %v698_v39  ;;  %v2702_v8 = vpop.f32.mrb[48].mxu0 }
 0x197   :  { %v3000_v45 = vpop.eup %2999  ;;  %2137 = vst.msk [vmem:[#allocation11 + $0x74] sm:$0xf] %vm2107_vm2, %v2480_v63  ;;  %3019 = vrcp.f32 %v1631_v35  ;;  %v1632_v46 = vadd.f32 1.0, %v2998_v40  ;;  %v3693_v6 = vadd.f32 %v3690_v55, %v1265_v49  ;;  %v1278_v59 = vadd.f32 %v2702_v8, %v2634_v23  ;;  %v1269_v48 = vpop.f32.mrb[49].mxu0 }
 0x198   :  { %v3002_v13 = vpop.eup %3001  ;;  %3021 = vrcp.f32 %v1634_v41  ;;  %v1637_v50 = vadd.f32 1.0, %v3000_v45  ;;  %v3696_v51 = vadd.f32 %v3690_v55, %v1257_v43  ;;  %v1270_v52 = vadd.f32 %v1269_v48, %v711_v33  ;;  %v2703_v53 = vpop.f32.mrb[50].mxu0 }
 0x199   :  { %v3004_v54 = vpop.eup %3003  ;;  %v1821_v39 = vmul.f32 %v3002_v13, %v3607_v22  ;;  %3023 = vrcp.f32 %v1632_v46  ;;  %v2370_v56 = vmul.f32 -1.442695, %v3693_v6  ;;  %v3701_v57 = vadd.f32 %v3690_v55, %v1278_v59  ;;  %v1272_v42 = vpop.f32.mrb[51].mxu0 }
 0x19a   :  { %v3006_v12 = vpop.eup %3005  ;;  %v1819_v5 = vmul.f32 %v3004_v54, %v3611_v24  ;;  %3025 = vrcp.f32 %v1637_v50  ;;  %v2368_v62 = vmul.f32 -1.442695, %v3696_v51  ;;  %v3706_v0 = vadd.f32 %v3690_v55, %v1270_v52  ;;  %v2638_v19 = vpop.f32.mrb[52].mxu1 }
 0x19b   :  { %v3008_v16 = vpop.eup %3007  ;;  %v2485_v2 = vpack.c.bf16 %v1821_v39, %v1821_v39  ;;  %v1822_v22 = vmul.f32 %v3006_v12, %v3619_v26  ;;  %3027 = vpow2.f32 %v2367_v36  ;;  %v2373_v4 = vmul.f32 -1.442695, %v3701_v57  ;;  %v727_v14 = vpop.f32.mrb[53].mxu1 }
 0x19c   :  { %v3010_v9 = vpop.eup %3009  ;;  %v2483_v10 = vpack.c.bf16 %v1819_v5, %v1819_v5  ;;  %v1820_v29 = vmul.f32 %v3008_v16, %v3623_v31  ;;  %3029 = vpow2.f32 %v2370_v56  ;;  %v2371_v24 = vmul.f32 -1.442695, %v3706_v0  ;;  %v2639_v26 = vpop.f32.mrb[54].mxu1 }
 0x19d   :  { %v3012_v32 = vpop.eup %3011  ;;  %2142 = vst.msk [vmem:[#allocation11 + $0x88] sm:$0xf] %vm2107_vm2, %v2485_v2  ;;  %v2486_v15 = vpack.c.bf16 %v1822_v22, %v1822_v22  ;;  %v1635_v17 = vadd.f32 1.0, %v3010_v9  ;;  %3031 = vpow2.f32 %v2368_v62  ;;  %v1281_v20 = vadd.f32 %v2703_v53, %v2635_v37  ;;  %v730_v31 = vpop.f32.mrb[55].mxu1 }
 0x19e   :  { %v3014_v21 = vpop.eup %3013  ;;  %2140 = vst.msk [vmem:[#allocation11 + $0x80] sm:$0xf] %vm2107_vm2, %v2483_v10  ;;  %v2484_v34 = vpack.c.bf16 %v1820_v29, %v1820_v29  ;;  %v1638_v23 = vadd.f32 1.0, %v3012_v32  ;;  %3033 = vpow2.f32 %v2373_v4  ;;  %v1273_v38 = vadd.f32 %v1272_v42, %v714_v3  ;;  %v2706_v25 = vpop.f32.mrb[52].mxu0 }
 0x19f   :  { %v3016_v44 = vpop.eup %3015  ;;  %2143 = vst.msk [vmem:[#allocation11 + $0x8c] sm:$0xf] %vm2107_vm2, %v2486_v15  ;;  %3035 = vrcp.f32 %v1635_v17  ;;  %v1636_v33 = vadd.f32 1.0, %v3014_v21  ;;  %v3716_v30 = vadd.f32 %v3690_v55, %v1281_v20  ;;  %v1294_v63 = vadd.f32 %v2706_v25, %v2638_v19  ;;  %v1285_v35 = vpop.f32.mrb[53].mxu0 }
 0x1a0   :  { %v3018_v49 = vpop.eup %3017  ;;  %2141 = vst.msk [vmem:[#allocation11 + $0x84] sm:$0xf] %vm2107_vm2, %v2484_v34  ;;  %3037 = vrcp.f32 %v1638_v23  ;;  %v1641_v37 = vadd.f32 1.0, %v3016_v44  ;;  %v3720_v40 = vadd.f32 %v3690_v55, %v1273_v38  ;;  %v1286_v41 = vadd.f32 %v1285_v35, %v727_v14  ;;  %v2707_v36 = vpop.f32.mrb[54].mxu0 }
 0x1a1   :  { %v3020_v43 = vpop.eup %3019  ;;  %v1825_v3 = vmul.f32 %v3018_v49, %v3631_v60  ;;  %3039 = vrcp.f32 %v1636_v33  ;;  %v2374_v8 = vmul.f32 -1.442695, %v3716_v30  ;;  %v3725_v45 = vadd.f32 %v3690_v55, %v1294_v63  ;;  %v1288_v46 = vpop.f32.mrb[55].mxu0 }
 0x1a2   :  { %v3022_v59 = vpop.eup %3021  ;;  %v1823_v48 = vmul.f32 %v3020_v43, %v3635_v7  ;;  %3041 = vrcp.f32 %v1641_v37  ;;  %v2372_v13 = vmul.f32 -1.442695, %v3720_v40  ;;  %v3730_v50 = vadd.f32 %v3690_v55, %v1286_v41  ;;  %v2642_v39 = vpop.f32.mrb[56].mxu1 }
 0x1a3   :  { %v3024_v52 = vpop.eup %3023  ;;  %v2489_v53 = vpack.c.bf16 %v1825_v3, %v1825_v3  ;;  %v1826_v60 = vmul.f32 %v3022_v59, %v3643_v11  ;;  %3043 = vpow2.f32 %v2371_v24  ;;  %v2377_v54 = vmul.f32 -1.442695, %v3725_v45  ;;  %v743_v5 = vpop.f32.mrb[57].mxu1 }
 0x1a4   :  { %v3026_v56 = vpop.eup %3025  ;;  %v2487_v42 = vpack.c.bf16 %v1823_v48, %v1823_v48  ;;  %v1824_v12 = vmul.f32 %v3024_v52, %v3647_v18  ;;  %3045 = vpow2.f32 %v2374_v8  ;;  %v2375_v7 = vmul.f32 -1.442695, %v3730_v50  ;;  %v2643_v22 = vpop.f32.mrb[58].mxu1 }
 0x1a5   :  { %v3028_v62 = vpop.eup %3027  ;;  %2146 = vst.msk [vmem:[#allocation11 + $0x98] sm:$0xf] %vm2107_vm2, %v2489_v53  ;;  %v2490_v16 = vpack.c.bf16 %v1826_v60, %v1826_v60  ;;  %v1829_v2 = vmul.f32 %v3026_v56, %v3652_v28  ;;  %3047 = vpow2.f32 %v2372_v13  ;;  %v1297_v11 = vadd.f32 %v2707_v36, %v2639_v26  ;;  %v746_v10 = vpop.f32.mrb[59].mxu1 }
 0x1a6   :  { %v3030_v4 = vpop.eup %3029  ;;  %2144 = vst.msk [vmem:[#allocation11 + $0x90] sm:$0xf] %vm2107_vm2, %v2487_v42  ;;  %v2488_v19 = vpack.c.bf16 %v1824_v12, %v1824_v12  ;;  %v1639_v9 = vadd.f32 1.0, %v3028_v62  ;;  %3049 = vpow2.f32 %v2377_v54  ;;  %v1289_v18 = vadd.f32 %v1288_v46, %v730_v31  ;;  %v2710_v29 = vpop.f32.mrb[56].mxu0 }
 0x1a7   :  { %v3032_v24 = vpop.eup %3031  ;;  %2147 = vst.msk [vmem:[#allocation11 + $0x9c] sm:$0xf] %vm2107_vm2, %v2490_v16  ;;  %v2493_v14 = vpack.c.bf16 %v1829_v2, %v1829_v2  ;;  %v1642_v32 = vadd.f32 1.0, %v3030_v4  ;;  %3051 = vpow2.f32 %v2375_v7  ;;  %v3741_v28 = vadd.f32 %v3690_v55, %v1297_v11  ;;  %v1301_v15 = vpop.f32.mrb[57].mxu0 }
 0x1a8   :  { %v3034_v17 = vpop.eup %3033  ;;  %2145 = vst.msk [vmem:[#allocation11 + $0x94] sm:$0xf] %vm2107_vm2, %v2488_v19  ;;  %3053 = vrcp.f32 %v1639_v9  ;;  %v1640_v20 = vadd.f32 1.0, %v3032_v24  ;;  %v3745_v26 = vadd.f32 %v3690_v55, %v1289_v18  ;;  %v1310_v21 = vadd.f32 %v2710_v29, %v2642_v39  ;;  %v2711_v34 = vpop.f32.mrb[58].mxu0 }
 0x1a9   :  { %v3036_v23 = vpop.eup %3035  ;;  %2150 = vst.msk [vmem:[#allocation11 + $0xa8] sm:$0xf] %vm2107_vm2, %v2493_v14  ;;  %3055 = vrcp.f32 %v1642_v32  ;;  %v1645_v38 = vadd.f32 1.0, %v3034_v17  ;;  %v2378_v31 = vmul.f32 -1.442695, %v3741_v28  ;;  %v1302_v25 = vadd.f32 %v1301_v15, %v743_v5  ;;  %v1304_v44 = vpop.f32.mrb[59].mxu0 }
 0x1aa   :  { %v3038_v33 = vpop.eup %3037  ;;  %v1827_v63 = vmul.f32 %v3036_v23, %v3660_v47  ;;  %3057 = vrcp.f32 %v1640_v20  ;;  %v2376_v35 = vmul.f32 -1.442695, %v3745_v26  ;;  %v3752_v49 = vadd.f32 %v3690_v55, %v1310_v21  ;;  %v2646_v3 = vpop.f32.mrb[60].mxu1 }
 0x1ab   :  { %v3040_v37 = vpop.eup %3039  ;;  %v1830_v41 = vmul.f32 %v3038_v33, %v3667_v61  ;;  %3059 = vrcp.f32 %v1645_v38  ;;  %v3756_v36 = vadd.f32 %v3690_v55, %v1302_v25  ;;  %v1313_v43 = vadd.f32 %v2711_v34, %v2643_v22  ;;  %v759_v48 = vpop.f32.mrb[61].mxu1 }
 0x1ac   :  { %v3042_v8 = vpop.eup %3041  ;;  %v2491_v46 = vpack.c.bf16 %v1827_v63, %v1827_v63  ;;  %v1828_v59 = vmul.f32 %v3040_v37, %v3671_v1  ;;  %3061 = vpow2.f32 %v2378_v31  ;;  %v2381_v47 = vmul.f32 -1.442695, %v3752_v49  ;;  %v2647_v60 = vpop.f32.mrb[62].mxu1 }
 0x1ad   :  { %v3044_v13 = vpop.eup %3043  ;;  %v2494_v52 = vpack.c.bf16 %v1830_v41, %v1830_v41  ;;  %v1833_v53 = vmul.f32 %v3042_v8, %v3676_v27  ;;  %3063 = vpow2.f32 %v2376_v35  ;;  %v2379_v61 = vmul.f32 -1.442695, %v3756_v36  ;;  %v762_v42 = vpop.f32.mrb[63].mxu1 }
 0x1ae   :  { %v3046_v54 = vpop.eup %3045  ;;  %2148 = vst.msk [vmem:[#allocation11 + $0xa0] sm:$0xf] %vm2107_vm2, %v2491_v46  ;;  %v2492_v39 = vpack.c.bf16 %v1828_v59, %v1828_v59  ;;  %v1643_v56 = vadd.f32 1.0, %v3044_v13  ;;  %3065 = vpow2.f32 %v2381_v47  ;;  %v3764_v1 = vadd.f32 %v3690_v55, %v1313_v43  ;;  %v2714_v12 = vpop.f32.mrb[60].mxu0 }
 0x1af   :  { %v3048_v7 = vpop.eup %3047  ;;  %2151 = vst.msk [vmem:[#allocation11 + $0xac] sm:$0xf] %vm2107_vm2, %v2494_v52  ;;  %v2497_v5 = vpack.c.bf16 %v1833_v53, %v1833_v53  ;;  %v1646_v27 = vadd.f32 1.0, %v3046_v54  ;;  %3067 = vpow2.f32 %v2379_v61  ;;  %v1305_v62 = vadd.f32 %v1304_v44, %v746_v10  ;;  %v1317_v16 = vpop.f32.mrb[61].mxu0 }
 0x1b0   :  { %v3050_v2 = vpop.eup %3049  ;;  %2149 = vst.msk [vmem:[#allocation11 + $0xa4] sm:$0xf] %vm2107_vm2, %v2492_v39  ;;  %3069 = vrcp.f32 %v1643_v56  ;;  %v1644_v11 = vadd.f32 1.0, %v3048_v7  ;;  %v2382_v22 = vmul.f32 -1.442695, %v3764_v1  ;;  %v1326_v4 = vadd.f32 %v2714_v12, %v2646_v3  ;;  %v2715_v19 = vpop.f32.mrb[62].mxu0 }
 0x1b1   :  { %v3052_v9 = vpop.eup %3051  ;;  %2154 = vst.msk [vmem:[#allocation11 + $0xb8] sm:$0xf] %vm2107_vm2, %v2497_v5  ;;  %3071 = vrcp.f32 %v1646_v27  ;;  %v1649_v18 = vadd.f32 1.0, %v3050_v2  ;;  %v3771_v29 = vadd.f32 %v3690_v55, %v1305_v62  ;;  %v1318_v24 = vadd.f32 %v1317_v16, %v759_v48  ;;  %v1320_v10 = vpop.f32.mrb[63].mxu0 }
 0x1b2   :  { %v3054_v14 = vpop.eup %3053  ;;  %3073 = vrcp.f32 %v1644_v11  ;;  %v1647_v32 = vadd.f32 1.0, %v3052_v9  ;;  %v3774_v15 = vadd.f32 %v3690_v55, %v1326_v4  ;;  %v1329_v17 = vadd.f32 %v2715_v19, %v2647_v60 }
 0x1b3   :  { %v3056_v20 = vpop.eup %3055  ;;  %v1831_v21 = vmul.f32 %v3054_v14, %v3684_v58  ;;  %3075 = vrcp.f32 %v1649_v18  ;;  %v2380_v34 = vmul.f32 -1.442695, %v3771_v29  ;;  %v3779_v23 = vadd.f32 %v3690_v55, %v1318_v24 }
 0x1b4   :  { %v3058_v38 = vpop.eup %3057  ;;  %v1834_v31 = vmul.f32 %v3056_v20, %v3693_v6  ;;  %3077 = vrcp.f32 %v1647_v32  ;;  %v2385_v25 = vmul.f32 -1.442695, %v3774_v15  ;;  %v3784_v44 = vadd.f32 %v3690_v55, %v1329_v17 }
 0x1b5   :  { %v3060_v33 = vpop.eup %3059  ;;  %v2495_v63 = vpack.c.bf16 %v1831_v21, %v1831_v21  ;;  %v1832_v35 = vmul.f32 %v3058_v38, %v3696_v51  ;;  %3079 = vpow2.f32 %v2382_v22  ;;  %v2383_v58 = vmul.f32 -1.442695, %v3779_v23 }
 0x1b6   :  { %v3062_v37 = vpop.eup %3061  ;;  %v2498_v41 = vpack.c.bf16 %v1834_v31, %v1834_v31  ;;  %v1837_v43 = vmul.f32 %v3060_v33, %v3701_v57  ;;  %3081 = vpow2.f32 %v2380_v34  ;;  %v1321_v46 = vadd.f32 %v1320_v10, %v762_v42 }
 0x1b7   :  { %v3064_v3 = vpop.eup %3063  ;;  %2152 = vst.msk [vmem:[#allocation11 + $0xb0] sm:$0xf] %vm2107_vm2, %v2495_v63  ;;  %v2496_v6 = vpack.c.bf16 %v1832_v35, %v1832_v35  ;;  %v1650_v8 = vadd.f32 1.0, %v3062_v37  ;;  %3083 = vpow2.f32 %v2385_v25  ;;  %v2386_v57 = vmul.f32 -1.442695, %v3784_v44 }
 0x1b8   :  { %v3066_v59 = vpop.eup %3065  ;;  %2155 = vst.msk [vmem:[#allocation11 + $0xbc] sm:$0xf] %vm2107_vm2, %v2498_v41  ;;  %v2501_v47 = vpack.c.bf16 %v1837_v43, %v1837_v43  ;;  %v1648_v51 = vadd.f32 1.0, %v3064_v3  ;;  %3085 = vpow2.f32 %v2383_v58  ;;  %v3794_v52 = vadd.f32 %v3690_v55, %v1321_v46 }
 0x1b9   :  { %v3068_v48 = vpop.eup %3067  ;;  %2153 = vst.msk [vmem:[#allocation11 + $0xb4] sm:$0xf] %vm2107_vm2, %v2496_v6  ;;  %3087 = vrcp.f32 %v1650_v8  ;;  %v1653_v13 = vadd.f32 1.0, %v3066_v59 }
 0x1ba   :  { %v3070_v53 = vpop.eup %3069  ;;  %2158 = vst.msk [vmem:[#allocation11 + $0xc8] sm:$0xf] %vm2107_vm2, %v2501_v47  ;;  %3089 = vrcp.f32 %v1648_v51  ;;  %v1651_v61 = vadd.f32 1.0, %v3068_v48  ;;  %v2384_v39 = vmul.f32 -1.442695, %v3794_v52 }
 0x1bb   :  { %v3072_v60 = vpop.eup %3071  ;;  %v1835_v54 = vmul.f32 %v3070_v53, %v3706_v0  ;;  %3091 = vrcp.f32 %v1653_v13 }
 0x1bc   :  { %v3074_v56 = vpop.eup %3073  ;;  %v1838_v42 = vmul.f32 %v3072_v60, %v3716_v30  ;;  %3093 = vrcp.f32 %v1651_v61 }
 0x1bd   :  { %v3076_v12 = vpop.eup %3075  ;;  %v2499_v7 = vpack.c.bf16 %v1835_v54, %v1835_v54  ;;  %v1836_v55 = vmul.f32 %v3074_v56, %v3720_v40  ;;  %3095 = vpow2.f32 %v2386_v57 }
 0x1be   :  { %v3078_v5 = vpop.eup %3077  ;;  %v2502_v27 = vpack.c.bf16 %v1838_v42, %v1838_v42  ;;  %v1841_v62 = vmul.f32 %v3076_v12, %v3725_v45  ;;  %3097 = vpow2.f32 %v2384_v39 }
 0x1bf   :  { %v3080_v16 = vpop.eup %3079  ;;  %2156 = vst.msk [vmem:[#allocation11 + $0xc0] sm:$0xf] %vm2107_vm2, %v2499_v7  ;;  %v2500_v0 = vpack.c.bf16 %v1836_v55, %v1836_v55  ;;  %v1839_v2 = vmul.f32 %v3078_v5, %v3730_v50 }
 0x1c0   :  { %v3082_v11 = vpop.eup %3081  ;;  %2159 = vst.msk [vmem:[#allocation11 + $0xcc] sm:$0xf] %vm2107_vm2, %v2502_v27  ;;  %v2505_v30 = vpack.c.bf16 %v1841_v62, %v1841_v62  ;;  %v1654_v22 = vadd.f32 1.0, %v3080_v16 }
 0x1c1   :  { %v3084_v4 = vpop.eup %3083  ;;  %2157 = vst.msk [vmem:[#allocation11 + $0xc4] sm:$0xf] %vm2107_vm2, %v2500_v0  ;;  %v2503_v40 = vpack.c.bf16 %v1839_v2, %v1839_v2  ;;  %v1652_v19 = vadd.f32 1.0, %v3082_v11 }
 0x1c2   :  { %v3086_v9 = vpop.eup %3085  ;;  %2162 = vst.msk [vmem:[#allocation11 + $0xd8] sm:$0xf] %vm2107_vm2, %v2505_v30  ;;  %3099 = vrcp.f32 %v1654_v22  ;;  %v1657_v45 = vadd.f32 1.0, %v3084_v4 }
 0x1c3   :  { %v3088_v18 = vpop.eup %3087  ;;  %2160 = vst.msk [vmem:[#allocation11 + $0xd0] sm:$0xf] %vm2107_vm2, %v2503_v40  ;;  %3101 = vrcp.f32 %v1652_v19  ;;  %v1655_v50 = vadd.f32 1.0, %v3086_v9 }
 0x1c4   :  { %v3090_v24 = vpop.eup %3089  ;;  %v1842_v10 = vmul.f32 %v3088_v18, %v3741_v28  ;;  %3103 = vrcp.f32 %v1657_v45 }
 0x1c5   :  { %v3092_v14 = vpop.eup %3091  ;;  %v1840_v32 = vmul.f32 %v3090_v24, %v3745_v26  ;;  %3105 = vrcp.f32 %v1655_v50 }
 0x1c6   :  { %v3094_v17 = vpop.eup %3093  ;;  %v2506_v20 = vpack.c.bf16 %v1842_v10, %v1842_v10  ;;  %v1845_v21 = vmul.f32 %v3092_v14, %v3752_v49 }
 0x1c7   :  { %v3096_v34 = vpop.eup %3095  ;;  %v2504_v38 = vpack.c.bf16 %v1840_v32, %v1840_v32  ;;  %v1843_v31 = vmul.f32 %v3094_v17, %v3756_v36 }
 0x1c8   :  { %v3098_v25 = vpop.eup %3097  ;;  %2163 = vst.msk [vmem:[#allocation11 + $0xdc] sm:$0xf] %vm2107_vm2, %v2506_v20  ;;  %v2509_v33 = vpack.c.bf16 %v1845_v21, %v1845_v21  ;;  %v1658_v63 = vadd.f32 1.0, %v3096_v34 }
 0x1c9   :  { %2161 = vst.msk [vmem:[#allocation11 + $0xd4] sm:$0xf] %vm2107_vm2, %v2504_v38  ;;  %v2507_v28 = vpack.c.bf16 %v1843_v31, %v1843_v31  ;;  %v1656_v35 = vadd.f32 1.0, %v3098_v25 }
 0x1ca   :  { %2166 = vst.msk [vmem:[#allocation11 + $0xe8] sm:$0xf] %vm2107_vm2, %v2509_v33  ;;  %3107 = vrcp.f32 %v1658_v63 }
 0x1cb   :  { %2164 = vst.msk [vmem:[#allocation11 + $0xe0] sm:$0xf] %vm2107_vm2, %v2507_v28  ;;  %3109 = vrcp.f32 %v1656_v35 }
 0x1cc   :  { %v3100_v26 = vpop.eup %3099 }
 0x1cd   :  { %v3102_v49 = vpop.eup %3101  ;;  %v1846_v58 = vmul.f32 %v3100_v26, %v3764_v1 }
 0x1ce   :  { %v3104_v36 = vpop.eup %3103  ;;  %v1844_v37 = vmul.f32 %v3102_v49, %v3771_v29 }
 0x1cf   :  { %v3106_v41 = vpop.eup %3105  ;;  %v2510_v43 = vpack.c.bf16 %v1846_v58, %v1846_v58  ;;  %v1849_v3 = vmul.f32 %v3104_v36, %v3774_v15 }
 0x1d0   :  { %v2508_v6 = vpack.c.bf16 %v1844_v37, %v1844_v37  ;;  %v1847_v8 = vmul.f32 %v3106_v41, %v3779_v23 }
 0x1d1   :  { %2167 = vst.msk [vmem:[#allocation11 + $0xec] sm:$0xf] %vm2107_vm2, %v2510_v43  ;;  %v2513_v46 = vpack.c.bf16 %v1849_v3, %v1849_v3 }
 0x1d2   :  { %2165 = vst.msk [vmem:[#allocation11 + $0xe4] sm:$0xf] %vm2107_vm2, %v2508_v6  ;;  %v2511_v59 = vpack.c.bf16 %v1847_v8, %v1847_v8 }
 0x1d3   :  { %2170 = vst.msk [vmem:[#allocation11 + $0xf8] sm:$0xf] %vm2107_vm2, %v2513_v46 }
 0x1d4   :  { %v3108_v47 = vpop.eup %3107  ;;  %2168 = vst.msk [vmem:[#allocation11 + $0xf0] sm:$0xf] %vm2107_vm2, %v2511_v59 }
 0x1d5   :  { %v3110_v1 = vpop.eup %3109  ;;  %v1850_v29 = vmul.f32 %v3108_v47, %v3784_v44 }
 0x1d6   :  { %v1848_v15 = vmul.f32 %v3110_v1, %v3794_v52 }
 0x1d7   :  { %v2514_v51 = vpack.c.bf16 %v1850_v29, %v1850_v29 }
 0x1d8   :  { %v2512_v23 = vpack.c.bf16 %v1848_v15, %v1848_v15 }
 0x1d9   :  { %2171 = vst.msk [vmem:[#allocation11 + $0xfc] sm:$0xf] %vm2107_vm2, %v2514_v51 }
 0x1da   :  { %2169 = vst.msk [vmem:[#allocation11 + $0xf4] sm:$0xf] %vm2107_vm2, %v2512_v23 }
 0x1db   :  { %3233 = shalt.err (!%p3230_p2)
}
 0x1dc   :  { %s3234_s8 = scalar_lea.hbm %s3848_s5, 4096 }
 0x1dd   :  { %p3235_p3 = scmp.ne.s32.totalorder %s3848_s5, %s3234_s8  ;;  %p3238_p4 = scmp.lt.u32.totalorder %s3234_s8, %s3848_s5 }
 0x1df   :  { %p3240_p5 = pnand %p3238_p4, %p3235_p3 }
 0x1e1   :  { %3243 = shalt.err (!%p3240_p5)
}
 0x1e2   :  { %2183 = dma.vmem_to_hbm [thread:$0]  %s2178_s29, 4096, %s3848_s5, [#allocation4], %s3254_s30, %s3254_s30, %s3255_s6  }
 0x1e3   :  { %3250 = dma.done.wait [#allocation4], 4096  }
 0x1e4   :  { %3251 = vsyncadd [#allocation4], 4294963200 }
 0x1e5   :  { %2187 = vsyncpa [#allocation3], 1 }
 0x1e6   :  { %2188 = vsyncpa [#allocation6], 1 }
 0x1e7   :  { %2189 = vsyncpa [#allocation9], 1 }
 0x1e8   :  { %2190 = vsyncpa [#allocation4], 1 }

// kernel: darkfpn_apply.23
= control target key start
LH: loop header
LB: loop body
LE: loop exit
PB: predicated region body
PF: predicated region fallthrough
CT: control target
= control target key end

     0   :  { %8 = vsyncpa [#allocation3], 0  ;;  %s3175_s0 = inlined_call_operand.hbm [shape: bf16[1,2,288,24], index: 0, kind: input, shape index: {}]   ;;  %s3176_s1 = inlined_call_operand.hbm [shape: bf16[3,24,8], index: 1, kind: input, shape index: {}]   ;;  %s3177_s2 = inlined_call_operand.hbm [shape: f32[1,8], index: 2, kind: input, shape index: {}]   ;;  %s3178_s3 = inlined_call_operand.hbm [shape: bf16[2,256,8], index: 3, kind: output, shape index: {}]  }
   0x1   :  { %10 = vsyncpa [#allocation3 + $0x1], 0 }
   0x2   :  { %11 = vsyncpa [#allocation6], 0 }
   0x3   :  { %12 = vsyncpa [#allocation4], 0 }
   0x4   :  { %14 = vsyncpa [#allocation4 + $0x1], 0  ;;  %s2578_s12 = smov 0   ;;  %s2580_s13 = smov 0  }
   0x5   :  { %s2582_s14 = smov 0   ;;  %s2584_s15 = smov 0  }
   0x6   :  { %s2586_s16 = smov 0   ;;  %s2588_s17 = smov 0  }
   0x7 LB: > { %s1684_s18 = sadd.s32 4294967295, %s2548_s17   ;;  %s1685_s19 = sadd.s32 4294967294, %s2548_s17   ;;  %s2548_s17 = sphi %s2588_s17, %s20_s17   ;;  %s2544_s16 = sphi %s2586_s16, %s3200_s16   ;;  %s2540_s15 = sphi %s2584_s15, %s3199_s15   ;;  %s2536_s14 = sphi %s2582_s14, %s3198_s14   ;;  %s2532_s13 = sphi %s2580_s13, %s3197_s13   ;;  %s2528_s12 = sphi %s2578_s12, %s3196_s12  }
   0x8   : > { %p52_p0 = scmp.ne.s32.totalorder %s2532_s13, %s2528_s12  ;;  %p2612_p1 = scmp.eq.s32.totalorder %s1684_s18, 0 }
   0x9   : > { %p2616_p2 = scmp.eq.s32.totalorder %s1684_s18, 1  ;;  %p136_p3 = scmp.eq.s32.totalorder %s1685_s19, 1 }
   0xa   : > { %s3183_s20 = scalar_select %p2612_p1, 1, 0 }
   0xb   : > { %p2622_p4 = por %p2612_p1, %p52_p0  ;;  %p1686_p5 = scmp.ge.s32.totalorder %s2548_s17, 1 }
   0xc   : > { %p2627_p6 = por %p136_p3, %p52_p0  ;;  %p143_p7 = scmp.lt.s32.totalorder %s2548_s17, 3 }
   0xd   : > { %s3185_s22 = scalar_select %p2622_p4, 1, 0 }
   0xe   : > { %s3186_s23 = scalar_select %p2627_p6, 1, 0 }
   0xf   : > { %p2632_p8 = pnand %p1686_p5, %p143_p7  ;;  %s2550_s25 = smov [#allocation5]  }
  0x10   : > { %s157_s26 = sshll.u32 %s2550_s25, 4  ;;  %s2551_s28 = smov [#allocation7]   ;;  %s2636_s26 = int_to_ptr.vmem [resolvable:$true] %s157_s26 }
  0x11   : > { %p2134_p9 = pneg %p2632_p8  ;;  %s173_s29 = sshll.u32 %s2551_s28, 4  ;;  %s2647_s29 = int_to_ptr.vmem [resolvable:$true] %s173_s29 }
  0x12   : > { %s2376_s5 = scalar_lea.hbm %s3176_s1, 576 }
  0x13   : > { %p2643_p11 = pnand %p2134_p9, %p2612_p1  ;;  %p2377_p12 = scmp.ne.s32.totalorder %s3176_s1, %s2376_s5 }
  0x14   : > { %p2383_p5 = scmp.lt.u32.totalorder %s2376_s5, %s3176_s1 }
  0x15   : > { %p2378_p13 = pneg %p2643_p11 }
  0x17   : > { %p2379_p0 = pnand %p2378_p13, %p2377_p12 }
  0x19   : > { %p2380_p3 = pneg %p2379_p0 }
  0x1b   : > { %p2385_p7 = pnand %p2383_p5, %p2380_p3 }
  0x1d   : > { %2388 = shalt.err (!%p2385_p7)
}
  0x1e   : > { %s2389_s10 = scalar_lea.vmem %s2636_s26, 576  ;;  %p2397_p1 = scmp.lt.s32.totalorder %s2636_s26, %s2636_s26 }
  0x1f   : > { %p2390_p9 = scmp.ne.s32.totalorder %s2636_s26, %s2389_s10  ;;  %p2398_p12 = scmp.lt.s32.totalorder %s2389_s10, %s2389_s10 }
  0x21   : > { %p2392_p10 = pnand %p2390_p9, %p2378_p13  ;;  %p2399_p0 = por %p2398_p12, %p2397_p1 }
  0x23   : > { %p2393_p6 = pneg %p2392_p10 }
  0x25   : > { %p2400_p4 = pnand %p2399_p0, %p2393_p6 }
  0x27   : > { %2403 = shalt.err (!%p2400_p4)
}
  0x28   : > { %s2552_s11 = smov 64   ;;  %s2553_s18 = smov 4  }
  0x29   : > { %2137 = dma.hbm_to_vmem [thread:$0]  (!%p2643_p11), %s3176_s1, 576, %s2636_s26, [#allocation6], %s2552_s11, %s2552_s11, %s2553_s18  }
  0x2a   : > { %s2404_s4 = scalar_lea.hbm %s3177_s2, 16 }
  0x2b   : > { %p2405_p1 = scmp.ne.s32.totalorder %s3177_s2, %s2404_s4  ;;  %p2411_p10 = scmp.lt.u32.totalorder %s2404_s4, %s3177_s2 }
  0x2d   : > { %p2407_p4 = pnand %p2405_p1, %p2378_p13 }
  0x2f   : > { %p2408_p6 = pneg %p2407_p4 }
  0x31   : > { %p2413_p3 = pnand %p2411_p10, %p2408_p6 }
  0x33   : > { %2416 = shalt.err (!%p2413_p3)
}
  0x34   : > { %s2417_s26 = scalar_lea.vmem %s2647_s29, 16  ;;  %s2424_s9 = scalar_lea.vmem %s2647_s29, 32 }
  0x35   : > { %p2418_p5 = scmp.ne.s32.totalorder %s2647_s29, %s2417_s26  ;;  %p2425_p12 = scmp.lt.s32.totalorder %s2647_s29, %s2647_s29 }
  0x36   : > { %p2426_p0 = scmp.lt.s32.totalorder %s2424_s9, %s2417_s26 }
  0x37   : > { %p2420_p7 = pnand %p2418_p5, %p2378_p13 }
  0x38   : > { %p2427_p1 = por %p2426_p0, %p2425_p12 }
  0x39   : > { %p2421_p9 = pneg %p2420_p7 }
  0x3b   : > { %p2428_p4 = pnand %p2427_p1, %p2421_p9 }
  0x3d   : > { %2431 = shalt.err (!%p2428_p4)
}
  0x3e   : > { %2140 = dma.hbm_to_vmem [thread:$0]  (!%p2643_p11), %s3177_s2, 16, %s2647_s29, [#allocation6]  }
  0x3f   : > { %s32_s25 = sadd.s32 1, %s2544_s16  ;;  %s39_s28 = sadd.s32 1, %s2536_s14 }
  0x40   : > { %p34_p13 = scmp.ge.s32.totalorder %s32_s25, 2  ;;  %p46_p6 = scmp.ne.s32.totalorder %s2536_s14, %s2532_s13 }
  0x41   : > { %p47_p10 = scmp.eq.s32.totalorder %s2548_s17, 0  ;;  %p2151_p3 = scmp.lt.s32.totalorder %s2548_s17, 2 }
  0x42   : > { %s3202_s25 = smov (%p34_p13, %s32_s25), 0  ;;  %p2715_p7 = por %p2616_p2, %p46_p6 }
  0x43   : > { %p48_p5 = por %p47_p10, %p46_p6  ;;  %s36_s30 = ssub.s32 %s2544_s16, %s3202_s25 }
  0x44   : > { %s3189_s27 = scalar_select %p2715_p7, 1, 0 }
  0x45   : > { %s184_s4 = sand.u32 1, %s2536_s14   ;;  %p37_p9 = scmp.eq.s32.totalorder %s36_s30, 0 }
  0x46   : > { %s2119_s29 = smul.u32 144, %s184_s4  ;;  %p2722_p11 = pnand %p2151_p3, %p48_p5 }
  0x47   : > { %s2727_s6 = scalar_select %p37_p9, %s2536_s14, %s39_s28  }
  0x48   : > { %s2120_s7 = smul.u32 2304, %s2544_s16  ;;  %s188_s8 = scalar_lea.vmem [#allocation2], %s2119_s29 }
  0x49   : > { %s195_s26 = sshll.u32 %s188_s8, 4  ;;  %s2737_s19 = scalar_lea.sflag [#allocation3], %s184_s4  ;;  %s2735_s26 = int_to_ptr.vmem [resolvable:$true] %s195_s26 }
  0x4a   : > { %s2733_s10 = scalar_lea.hbm %s3175_s0, %s2120_s7  ;;  %p2434_p12 = pneg %p2722_p11 }
  0x4b   : > { %s2432_s30 = scalar_lea.hbm %s2733_s10, 2304  ;;  %s2437_s7 = scalar_lea.hbm %s3175_s0, 4608 }
  0x4c   : > { %p2433_p2 = scmp.ne.s32.totalorder %s2733_s10, %s2432_s30  ;;  %p2438_p4 = scmp.lt.u32.totalorder %s2733_s10, %s3175_s0 }
  0x4d   : > { %p2439_p13 = scmp.lt.u32.totalorder %s2437_s7, %s2432_s30  ;;  %p2441_p10 = scmp.lt.u32.totalorder %s2432_s30, %s2733_s10 }
  0x4e   : > { %p2435_p0 = pnand %p2434_p12, %p2433_p2 }
  0x4f   : > { %p2440_p6 = por %p2439_p13, %p2438_p4 }
  0x50   : > { %p2436_p1 = pneg %p2435_p0 }
  0x51   : > { %p2442_p3 = por %p2441_p10, %p2440_p6 }
  0x53   : > { %p2443_p5 = pnand %p2442_p3, %p2436_p1 }
  0x55   : > { %2446 = shalt.err (!%p2443_p5)
}
  0x56   : > { %s2447_s4 = scalar_lea.vmem %s2735_s26, 2304  ;;  %s2554_s9 = smov [#allocation2]  }
  0x57   : > { %p2448_p9 = scmp.ne.s32.totalorder %s2735_s26, %s2447_s4  ;;  %s2452_s28 = sshll.u32 %s2554_s9, 4  ;;  %s2453_s28 = int_to_ptr.vmem [resolvable:$false] %s2452_s28 }
  0x58   : > { %s2454_s29 = scalar_lea.vmem %s2453_s28, 4608  ;;  %p2455_p7 = scmp.lt.s32.totalorder %s2735_s26, %s2453_s28 }
  0x59   : > { %p2450_p2 = pnand %p2448_p9, %p2434_p12  ;;  %p2456_p4 = scmp.lt.s32.totalorder %s2454_s29, %s2447_s4 }
  0x5b   : > { %p2451_p0 = pneg %p2450_p2  ;;  %p2457_p13 = por %p2456_p4, %p2455_p7 }
  0x5d   : > { %p2458_p6 = pnand %p2457_p13, %p2451_p0 }
  0x5f   : > { %2461 = shalt.err (!%p2458_p6)
}
  0x60   : > { %2144 = dma.hbm_to_vmem [thread:$0]  (!%p2722_p11), %s2733_s10, 2304, %s2735_s26, %s2737_s19, %s2552_s11, %s2552_s11, %s2553_s18  }
  0x61   : > { %207 = sbr.rel (%p2632_p8) target bundleno = 475 (0x1db), region = 32  ;;  %s2771_s30 = sand.u32 (!%p2632_p8), 1, %s2532_s13  }
  0x62   : > { %s2121_s7 = smul.u32 (!%p2632_p8), 144, %s2771_s30  ;;  %s210_s8 = scalar_lea.sflag (!%p2632_p8), [#allocation3], %s2771_s30 }
  0x63   : > { %p3191_p7 = scmp.ne.s32.totalorder (!%p2632_p8), %s3185_s22, 0 }
  0x64   : > { %s2775_s21 = scalar_lea.vmem (!%p2632_p8), [#allocation2], %s2121_s7 }
  0x68   : > { %2515 = dma.done.wait (%p3191_p7), %s210_s8, 2304  }
  0x69   : > { %2517 = vsyncadd (%p3191_p7), %s210_s8, 4294964992  ;;  %p3192_p11 = scmp.ne.s32.totalorder %s3183_s20, 0 }
  0x6b   : > { %2519 = dma.done.wait (%p3192_p11), [#allocation6], 592  }
  0x6c   : > { %2521 = vsyncadd (%p3192_p11), [#allocation6], 4294966704  ;;  %v2209_v0 = vld [vmem:[#allocation5 + $0xc] sm:$0xff]   ;;  %vm424_vm0 = vcmask 1043456   ;;  %v2210_v1 = vld [vmem:[#allocation5] sm:$0xff]   ;;  %vm375_vm1 = vcmask 195584  }
  0x6d   : > { %1939 = vmatprep.subr.bf16.mxu1 %v2209_v0  ;;  %v2211_v2 = vld [vmem:[#allocation5 + $0x14] ss:$0 sps:$4 sm:$0xff]   ;;  %1975 = vmatprep.subr.bf16.mxu0 %v2210_v1  ;;  %v2212_v3 = vld [vmem:[#allocation5 + $0x8] ss:$0 sps:$4 sm:$0xff]   ;;  %v2216_v9 = vld [vmem:[#allocation5 + $0x18] sm:$0xff]   ;;  %s1694_s20 = sshll.u32 %s2771_s30, 7 }
  0x6e   : > { %1940 = vmatpush3.bf16.msra.mxu1 %v2209_v0  ;;  %1976 = vmatpush3.bf16.msra.mxu0 %v2210_v1  ;;  %v426_v4 = vsel %vm424_vm0, %v2211_v2, 0  ;;  %v2213_v5 = vld [vmem:[%s2775_s21 + $0x8] sm:$0xff]   ;;  %v607_v6 = vsel %vm424_vm0, %v2212_v3, 0  ;;  %v2214_v7 = vld [vmem:[%s2775_s21] sm:$0xff]   ;;  %v2215_v8 = vld [vmem:[%s2775_s21 + $0x10] sm:$0xff]   ;;  %vm1530_vm2 = vcmask 60416  }
  0x6f   : > { %2115 = vmatprep.subr.msk.bf16.mxu1 %vm424_vm0, %v2211_v2  ;;  %2116 = vmatprep.subr.msk.bf16.mxu0 %vm424_vm0, %v2212_v3  ;;  %v2217_v10 = vld [vmem:[%s2775_s21 + $0x18] sm:$0xff]   ;;  %v2221_v11 = vld [vmem:[#allocation5 + $0x20] ss:$0 sps:$4 sm:$0xff]   ;;  %v2219_v14 = vld [vmem:[%s2775_s21 + $0x28] sm:$0xff]   ;;  %s2961_s22 = scalar_lea.vmem [#allocation8], %s1694_s20  ;;  %s1884_s24 = sshll.u32 %s2540_s15, 11 }
  0x70   : > { %1943 = vmatprep.mubr.msk.bf16.mxu1 %vm375_vm1, %v2213_v5  ;;  %1979 = vmatprep.mubr.msk.bf16.mxu0 %vm375_vm1, %v2214_v7  ;;  %v944_v12 = vsel %vm424_vm0, %v2221_v11, 0  ;;  %v2218_v13 = vld [vmem:[%s2775_s21 + $0x20] sm:$0xff]   ;;  %v2220_v15 = vld [vmem:[%s2775_s21 + $0x30] sm:$0xff]   ;;  %v2222_v16 = vld [vmem:[%s2775_s21 + $0x38] sm:$0xff]   ;;  %s1578_s11 = sshll.u32 %s2961_s22, 4  ;;  %s3118_s26 = scalar_lea.hbm %s3178_s3, %s1884_s24  ;;  %s3120_s11 = int_to_ptr.vmem [resolvable:$true] %s1578_s11 }
  0x71   : > { %v2223_v17 = vld [vmem:[%s2775_s21 + $0x40] sm:$0xff]   ;;  %v2224_v18 = vld [vmem:[%s2775_s21 + $0x48] sm:$0xff]   ;;  %v2225_v19 = vld [vmem:[%s2775_s21 + $0x10] sm:$0xff]   ;;  %s1564_s15 = scalar_lea.sflag [#allocation4], %s2771_s30  ;;  %s2462_s10 = scalar_lea.vmem %s3120_s11, 2048 }
  0x72   : > { %1942 = vmatpush3.bf16.msra.mxu1 %v426_v4  ;;  %1978 = vmatpush3.bf16.msra.mxu0 %v607_v6  ;;  %v2226_v20 = vld [vmem:[%s2775_s21 + $0x50] sm:$0xff]   ;;  %v2227_v21 = vld [vmem:[%s2775_s21 + $0x18] sm:$0xff]   ;;  %v2229_v23 = vld [vmem:[%s2775_s21 + $0x20] sm:$0xff]   ;;  %p2463_p8 = scmp.ne.s32.totalorder %s3120_s11, %s2462_s10  ;;  %p3193_p12 = scmp.ne.s32.totalorder %s3189_s27, 0 }
  0x73   : > { %2047 = vmatprep.subr.bf16.mxu1 %v2210_v1  ;;  %2011 = vmatprep.subr.bf16.mxu0 %v2216_v9  ;;  %v2228_v22 = vld [vmem:[%s2775_s21 + $0x58] sm:$0xff]   ;;  %v2230_v24 = vld [vmem:[%s2775_s21 + $0x60] sm:$0xff]   ;;  %v2231_v25 = vld [vmem:[%s2775_s21 + $0x28] sm:$0xff]   ;;  %s2555_s19 = smov [#allocation8]  }
  0x74   : > { %v2232_v26 = vld [vmem:[%s2775_s21 + $0x68] sm:$0xff]   ;;  %v2233_v27 = vld [vmem:[%s2775_s21 + $0x30] sm:$0xff]   ;;  %v2235_v29 = vld [vmem:[%s2775_s21 + $0x38] sm:$0xff]   ;;  %p2464_p1 = pnand %p2463_p8, %p3193_p12  ;;  %s2466_s4 = sshll.u32 %s2555_s19, 4  ;;  %s2467_s4 = int_to_ptr.vmem [resolvable:$false] %s2466_s4 }
  0x75   : > { %1944 = vmatmul.mubr.msk.bf16.vlgmr.msra.gmra.mrb[0].mxu1 %vm375_vm1, %v2215_v8  ;;  %1980 = vmatmul.mubr.msk.bf16.vlgmr.msra.gmra.mrb[0].mxu0 %vm375_vm1, %v2213_v5  ;;  %v2234_v28 = vld [vmem:[%s2775_s21 + $0x70] sm:$0xff]   ;;  %v2236_v30 = vld [vmem:[%s2775_s21 + $0x78] sm:$0xff]   ;;  %v2237_v31 = vld [vmem:[%s2775_s21 + $0x40] sm:$0xff]   ;;  %s2468_s9 = scalar_lea.vmem %s2467_s4, 4096  ;;  %p2469_p3 = scmp.lt.s32.totalorder %s3120_s11, %s2467_s4 }
  0x76   : > { %2049 = vmatpush3.bf16.msra.mxu1 %v2210_v1  ;;  %2012 = vmatpush3.bf16.msra.mxu0 %v2216_v9  ;;  %v2238_v32 = vld [vmem:[%s2775_s21 + $0x80] sm:$0xff]   ;;  %v2239_v33 = vld [vmem:[%s2775_s21 + $0x48] sm:$0xff]   ;;  %v2240_v34 = vld [vmem:[%s2775_s21 + $0x50] sm:$0xff]   ;;  %p2465_p10 = pneg %p2464_p1  ;;  %p2470_p5 = scmp.lt.s32.totalorder %s2468_s9, %s2462_s10 }
  0x77   : > { %1947 = vmatprep.mubr.msk.bf16.mxu1 %vm375_vm1, %v2217_v10  ;;  %1983 = vmatprep.mubr.msk.bf16.mxu0 %vm375_vm1, %v2215_v8  ;;  %v2241_v35 = vld [vmem:[%s2775_s21 + $0x58] sm:$0xff]   ;;  %v2242_v36 = vld [vmem:[%s2775_s21 + $0x60] sm:$0xff]   ;;  %v2243_v37 = vld [vmem:[%s2775_s21 + $0x68] sm:$0xff]  }
  0x78   : > { %2118 = vmatprep.subr.msk.bf16.mxu0 %vm424_vm0, %v2221_v11  ;;  %2117 = vmatprep.subr.msk.bf16.mxu1 %vm424_vm0, %v2212_v3  ;;  %v2244_v38 = vld [vmem:[%s2775_s21 + $0x70] sm:$0xff]   ;;  %v2245_v39 = vld [vmem:[%s2775_s21 + $0x78] sm:$0xff]   ;;  %v2246_v40 = vld [vmem:[%s2775_s21 + $0x80] sm:$0xff]   ;;  %p2471_p9 = por %p2470_p5, %p2469_p3 }
  0x79   : > { %v2247_v41 = vld [vmem:[%s2775_s21 + $0x88] sm:$0xff]   ;;  %v2883_v59 = vld [vmem:[#allocation7] ss:$0 sm:$0xff] }
  0x7a   : > { %2050 = vmatpush3.bf16.msra.mxu1 %v607_v6  ;;  %2014 = vmatpush3.bf16.msra.mxu0 %v944_v12  ;;  %p2472_p2 = pnand %p2471_p9, %p2465_p10 }
  0x7d   : > { %1948 = vmatmul.mubr.msk.bf16.gmra.mrb[4].mxu1 %vm375_vm1, %v2218_v13  ;;  %1984 = vmatmul.mubr.msk.bf16.gmra.mrb[4].mxu0 %vm375_vm1, %v2217_v10 }
  0x7e   : > { %1951 = vmatprep.mubr.msk.bf16.mxu1 %vm375_vm1, %v2219_v14  ;;  %1987 = vmatprep.mubr.msk.bf16.mxu0 %vm375_vm1, %v2218_v13 }
  0x85   : > { %1952 = vmatmul.mubr.msk.bf16.gmra.mrb[8].mxu1 %vm375_vm1, %v2220_v15  ;;  %1988 = vmatmul.mubr.msk.bf16.gmra.mrb[8].mxu0 %vm375_vm1, %v2219_v14 }
  0x86   : > { %1955 = vmatprep.mubr.msk.bf16.mxu1 %vm375_vm1, %v2222_v16  ;;  %1991 = vmatprep.mubr.msk.bf16.mxu0 %vm375_vm1, %v2220_v15 }
  0x8d   : > { %1956 = vmatmul.mubr.msk.bf16.gmra.mrb[12].mxu1 %vm375_vm1, %v2223_v17  ;;  %1992 = vmatmul.mubr.msk.bf16.gmra.mrb[12].mxu0 %vm375_vm1, %v2222_v16 }
  0x8e   : > { %1959 = vmatprep.mubr.msk.bf16.mxu1 %vm375_vm1, %v2224_v18  ;;  %2015 = vmatprep.mubr.msk.bf16.mxu0 %vm375_vm1, %v2225_v19 }
  0x95   : > { %1960 = vmatmul.mubr.msk.bf16.gmra.mrb[16].mxu1 %vm375_vm1, %v2226_v20  ;;  %2016 = vmatmul.mubr.msk.bf16.vlgmr.msra.gmra.mrb[0].mxu0 %vm375_vm1, %v2227_v21 }
  0x96   : > { %1963 = vmatprep.mubr.msk.bf16.mxu1 %vm375_vm1, %v2228_v22  ;;  %2019 = vmatprep.mubr.msk.bf16.mxu0 %vm375_vm1, %v2229_v23 }
  0x9d   : > { %1964 = vmatmul.mubr.msk.bf16.gmra.mrb[20].mxu1 %vm375_vm1, %v2230_v24  ;;  %2020 = vmatmul.mubr.msk.bf16.gmra.mrb[4].mxu0 %vm375_vm1, %v2231_v25 }
  0x9e   : > { %1967 = vmatprep.mubr.msk.bf16.mxu1 %vm375_vm1, %v2232_v26  ;;  %2023 = vmatprep.mubr.msk.bf16.mxu0 %vm375_vm1, %v2233_v27 }
  0xa5   : > { %1968 = vmatmul.mubr.msk.bf16.gmra.mrb[24].mxu1 %vm375_vm1, %v2234_v28  ;;  %2024 = vmatmul.mubr.msk.bf16.gmra.mrb[8].mxu0 %vm375_vm1, %v2235_v29 }
  0xa6   : > { %1971 = vmatprep.mubr.msk.bf16.mxu1 %vm375_vm1, %v2236_v30  ;;  %2027 = vmatprep.mubr.msk.bf16.mxu0 %vm375_vm1, %v2237_v31 }
  0xad   : > { %1972 = vmatmul.mubr.msk.bf16.gmra.mrb[28].mxu1 %vm375_vm1, %v2238_v32  ;;  %2028 = vmatmul.mubr.msk.bf16.gmra.mrb[12].mxu0 %vm375_vm1, %v2239_v33 }
  0xae   : > { %1995 = vmatprep.mubr.msk.bf16.mxu1 %vm375_vm1, %v2223_v17  ;;  %2031 = vmatprep.mubr.msk.bf16.mxu0 %vm375_vm1, %v2240_v34 }
  0xb5   : > { %1996 = vmatmul.mubr.msk.bf16.vlgmr.msra.gmra.mrb[16].mxu1 %vm375_vm1, %v2224_v18  ;;  %2032 = vmatmul.mubr.msk.bf16.gmra.mrb[16].mxu0 %vm375_vm1, %v2241_v35 }
  0xb6   : > { %1999 = vmatprep.mubr.msk.bf16.mxu1 %vm375_vm1, %v2226_v20  ;;  %2035 = vmatprep.mubr.msk.bf16.mxu0 %vm375_vm1, %v2242_v36 }
  0xbd   : > { %2000 = vmatmul.mubr.msk.bf16.gmra.mrb[20].mxu1 %vm375_vm1, %v2228_v22  ;;  %2036 = vmatmul.mubr.msk.bf16.gmra.mrb[20].mxu0 %vm375_vm1, %v2243_v37 }
  0xbe   : > { %2003 = vmatprep.mubr.msk.bf16.mxu1 %vm375_vm1, %v2230_v24  ;;  %2039 = vmatprep.mubr.msk.bf16.mxu0 %vm375_vm1, %v2244_v38 }
  0xc5   : > { %2004 = vmatmul.mubr.msk.bf16.gmra.mrb[24].mxu1 %vm375_vm1, %v2232_v26  ;;  %2040 = vmatmul.mubr.msk.bf16.gmra.mrb[24].mxu0 %vm375_vm1, %v2245_v39 }
  0xc6   : > { %2007 = vmatprep.mubr.msk.bf16.mxu1 %vm375_vm1, %v2234_v28  ;;  %2043 = vmatprep.mubr.msk.bf16.mxu0 %vm375_vm1, %v2246_v40 }
  0xcd   : > { %2008 = vmatmul.mubr.msk.bf16.gmra.mrb[28].mxu1 %vm375_vm1, %v2236_v30  ;;  %2044 = vmatmul.mubr.msk.bf16.gmra.mrb[28].mxu0 %vm375_vm1, %v2247_v41 }
 0x148   : > { %v1945_v42 = vpop.f32.mrb[0].mxu1 }
 0x149   : > { %v462_v43 = vpop.f32.mrb[1].mxu1 }
 0x14a   : > { %v1946_v44 = vpop.f32.mrb[2].mxu1 }
 0x14b   : > { %v465_v45 = vpop.f32.mrb[3].mxu1 }
 0x150   : > { %v1949_v46 = vpop.f32.mrb[4].mxu1 }
 0x151   : > { %v478_v47 = vpop.f32.mrb[5].mxu1 }
 0x152   : > { %v1950_v48 = vpop.f32.mrb[6].mxu1 }
 0x153   : > { %v481_v49 = vpop.f32.mrb[7].mxu1 }
 0x158   : > { %v1953_v50 = vpop.f32.mrb[8].mxu1 }
 0x159   : > { %v494_v51 = vpop.f32.mrb[9].mxu1 }
 0x15a   : > { %v1954_v52 = vpop.f32.mrb[10].mxu1 }
 0x15b   : > { %v2873_v53 = vpop.f32.mrb[11].mxu1 }
 0x160   : > { %v2875_v54 = vpop.f32.mrb[12].mxu1 }
 0x161   : > { %v2877_v55 = vpop.f32.mrb[13].mxu1 }
 0x162   : > { %v2879_v56 = vpop.f32.mrb[14].mxu1 }
 0x163   : > { %v2881_v57 = vpop.f32.mrb[15].mxu1 }
 0x168   : > { %v2017_v58 = vpop.f32.mrb[0].mxu0 }
 0x169   : > { %v2051_v60 = vadd.f32 %v2017_v58, %v1945_v42  ;;  %v980_v61 = vpop.f32.mrb[1].mxu0 }
 0x16a   : > { %v2052_v62 = vadd.f32 %v980_v61, %v462_v43  ;;  %v2018_v63 = vpop.f32.mrb[2].mxu0 }
 0x16b   : > { %v2886_v0 = vadd.f32 %v2051_v60, %v2883_v59  ;;  %v2053_v1 = vadd.f32 %v2018_v63, %v1946_v44  ;;  %v983_v2 = vpop.f32.mrb[3].mxu0 }
 0x16c   : > { %v2889_v3 = vadd.f32 %v2052_v62, %v2883_v59  ;;  %v2054_v4 = vadd.f32 %v983_v2, %v465_v45 }
 0x16d   : > { %v1785_v5 = vmul.f32 -1.442695, %v2886_v0  ;;  %v2893_v6 = vadd.f32 %v2053_v1, %v2883_v59 }
 0x16e   : > { %v1783_v7 = vmul.f32 -1.442695, %v2889_v3  ;;  %v2897_v8 = vadd.f32 %v2054_v4, %v2883_v59 }
 0x16f   : > { %2248 = vpow2.f32 %v1785_v5  ;;  %v1786_v9 = vmul.f32 -1.442695, %v2893_v6 }
 0x170   : > { %2250 = vpow2.f32 %v1783_v7  ;;  %v1784_v10 = vmul.f32 -1.442695, %v2897_v8  ;;  %v2021_v11 = vpop.f32.mrb[4].mxu0 }
 0x171   : > { %2252 = vpow2.f32 %v1786_v9  ;;  %v2055_v12 = vadd.f32 %v2021_v11, %v1949_v46  ;;  %v996_v13 = vpop.f32.mrb[5].mxu0 }
 0x172   : > { %2254 = vpow2.f32 %v1784_v10  ;;  %v2056_v14 = vadd.f32 %v996_v13, %v478_v47  ;;  %v2022_v15 = vpop.f32.mrb[6].mxu0 }
 0x173   : > { %v2902_v16 = vadd.f32 %v2055_v12, %v2883_v59  ;;  %v2057_v17 = vadd.f32 %v2022_v15, %v1950_v48  ;;  %v999_v18 = vpop.f32.mrb[7].mxu0 }
 0x174   : > { %v2905_v19 = vadd.f32 %v2056_v14, %v2883_v59  ;;  %v2058_v20 = vadd.f32 %v999_v18, %v481_v49 }
 0x175   : > { %v1789_v21 = vmul.f32 -1.442695, %v2902_v16  ;;  %v2909_v22 = vadd.f32 %v2057_v17, %v2883_v59 }
 0x176   : > { %v1787_v23 = vmul.f32 -1.442695, %v2905_v19  ;;  %v2913_v24 = vadd.f32 %v2058_v20, %v2883_v59 }
 0x177   : > { %2256 = vpow2.f32 %v1789_v21  ;;  %v1790_v25 = vmul.f32 -1.442695, %v2909_v22 }
 0x178   : > { %2258 = vpow2.f32 %v1787_v23  ;;  %v1788_v26 = vmul.f32 -1.442695, %v2913_v24  ;;  %v2025_v27 = vpop.f32.mrb[8].mxu0 }
 0x179   : > { %v2249_v28 = vpop.eup %2248  ;;  %2260 = vpow2.f32 %v1790_v25  ;;  %v2059_v29 = vadd.f32 %v2025_v27, %v1953_v50  ;;  %v1012_v30 = vpop.f32.mrb[9].mxu0 }
 0x17a   : > { %v2251_v31 = vpop.eup %2250  ;;  %v1276_v32 = vadd.f32 1.0, %v2249_v28  ;;  %2262 = vpow2.f32 %v1788_v26  ;;  %v2060_v33 = vadd.f32 %v1012_v30, %v494_v51  ;;  %v2026_v34 = vpop.f32.mrb[10].mxu0 }
 0x17b   : > { %v2253_v35 = vpop.eup %2252  ;;  %v1274_v36 = vadd.f32 1.0, %v2251_v31  ;;  %v2918_v37 = vadd.f32 %v2059_v29, %v2883_v59  ;;  %v2061_v38 = vadd.f32 %v2026_v34, %v1954_v52  ;;  %v1015_v39 = vpop.f32.mrb[11].mxu0 }
 0x17c   : > { %v2255_v40 = vpop.eup %2254  ;;  %2264 = vrcp.f32 %v1276_v32  ;;  %v1277_v41 = vadd.f32 1.0, %v2253_v35  ;;  %v2921_v42 = vadd.f32 %v2060_v33, %v2883_v59  ;;  %v2062_v43 = vadd.f32 %v1015_v39, %v2873_v53 }
 0x17d   : > { %2266 = vrcp.f32 %v1274_v36  ;;  %v1275_v44 = vadd.f32 1.0, %v2255_v40  ;;  %v1793_v45 = vmul.f32 -1.442695, %v2918_v37  ;;  %v2926_v46 = vadd.f32 %v2061_v38, %v2883_v59 }
 0x17e   : > { %2268 = vrcp.f32 %v1277_v41  ;;  %v1791_v47 = vmul.f32 -1.442695, %v2921_v42  ;;  %v2930_v48 = vadd.f32 %v2062_v43, %v2883_v59 }
 0x17f   : > { %2270 = vrcp.f32 %v1275_v44  ;;  %v1794_v49 = vmul.f32 -1.442695, %v2926_v46 }
 0x180   : > { %2272 = vpow2.f32 %v1793_v45  ;;  %v1792_v50 = vmul.f32 -1.442695, %v2930_v48  ;;  %v2029_v51 = vpop.f32.mrb[12].mxu0 }
 0x181   : > { %v2257_v52 = vpop.eup %2256  ;;  %2274 = vpow2.f32 %v1791_v47  ;;  %v2063_v53 = vadd.f32 %v2029_v51, %v2875_v54  ;;  %v1028_v58 = vpop.f32.mrb[13].mxu0 }
 0x182   : > { %v2259_v60 = vpop.eup %2258  ;;  %v1280_v61 = vadd.f32 1.0, %v2257_v52  ;;  %2276 = vpow2.f32 %v1794_v49  ;;  %v2064_v62 = vadd.f32 %v1028_v58, %v2877_v55  ;;  %v2030_v63 = vpop.f32.mrb[14].mxu0 }
 0x183   : > { %v2261_v1 = vpop.eup %2260  ;;  %v1278_v2 = vadd.f32 1.0, %v2259_v60  ;;  %2278 = vpow2.f32 %v1792_v50  ;;  %v2937_v4 = vadd.f32 %v2063_v53, %v2883_v59  ;;  %v2065_v5 = vadd.f32 %v2030_v63, %v2879_v56  ;;  %v1031_v7 = vpop.f32.mrb[15].mxu0 }
 0x184   : > { %v2263_v9 = vpop.eup %2262  ;;  %2280 = vrcp.f32 %v1280_v61  ;;  %v1281_v54 = vadd.f32 1.0, %v2261_v1  ;;  %v2941_v10 = vadd.f32 %v2064_v62, %v2883_v59  ;;  %v2066_v11 = vadd.f32 %v1031_v7, %v2881_v57 }
 0x185   : > { %2282 = vrcp.f32 %v1278_v2  ;;  %v1279_v55 = vadd.f32 1.0, %v2263_v9  ;;  %v1797_v12 = vmul.f32 -1.442695, %v2937_v4  ;;  %v2947_v13 = vadd.f32 %v2065_v5, %v2883_v59 }
 0x186   : > { %v2265_v14 = vpop.eup %2264  ;;  %2284 = vrcp.f32 %v1281_v54  ;;  %v1795_v56 = vmul.f32 -1.442695, %v2941_v10  ;;  %v2951_v15 = vadd.f32 %v2066_v11, %v2883_v59 }
 0x187   : > { %v2267_v17 = vpop.eup %2266  ;;  %v1372_v18 = vmul.f32 %v2265_v14, %v2886_v0  ;;  %2286 = vrcp.f32 %v1279_v55  ;;  %v1798_v57 = vmul.f32 -1.442695, %v2947_v13 }
 0x188   : > { %v1997_v20 = vpop.f32.mrb[16].mxu1  ;;  %v2269_v21 = vpop.eup %2268  ;;  %v1370_v23 = vmul.f32 %v2267_v17, %v2889_v3  ;;  %2288 = vpow2.f32 %v1797_v12  ;;  %v1796_v25 = vmul.f32 -1.442695, %v2951_v15 }
 0x189   : > { %v2033_v26 = vpop.f32.mrb[16].mxu0  ;;  %v707_v27 = vpop.f32.mrb[17].mxu1  ;;  %v1854_v29 = vpack.c.bf16 %v1372_v18, %v1372_v18  ;;  %v1373_v30 = vmul.f32 %v2269_v21, %v2893_v6  ;;  %2290 = vpow2.f32 %v1795_v56 }
 0x18a   : > { %v2271_v28 = vpop.eup %2270  ;;  %v2067_v0 = vadd.f32 %v2033_v26, %v1997_v20  ;;  %v1044_v31 = vpop.f32.mrb[17].mxu0  ;;  %v1852_v34 = vpack.c.bf16 %v1370_v23, %v1370_v23  ;;  %2292 = vpow2.f32 %v1798_v57 }
 0x18b   : > { %v1998_v32 = vpop.f32.mrb[18].mxu1  ;;  %v2273_v33 = vpop.eup %2272  ;;  %v1371_v35 = vmul.f32 %v2271_v28, %v2897_v8  ;;  %v2068_v3 = vadd.f32 %v1044_v31, %v707_v27  ;;  %1533 = vst.msk [vmem:[%s2961_s22 + $0x8] sm:$0xf] %vm1530_vm2, %v1854_v29  ;;  %v1855_v6 = vpack.c.bf16 %v1373_v30, %v1373_v30  ;;  %2294 = vpow2.f32 %v1796_v25 }
 0x18c   : > { %v2034_v36 = vpop.f32.mrb[18].mxu0  ;;  %v710_v38 = vpop.f32.mrb[19].mxu1  ;;  %v1284_v40 = vadd.f32 1.0, %v2273_v33  ;;  %v2966_v41 = vadd.f32 %v2067_v0, %v2883_v59  ;;  %1531 = vst.msk [vmem:[%s2961_s22] sm:$0xf] %vm1530_vm2, %v1852_v34 }
 0x18d   : > { %v2275_v39 = vpop.eup %2274  ;;  %v1047_v8 = vpop.f32.mrb[19].mxu0  ;;  %v1853_v44 = vpack.c.bf16 %v1371_v35, %v1371_v35  ;;  %v2971_v47 = vadd.f32 %v2068_v3, %v2883_v59  ;;  %v2069_v49 = vadd.f32 %v2034_v36, %v1998_v32  ;;  %1534 = vst.msk [vmem:[%s2961_s22 + $0xc] sm:$0xf] %vm1530_vm2, %v1855_v6 }
 0x18e   : > { %v2277_v43 = vpop.eup %2276  ;;  %v1282_v45 = vadd.f32 1.0, %v2275_v39  ;;  %2296 = vrcp.f32 %v1284_v40  ;;  %v1801_v52 = vmul.f32 -1.442695, %v2966_v41  ;;  %v2070_v53 = vadd.f32 %v1047_v8, %v710_v38 }
 0x18f   : > { %v2279_v50 = vpop.eup %2278  ;;  %v1285_v51 = vadd.f32 1.0, %v2277_v43  ;;  %1532 = vst.msk [vmem:[%s2961_s22 + $0x4] sm:$0xf] %vm1530_vm2, %v1853_v44  ;;  %v1799_v61 = vmul.f32 -1.442695, %v2971_v47  ;;  %v2980_v62 = vadd.f32 %v2069_v49, %v2883_v59 }
 0x190   : > { %v2281_v58 = vpop.eup %2280  ;;  %2298 = vrcp.f32 %v1282_v45  ;;  %v1283_v60 = vadd.f32 1.0, %v2279_v50  ;;  %v2984_v2 = vadd.f32 %v2070_v53, %v2883_v59  ;;  %v2001_v5 = vpop.f32.mrb[20].mxu1 }
 0x191   : > { %v2283_v63 = vpop.eup %2282  ;;  %v1376_v1 = vmul.f32 %v2281_v58, %v2902_v16  ;;  %2300 = vrcp.f32 %v1285_v51  ;;  %v1802_v54 = vmul.f32 -1.442695, %v2980_v62  ;;  %v2037_v11 = vpop.f32.mrb[20].mxu0 }
 0x192   : > { %v2285_v7 = vpop.eup %2284  ;;  %v1374_v9 = vmul.f32 %v2283_v63, %v2905_v19  ;;  %2302 = vrcp.f32 %v1283_v60  ;;  %v723_v55 = vpop.f32.mrb[21].mxu1  ;;  %v1800_v16 = vmul.f32 -1.442695, %v2984_v2  ;;  %v2071_v21 = vadd.f32 %v2037_v11, %v2001_v5 }
 0x193   : > { %v2287_v12 = vpop.eup %2286  ;;  %v1858_v14 = vpack.c.bf16 %v1376_v1, %v1376_v1  ;;  %v1377_v56 = vmul.f32 %v2285_v7, %v2909_v22  ;;  %2304 = vpow2.f32 %v1801_v52  ;;  %v1060_v17 = vpop.f32.mrb[21].mxu0 }
 0x194   : > { %v2002_v18 = vpop.f32.mrb[22].mxu1  ;;  %v2289_v57 = vpop.eup %2288  ;;  %v1856_v20 = vpack.c.bf16 %v1374_v9, %v1374_v9  ;;  %v1375_v19 = vmul.f32 %v2287_v12, %v2913_v24  ;;  %2306 = vpow2.f32 %v1799_v61  ;;  %v2072_v28 = vadd.f32 %v1060_v17, %v723_v55 }
 0x195   : > { %v2038_v23 = vpop.f32.mrb[22].mxu0  ;;  %v726_v25 = vpop.f32.mrb[23].mxu1  ;;  %1537 = vst.msk [vmem:[%s2961_s22 + $0x18] sm:$0xf] %vm1530_vm2, %v1858_v14  ;;  %v1859_v27 = vpack.c.bf16 %v1377_v56, %v1377_v56  ;;  %v1288_v22 = vadd.f32 1.0, %v2289_v57  ;;  %2308 = vpow2.f32 %v1802_v54  ;;  %v2996_v24 = vadd.f32 %v2071_v21, %v2883_v59 }
 0x196   : > { %v2291_v26 = vpop.eup %2290  ;;  %v1063_v29 = vpop.f32.mrb[23].mxu0  ;;  %1535 = vst.msk [vmem:[%s2961_s22 + $0x10] sm:$0xf] %vm1530_vm2, %v1856_v20  ;;  %v1857_v0 = vpack.c.bf16 %v1375_v19, %v1375_v19  ;;  %2310 = vpow2.f32 %v1800_v16  ;;  %v3001_v34 = vadd.f32 %v2072_v28, %v2883_v59  ;;  %v2073_v35 = vadd.f32 %v2038_v23, %v2002_v18 }
 0x197   : > { %v2293_v30 = vpop.eup %2292  ;;  %v1286_v31 = vadd.f32 1.0, %v2291_v26  ;;  %1538 = vst.msk [vmem:[%s2961_s22 + $0x1c] sm:$0xf] %vm1530_vm2, %v1859_v27  ;;  %2312 = vrcp.f32 %v1288_v22  ;;  %v1805_v36 = vmul.f32 -1.442695, %v2996_v24  ;;  %v2074_v38 = vadd.f32 %v1063_v29, %v726_v25 }
 0x198   : > { %v2295_v32 = vpop.eup %2294  ;;  %v1289_v33 = vadd.f32 1.0, %v2293_v30  ;;  %1536 = vst.msk [vmem:[%s2961_s22 + $0x14] sm:$0xf] %vm1530_vm2, %v1857_v0  ;;  %v1803_v6 = vmul.f32 -1.442695, %v3001_v34  ;;  %v3008_v40 = vadd.f32 %v2073_v35, %v2883_v59  ;;  %v2005_v8 = vpop.f32.mrb[24].mxu1 }
 0x199   : > { %2314 = vrcp.f32 %v1286_v31  ;;  %v1287_v3 = vadd.f32 1.0, %v2295_v32  ;;  %v2297_v39 = vpop.eup %2296  ;;  %v3012_v45 = vadd.f32 %v2074_v38, %v2883_v59  ;;  %v2041_v49 = vpop.f32.mrb[24].mxu0 }
 0x19a   : > { %2316 = vrcp.f32 %v1289_v33  ;;  %v2299_v43 = vpop.eup %2298  ;;  %v1380_v44 = vmul.f32 %v2297_v39, %v2918_v37  ;;  %v739_v50 = vpop.f32.mrb[25].mxu1  ;;  %v1806_v53 = vmul.f32 -1.442695, %v3008_v40  ;;  %v2075_v58 = vadd.f32 %v2041_v49, %v2005_v8 }
 0x19b   : > { %2318 = vrcp.f32 %v1287_v3  ;;  %v2301_v51 = vpop.eup %2300  ;;  %v1378_v52 = vmul.f32 %v2299_v43, %v2921_v42  ;;  %v1076_v60 = vpop.f32.mrb[25].mxu0  ;;  %v1804_v5 = vmul.f32 -1.442695, %v3012_v45 }
 0x19c   : > { %2320 = vpow2.f32 %v1805_v36  ;;  %v2006_v61 = vpop.f32.mrb[26].mxu1  ;;  %v2303_v63 = vpop.eup %2302  ;;  %v1862_v1 = vpack.c.bf16 %v1380_v44, %v1380_v44  ;;  %v1381_v37 = vmul.f32 %v2301_v51, %v2926_v46  ;;  %v3020_v55 = vadd.f32 %v2075_v58, %v2883_v59 }
 0x19d   : > { %2322 = vpow2.f32 %v1803_v6  ;;  %v2042_v7 = vpop.f32.mrb[26].mxu0  ;;  %v742_v9 = vpop.f32.mrb[27].mxu1  ;;  %v1860_v11 = vpack.c.bf16 %v1378_v52, %v1378_v52  ;;  %v1379_v42 = vmul.f32 %v2303_v63, %v2930_v48  ;;  %v2076_v16 = vadd.f32 %v1076_v60, %v739_v50 }
 0x19e   : > { %v2305_v54 = vpop.eup %2304  ;;  %2324 = vpow2.f32 %v1806_v53  ;;  %v1079_v12 = vpop.f32.mrb[27].mxu0  ;;  %1541 = vst.msk [vmem:[%s2961_s22 + $0x28] sm:$0xf] %vm1530_vm2, %v1862_v1  ;;  %v1863_v46 = vpack.c.bf16 %v1381_v37, %v1381_v37  ;;  %v1809_v48 = vmul.f32 -1.442695, %v3020_v55  ;;  %v2077_v20 = vadd.f32 %v2042_v7, %v2006_v61 }
 0x19f   : > { %v2307_v14 = vpop.eup %2306  ;;  %v1292_v56 = vadd.f32 1.0, %v2305_v54  ;;  %2326 = vpow2.f32 %v1804_v5  ;;  %1539 = vst.msk [vmem:[%s2961_s22 + $0x20] sm:$0xf] %vm1530_vm2, %v1860_v11  ;;  %v1861_v18 = vpack.c.bf16 %v1379_v42, %v1379_v42  ;;  %v3030_v23 = vadd.f32 %v2076_v16, %v2883_v59 }
 0x1a0   : > { %v2309_v17 = vpop.eup %2308  ;;  %v1290_v57 = vadd.f32 1.0, %v2307_v14  ;;  %1542 = vst.msk [vmem:[%s2961_s22 + $0x2c] sm:$0xf] %vm1530_vm2, %v1863_v46  ;;  %v2078_v25 = vadd.f32 %v1079_v12, %v742_v9  ;;  %v3035_v22 = vadd.f32 %v2077_v20, %v2883_v59  ;;  %v2009_v28 = vpop.f32.mrb[28].mxu1 }
 0x1a1   : > { %v2311_v19 = vpop.eup %2310  ;;  %2328 = vrcp.f32 %v1292_v56  ;;  %v1293_v21 = vadd.f32 1.0, %v2309_v17  ;;  %1540 = vst.msk [vmem:[%s2961_s22 + $0x24] sm:$0xf] %vm1530_vm2, %v1861_v18  ;;  %v1807_v0 = vmul.f32 -1.442695, %v3030_v23  ;;  %v2045_v32 = vpop.f32.mrb[28].mxu0 }
 0x1a2   : > { %v2313_v26 = vpop.eup %2312  ;;  %2330 = vrcp.f32 %v1290_v57  ;;  %v1291_v27 = vadd.f32 1.0, %v2311_v19  ;;  %v3040_v31 = vadd.f32 %v2078_v25, %v2883_v59  ;;  %v755_v33 = vpop.f32.mrb[29].mxu1  ;;  %v1810_v36 = vmul.f32 -1.442695, %v3035_v22 }
 0x1a3   : > { %v2315_v29 = vpop.eup %2314  ;;  %v1384_v30 = vmul.f32 %v2313_v26, %v2937_v4  ;;  %2332 = vrcp.f32 %v1293_v21  ;;  %v2079_v38 = vadd.f32 %v2045_v32, %v2009_v28  ;;  %v1092_v39 = vpop.f32.mrb[29].mxu0 }
 0x1a4   : > { %v2317_v35 = vpop.eup %2316  ;;  %v1382_v3 = vmul.f32 %v2315_v29, %v2941_v10  ;;  %2334 = vrcp.f32 %v1291_v27  ;;  %v2010_v6 = vpop.f32.mrb[30].mxu1  ;;  %v1808_v44 = vmul.f32 -1.442695, %v3040_v31  ;;  %v2080_v63 = vadd.f32 %v1092_v39, %v755_v33 }
 0x1a5   : > { %v2319_v8 = vpop.eup %2318  ;;  %v1866_v4 = vpack.c.bf16 %v1384_v30, %v1384_v30  ;;  %v1385_v43 = vmul.f32 %v2317_v35, %v2947_v13  ;;  %2336 = vpow2.f32 %v1809_v48  ;;  %v2046_v49 = vpop.f32.mrb[30].mxu0  ;;  %v3048_v53 = vadd.f32 %v2079_v38, %v2883_v59 }
 0x1a6   : > { %v758_v50 = vpop.f32.mrb[31].mxu1  ;;  %v2321_v51 = vpop.eup %2320  ;;  %v1864_v52 = vpack.c.bf16 %v1382_v3, %v1382_v3  ;;  %v1383_v10 = vmul.f32 %v2319_v8, %v2951_v15  ;;  %2338 = vpow2.f32 %v1807_v0  ;;  %v3058_v54 = vadd.f32 %v2080_v63, %v2883_v59 }
 0x1a7   : > { %v1095_v58 = vpop.f32.mrb[31].mxu0  ;;  %v2323_v60 = vpop.eup %2322  ;;  %1545 = vst.msk [vmem:[%s2961_s22 + $0x38] sm:$0xf] %vm1530_vm2, %v1866_v4  ;;  %v1867_v13 = vpack.c.bf16 %v1385_v43, %v1385_v43  ;;  %v1296_v61 = vadd.f32 1.0, %v2321_v51  ;;  %2340 = vpow2.f32 %v1810_v36  ;;  %v1813_v15 = vmul.f32 -1.442695, %v3048_v53 }
 0x1a8   : > { %v2325_v1 = vpop.eup %2324  ;;  %1543 = vst.msk [vmem:[%s2961_s22 + $0x30] sm:$0xf] %vm1530_vm2, %v1864_v52  ;;  %v1865_v37 = vpack.c.bf16 %v1383_v10, %v1383_v10  ;;  %v1294_v5 = vadd.f32 1.0, %v2323_v60  ;;  %2342 = vpow2.f32 %v1808_v44  ;;  %v2081_v11 = vadd.f32 %v2046_v49, %v2010_v6 }
 0x1a9   : > { %v2327_v7 = vpop.eup %2326  ;;  %1546 = vst.msk [vmem:[%s2961_s22 + $0x3c] sm:$0xf] %vm1530_vm2, %v1867_v13  ;;  %2344 = vrcp.f32 %v1296_v61  ;;  %v1297_v9 = vadd.f32 1.0, %v2325_v1  ;;  %v2082_v12 = vadd.f32 %v1095_v58, %v758_v50  ;;  %v1811_v46 = vmul.f32 -1.442695, %v3058_v54 }
 0x1aa   : > { %1544 = vst.msk [vmem:[%s2961_s22 + $0x34] sm:$0xf] %vm1530_vm2, %v1865_v37  ;;  %2346 = vrcp.f32 %v1294_v5  ;;  %v1295_v42 = vadd.f32 1.0, %v2327_v7  ;;  %v3064_v56 = vadd.f32 %v2081_v11, %v2883_v59 }
 0x1ab   : > { %v2329_v14 = vpop.eup %2328  ;;  %2348 = vrcp.f32 %v1297_v9  ;;  %v3068_v18 = vadd.f32 %v2082_v12, %v2883_v59 }
 0x1ac   : > { %v2331_v16 = vpop.eup %2330  ;;  %v1388_v17 = vmul.f32 %v2329_v14, %v2966_v41  ;;  %2350 = vrcp.f32 %v1295_v42  ;;  %v1814_v20 = vmul.f32 -1.442695, %v3064_v56 }
 0x1ad   : > { %v2333_v57 = vpop.eup %2332  ;;  %v1386_v48 = vmul.f32 %v2331_v16, %v2971_v47  ;;  %2352 = vpow2.f32 %v1813_v15  ;;  %v1812_v41 = vmul.f32 -1.442695, %v3068_v18 }
 0x1ae   : > { %v2335_v19 = vpop.eup %2334  ;;  %v1870_v21 = vpack.c.bf16 %v1388_v17, %v1388_v17  ;;  %v1389_v25 = vmul.f32 %v2333_v57, %v2980_v62  ;;  %2354 = vpow2.f32 %v1811_v46 }
 0x1af   : > { %v2337_v26 = vpop.eup %2336  ;;  %v1868_v27 = vpack.c.bf16 %v1386_v48, %v1386_v48  ;;  %v1387_v59 = vmul.f32 %v2335_v19, %v2984_v2  ;;  %2356 = vpow2.f32 %v1814_v20 }
 0x1b0   : > { %v2339_v28 = vpop.eup %2338  ;;  %1549 = vst.msk [vmem:[%s2961_s22 + $0x48] sm:$0xf] %vm1530_vm2, %v1870_v21  ;;  %v1871_v47 = vpack.c.bf16 %v1389_v25, %v1389_v25  ;;  %v1300_v29 = vadd.f32 1.0, %v2337_v26  ;;  %2358 = vpow2.f32 %v1812_v41 }
 0x1b1   : > { %v2341_v30 = vpop.eup %2340  ;;  %1547 = vst.msk [vmem:[%s2961_s22 + $0x40] sm:$0xf] %vm1530_vm2, %v1868_v27  ;;  %v1869_v62 = vpack.c.bf16 %v1387_v59, %v1387_v59  ;;  %v1298_v0 = vadd.f32 1.0, %v2339_v28 }
 0x1b2   : > { %v2343_v32 = vpop.eup %2342  ;;  %1550 = vst.msk [vmem:[%s2961_s22 + $0x4c] sm:$0xf] %vm1530_vm2, %v1871_v47  ;;  %2360 = vrcp.f32 %v1300_v29  ;;  %v1301_v33 = vadd.f32 1.0, %v2341_v30 }
 0x1b3   : > { %v2345_v35 = vpop.eup %2344  ;;  %1548 = vst.msk [vmem:[%s2961_s22 + $0x44] sm:$0xf] %vm1530_vm2, %v1869_v62  ;;  %2362 = vrcp.f32 %v1298_v0  ;;  %v1299_v2 = vadd.f32 1.0, %v2343_v32 }
 0x1b4   : > { %v2347_v3 = vpop.eup %2346  ;;  %v1392_v36 = vmul.f32 %v2345_v35, %v2996_v24  ;;  %2364 = vrcp.f32 %v1301_v33 }
 0x1b5   : > { %v2349_v38 = vpop.eup %2348  ;;  %v1390_v39 = vmul.f32 %v2347_v3, %v3001_v34  ;;  %2366 = vrcp.f32 %v1299_v2 }
 0x1b6   : > { %v2351_v6 = vpop.eup %2350  ;;  %v1874_v8 = vpack.c.bf16 %v1392_v36, %v1392_v36  ;;  %v1393_v4 = vmul.f32 %v2349_v38, %v3008_v40 }
 0x1b7   : > { %v2353_v43 = vpop.eup %2352  ;;  %v1872_v44 = vpack.c.bf16 %v1390_v39, %v1390_v39  ;;  %v1391_v49 = vmul.f32 %v2351_v6, %v3012_v45 }
 0x1b8   : > { %v2355_v50 = vpop.eup %2354  ;;  %1553 = vst.msk [vmem:[%s2961_s22 + $0x58] sm:$0xf] %vm1530_vm2, %v1874_v8  ;;  %v1875_v24 = vpack.c.bf16 %v1393_v4, %v1393_v4  ;;  %v1304_v51 = vadd.f32 1.0, %v2353_v43 }
 0x1b9   : > { %v2357_v52 = vpop.eup %2356  ;;  %1551 = vst.msk [vmem:[%s2961_s22 + $0x50] sm:$0xf] %vm1530_vm2, %v1872_v44  ;;  %v1873_v34 = vpack.c.bf16 %v1391_v49, %v1391_v49  ;;  %v1302_v10 = vadd.f32 1.0, %v2355_v50 }
 0x1ba   : > { %v2359_v58 = vpop.eup %2358  ;;  %1554 = vst.msk [vmem:[%s2961_s22 + $0x5c] sm:$0xf] %vm1530_vm2, %v1875_v24  ;;  %2368 = vrcp.f32 %v1304_v51  ;;  %v1305_v40 = vadd.f32 1.0, %v2357_v52 }
 0x1bb   : > { %1552 = vst.msk [vmem:[%s2961_s22 + $0x54] sm:$0xf] %vm1530_vm2, %v1873_v34  ;;  %2370 = vrcp.f32 %v1302_v10  ;;  %v1303_v45 = vadd.f32 1.0, %v2359_v58 }
 0x1bc   : > { %v2361_v60 = vpop.eup %2360  ;;  %2372 = vrcp.f32 %v1305_v40 }
 0x1bd   : > { %v2363_v13 = vpop.eup %2362  ;;  %v1396_v61 = vmul.f32 %v2361_v60, %v3020_v55  ;;  %2374 = vrcp.f32 %v1303_v45 }
 0x1be   : > { %v2365_v63 = vpop.eup %2364  ;;  %v1394_v1 = vmul.f32 %v2363_v13, %v3030_v23 }
 0x1bf   : > { %v2367_v37 = vpop.eup %2366  ;;  %v1878_v5 = vpack.c.bf16 %v1396_v61, %v1396_v61  ;;  %v1397_v15 = vmul.f32 %v2365_v63, %v3035_v22 }
 0x1c0   : > { %v1876_v7 = vpack.c.bf16 %v1394_v1, %v1394_v1  ;;  %v1395_v9 = vmul.f32 %v2367_v37, %v3040_v31 }
 0x1c1   : > { %1557 = vst.msk [vmem:[%s2961_s22 + $0x68] sm:$0xf] %vm1530_vm2, %v1878_v5  ;;  %v1879_v11 = vpack.c.bf16 %v1397_v15, %v1397_v15 }
 0x1c2   : > { %1555 = vst.msk [vmem:[%s2961_s22 + $0x60] sm:$0xf] %vm1530_vm2, %v1876_v7  ;;  %v1877_v55 = vpack.c.bf16 %v1395_v9, %v1395_v9 }
 0x1c3   : > { %1558 = vst.msk [vmem:[%s2961_s22 + $0x6c] sm:$0xf] %vm1530_vm2, %v1879_v11 }
 0x1c4   : > { %v2369_v42 = vpop.eup %2368  ;;  %1556 = vst.msk [vmem:[%s2961_s22 + $0x64] sm:$0xf] %vm1530_vm2, %v1877_v55 }
 0x1c5   : > { %v2371_v23 = vpop.eup %2370  ;;  %v1400_v12 = vmul.f32 %v2369_v42, %v3048_v53 }
 0x1c6   : > { %v2373_v22 = vpop.eup %2372  ;;  %v1398_v31 = vmul.f32 %v2371_v23, %v3058_v54 }
 0x1c7   : > { %v2375_v14 = vpop.eup %2374  ;;  %v1882_v46 = vpack.c.bf16 %v1400_v12, %v1400_v12  ;;  %v1401_v16 = vmul.f32 %v2373_v22, %v3064_v56 }
 0x1c8   : > { %v1880_v17 = vpack.c.bf16 %v1398_v31, %v1398_v31  ;;  %v1399_v57 = vmul.f32 %v2375_v14, %v3068_v18 }
 0x1c9   : > { %1561 = vst.msk [vmem:[%s2961_s22 + $0x78] sm:$0xf] %vm1530_vm2, %v1882_v46  ;;  %v1883_v48 = vpack.c.bf16 %v1401_v16, %v1401_v16 }
 0x1ca   : > { %1559 = vst.msk [vmem:[%s2961_s22 + $0x70] sm:$0xf] %vm1530_vm2, %v1880_v17  ;;  %v1881_v53 = vpack.c.bf16 %v1399_v57, %v1399_v57 }
 0x1cb   : > { %1562 = vst.msk [vmem:[%s2961_s22 + $0x7c] sm:$0xf] %vm1530_vm2, %v1883_v48 }
 0x1cc   : > { %1560 = vst.msk [vmem:[%s2961_s22 + $0x74] sm:$0xf] %vm1530_vm2, %v1881_v53 }
 0x1cd   : > { %2475 = shalt.err (!%p2472_p2)
}
 0x1ce   : > { %s2476_s28 = scalar_lea.hbm %s3118_s26, 2048  ;;  %s2480_s8 = scalar_lea.hbm %s3178_s3, 4096 }
 0x1cf   : > { %p2477_p0 = scmp.ne.s32.totalorder %s3118_s26, %s2476_s28  ;;  %p2481_p6 = scmp.lt.u32.totalorder %s3118_s26, %s3178_s3 }
 0x1d0   : > { %p2482_p7 = scmp.lt.u32.totalorder %s2480_s8, %s2476_s28  ;;  %p2484_p8 = scmp.lt.u32.totalorder %s2476_s28, %s3118_s26 }
 0x1d1   : > { %p2478_p4 = pnand %p2477_p0, %p3193_p12 }
 0x1d2   : > { %p2483_p11 = por %p2482_p7, %p2481_p6 }
 0x1d3   : > { %p2479_p13 = pneg %p2478_p4 }
 0x1d4   : > { %p2485_p1 = por %p2484_p8, %p2483_p11 }
 0x1d6   : > { %p2486_p10 = pnand %p2485_p1, %p2479_p13 }
 0x1d8   : > { %2489 = shalt.err (!%p2486_p10)
}
 0x1d9   : > { %s2556_s22 = smov 64   ;;  %s2557_s24 = smov 4  }
 0x1da   : > { %2132 = dma.vmem_to_hbm [thread:$0]  (%p3193_p12), %s3120_s11, 2048, %s3118_s26, %s1564_s15, %s2556_s22, %s2556_s22, %s2557_s24  }
 0x1db PF: > { %s1593_s18 = sand.u32 1, %s2528_s12   ;;  %p3194_p3 = scmp.ne.s32.totalorder %s3186_s23, 0 }
 0x1dc   : > { %p3195_p5 = scmp.ge.s32.totalorder %s2548_s17, 2  ;;  %s1594_s5 = scalar_lea.sflag [#allocation4], %s1593_s18 }
 0x1de   : > { %p2146_p9 = pnand %p3195_p5, %p3194_p3 }
 0x1e0   : > { %2523 = dma.done.wait (!%p2146_p9), %s1594_s5, 2048  }
 0x1e1   : > { %2525 = vsyncadd (!%p2146_p9), %s1594_s5, 4294965248  ;;  %s20_s17 = sadd.s32 1, %s2548_s17   ;;  %s3196_s12 = smov %s2532_s13 }
 0x1e2   : > { %p17_p2 = scmp.ge.s32.totalorder %s20_s17, 4   ;;  %s3197_s13 = smov %s2536_s14 }
 0x1e3   : > { %s3198_s14 = smov %s2727_s6  ;;  %s3199_s15 = smov %s2544_s16 }
 0x1e4   : > { %s3200_s16 = smov %s3202_s25  ;;  %19 = sbr.rel (!%p17_p2) target bundleno = 7 (0x7), region = 89 }
 0x1eb   :  { %1599 = vsyncpa [#allocation3], 1 }
 0x1ec   :  { %1601 = vsyncpa [#allocation3 + $0x1], 1 }
 0x1ed   :  { %1602 = vsyncpa [#allocation6], 1 }
 0x1ee   :  { %1603 = vsyncpa [#allocation4], 1 }
 0x1ef   :  { %1605 = vsyncpa [#allocation4 + $0x1], 1 }

// kernel: darkfpn_apply.26
= control target key start
LH: loop header
LB: loop body
LE: loop exit
PB: predicated region body
PF: predicated region fallthrough
CT: control target
= control target key end

     0   :  { %8 = vsyncpa [#allocation3], 0  ;;  %s1673_s0 = inlined_call_operand.hbm [shape: bf16[2,2,72,48], index: 0, kind: input, shape index: {}]   ;;  %s1674_s1 = inlined_call_operand.hbm [shape: bf16[3,48,16], index: 1, kind: input, shape index: {}]   ;;  %s1675_s2 = inlined_call_operand.hbm [shape: f32[1,16], index: 2, kind: input, shape index: {}]   ;;  %s1676_s3 = inlined_call_operand.hbm [shape: bf16[2,64,16], index: 3, kind: output, shape index: {}]  }
   0x1   :  { %10 = vsyncpa [#allocation3 + $0x1], 0 }
   0x2   :  { %11 = vsyncpa [#allocation6], 0 }
   0x3   :  { %12 = vsyncpa [#allocation4], 0 }
   0x4   :  { %14 = vsyncpa [#allocation4 + $0x1], 0  ;;  %s1400_s12 = smov 0   ;;  %s1402_s13 = smov 0  }
   0x5   :  { %s1404_s14 = smov 0   ;;  %s1406_s15 = smov 0  }
   0x6   :  { %s1408_s16 = smov 0   ;;  %s1410_s17 = smov 0  }
   0x7 LB: > { %s902_s18 = sadd.s32 4294967295, %s1365_s17   ;;  %s903_s19 = sadd.s32 4294967294, %s1365_s17   ;;  %s1365_s17 = sphi %s1410_s17, %s20_s17   ;;  %s1361_s16 = sphi %s1408_s16, %s1703_s16   ;;  %s1357_s15 = sphi %s1406_s15, %s1702_s15   ;;  %s1353_s14 = sphi %s1404_s14, %s1701_s14   ;;  %s1349_s13 = sphi %s1402_s13, %s1700_s13   ;;  %s1345_s12 = sphi %s1400_s12, %s1699_s12  }
   0x8   : > { %s32_s20 = sadd.s32 1, %s1361_s16  ;;  %s39_s21 = sadd.s32 1, %s1353_s14 }
   0x9   : > { %p34_p0 = scmp.ge.s32.totalorder %s32_s20, 2  ;;  %p46_p1 = scmp.ne.s32.totalorder %s1353_s14, %s1349_s13 }
   0xa   : > { %p47_p2 = scmp.eq.s32.totalorder %s1365_s17, 0  ;;  %p52_p3 = scmp.ne.s32.totalorder %s1349_s13, %s1345_s12 }
   0xb   : > { %s1705_s20 = smov (%p34_p0, %s32_s20), 0  ;;  %p1445_p5 = scmp.eq.s32.totalorder %s902_s18, 0 }
   0xc   : > { %1684 = sst [smem:[#allocation15_spill]] %s1705_s20  ;;  %p1441_p4 = por %p47_p2, %p46_p1 }
   0xd   : > { %s1686_s23 = scalar_select %p1445_p5, 1, 0 }
   0xe   : > { %s1685_s22 = scalar_select %p1441_p4, 1, 0 }
   0xf   : > { %s36_s24 = ssub.s32 %s1361_s16, %s1705_s20  ;;  %p130_p6 = scmp.eq.s32.totalorder %s902_s18, 1 }
  0x10   : > { %p37_p7 = scmp.eq.s32.totalorder %s36_s24, 0  ;;  %p1453_p8 = por %p1445_p5, %p52_p3 }
  0x11   : > { %p1457_p9 = por %p130_p6, %p46_p1  ;;  %p136_p10 = scmp.eq.s32.totalorder %s903_s19, 1 }
  0x12   : > { %s1687_s25 = scalar_select %p1453_p8, 1, 0 }
  0x13   : > { %s1688_s26 = scalar_select %p1457_p9, 1, 0 }
  0x14   : > { %s1462_s27 = scalar_select %p37_p7, %s1353_s14, %s39_s21  }
  0x15   : > { %p1464_p11 = por %p136_p10, %p52_p3  ;;  %p904_p12 = scmp.ge.s32.totalorder %s1365_s17, 1 }
  0x16   : > { %p143_p13 = scmp.lt.s32.totalorder %s1365_s17, 3  ;;  %s1367_s30 = smov [#allocation5]  }
  0x17   : > { %s1689_s28 = scalar_select %p1464_p11, 1, 0 }
  0x18   : > { %p1470_p0 = pnand %p904_p12, %p143_p13  ;;  %s157_s4 = sshll.u32 %s1367_s30, 4  ;;  %s158_s4 = int_to_ptr.vmem [resolvable:$true] %s157_s4 }
  0x19   : > { %s1368_s5 = smov [#allocation7]   ;;  %s1223_s10 = scalar_lea.hbm %s1674_s1, 1152 }
  0x1a   : > { %s1690_s29 = scalar_select %p1470_p0, 1, 0 }
  0x1b   : > { %p1094_p1 = pneg %p1470_p0  ;;  %s173_s6 = sshll.u32 %s1368_s5, 4  ;;  %s1482_s6 = int_to_ptr.vmem [resolvable:$true] %s173_s6 }
  0x1c   : > { %p1224_p3 = scmp.ne.s32.totalorder %s1674_s1, %s1223_s10  ;;  %p1230_p12 = scmp.lt.u32.totalorder %s1223_s10, %s1674_s1 }
  0x1d   : > { %p1478_p2 = pnand %p1094_p1, %p1445_p5 }
  0x1f   : > { %p1225_p6 = pneg %p1478_p2 }
  0x21   : > { %p1226_p7 = pnand %p1225_p6, %p1224_p3 }
  0x23   : > { %p1227_p10 = pneg %p1226_p7 }
  0x25   : > { %p1232_p13 = pnand %p1230_p12, %p1227_p10 }
  0x27   : > { %1235 = shalt.err (!%p1232_p13)
}
  0x28   : > { %s1236_s24 = scalar_lea.vmem %s158_s4, 1152  ;;  %p1244_p5 = scmp.lt.s32.totalorder %s158_s4, %s158_s4 }
  0x29   : > { %p1237_p1 = scmp.ne.s32.totalorder %s158_s4, %s1236_s24  ;;  %p1245_p8 = scmp.lt.s32.totalorder %s1236_s24, %s1236_s24 }
  0x2b   : > { %p1239_p11 = pnand %p1237_p1, %p1225_p6  ;;  %p1246_p0 = por %p1245_p8, %p1244_p5 }
  0x2d   : > { %p1240_p9 = pneg %p1239_p11 }
  0x2f   : > { %p1247_p4 = pnand %p1246_p0, %p1240_p9 }
  0x31   : > { %1250 = shalt.err (!%p1247_p4)
}
  0x32   : > { %s1369_s30 = smov 64   ;;  %s1370_s5 = smov 4  }
  0x33   : > { %1097 = dma.hbm_to_vmem [thread:$0]  (!%p1478_p2), %s1674_s1, 1152, %s158_s4, [#allocation6], %s1369_s30, %s1369_s30, %s1370_s5  }
  0x34   : > { %s1251_s18 = scalar_lea.hbm %s1675_s2, 16 }
  0x35   : > { %p1252_p11 = scmp.ne.s32.totalorder %s1675_s2, %s1251_s18  ;;  %p1258_p8 = scmp.lt.u32.totalorder %s1251_s18, %s1675_s2 }
  0x37   : > { %p1254_p4 = pnand %p1252_p11, %p1225_p6 }
  0x39   : > { %p1255_p5 = pneg %p1254_p4 }
  0x3b   : > { %p1260_p9 = pnand %p1258_p8, %p1255_p5 }
  0x3d   : > { %1263 = shalt.err (!%p1260_p9)
}
  0x3e   : > { %s1264_s4 = scalar_lea.vmem %s1482_s6, 16  ;;  %s1271_s30 = scalar_lea.vmem %s1482_s6, 32 }
  0x3f   : > { %p1265_p0 = scmp.ne.s32.totalorder %s1482_s6, %s1264_s4  ;;  %p1272_p10 = scmp.lt.s32.totalorder %s1482_s6, %s1482_s6 }
  0x40   : > { %p1273_p12 = scmp.lt.s32.totalorder %s1271_s30, %s1264_s4 }
  0x41   : > { %p1267_p3 = pnand %p1265_p0, %p1225_p6 }
  0x42   : > { %p1274_p13 = por %p1273_p12, %p1272_p10 }
  0x43   : > { %p1268_p7 = pneg %p1267_p3 }
  0x45   : > { %p1275_p1 = pnand %p1274_p13, %p1268_p7 }
  0x47   : > { %1278 = shalt.err (!%p1275_p1)
}
  0x48   : > { %1100 = dma.hbm_to_vmem [thread:$0]  (!%p1478_p2), %s1675_s2, 16, %s1482_s6, [#allocation6]  }
  0x49   : > { %p907_p11 = scmp.ge.s32.totalorder %s1365_s17, 2 }
  0x4b   : > { %180 = sbr.rel (%p907_p11) target bundleno = 98 (0x62), region = 24 }
  0x52   : > { %s184_s8 = sand.u32 1, %s1353_s14   ;;  %s1073_s9 = smul.u32 576, %s1361_s16 }
  0x53   : > { %s1072_s7 = smul.u32 72, %s184_s8  ;;  %s1371_s10 = smov 1152  }
  0x54   : > { %p1692_p6 = scmp.ne.s32.totalorder %s1685_s22, 0  ;;  %s194_s19 = scalar_lea.hbm %s1673_s0, %s1073_s9 }
  0x55   : > { %s188_s24 = scalar_lea.vmem [#allocation2], %s1072_s7  ;;  %s1372_s30 = smov 576  }
  0x56   : > { %1080 = sst [smem:[#allocation10]] (%p1692_p6), %s1371_s10  ;;  %s207_s4 = sshll.u32 %s188_s24, 4  ;;  %s208_s4 = int_to_ptr.vmem [resolvable:$true] %s207_s4 }
  0x57   : > { %s1079_s6 = scalar_select %p1692_p6, [#allocation0], [#allocation11] }
  0x58   : > { %1081 = sst [smem:[#allocation10 + $0x1]] (%p1692_p6), %s1372_s30  ;;  %s1373_s20 = smov 9  }
  0x59   : > { %s199_s21 = sld [smem:[%s1079_s6]]   ;;  %s1374_s5 = smov 64  }
  0x5a   : > { %1082 = sst [smem:[#allocation10 + $0x2]] (%p1692_p6), %s1373_s20  ;;  %s1375_s10 = smov 4  }
  0x5b   : > { %1083 = sst [smem:[#allocation10 + $0x3]] (%p1692_p6), %s1374_s5  ;;  %s185_s7 = scalar_lea.sflag [#allocation3], %s184_s8 }
  0x5c   : > { %1084 = sst [smem:[#allocation10 + $0x4]] (%p1692_p6), %s1374_s5  ;;  %s1376_s11 = smov [#allocation9]  }
  0x5d   : > { %1085 = sst [smem:[#allocation10 + $0x5]] (%p1692_p6), %s1375_s10 }
  0x5f   : > { %s909_s9 = sshll.u32 %s199_s21, 26 }
  0x60   : > { %s910_s6 = sadd.s32 134217728, %s909_s9 }
  0x61   : > { %1086 = dma.general (%p1692_p6), %s194_s19, 1152, %s208_s4, %s185_s7, %s1376_s11, [#allocation10], %s910_s6, 0  }
  0x62 PF: > { %p1693_p2 = scmp.ne.s32.totalorder %s1690_s29, 0 }
  0x63   : > { %s1559_s18 = sand.u32 (!%p1693_p2), 1, %s1349_s13   ;;  %p1694_p4 = scmp.ne.s32.totalorder (!%p1693_p2), %s1687_s25, 0 }
  0x64   : > { %232 = sbr.rel (%p1693_p2) target bundleno = 408 (0x198), region = 32  ;;  %s235_s30 = scalar_lea.sflag (!%p1693_p2), [#allocation3], %s1559_s18 }
  0x65   : > { %s1074_s24 = smul.u32 (!%p1693_p2), 72, %s1559_s18 }
  0x67   : > { %s1563_s20 = scalar_lea.vmem (!%p1693_p2), [#allocation2], %s1074_s24 }
  0x6b   : > { %1332 = dma.done.wait (%p1694_p4), %s235_s30, 1152  }
  0x6c   : > { %1334 = vsyncadd (%p1694_p4), %s235_s30, 4294966144  ;;  %p1695_p5 = scmp.ne.s32.totalorder %s1686_s23, 0 }
  0x6e   : > { %1336 = dma.done.wait (%p1695_p5), [#allocation6], 1168  }
  0x6f   : > { %1338 = vsyncadd (%p1695_p5), [#allocation6], 4294966128  ;;  %v1170_v0 = vld [vmem:[#allocation5 + $0x18] sm:$0xff]   ;;  %v1171_v1 = vld [vmem:[#allocation5] sm:$0xff]   ;;  %vm338_vm0 = vcmask 392192   ;;  %s914_s22 = sshll.u32 %s1559_s18, 5 }
  0x70   : > { %1008 = vmatprep.subr.bf16.mxu1 %v1170_v0  ;;  %v1172_v2 = vld [vmem:[#allocation5 + $0x20] sm:$0xff]   ;;  %1022 = vmatprep.subr.bf16.mxu0 %v1171_v1  ;;  %v1173_v3 = vld [vmem:[#allocation5 + $0x8] sm:$0xff]   ;;  %v1175_v5 = vld [vmem:[#allocation5 + $0x10] sm:$0xff]   ;;  %vm772_vm1 = vcmask 125952   ;;  %s268_s23 = scalar_lea.vmem [#allocation8], %s914_s22  ;;  %s986_s25 = sshll.u32 %s1357_s15, 9 }
  0x71   : > { %1009 = vmatpush3.bf16.msra.mxu1 %v1170_v0  ;;  %1023 = vmatpush3.bf16.msra.mxu0 %v1171_v1  ;;  %v1174_v4 = vld [vmem:[#allocation5 + $0x28] sm:$0xff]   ;;  %v1176_v6 = vld [vmem:[%s1563_s20 + $0x24] sm:$0xff]   ;;  %s796_s29 = sshll.u32 %s268_s23, 4  ;;  %s1619_s15 = scalar_lea.hbm %s1676_s3, %s986_s25  ;;  %s1621_s29 = int_to_ptr.vmem [resolvable:$true] %s796_s29 }
  0x72   : > { %1010 = vmatprep.subr.bf16.mxu1 %v1172_v2  ;;  %1024 = vmatprep.subr.bf16.mxu0 %v1173_v3  ;;  %v1177_v7 = vld [vmem:[%s1563_s20] sm:$0xff]   ;;  %v1178_v8 = vld [vmem:[%s1563_s20 + $0x2c] sm:$0xff]   ;;  %v1182_v12 = vld [vmem:[%s1563_s20 + $0x34] sm:$0xff]   ;;  %s782_s21 = scalar_lea.sflag [#allocation4], %s1559_s18  ;;  %s1279_s4 = scalar_lea.vmem %s1621_s29, 512 }
  0x73   : > { %1014 = vmatprep.mubr.msk.bf16.mxu1 %vm338_vm0, %v1176_v6  ;;  %1028 = vmatprep.mubr.msk.bf16.mxu0 %vm338_vm0, %v1177_v7  ;;  %v1180_v9 = vld [vmem:[#allocation5 + $0x30] sm:$0xff]   ;;  %v1179_v10 = vld [vmem:[%s1563_s20 + $0x8] sm:$0xff]   ;;  %v1183_v13 = vld [vmem:[%s1563_s20 + $0x10] sm:$0xff]   ;;  %p1280_p8 = scmp.ne.s32.totalorder %s1621_s29, %s1279_s4  ;;  %p1696_p9 = scmp.ne.s32.totalorder %s1688_s26, 0 }
  0x74   : > { %v1181_v11 = vld [vmem:[#allocation5 + $0x38] sm:$0xff]   ;;  %v1186_v14 = vld [vmem:[#allocation5 + $0x40] sm:$0xff]   ;;  %v1185_v16 = vld [vmem:[%s1563_s20 + $0x18] sm:$0xff]   ;;  %s1377_s5 = smov [#allocation8]  }
  0x75   : > { %1011 = vmatpush3.bf16.msra.mxu1 %v1172_v2  ;;  %1025 = vmatpush3.bf16.msra.mxu0 %v1173_v3  ;;  %v1184_v15 = vld [vmem:[%s1563_s20 + $0x3c] sm:$0xff]   ;;  %v1187_v17 = vld [vmem:[%s1563_s20 + $0x4] sm:$0xff]   ;;  %v1188_v18 = vld [vmem:[%s1563_s20 + $0x14] sm:$0xff]   ;;  %p1281_p0 = pnand %p1280_p8, %p1696_p9  ;;  %s1283_s10 = sshll.u32 %s1377_s5, 4  ;;  %s1284_s10 = int_to_ptr.vmem [resolvable:$false] %s1283_s10 }
  0x76   : > { %1012 = vmatprep.subr.bf16.mxu1 %v1174_v4  ;;  %1026 = vmatprep.subr.bf16.mxu0 %v1175_v5  ;;  %v1190_v19 = vld [vmem:[%s1563_s20 + $0x1c] sm:$0xff]   ;;  %v1189_v20 = vld [vmem:[%s1563_s20 + $0xc] sm:$0xff]   ;;  %s1285_s9 = scalar_lea.vmem %s1284_s10, 1024  ;;  %p1286_p7 = scmp.lt.s32.totalorder %s1621_s29, %s1284_s10 }
  0x77   : > { %v956_v37 = vld [vmem:[#allocation7] ss:$0 sm:$0xff]  ;;  %p1282_p3 = pneg %p1281_p0  ;;  %p1287_p10 = scmp.lt.s32.totalorder %s1285_s9, %s1279_s4 }
  0x79   : > { %1013 = vmatpush3.bf16.msra.mxu1 %v1174_v4  ;;  %1027 = vmatpush3.bf16.msra.mxu0 %v1175_v5  ;;  %p1288_p12 = por %p1287_p10, %p1286_p7 }
  0x7a   : > { %1050 = vmatprep.subr.bf16.mxu1 %v1180_v9  ;;  %1036 = vmatprep.subr.bf16.mxu0 %v1180_v9 }
  0x7b   : > { %p1289_p13 = pnand %p1288_p12, %p1282_p3 }
  0x7c   : > { %1015 = vmatmul.mubr.msk.bf16.vlgmr.msra.gmra.mrb[0].mxu1 %vm338_vm0, %v1178_v8  ;;  %1029 = vmatmul.mubr.msk.bf16.vlgmr.msra.gmra.mrb[0].mxu0 %vm338_vm0, %v1179_v10 }
  0x7d   : > { %1053 = vmatpush3.bf16.msra.mxu1 %v1180_v9  ;;  %1037 = vmatpush3.bf16.msra.mxu0 %v1180_v9 }
  0x7e   : > { %1051 = vmatprep.subr.bf16.mxu1 %v1181_v11  ;;  %1038 = vmatprep.subr.bf16.mxu0 %v1181_v11 }
  0x7f   : > { %1018 = vmatprep.mubr.msk.bf16.mxu1 %vm338_vm0, %v1182_v12  ;;  %1032 = vmatprep.mubr.msk.bf16.mxu0 %vm338_vm0, %v1183_v13 }
  0x81   : > { %1054 = vmatpush3.bf16.msra.mxu1 %v1181_v11  ;;  %1039 = vmatpush3.bf16.msra.mxu0 %v1181_v11 }
  0x82   : > { %1052 = vmatprep.subr.bf16.mxu1 %v1186_v14  ;;  %1040 = vmatprep.subr.bf16.mxu0 %v1186_v14 }
  0x84   : > { %1019 = vmatmul.mubr.msk.bf16.gmra.mrb[4].mxu1 %vm338_vm0, %v1184_v15  ;;  %1033 = vmatmul.mubr.msk.bf16.gmra.mrb[4].mxu0 %vm338_vm0, %v1185_v16 }
  0x85   : > { %1055 = vmatpush3.bf16.msra.mxu1 %v1186_v14  ;;  %1041 = vmatpush3.bf16.msra.mxu0 %v1186_v14 }
  0x86   : > { %1042 = vmatprep.mubr.msk.bf16.mxu0 %vm338_vm0, %v1187_v17  ;;  %1046 = vmatprep.mubr.msk.bf16.mxu1 %vm338_vm0, %v1188_v18 }
  0x8c   : > { %1047 = vmatmul.mubr.msk.bf16.vlgmr.msra.gmra.mrb[8].mxu1 %vm338_vm0, %v1190_v19  ;;  %1043 = vmatmul.mubr.msk.bf16.vlgmr.msra.gmra.mrb[0].mxu0 %vm338_vm0, %v1189_v20 }
 0x14f   : > { %v1016_v21 = vpop.f32.mrb[0].mxu1 }
 0x150   : > { %v385_v22 = vpop.f32.mrb[1].mxu1 }
 0x151   : > { %v1017_v23 = vpop.f32.mrb[2].mxu1 }
 0x152   : > { %v388_v24 = vpop.f32.mrb[3].mxu1 }
 0x157   : > { %v1020_v25 = vpop.f32.mrb[4].mxu1  ;;  %v1034_v26 = vpop.f32.mrb[4].mxu0 }
 0x158   : > { %v401_v27 = vpop.f32.mrb[5].mxu1  ;;  %v525_v28 = vadd.f32 %v1034_v26, %v1020_v25  ;;  %v516_v29 = vpop.f32.mrb[5].mxu0 }
 0x159   : > { %v1021_v30 = vpop.f32.mrb[6].mxu1  ;;  %v517_v31 = vadd.f32 %v516_v29, %v401_v27  ;;  %v1035_v32 = vpop.f32.mrb[6].mxu0 }
 0x15a   : > { %v404_v33 = vpop.f32.mrb[7].mxu1  ;;  %v528_v34 = vadd.f32 %v1035_v32, %v1021_v30  ;;  %v519_v35 = vpop.f32.mrb[7].mxu0 }
 0x15b   : > { %v520_v36 = vadd.f32 %v519_v35, %v404_v33 }
 0x15f   : > { %v1048_v38 = vpop.f32.mrb[8].mxu1  ;;  %v1044_v39 = vpop.f32.mrb[0].mxu0 }
 0x160   : > { %v667_v40 = vadd.f32 %v1048_v38, %v525_v28  ;;  %v646_v41 = vpop.f32.mrb[9].mxu1  ;;  %v1056_v42 = vadd.f32 %v1044_v39, %v1016_v21  ;;  %v630_v43 = vpop.f32.mrb[1].mxu0 }
 0x161   : > { %v665_v44 = vadd.f32 %v646_v41, %v517_v31  ;;  %v1049_v45 = vpop.f32.mrb[10].mxu1  ;;  %v1057_v47 = vadd.f32 %v630_v43, %v385_v22  ;;  %v1045_v48 = vpop.f32.mrb[2].mxu0 }
 0x162   : > { %v682_v46 = vadd.f32 %v956_v37, %v667_v40  ;;  %v668_v49 = vadd.f32 %v1049_v45, %v528_v34  ;;  %v649_v50 = vpop.f32.mrb[11].mxu1  ;;  %v678_v51 = vadd.f32 %v1056_v42, %v956_v37  ;;  %v1058_v53 = vadd.f32 %v1045_v48, %v1017_v23  ;;  %v633_v54 = vpop.f32.mrb[3].mxu0 }
 0x163   : > { %v680_v52 = vadd.f32 %v956_v37, %v665_v44  ;;  %v666_v55 = vadd.f32 %v649_v50, %v520_v36  ;;  %v676_v57 = vadd.f32 %v1057_v47, %v956_v37  ;;  %v1059_v59 = vadd.f32 %v633_v54, %v388_v24 }
 0x164   : > { %v963_v56 = vmul.f32 -1.442695, %v682_v46  ;;  %v1597_v58 = vadd.f32 %v956_v37, %v668_v49  ;;  %v959_v60 = vmul.f32 -1.442695, %v678_v51  ;;  %v679_v62 = vadd.f32 %v1058_v53, %v956_v37 }
 0x165   : > { %v961_v61 = vmul.f32 -1.442695, %v680_v52  ;;  %v1599_v63 = vadd.f32 %v956_v37, %v666_v55  ;;  %v957_v0 = vmul.f32 -1.442695, %v676_v57  ;;  %v1601_v1 = vadd.f32 %v1059_v59, %v956_v37 }
 0x166   : > { %1191 = vpow2.f32 %v963_v56  ;;  %v960_v2 = vmul.f32 -1.442695, %v679_v62  ;;  %v964_v3 = vmul.f32 -1.442695, %v1597_v58 }
 0x167   : > { %1193 = vpow2.f32 %v959_v60  ;;  %v958_v4 = vmul.f32 -1.442695, %v1601_v1  ;;  %v962_v5 = vmul.f32 -1.442695, %v1599_v63 }
 0x168   : > { %1195 = vpow2.f32 %v957_v0 }
 0x169   : > { %1197 = vpow2.f32 %v961_v61 }
 0x16a   : > { %1199 = vpow2.f32 %v960_v2 }
 0x16b   : > { %1201 = vpow2.f32 %v964_v3 }
 0x16c   : > { %1203 = vpow2.f32 %v958_v4 }
 0x16d   : > { %1205 = vpow2.f32 %v962_v5 }
 0x170   : > { %v1192_v6 = vpop.eup %1191 }
 0x171   : > { %v1194_v7 = vpop.eup %1193  ;;  %v714_v8 = vadd.f32 1.0, %v1192_v6 }
 0x172   : > { %v1196_v9 = vpop.eup %1195  ;;  %v710_v10 = vadd.f32 1.0, %v1194_v7 }
 0x173   : > { %v1198_v11 = vpop.eup %1197  ;;  %1207 = vrcp.f32 %v714_v8  ;;  %v708_v12 = vadd.f32 1.0, %v1196_v9 }
 0x174   : > { %v1200_v13 = vpop.eup %1199  ;;  %1209 = vrcp.f32 %v710_v10  ;;  %v712_v14 = vadd.f32 1.0, %v1198_v11 }
 0x175   : > { %v1202_v15 = vpop.eup %1201  ;;  %1211 = vrcp.f32 %v708_v12  ;;  %v711_v16 = vadd.f32 1.0, %v1200_v13 }
 0x176   : > { %v1204_v17 = vpop.eup %1203  ;;  %1213 = vrcp.f32 %v712_v14  ;;  %v715_v18 = vadd.f32 1.0, %v1202_v15 }
 0x177   : > { %v1206_v19 = vpop.eup %1205  ;;  %1215 = vrcp.f32 %v711_v16  ;;  %v709_v20 = vadd.f32 1.0, %v1204_v17 }
 0x178   : > { %1217 = vrcp.f32 %v715_v18  ;;  %v713_v21 = vadd.f32 1.0, %v1206_v19 }
 0x179   : > { %1219 = vrcp.f32 %v709_v20 }
 0x17a   : > { %1221 = vrcp.f32 %v713_v21 }
 0x17d   : > { %v1208_v22 = vpop.eup %1207 }
 0x17e   : > { %v1210_v23 = vpop.eup %1209  ;;  %v738_v24 = vmul.f32 %v1208_v22, %v682_v46 }
 0x17f   : > { %v1212_v25 = vpop.eup %1211  ;;  %v734_v26 = vmul.f32 %v1210_v23, %v678_v51 }
 0x180   : > { %v1214_v27 = vpop.eup %1213  ;;  %v984_v28 = vpack.c.bf16 %v738_v24, %v738_v24  ;;  %v732_v29 = vmul.f32 %v1212_v25, %v676_v57 }
 0x181   : > { %v1216_v30 = vpop.eup %1215  ;;  %v980_v31 = vpack.c.bf16 %v734_v26, %v734_v26  ;;  %v736_v32 = vmul.f32 %v1214_v27, %v680_v52 }
 0x182   : > { %v1218_v33 = vpop.eup %1217  ;;  %779 = vst.msk [vmem:[%s268_s23 + $0x18] sm:$0xf] %vm772_vm1, %v984_v28  ;;  %v978_v34 = vpack.c.bf16 %v732_v29, %v732_v29  ;;  %v735_v35 = vmul.f32 %v1216_v30, %v679_v62 }
 0x183   : > { %v1220_v36 = vpop.eup %1219  ;;  %775 = vst.msk [vmem:[%s268_s23 + $0x8] sm:$0xf] %vm772_vm1, %v980_v31  ;;  %v982_v37 = vpack.c.bf16 %v736_v32, %v736_v32  ;;  %v739_v38 = vmul.f32 %v1218_v33, %v1597_v58 }
 0x184   : > { %v1222_v39 = vpop.eup %1221  ;;  %773 = vst.msk [vmem:[%s268_s23] sm:$0xf] %vm772_vm1, %v978_v34  ;;  %v981_v40 = vpack.c.bf16 %v735_v35, %v735_v35  ;;  %v733_v41 = vmul.f32 %v1220_v36, %v1601_v1 }
 0x185   : > { %777 = vst.msk [vmem:[%s268_s23 + $0x10] sm:$0xf] %vm772_vm1, %v982_v37  ;;  %v985_v42 = vpack.c.bf16 %v739_v38, %v739_v38  ;;  %v737_v43 = vmul.f32 %v1222_v39, %v1599_v63 }
 0x186   : > { %776 = vst.msk [vmem:[%s268_s23 + $0xc] sm:$0xf] %vm772_vm1, %v981_v40  ;;  %v979_v44 = vpack.c.bf16 %v733_v41, %v733_v41 }
 0x187   : > { %780 = vst.msk [vmem:[%s268_s23 + $0x1c] sm:$0xf] %vm772_vm1, %v985_v42  ;;  %v983_v45 = vpack.c.bf16 %v737_v43, %v737_v43 }
 0x188   : > { %774 = vst.msk [vmem:[%s268_s23 + $0x4] sm:$0xf] %vm772_vm1, %v979_v44 }
 0x189   : > { %778 = vst.msk [vmem:[%s268_s23 + $0x14] sm:$0xf] %vm772_vm1, %v983_v45 }
 0x18a   : > { %1292 = shalt.err (!%p1289_p13)
}
 0x18b   : > { %s1293_s6 = scalar_lea.hbm %s1619_s15, 512  ;;  %s1297_s24 = scalar_lea.hbm %s1676_s3, 1024 }
 0x18c   : > { %p1294_p1 = scmp.ne.s32.totalorder %s1619_s15, %s1293_s6  ;;  %p1298_p4 = scmp.lt.u32.totalorder %s1619_s15, %s1676_s3 }
 0x18d   : > { %p1299_p5 = scmp.lt.u32.totalorder %s1297_s24, %s1293_s6  ;;  %p1301_p0 = scmp.lt.u32.totalorder %s1293_s6, %s1619_s15 }
 0x18e   : > { %p1295_p6 = pnand %p1294_p1, %p1696_p9 }
 0x18f   : > { %p1300_p8 = por %p1299_p5, %p1298_p4 }
 0x190   : > { %p1296_p2 = pneg %p1295_p6 }
 0x191   : > { %p1302_p3 = por %p1301_p0, %p1300_p8 }
 0x193   : > { %p1303_p7 = pnand %p1302_p3, %p1296_p2 }
 0x195   : > { %1306 = shalt.err (!%p1303_p7)
}
 0x196   : > { %s1378_s22 = smov 64   ;;  %s1379_s23 = smov 4  }
 0x197   : > { %1092 = dma.vmem_to_hbm [thread:$0]  (%p1696_p9), %s1621_s29, 512, %s1619_s15, %s782_s21, %s1378_s22, %s1378_s22, %s1379_s23  }
 0x198 PF: > { %s811_s25 = sand.u32 1, %s1345_s12   ;;  %p1697_p10 = scmp.ne.s32.totalorder %s1689_s28, 0 }
 0x199   : > { %s812_s8 = scalar_lea.sflag [#allocation4], %s811_s25 }
 0x19a   : > { %p1102_p12 = pnand %p907_p11, %p1697_p10 }
 0x19c   : > { %1340 = dma.done.wait (!%p1102_p12), %s812_s8, 512  }
 0x19d   : > { %1342 = vsyncadd (!%p1102_p12), %s812_s8, 4294966784  ;;  %s20_s17 = sadd.s32 1, %s1365_s17   ;;  %s1698_s26 = sld [smem:[#allocation15_spill]] }
 0x19e   : > { %p17_p13 = scmp.ge.s32.totalorder %s20_s17, 4   ;;  %s1699_s12 = smov %s1349_s13 }
 0x19f   : > { %s1700_s13 = smov %s1353_s14  ;;  %s1701_s14 = smov %s1462_s27 }
 0x1a0   : > { %s1702_s15 = smov %s1361_s16  ;;  %19 = sbr.rel (!%p17_p13) target bundleno = 7 (0x7), region = 95 }
 0x1a3   : > { %s1703_s16 = smov %s1698_s26 }
 0x1a7   :  { %817 = vsyncpa [#allocation3], 1 }
 0x1a8   :  { %819 = vsyncpa [#allocation3 + $0x1], 1 }
 0x1a9   :  { %820 = vsyncpa [#allocation6], 1 }
 0x1aa   :  { %821 = vsyncpa [#allocation4], 1 }
 0x1ab   :  { %823 = vsyncpa [#allocation4 + $0x1], 1 }

// kernel: darkfpn_apply.25
= control target key start
LH: loop header
LB: loop body
LE: loop exit
PB: predicated region body
PF: predicated region fallthrough
CT: control target
= control target key end

     0   :  { %10 = vsyncpa [#allocation3], 0  ;;  %s3814_s0 = inlined_call_operand.hbm [shape: bf16[512,16], index: 0, kind: input, shape index: {}]   ;;  %s3815_s1 = inlined_call_operand.hbm [shape: bf16[512,8], index: 1, kind: input, shape index: {}]   ;;  %s3816_s2 = inlined_call_operand.hbm [shape: bf16[16,16], index: 2, kind: input, shape index: {}]   ;;  %s3817_s3 = inlined_call_operand.hbm [shape: bf16[8,16], index: 3, kind: input, shape index: {}]   ;;  %s3818_s4 = inlined_call_operand.hbm [shape: f32[1,16], index: 4, kind: input, shape index: {}]   ;;  %s3819_s5 = inlined_call_operand.hbm [shape: bf16[512,16], index: 5, kind: output, shape index: {}]  }
   0x1   :  { %11 = vsyncpa [#allocation6], 0 }
   0x2   :  { %12 = vsyncpa [#allocation9], 0 }
   0x3   :  { %13 = vsyncpa [#allocation4], 0  ;;  %s3233_s18 = smov [#allocation5]   ;;  %s3234_s20 = smov [#allocation8]  }
   0x4   :  { %s31_s19 = sshll.u32 %s3233_s18, 4  ;;  %s56_s21 = sshll.u32 %s3234_s20, 4  ;;  %s32_s19 = int_to_ptr.vmem [resolvable:$true] %s31_s19  ;;  %s57_s21 = int_to_ptr.vmem [resolvable:$true] %s56_s21 }
   0x5   :  { %s3093_s24 = scalar_lea.hbm %s3815_s1, 4096 }
   0x6   :  { %p3094_p0 = scmp.ne.s32.totalorder %s3815_s1, %s3093_s24  ;;  %p3097_p1 = scmp.lt.u32.totalorder %s3093_s24, %s3815_s1 }
   0x8   :  { %p3099_p2 = pnand %p3097_p1, %p3094_p0 }
   0xa   :  { %3102 = shalt.err (!%p3099_p2)
}
   0xb   :  { %s3103_s29 = scalar_lea.vmem %s32_s19, 4096  ;;  %p3108_p4 = scmp.lt.s32.totalorder %s32_s19, %s32_s19 }
   0xc   :  { %p3104_p3 = scmp.ne.s32.totalorder %s32_s19, %s3103_s29  ;;  %p3109_p5 = scmp.lt.s32.totalorder %s3103_s29, %s3103_s29 }
   0xe   :  { %p3110_p6 = por %p3109_p5, %p3108_p4 }
  0x10   :  { %p3111_p7 = pnand %p3110_p6, %p3104_p3 }
  0x12   :  { %3114 = shalt.err (!%p3111_p7)
}
  0x13   :  { %s3235_s30 = smov 64   ;;  %s3236_s6 = smov 4  }
  0x14   :  { %37 = dma.hbm_to_vmem [thread:$0]  %s3815_s1, 4096, %s32_s19, [#allocation6], %s3235_s30, %s3235_s30, %s3236_s6  }
  0x15   :  { %s3115_s11 = scalar_lea.hbm %s3817_s3, 64 }
  0x16   :  { %p3116_p8 = scmp.ne.s32.totalorder %s3817_s3, %s3115_s11  ;;  %p3119_p9 = scmp.lt.u32.totalorder %s3115_s11, %s3817_s3 }
  0x18   :  { %p3121_p10 = pnand %p3119_p9, %p3116_p8 }
  0x1a   :  { %3124 = shalt.err (!%p3121_p10)
}
  0x1b   :  { %s3125_s16 = scalar_lea.vmem %s57_s21, 64  ;;  %p3130_p12 = scmp.lt.s32.totalorder %s57_s21, %s57_s21 }
  0x1c   :  { %p3126_p11 = scmp.ne.s32.totalorder %s57_s21, %s3125_s16  ;;  %p3131_p13 = scmp.lt.s32.totalorder %s3125_s16, %s3125_s16 }
  0x1e   :  { %p3132_p0 = por %p3131_p13, %p3130_p12 }
  0x20   :  { %p3133_p1 = pnand %p3132_p0, %p3126_p11 }
  0x22   :  { %3136 = shalt.err (!%p3133_p1)
}
  0x23   :  { %59 = dma.hbm_to_vmem [thread:$0]  %s3817_s3, 64, %s57_s21, [#allocation9]  }
  0x24   :  { %s3237_s18 = smov [#allocation2]   ;;  %s3238_s20 = smov [#allocation7]  }
  0x25   :  { %s19_s19 = sshll.u32 %s3237_s18, 4  ;;  %s43_s22 = sshll.u32 %s3238_s20, 4  ;;  %s20_s19 = int_to_ptr.vmem [resolvable:$true] %s19_s19  ;;  %s3298_s22 = int_to_ptr.vmem [resolvable:$true] %s43_s22 }
  0x26   :  { %s3137_s25 = scalar_lea.hbm %s3814_s0, 4096 }
  0x27   :  { %p3138_p2 = scmp.ne.s32.totalorder %s3814_s0, %s3137_s25  ;;  %p3141_p3 = scmp.lt.u32.totalorder %s3137_s25, %s3814_s0 }
  0x29   :  { %p3143_p4 = pnand %p3141_p3, %p3138_p2 }
  0x2b   :  { %3146 = shalt.err (!%p3143_p4)
}
  0x2c   :  { %s3147_s3 = scalar_lea.vmem %s20_s19, 4096  ;;  %p3152_p6 = scmp.lt.s32.totalorder %s20_s19, %s20_s19 }
  0x2d   :  { %p3148_p5 = scmp.ne.s32.totalorder %s20_s19, %s3147_s3  ;;  %p3153_p7 = scmp.lt.s32.totalorder %s3147_s3, %s3147_s3 }
  0x2f   :  { %p3154_p8 = por %p3153_p7, %p3152_p6 }
  0x31   :  { %p3155_p9 = pnand %p3154_p8, %p3148_p5 }
  0x33   :  { %3158 = shalt.err (!%p3155_p9)
}
  0x34   :  { %25 = dma.hbm_to_vmem [thread:$0]  %s3814_s0, 4096, %s20_s19, [#allocation3], %s3235_s30, %s3235_s30, %s3236_s6  }
  0x35   :  { %s3159_s10 = scalar_lea.hbm %s3816_s2, 128 }
  0x36   :  { %p3160_p10 = scmp.ne.s32.totalorder %s3816_s2, %s3159_s10  ;;  %p3163_p11 = scmp.lt.u32.totalorder %s3159_s10, %s3816_s2 }
  0x38   :  { %p3165_p12 = pnand %p3163_p11, %p3160_p10 }
  0x3a   :  { %3168 = shalt.err (!%p3165_p12)
}
  0x3b   :  { %s3169_s15 = scalar_lea.vmem %s3298_s22, 128  ;;  %p3174_p0 = scmp.lt.s32.totalorder %s3298_s22, %s3298_s22 }
  0x3c   :  { %p3170_p13 = scmp.ne.s32.totalorder %s3298_s22, %s3169_s15  ;;  %p3175_p1 = scmp.lt.s32.totalorder %s3169_s15, %s3169_s15 }
  0x3e   :  { %p3176_p2 = por %p3175_p1, %p3174_p0 }
  0x40   :  { %p3177_p3 = pnand %p3176_p2, %p3170_p13 }
  0x42   :  { %3180 = shalt.err (!%p3177_p3)
}
  0x43   :  { %49 = dma.hbm_to_vmem [thread:$0]  %s3816_s2, 128, %s3298_s22, [#allocation6], %s3235_s30, %s3235_s30, %s3236_s6  }
  0x44   :  { %s3239_s1 = smov [#allocation10]   ;;  %s3181_s20 = scalar_lea.hbm %s3818_s4, 16 }
  0x45   :  { %s66_s17 = sshll.u32 %s3239_s1, 4  ;;  %p3182_p4 = scmp.ne.s32.totalorder %s3818_s4, %s3181_s20  ;;  %s67_s17 = int_to_ptr.vmem [resolvable:$true] %s66_s17 }
  0x46   :  { %p3185_p5 = scmp.lt.u32.totalorder %s3181_s20, %s3818_s4 }
  0x48   :  { %p3187_p6 = pnand %p3185_p5, %p3182_p4 }
  0x4a   :  { %3190 = shalt.err (!%p3187_p6)
}
  0x4b   :  { %s3191_s27 = scalar_lea.vmem %s67_s17, 16  ;;  %s3195_s2 = scalar_lea.vmem %s67_s17, 32 }
  0x4c   :  { %p3192_p7 = scmp.ne.s32.totalorder %s67_s17, %s3191_s27  ;;  %p3196_p8 = scmp.lt.s32.totalorder %s67_s17, %s67_s17 }
  0x4d   :  { %p3197_p9 = scmp.lt.s32.totalorder %s3195_s2, %s3191_s27 }
  0x4f   :  { %p3198_p10 = por %p3197_p9, %p3196_p8 }
  0x51   :  { %p3199_p11 = pnand %p3198_p10, %p3192_p7 }
  0x53   :  { %3202 = shalt.err (!%p3199_p11)
}
  0x54   :  { %69 = dma.hbm_to_vmem [thread:$0]  %s3818_s4, 16, %s67_s17, [#allocation9]  }
  0x55   :  { %3225 = dma.done.wait [#allocation3], 4096  }
  0x56   :  { %3226 = vsyncadd [#allocation3], 4294963200 }
  0x57   :  { %3227 = dma.done.wait [#allocation6], 4224  }
  0x58   :  { %3228 = vsyncadd [#allocation6], 4294963072 }
  0x59   :  { %3229 = dma.done.wait [#allocation9], 80  }
  0x5a   :  { %3230 = vsyncadd [#allocation9], 4294967216  ;;  %vm474_vm0 = vcmask 1043456   ;;  %vm377_vm1 = vcmask 64512   ;;  %v216_v0 = vld [vmem:[#allocation8] sm:$0xf] }
  0x5b   :  { %2762 = vmatprep.subr.msk.bf16.mxu1 %vm474_vm0, %v216_v0  ;;  %v476_v1 = vsel %vm474_vm0, %v216_v0, 0  ;;  %v2771_v2 = vld [vmem:[#allocation7] sm:$0xff]   ;;  %v2773_v4 = vld [vmem:[#allocation5 + $0x8] sm:$0xff]   ;;  %vm933_vm2 = vcmask 130048   ;;  %v2776_v7 = vld [vmem:[#allocation5 + $0x10] sm:$0xff]   ;;  %vm2094_vm3 = vcmask 125952  }
  0x5c   :  { %2567 = vmatpush3.bf16.msra.mxu1 %v476_v1  ;;  %v2772_v3 = vld [vmem:[#allocation5] sm:$0xff]   ;;  %2632 = vmatprep.subr.bf16.mxu0 %v2771_v2  ;;  %v2775_v6 = vld [vmem:[#allocation2 + $0x8] sm:$0xff]   ;;  %v2778_v8 = vld [vmem:[#allocation2 + $0x10] sm:$0xff]   ;;  %s3240_s4 = smov [#allocation11]  }
  0x5d   :  { %2568 = vmatprep.mubr.msk.bf16.mxu1 %vm377_vm1, %v2772_v3  ;;  %2633 = vmatpush3.bf16.msra.mxu0 %v2771_v2  ;;  %v2774_v5 = vld [vmem:[#allocation2] sm:$0xff]   ;;  %v2777_v9 = vld [vmem:[#allocation5 + $0x18] sm:$0xff]   ;;  %v2781_v13 = vld [vmem:[#allocation5 + $0x28] sm:$0xff]   ;;  %s2164_s29 = sshll.u32 %s3240_s4, 4  ;;  %s2165_s29 = int_to_ptr.vmem [resolvable:$true] %s2164_s29 }
  0x5e   :  { %2634 = vmatprep.mubr.msk.bf16.mxu0 %vm933_vm2, %v2774_v5  ;;  %v2780_v10 = vld [vmem:[#allocation5 + $0x20] sm:$0xff]   ;;  %v2779_v11 = vld [vmem:[#allocation2 + $0x18] sm:$0xff]   ;;  %v2784_v14 = vld [vmem:[#allocation5 + $0x30] sm:$0xff]   ;;  %s3203_s3 = scalar_lea.vmem %s2165_s29, 4096  ;;  %p3208_p13 = scmp.lt.s32.totalorder %s2165_s29, %s2165_s29 }
  0x5f   :  { %2569 = vmatmul.mubr.msk.bf16.vlgmr.msra.gmra.mrb[0].mxu1 %vm377_vm1, %v2773_v4  ;;  %v2782_v12 = vld [vmem:[#allocation2 + $0x20] sm:$0xff]   ;;  %v2783_v15 = vld [vmem:[#allocation2 + $0x28] sm:$0xff]   ;;  %v2786_v16 = vld [vmem:[#allocation2 + $0x30] sm:$0xff]   ;;  %p3204_p12 = scmp.ne.s32.totalorder %s2165_s29, %s3203_s3  ;;  %p3209_p0 = scmp.lt.s32.totalorder %s3203_s3, %s3203_s3 }
  0x60   :  { %2635 = vmatmul.mubr.msk.bf16.vlgmr.msra.gmra.mrb[0].mxu0 %vm933_vm2, %v2775_v6  ;;  %2572 = vmatprep.mubr.msk.bf16.mxu1 %vm377_vm1, %v2776_v7  ;;  %v2785_v17 = vld [vmem:[#allocation5 + $0x38] sm:$0xff]   ;;  %v2788_v18 = vld [vmem:[#allocation5 + $0x40] sm:$0xff]   ;;  %v2789_v21 = vld [vmem:[#allocation5 + $0x48] sm:$0xff]  }
  0x61   :  { %2638 = vmatprep.mubr.msk.bf16.mxu0 %vm933_vm2, %v2778_v8  ;;  %v2787_v19 = vld [vmem:[#allocation2 + $0x38] sm:$0xff]   ;;  %v2790_v20 = vld [vmem:[#allocation2 + $0x40] sm:$0xff]   ;;  %v2792_v22 = vld [vmem:[#allocation5 + $0x50] sm:$0xff]   ;;  %p3210_p1 = por %p3209_p0, %p3208_p13 }
  0x62   :  { %v2791_v23 = vld [vmem:[#allocation2 + $0x48] sm:$0xff]   ;;  %v2794_v24 = vld [vmem:[#allocation2 + $0x50] sm:$0xff]   ;;  %v2793_v25 = vld [vmem:[#allocation5 + $0x58] sm:$0xff]  }
  0x63   :  { %v2796_v26 = vld [vmem:[#allocation5 + $0x60] sm:$0xff]   ;;  %v2795_v27 = vld [vmem:[#allocation2 + $0x58] sm:$0xff]   ;;  %v2797_v29 = vld [vmem:[#allocation5 + $0x68] sm:$0xff]   ;;  %p3211_p2 = pnand %p3210_p1, %p3204_p12 }
  0x64   :  { %v2798_v28 = vld [vmem:[#allocation2 + $0x60] sm:$0xff]   ;;  %v2800_v30 = vld [vmem:[#allocation5 + $0x70] sm:$0xff]   ;;  %v2799_v31 = vld [vmem:[#allocation2 + $0x68] sm:$0xff]  }
  0x65   :  { %v2802_v32 = vld [vmem:[#allocation2 + $0x70] sm:$0xff]   ;;  %v2801_v33 = vld [vmem:[#allocation5 + $0x78] sm:$0xff]   ;;  %v2804_v34 = vld [vmem:[#allocation5 + $0x80] sm:$0xff]  }
  0x66   :  { %v2803_v35 = vld [vmem:[#allocation2 + $0x78] sm:$0xff]   ;;  %v2806_v36 = vld [vmem:[#allocation2 + $0x80] sm:$0xff]   ;;  %v2805_v37 = vld [vmem:[#allocation5 + $0x88] sm:$0xff]  }
  0x67   :  { %2573 = vmatmul.mubr.msk.bf16.gmra.mrb[4].mxu1 %vm377_vm1, %v2777_v9  ;;  %v2808_v38 = vld [vmem:[#allocation5 + $0x90] sm:$0xff]   ;;  %v2807_v39 = vld [vmem:[#allocation2 + $0x88] sm:$0xff]   ;;  %v2809_v41 = vld [vmem:[#allocation5 + $0x98] sm:$0xff]  }
  0x68   :  { %2576 = vmatprep.mubr.msk.bf16.mxu1 %vm377_vm1, %v2780_v10  ;;  %2639 = vmatmul.mubr.msk.bf16.gmra.mrb[4].mxu0 %vm933_vm2, %v2779_v11  ;;  %v2810_v40 = vld [vmem:[#allocation2 + $0x90] sm:$0xff]   ;;  %v2812_v42 = vld [vmem:[#allocation5 + $0xa0] sm:$0xff]   ;;  %v2811_v43 = vld [vmem:[#allocation2 + $0x98] sm:$0xff]  }
  0x69   :  { %2642 = vmatprep.mubr.msk.bf16.mxu0 %vm933_vm2, %v2782_v12  ;;  %v2814_v44 = vld [vmem:[#allocation2 + $0xa0] sm:$0xff]   ;;  %v2813_v45 = vld [vmem:[#allocation5 + $0xa8] sm:$0xff]   ;;  %v2816_v46 = vld [vmem:[#allocation5 + $0xb0] sm:$0xff]  }
  0x6a   :  { %v2815_v47 = vld [vmem:[#allocation2 + $0xa8] sm:$0xff]   ;;  %v2818_v48 = vld [vmem:[#allocation2 + $0xb0] sm:$0xff]   ;;  %v2817_v49 = vld [vmem:[#allocation5 + $0xb8] sm:$0xff]  }
  0x6b   :  { %v2820_v50 = vld [vmem:[#allocation5 + $0xc0] sm:$0xff]   ;;  %v2819_v51 = vld [vmem:[#allocation2 + $0xb8] sm:$0xff]   ;;  %v2821_v53 = vld [vmem:[#allocation5 + $0xc8] sm:$0xff]  }
  0x6c   :  { %v2822_v52 = vld [vmem:[#allocation2 + $0xc0] sm:$0xff]   ;;  %v2824_v54 = vld [vmem:[#allocation5 + $0xd0] sm:$0xff]   ;;  %v2823_v55 = vld [vmem:[#allocation2 + $0xc8] sm:$0xff]  }
  0x6d   :  { %v2826_v56 = vld [vmem:[#allocation2 + $0xd0] sm:$0xff]   ;;  %v2825_v57 = vld [vmem:[#allocation5 + $0xd8] sm:$0xff]   ;;  %v2828_v58 = vld [vmem:[#allocation5 + $0xe0] sm:$0xff]  }
  0x6e   :  { %v2827_v59 = vld [vmem:[#allocation2 + $0xd8] sm:$0xff]   ;;  %v2830_v60 = vld [vmem:[#allocation2 + $0xe0] sm:$0xff]   ;;  %v2829_v61 = vld [vmem:[#allocation5 + $0xe8] sm:$0xff]  }
  0x6f   :  { %2577 = vmatmul.mubr.msk.bf16.gmra.mrb[8].mxu1 %vm377_vm1, %v2781_v13  ;;  %v2832_v62 = vld [vmem:[#allocation5 + $0xf0] sm:$0xff]   ;;  %v2831_v63 = vld [vmem:[#allocation2 + $0xe8] sm:$0xff]   ;;  %v2833_v1 = vld [vmem:[#allocation5 + $0xf8] sm:$0xff]  }
  0x70   :  { %2580 = vmatprep.mubr.msk.bf16.mxu1 %vm377_vm1, %v2784_v14  ;;  %2643 = vmatmul.mubr.msk.bf16.gmra.mrb[8].mxu0 %vm933_vm2, %v2783_v15  ;;  %v2834_v0 = vld [vmem:[#allocation2 + $0xf0] sm:$0xff]   ;;  %v2835_v2 = vld [vmem:[#allocation2 + $0xf8] sm:$0xff]   ;;  %v3411_v7 = vld [vmem:[#allocation10] ss:$0 sm:$0xff] }
  0x71   :  { %2646 = vmatprep.mubr.msk.bf16.mxu0 %vm933_vm2, %v2786_v16 }
  0x77   :  { %2581 = vmatmul.mubr.msk.bf16.gmra.mrb[12].mxu1 %vm377_vm1, %v2785_v17 }
  0x78   :  { %2584 = vmatprep.mubr.msk.bf16.mxu1 %vm377_vm1, %v2788_v18  ;;  %2647 = vmatmul.mubr.msk.bf16.gmra.mrb[12].mxu0 %vm933_vm2, %v2787_v19 }
  0x79   :  { %2650 = vmatprep.mubr.msk.bf16.mxu0 %vm933_vm2, %v2790_v20 }
  0x7f   :  { %2585 = vmatmul.mubr.msk.bf16.gmra.mrb[16].mxu1 %vm377_vm1, %v2789_v21 }
  0x80   :  { %2588 = vmatprep.mubr.msk.bf16.mxu1 %vm377_vm1, %v2792_v22  ;;  %2651 = vmatmul.mubr.msk.bf16.gmra.mrb[16].mxu0 %vm933_vm2, %v2791_v23 }
  0x81   :  { %2654 = vmatprep.mubr.msk.bf16.mxu0 %vm933_vm2, %v2794_v24 }
  0x87   :  { %2589 = vmatmul.mubr.msk.bf16.gmra.mrb[20].mxu1 %vm377_vm1, %v2793_v25 }
  0x88   :  { %2592 = vmatprep.mubr.msk.bf16.mxu1 %vm377_vm1, %v2796_v26  ;;  %2655 = vmatmul.mubr.msk.bf16.gmra.mrb[20].mxu0 %vm933_vm2, %v2795_v27 }
  0x89   :  { %2658 = vmatprep.mubr.msk.bf16.mxu0 %vm933_vm2, %v2798_v28 }
  0x8f   :  { %2593 = vmatmul.mubr.msk.bf16.gmra.mrb[24].mxu1 %vm377_vm1, %v2797_v29 }
  0x90   :  { %2596 = vmatprep.mubr.msk.bf16.mxu1 %vm377_vm1, %v2800_v30  ;;  %2659 = vmatmul.mubr.msk.bf16.gmra.mrb[24].mxu0 %vm933_vm2, %v2799_v31 }
  0x91   :  { %2662 = vmatprep.mubr.msk.bf16.mxu0 %vm933_vm2, %v2802_v32 }
  0x97   :  { %2597 = vmatmul.mubr.msk.bf16.gmra.mrb[28].mxu1 %vm377_vm1, %v2801_v33 }
  0x98   :  { %2600 = vmatprep.mubr.msk.bf16.mxu1 %vm377_vm1, %v2804_v34  ;;  %2663 = vmatmul.mubr.msk.bf16.gmra.mrb[28].mxu0 %vm933_vm2, %v2803_v35 }
  0x99   :  { %2666 = vmatprep.mubr.msk.bf16.mxu0 %vm933_vm2, %v2806_v36 }
  0x9f   :  { %2601 = vmatmul.mubr.msk.bf16.gmra.mrb[32].mxu1 %vm377_vm1, %v2805_v37 }
  0xa0   :  { %2604 = vmatprep.mubr.msk.bf16.mxu1 %vm377_vm1, %v2808_v38  ;;  %2667 = vmatmul.mubr.msk.bf16.gmra.mrb[32].mxu0 %vm933_vm2, %v2807_v39 }
  0xa1   :  { %2670 = vmatprep.mubr.msk.bf16.mxu0 %vm933_vm2, %v2810_v40 }
  0xa7   :  { %2605 = vmatmul.mubr.msk.bf16.gmra.mrb[36].mxu1 %vm377_vm1, %v2809_v41 }
  0xa8   :  { %2608 = vmatprep.mubr.msk.bf16.mxu1 %vm377_vm1, %v2812_v42  ;;  %2671 = vmatmul.mubr.msk.bf16.gmra.mrb[36].mxu0 %vm933_vm2, %v2811_v43 }
  0xa9   :  { %2674 = vmatprep.mubr.msk.bf16.mxu0 %vm933_vm2, %v2814_v44 }
  0xaf   :  { %2609 = vmatmul.mubr.msk.bf16.gmra.mrb[40].mxu1 %vm377_vm1, %v2813_v45 }
  0xb0   :  { %2612 = vmatprep.mubr.msk.bf16.mxu1 %vm377_vm1, %v2816_v46  ;;  %2675 = vmatmul.mubr.msk.bf16.gmra.mrb[40].mxu0 %vm933_vm2, %v2815_v47 }
  0xb1   :  { %2678 = vmatprep.mubr.msk.bf16.mxu0 %vm933_vm2, %v2818_v48 }
  0xb7   :  { %2613 = vmatmul.mubr.msk.bf16.gmra.mrb[44].mxu1 %vm377_vm1, %v2817_v49 }
  0xb8   :  { %2616 = vmatprep.mubr.msk.bf16.mxu1 %vm377_vm1, %v2820_v50  ;;  %2679 = vmatmul.mubr.msk.bf16.gmra.mrb[44].mxu0 %vm933_vm2, %v2819_v51 }
  0xb9   :  { %2682 = vmatprep.mubr.msk.bf16.mxu0 %vm933_vm2, %v2822_v52 }
  0xbf   :  { %2617 = vmatmul.mubr.msk.bf16.gmra.mrb[48].mxu1 %vm377_vm1, %v2821_v53 }
  0xc0   :  { %2620 = vmatprep.mubr.msk.bf16.mxu1 %vm377_vm1, %v2824_v54  ;;  %2683 = vmatmul.mubr.msk.bf16.gmra.mrb[48].mxu0 %vm933_vm2, %v2823_v55 }
  0xc1   :  { %2686 = vmatprep.mubr.msk.bf16.mxu0 %vm933_vm2, %v2826_v56 }
  0xc7   :  { %2621 = vmatmul.mubr.msk.bf16.gmra.mrb[52].mxu1 %vm377_vm1, %v2825_v57 }
  0xc8   :  { %2624 = vmatprep.mubr.msk.bf16.mxu1 %vm377_vm1, %v2828_v58  ;;  %2687 = vmatmul.mubr.msk.bf16.gmra.mrb[52].mxu0 %vm933_vm2, %v2827_v59 }
  0xc9   :  { %2690 = vmatprep.mubr.msk.bf16.mxu0 %vm933_vm2, %v2830_v60 }
  0xcf   :  { %2625 = vmatmul.mubr.msk.bf16.gmra.mrb[56].mxu1 %vm377_vm1, %v2829_v61 }
  0xd0   :  { %2628 = vmatprep.mubr.msk.bf16.mxu1 %vm377_vm1, %v2832_v62  ;;  %2691 = vmatmul.mubr.msk.bf16.gmra.mrb[56].mxu0 %vm933_vm2, %v2831_v63 }
  0xd1   :  { %2694 = vmatprep.mubr.msk.bf16.mxu0 %vm933_vm2, %v2834_v0 }
  0xd7   :  { %2629 = vmatmul.mubr.msk.bf16.gmra.mrb[60].mxu1 %vm377_vm1, %v2833_v1 }
  0xd8   :  { %2695 = vmatmul.mubr.msk.bf16.gmra.mrb[60].mxu0 %vm933_vm2, %v2835_v2 }
 0x132   :  { %v2570_v3 = vpop.f32.mrb[0].mxu1 }
 0x133   :  { %v512_v4 = vpop.f32.mrb[1].mxu1  ;;  %v2636_v6 = vpop.f32.mrb[0].mxu0 }
 0x134   :  { %v2571_v5 = vpop.f32.mrb[2].mxu1  ;;  %v1073_v8 = vadd.f32 %v2636_v6, %v2570_v3  ;;  %v1064_v10 = vpop.f32.mrb[1].mxu0 }
 0x135   :  { %v515_v9 = vpop.f32.mrb[3].mxu1  ;;  %v1065_v11 = vadd.f32 %v1064_v10, %v512_v4  ;;  %v2637_v12 = vpop.f32.mrb[2].mxu0 }
 0x136   :  { %v3414_v13 = vadd.f32 %v3411_v7, %v1073_v8  ;;  %v1076_v14 = vadd.f32 %v2637_v12, %v2571_v5  ;;  %v1067_v15 = vpop.f32.mrb[3].mxu0 }
 0x137   :  { %v3417_v16 = vadd.f32 %v3411_v7, %v1065_v11  ;;  %v1068_v17 = vadd.f32 %v1067_v15, %v515_v9 }
 0x138   :  { %v2310_v18 = vmul.f32 -1.442695, %v3414_v13  ;;  %v3421_v19 = vadd.f32 %v3411_v7, %v1076_v14 }
 0x139   :  { %v2308_v20 = vmul.f32 -1.442695, %v3417_v16  ;;  %v3425_v21 = vadd.f32 %v3411_v7, %v1068_v17 }
 0x13a   :  { %v2574_v22 = vpop.f32.mrb[4].mxu1  ;;  %2836 = vpow2.f32 %v2310_v18  ;;  %v2311_v23 = vmul.f32 -1.442695, %v3421_v19 }
 0x13b   :  { %v528_v24 = vpop.f32.mrb[5].mxu1  ;;  %2838 = vpow2.f32 %v2308_v20  ;;  %v2309_v25 = vmul.f32 -1.442695, %v3425_v21  ;;  %v2640_v27 = vpop.f32.mrb[4].mxu0 }
 0x13c   :  { %v2575_v26 = vpop.f32.mrb[6].mxu1  ;;  %2840 = vpow2.f32 %v2311_v23  ;;  %v1089_v28 = vadd.f32 %v2640_v27, %v2574_v22  ;;  %v1080_v30 = vpop.f32.mrb[5].mxu0 }
 0x13d   :  { %v531_v29 = vpop.f32.mrb[7].mxu1  ;;  %2842 = vpow2.f32 %v2309_v25  ;;  %v1081_v31 = vadd.f32 %v1080_v30, %v528_v24  ;;  %v2641_v32 = vpop.f32.mrb[6].mxu0 }
 0x13e   :  { %v3430_v33 = vadd.f32 %v3411_v7, %v1089_v28  ;;  %v1092_v34 = vadd.f32 %v2641_v32, %v2575_v26  ;;  %v1083_v35 = vpop.f32.mrb[7].mxu0 }
 0x13f   :  { %v3433_v36 = vadd.f32 %v3411_v7, %v1081_v31  ;;  %v1084_v37 = vadd.f32 %v1083_v35, %v531_v29 }
 0x140   :  { %v2314_v38 = vmul.f32 -1.442695, %v3430_v33  ;;  %v3437_v39 = vadd.f32 %v3411_v7, %v1092_v34 }
 0x141   :  { %v2312_v40 = vmul.f32 -1.442695, %v3433_v36  ;;  %v3441_v41 = vadd.f32 %v3411_v7, %v1084_v37 }
 0x142   :  { %v2578_v42 = vpop.f32.mrb[8].mxu1  ;;  %2844 = vpow2.f32 %v2314_v38  ;;  %v2315_v43 = vmul.f32 -1.442695, %v3437_v39 }
 0x143   :  { %v544_v44 = vpop.f32.mrb[9].mxu1  ;;  %2846 = vpow2.f32 %v2312_v40  ;;  %v2313_v45 = vmul.f32 -1.442695, %v3441_v41  ;;  %v2644_v47 = vpop.f32.mrb[8].mxu0 }
 0x144   :  { %v2579_v46 = vpop.f32.mrb[10].mxu1  ;;  %v2837_v48 = vpop.eup %2836  ;;  %2848 = vpow2.f32 %v2315_v43  ;;  %v1105_v49 = vadd.f32 %v2644_v47, %v2578_v42 }
 0x145   :  { %v547_v50 = vpop.f32.mrb[11].mxu1  ;;  %v1096_v51 = vpop.f32.mrb[9].mxu0  ;;  %v1584_v53 = vadd.f32 1.0, %v2837_v48  ;;  %2850 = vpow2.f32 %v2313_v45 }
 0x146   :  { %v2839_v52 = vpop.eup %2838  ;;  %v1097_v54 = vadd.f32 %v1096_v51, %v544_v44  ;;  %v2645_v55 = vpop.f32.mrb[10].mxu0  ;;  %v3446_v58 = vadd.f32 %v3411_v7, %v1105_v49 }
 0x147   :  { %v2841_v56 = vpop.eup %2840  ;;  %v1582_v57 = vadd.f32 1.0, %v2839_v52  ;;  %v1108_v59 = vadd.f32 %v2645_v55, %v2579_v46  ;;  %v1099_v60 = vpop.f32.mrb[11].mxu0  ;;  %2852 = vrcp.f32 %v1584_v53 }
 0x148   :  { %v2843_v61 = vpop.eup %2842  ;;  %v1585_v62 = vadd.f32 1.0, %v2841_v56  ;;  %v3449_v63 = vadd.f32 %v3411_v7, %v1097_v54  ;;  %v1100_v0 = vadd.f32 %v1099_v60, %v547_v50  ;;  %v2318_v2 = vmul.f32 -1.442695, %v3446_v58 }
 0x149   :  { %2854 = vrcp.f32 %v1582_v57  ;;  %v1583_v1 = vadd.f32 1.0, %v2843_v61  ;;  %v3453_v3 = vadd.f32 %v3411_v7, %v1108_v59 }
 0x14a   :  { %2856 = vrcp.f32 %v1585_v62  ;;  %v2316_v4 = vmul.f32 -1.442695, %v3449_v63  ;;  %v3457_v5 = vadd.f32 %v3411_v7, %v1100_v0  ;;  %v2582_v6 = vpop.f32.mrb[12].mxu1 }
 0x14b   :  { %2858 = vrcp.f32 %v1583_v1  ;;  %v2319_v8 = vmul.f32 -1.442695, %v3453_v3  ;;  %v560_v9 = vpop.f32.mrb[13].mxu1  ;;  %v2648_v12 = vpop.f32.mrb[12].mxu0 }
 0x14c   :  { %2860 = vpow2.f32 %v2318_v2  ;;  %v2317_v10 = vmul.f32 -1.442695, %v3457_v5  ;;  %v2583_v11 = vpop.f32.mrb[14].mxu1  ;;  %v2845_v14 = vpop.eup %2844  ;;  %v1121_v15 = vadd.f32 %v2648_v12, %v2582_v6 }
 0x14d   :  { %2862 = vpow2.f32 %v2316_v4  ;;  %v563_v17 = vpop.f32.mrb[15].mxu1  ;;  %v1112_v18 = vpop.f32.mrb[13].mxu0  ;;  %v1588_v22 = vadd.f32 1.0, %v2845_v14 }
 0x14e   :  { %v2847_v20 = vpop.eup %2846  ;;  %2864 = vpow2.f32 %v2319_v8  ;;  %v1113_v23 = vadd.f32 %v1112_v18, %v560_v9  ;;  %v2649_v24 = vpop.f32.mrb[14].mxu0  ;;  %v3462_v27 = vadd.f32 %v3411_v7, %v1121_v15 }
 0x14f   :  { %v2849_v25 = vpop.eup %2848  ;;  %v1586_v26 = vadd.f32 1.0, %v2847_v20  ;;  %2866 = vpow2.f32 %v2317_v10  ;;  %v1124_v28 = vadd.f32 %v2649_v24, %v2583_v11  ;;  %v1115_v29 = vpop.f32.mrb[15].mxu0 }
 0x150   :  { %v2851_v30 = vpop.eup %2850  ;;  %2868 = vrcp.f32 %v1588_v22  ;;  %v1589_v31 = vadd.f32 1.0, %v2849_v25  ;;  %v3465_v32 = vadd.f32 %v3411_v7, %v1113_v23  ;;  %v1116_v34 = vadd.f32 %v1115_v29, %v563_v17 }
 0x151   :  { %2870 = vrcp.f32 %v1586_v26  ;;  %v1587_v35 = vadd.f32 1.0, %v2851_v30  ;;  %v2322_v37 = vmul.f32 -1.442695, %v3462_v27  ;;  %v3469_v38 = vadd.f32 %v3411_v7, %v1124_v28  ;;  %v2853_v40 = vpop.eup %2852 }
 0x152   :  { %2872 = vrcp.f32 %v1589_v31  ;;  %v2320_v42 = vmul.f32 -1.442695, %v3465_v32  ;;  %v3473_v43 = vadd.f32 %v3411_v7, %v1116_v34  ;;  %v2586_v44 = vpop.f32.mrb[16].mxu1  ;;  %v1776_v46 = vmul.f32 %v2853_v40, %v3414_v13 }
 0x153   :  { %v2855_v45 = vpop.eup %2854  ;;  %2874 = vrcp.f32 %v1587_v35  ;;  %v2323_v47 = vmul.f32 -1.442695, %v3469_v38  ;;  %v576_v48 = vpop.f32.mrb[17].mxu1 }
 0x154   :  { %v2857_v49 = vpop.eup %2856  ;;  %v1774_v50 = vmul.f32 %v2855_v45, %v3417_v16  ;;  %2876 = vpow2.f32 %v2322_v37  ;;  %v2321_v51 = vmul.f32 -1.442695, %v3473_v43  ;;  %v2587_v52 = vpop.f32.mrb[18].mxu1  ;;  %v2438_v55 = vpack.c.bf16 %v1776_v46, %v1776_v46 }
 0x155   :  { %v2652_v53 = vpop.f32.mrb[16].mxu0  ;;  %v2859_v54 = vpop.eup %2858  ;;  %v1777_v56 = vmul.f32 %v2857_v49, %v3421_v19  ;;  %2878 = vpow2.f32 %v2320_v42 }
 0x156   :  { %v1137_v57 = vadd.f32 %v2652_v53, %v2586_v44  ;;  %v579_v13 = vpop.f32.mrb[19].mxu1  ;;  %v1128_v59 = vpop.f32.mrb[17].mxu0  ;;  %v2436_v61 = vpack.c.bf16 %v1774_v50, %v1774_v50  ;;  %v1775_v62 = vmul.f32 %v2859_v54, %v3425_v21  ;;  %2880 = vpow2.f32 %v2323_v47  ;;  %2097 = vst.msk [vmem:[#allocation11 + $0x8] sm:$0xf] %vm2094_vm3, %v2438_v55 }
 0x157   :  { %v2861_v60 = vpop.eup %2860  ;;  %v1129_v0 = vadd.f32 %v1128_v59, %v576_v48  ;;  %v2653_v16 = vpop.f32.mrb[18].mxu0  ;;  %v2439_v2 = vpack.c.bf16 %v1777_v56, %v1777_v56  ;;  %2882 = vpow2.f32 %v2321_v51 }
 0x158   :  { %v2863_v1 = vpop.eup %2862  ;;  %v1592_v4 = vadd.f32 1.0, %v2861_v60  ;;  %v3483_v6 = vadd.f32 %v3411_v7, %v1137_v57  ;;  %v1131_v19 = vpop.f32.mrb[19].mxu0  ;;  %2095 = vst.msk [vmem:[#allocation11] sm:$0xf] %vm2094_vm3, %v2436_v61  ;;  %v2437_v9 = vpack.c.bf16 %v1775_v62, %v1775_v62  ;;  %v1140_v11 = vadd.f32 %v2653_v16, %v2587_v52 }
 0x159   :  { %v2865_v8 = vpop.eup %2864  ;;  %v1590_v10 = vadd.f32 1.0, %v2863_v1  ;;  %v3487_v21 = vadd.f32 %v3411_v7, %v1129_v0  ;;  %2098 = vst.msk [vmem:[#allocation11 + $0xc] sm:$0xf] %vm2094_vm3, %v2439_v2  ;;  %v1132_v17 = vadd.f32 %v1131_v19, %v579_v13 }
 0x15a   :  { %v2867_v12 = vpop.eup %2866  ;;  %2884 = vrcp.f32 %v1592_v4  ;;  %v1593_v14 = vadd.f32 1.0, %v2865_v8  ;;  %v2326_v15 = vmul.f32 -1.442695, %v3483_v6  ;;  %2096 = vst.msk [vmem:[#allocation11 + $0x4] sm:$0xf] %vm2094_vm3, %v2437_v9  ;;  %v3494_v23 = vadd.f32 %v3411_v7, %v1140_v11  ;;  %v2590_v24 = vpop.f32.mrb[20].mxu1 }
 0x15b   :  { %v2869_v18 = vpop.eup %2868  ;;  %2886 = vrcp.f32 %v1590_v10  ;;  %v1591_v20 = vadd.f32 1.0, %v2867_v12  ;;  %v2324_v22 = vmul.f32 -1.442695, %v3487_v21  ;;  %v3498_v28 = vadd.f32 %v3411_v7, %v1132_v17  ;;  %v592_v29 = vpop.f32.mrb[21].mxu1 }
 0x15c   :  { %v2871_v25 = vpop.eup %2870  ;;  %v1780_v26 = vmul.f32 %v2869_v18, %v3430_v33  ;;  %2888 = vrcp.f32 %v1593_v14  ;;  %v2327_v34 = vmul.f32 -1.442695, %v3494_v23  ;;  %v2591_v35 = vpop.f32.mrb[22].mxu1 }
 0x15d   :  { %v2873_v30 = vpop.eup %2872  ;;  %v1778_v31 = vmul.f32 %v2871_v25, %v3433_v36  ;;  %2890 = vrcp.f32 %v1591_v20  ;;  %v2656_v37 = vpop.f32.mrb[20].mxu0  ;;  %v2325_v33 = vmul.f32 -1.442695, %v3498_v28 }
 0x15e   :  { %v2875_v40 = vpop.eup %2874  ;;  %v2442_v42 = vpack.c.bf16 %v1780_v26, %v1780_v26  ;;  %v1781_v44 = vmul.f32 %v2873_v30, %v3437_v39  ;;  %2892 = vpow2.f32 %v2326_v15  ;;  %v595_v45 = vpop.f32.mrb[23].mxu1  ;;  %v1153_v36 = vadd.f32 %v2656_v37, %v2590_v24 }
 0x15f   :  { %v1144_v46 = vpop.f32.mrb[21].mxu0  ;;  %v2877_v47 = vpop.eup %2876  ;;  %v2440_v48 = vpack.c.bf16 %v1778_v31, %v1778_v31  ;;  %v1779_v49 = vmul.f32 %v2875_v40, %v3441_v41  ;;  %2894 = vpow2.f32 %v2324_v22 }
 0x160   :  { %v2657_v50 = vpop.f32.mrb[22].mxu0  ;;  %v2879_v51 = vpop.eup %2878  ;;  %2101 = vst.msk [vmem:[#allocation11 + $0x18] sm:$0xf] %vm2094_vm3, %v2442_v42  ;;  %v2443_v52 = vpack.c.bf16 %v1781_v44, %v1781_v44  ;;  %v1596_v53 = vadd.f32 1.0, %v2877_v47  ;;  %2896 = vpow2.f32 %v2327_v34  ;;  %v1145_v54 = vadd.f32 %v1144_v46, %v592_v29 }
 0x161   :  { %v1147_v39 = vpop.f32.mrb[23].mxu0  ;;  %v2881_v55 = vpop.eup %2880  ;;  %2099 = vst.msk [vmem:[#allocation11 + $0x10] sm:$0xf] %vm2094_vm3, %v2440_v48  ;;  %v2441_v56 = vpack.c.bf16 %v1779_v49, %v1779_v49  ;;  %v1594_v57 = vadd.f32 1.0, %v2879_v51  ;;  %2898 = vpow2.f32 %v2325_v33  ;;  %v3508_v13 = vadd.f32 %v3411_v7, %v1153_v36 }
 0x162   :  { %v2883_v41 = vpop.eup %2882  ;;  %2102 = vst.msk [vmem:[#allocation11 + $0x1c] sm:$0xf] %vm2094_vm3, %v2443_v52  ;;  %2900 = vrcp.f32 %v1596_v53  ;;  %v1597_v59 = vadd.f32 1.0, %v2881_v55  ;;  %v3512_v60 = vadd.f32 %v3411_v7, %v1145_v54  ;;  %v1156_v61 = vadd.f32 %v2657_v50, %v2591_v35  ;;  %v2594_v1 = vpop.f32.mrb[24].mxu1 }
 0x163   :  { %2100 = vst.msk [vmem:[#allocation11 + $0x14] sm:$0xf] %vm2094_vm3, %v2441_v56  ;;  %2902 = vrcp.f32 %v1594_v57  ;;  %v1595_v62 = vadd.f32 1.0, %v2883_v41  ;;  %v2330_v0 = vmul.f32 -1.442695, %v3508_v13  ;;  %v1148_v16 = vadd.f32 %v1147_v39, %v595_v45  ;;  %v608_v8 = vpop.f32.mrb[25].mxu1 }
 0x164   :  { %v2885_v2 = vpop.eup %2884  ;;  %2904 = vrcp.f32 %v1597_v59  ;;  %v2328_v4 = vmul.f32 -1.442695, %v3512_v60  ;;  %v3518_v19 = vadd.f32 %v3411_v7, %v1156_v61  ;;  %v2595_v12 = vpop.f32.mrb[26].mxu1 }
 0x165   :  { %v2887_v9 = vpop.eup %2886  ;;  %v1784_v10 = vmul.f32 %v2885_v2, %v3446_v58  ;;  %2906 = vrcp.f32 %v1595_v62  ;;  %v3522_v11 = vadd.f32 %v3411_v7, %v1148_v16  ;;  %v2660_v14 = vpop.f32.mrb[24].mxu0 }
 0x166   :  { %v2889_v15 = vpop.eup %2888  ;;  %v1782_v17 = vmul.f32 %v2887_v9, %v3449_v63  ;;  %2908 = vpow2.f32 %v2330_v0  ;;  %v2331_v18 = vmul.f32 -1.442695, %v3518_v19  ;;  %v1169_v20 = vadd.f32 %v2660_v14, %v2594_v1  ;;  %v611_v22 = vpop.f32.mrb[27].mxu1 }
 0x167   :  { %v1160_v24 = vpop.f32.mrb[25].mxu0  ;;  %v2891_v25 = vpop.eup %2890  ;;  %v2446_v26 = vpack.c.bf16 %v1784_v10, %v1784_v10  ;;  %v1785_v29 = vmul.f32 %v2889_v15, %v3453_v3  ;;  %2910 = vpow2.f32 %v2328_v4  ;;  %v2329_v58 = vmul.f32 -1.442695, %v3522_v11 }
 0x168   :  { %v2661_v30 = vpop.f32.mrb[26].mxu0  ;;  %v2893_v31 = vpop.eup %2892  ;;  %v2444_v34 = vpack.c.bf16 %v1782_v17, %v1782_v17  ;;  %v1783_v35 = vmul.f32 %v2891_v25, %v3457_v5  ;;  %2912 = vpow2.f32 %v2331_v18  ;;  %v3530_v63 = vadd.f32 %v3411_v7, %v1169_v20 }
 0x169   :  { %v1163_v37 = vpop.f32.mrb[27].mxu0  ;;  %v2895_v40 = vpop.eup %2894  ;;  %2105 = vst.msk [vmem:[#allocation11 + $0x28] sm:$0xf] %vm2094_vm3, %v2446_v26  ;;  %v2447_v42 = vpack.c.bf16 %v1785_v29, %v1785_v29  ;;  %v1600_v44 = vadd.f32 1.0, %v2893_v31  ;;  %2914 = vpow2.f32 %v2329_v58  ;;  %v1161_v3 = vadd.f32 %v1160_v24, %v608_v8 }
 0x16a   :  { %v2897_v33 = vpop.eup %2896  ;;  %2103 = vst.msk [vmem:[#allocation11 + $0x20] sm:$0xf] %vm2094_vm3, %v2444_v34  ;;  %v2445_v45 = vpack.c.bf16 %v1783_v35, %v1783_v35  ;;  %v1598_v46 = vadd.f32 1.0, %v2895_v40  ;;  %v2334_v47 = vmul.f32 -1.442695, %v3530_v63  ;;  %v1172_v5 = vadd.f32 %v2661_v30, %v2595_v12  ;;  %v2598_v51 = vpop.f32.mrb[28].mxu1 }
 0x16b   :  { %v2899_v48 = vpop.eup %2898  ;;  %2106 = vst.msk [vmem:[#allocation11 + $0x2c] sm:$0xf] %vm2094_vm3, %v2447_v42  ;;  %2916 = vrcp.f32 %v1600_v44  ;;  %v1601_v49 = vadd.f32 1.0, %v2897_v33  ;;  %v3537_v36 = vadd.f32 %v3411_v7, %v1161_v3  ;;  %v1164_v50 = vadd.f32 %v1163_v37, %v611_v22  ;;  %v624_v39 = vpop.f32.mrb[29].mxu1 }
 0x16c   :  { %v2901_v52 = vpop.eup %2900  ;;  %2104 = vst.msk [vmem:[#allocation11 + $0x24] sm:$0xf] %vm2094_vm3, %v2445_v45  ;;  %2918 = vrcp.f32 %v1598_v46  ;;  %v1599_v53 = vadd.f32 1.0, %v2899_v48  ;;  %v3541_v54 = vadd.f32 %v3411_v7, %v1172_v5  ;;  %v2599_v59 = vpop.f32.mrb[30].mxu1 }
 0x16d   :  { %v2903_v55 = vpop.eup %2902  ;;  %v1788_v56 = vmul.f32 %v2901_v52, %v3462_v27  ;;  %2920 = vrcp.f32 %v1601_v49  ;;  %v2332_v57 = vmul.f32 -1.442695, %v3537_v36  ;;  %v3546_v41 = vadd.f32 %v3411_v7, %v1164_v50  ;;  %v2664_v61 = vpop.f32.mrb[28].mxu0 }
 0x16e   :  { %v2905_v62 = vpop.eup %2904  ;;  %v1786_v0 = vmul.f32 %v2903_v55, %v3465_v32  ;;  %2922 = vrcp.f32 %v1599_v53  ;;  %v2335_v16 = vmul.f32 -1.442695, %v3541_v54  ;;  %v1185_v1 = vadd.f32 %v2664_v61, %v2598_v51  ;;  %v627_v2 = vpop.f32.mrb[31].mxu1 }
 0x16f   :  { %v1176_v4 = vpop.f32.mrb[29].mxu0  ;;  %v2907_v8 = vpop.eup %2906  ;;  %v2450_v9 = vpack.c.bf16 %v1788_v56, %v1788_v56  ;;  %v1789_v27 = vmul.f32 %v2905_v62, %v3469_v38  ;;  %2924 = vpow2.f32 %v2334_v47  ;;  %v2333_v10 = vmul.f32 -1.442695, %v3546_v41 }
 0x170   :  { %v2665_v12 = vpop.f32.mrb[30].mxu0  ;;  %v2909_v14 = vpop.eup %2908  ;;  %v2448_v15 = vpack.c.bf16 %v1786_v0, %v1786_v0  ;;  %v1787_v17 = vmul.f32 %v2907_v8, %v3473_v43  ;;  %2926 = vpow2.f32 %v2332_v57  ;;  %v3554_v32 = vadd.f32 %v3411_v7, %v1185_v1 }
 0x171   :  { %v1179_v18 = vpop.f32.mrb[31].mxu0  ;;  %v2911_v20 = vpop.eup %2910  ;;  %2109 = vst.msk [vmem:[#allocation11 + $0x38] sm:$0xf] %vm2094_vm3, %v2450_v9  ;;  %v2451_v22 = vpack.c.bf16 %v1789_v27, %v1789_v27  ;;  %v1604_v24 = vadd.f32 1.0, %v2909_v14  ;;  %2928 = vpow2.f32 %v2335_v16  ;;  %v1177_v38 = vadd.f32 %v1176_v4, %v624_v39 }
 0x172   :  { %v2913_v25 = vpop.eup %2912  ;;  %2107 = vst.msk [vmem:[#allocation11 + $0x30] sm:$0xf] %vm2094_vm3, %v2448_v15  ;;  %v2449_v26 = vpack.c.bf16 %v1787_v17, %v1787_v17  ;;  %v1602_v29 = vadd.f32 1.0, %v2911_v20  ;;  %2930 = vpow2.f32 %v2333_v10  ;;  %v2338_v43 = vmul.f32 -1.442695, %v3554_v32  ;;  %v2602_v35 = vpop.f32.mrb[32].mxu1 }
 0x173   :  { %v2915_v58 = vpop.eup %2914  ;;  %2110 = vst.msk [vmem:[#allocation11 + $0x3c] sm:$0xf] %vm2094_vm3, %v2451_v22  ;;  %2932 = vrcp.f32 %v1604_v24  ;;  %v1605_v30 = vadd.f32 1.0, %v2913_v25  ;;  %v3561_v31 = vadd.f32 %v3411_v7, %v1177_v38  ;;  %v1188_v34 = vadd.f32 %v2665_v12, %v2599_v59  ;;  %v640_v42 = vpop.f32.mrb[33].mxu1 }
 0x174   :  { %2108 = vst.msk [vmem:[#allocation11 + $0x34] sm:$0xf] %vm2094_vm3, %v2449_v26  ;;  %2934 = vrcp.f32 %v1602_v29  ;;  %v1603_v37 = vadd.f32 1.0, %v2915_v58  ;;  %v1180_v40 = vadd.f32 %v1179_v18, %v627_v2  ;;  %v2603_v45 = vpop.f32.mrb[34].mxu1  ;;  %v2668_v46 = vpop.f32.mrb[32].mxu0 }
 0x175   :  { %v2917_v44 = vpop.eup %2916  ;;  %2936 = vrcp.f32 %v1605_v30  ;;  %v2336_v3 = vmul.f32 -1.442695, %v3561_v31  ;;  %v3566_v33 = vadd.f32 %v3411_v7, %v1188_v34  ;;  %v1201_v49 = vadd.f32 %v2668_v46, %v2602_v35  ;;  %v643_v50 = vpop.f32.mrb[35].mxu1 }
 0x176   :  { %v2919_v47 = vpop.eup %2918  ;;  %v1792_v5 = vmul.f32 %v2917_v44, %v3483_v6  ;;  %2938 = vrcp.f32 %v1603_v37  ;;  %v3570_v48 = vadd.f32 %v3411_v7, %v1180_v40  ;;  %v1192_v51 = vpop.f32.mrb[33].mxu0 }
 0x177   :  { %v2921_v52 = vpop.eup %2920  ;;  %v1790_v53 = vmul.f32 %v2919_v47, %v3487_v21  ;;  %2940 = vpow2.f32 %v2338_v43  ;;  %v2339_v39 = vmul.f32 -1.442695, %v3566_v33  ;;  %v1193_v55 = vadd.f32 %v1192_v51, %v640_v42  ;;  %v2669_v56 = vpop.f32.mrb[34].mxu0 }
 0x178   :  { %v2923_v57 = vpop.eup %2922  ;;  %v2454_v59 = vpack.c.bf16 %v1792_v5, %v1792_v5  ;;  %v1793_v61 = vmul.f32 %v2921_v52, %v3494_v23  ;;  %2942 = vpow2.f32 %v2336_v3  ;;  %v2337_v6 = vmul.f32 -1.442695, %v3570_v48  ;;  %v1195_v62 = vpop.f32.mrb[35].mxu0 }
 0x179   :  { %v2925_v0 = vpop.eup %2924  ;;  %v2452_v16 = vpack.c.bf16 %v1790_v53, %v1790_v53  ;;  %v1791_v1 = vmul.f32 %v2923_v57, %v3498_v28  ;;  %2944 = vpow2.f32 %v2339_v39  ;;  %v3578_v21 = vadd.f32 %v3411_v7, %v1201_v49 }
 0x17a   :  { %v2927_v2 = vpop.eup %2926  ;;  %2113 = vst.msk [vmem:[#allocation11 + $0x48] sm:$0xf] %vm2094_vm3, %v2454_v59  ;;  %v2455_v4 = vpack.c.bf16 %v1793_v61, %v1793_v61  ;;  %v1608_v8 = vadd.f32 1.0, %v2925_v0  ;;  %2946 = vpow2.f32 %v2337_v6  ;;  %v3582_v23 = vadd.f32 %v3411_v7, %v1193_v55  ;;  %v2606_v28 = vpop.f32.mrb[36].mxu1 }
 0x17b   :  { %v2929_v9 = vpop.eup %2928  ;;  %2111 = vst.msk [vmem:[#allocation11 + $0x40] sm:$0xf] %vm2094_vm3, %v2452_v16  ;;  %v2453_v27 = vpack.c.bf16 %v1791_v1, %v1791_v1  ;;  %v1606_v10 = vadd.f32 1.0, %v2927_v2  ;;  %v1204_v12 = vadd.f32 %v2669_v56, %v2603_v45  ;;  %v2342_v17 = vmul.f32 -1.442695, %v3578_v21  ;;  %v656_v20 = vpop.f32.mrb[37].mxu1 }
 0x17c   :  { %v2931_v14 = vpop.eup %2930  ;;  %2114 = vst.msk [vmem:[#allocation11 + $0x4c] sm:$0xf] %vm2094_vm3, %v2455_v4  ;;  %2948 = vrcp.f32 %v1608_v8  ;;  %v1609_v15 = vadd.f32 1.0, %v2929_v9  ;;  %v1196_v18 = vadd.f32 %v1195_v62, %v643_v50  ;;  %v2340_v38 = vmul.f32 -1.442695, %v3582_v23  ;;  %v2607_v26 = vpop.f32.mrb[38].mxu1 }
 0x17d   :  { %v2933_v22 = vpop.eup %2932  ;;  %2112 = vst.msk [vmem:[#allocation11 + $0x44] sm:$0xf] %vm2094_vm3, %v2453_v27  ;;  %2950 = vrcp.f32 %v1606_v10  ;;  %v1607_v24 = vadd.f32 1.0, %v2931_v14  ;;  %v3590_v25 = vadd.f32 %v3411_v7, %v1204_v12  ;;  %v2672_v29 = vpop.f32.mrb[36].mxu0 }
 0x17e   :  { %v2935_v43 = vpop.eup %2934  ;;  %v1796_v58 = vmul.f32 %v2933_v22, %v3508_v13  ;;  %2952 = vrcp.f32 %v1609_v15  ;;  %v3594_v30 = vadd.f32 %v3411_v7, %v1196_v18  ;;  %v1217_v34 = vadd.f32 %v2672_v29, %v2606_v28  ;;  %v659_v35 = vpop.f32.mrb[39].mxu1 }
 0x17f   :  { %v1208_v37 = vpop.f32.mrb[37].mxu0  ;;  %v2937_v40 = vpop.eup %2936  ;;  %v1794_v42 = vmul.f32 %v2935_v43, %v3512_v60  ;;  %2954 = vrcp.f32 %v1607_v24  ;;  %v2343_v44 = vmul.f32 -1.442695, %v3590_v25 }
 0x180   :  { %v1209_v3 = vadd.f32 %v1208_v37, %v656_v20  ;;  %v2673_v45 = vpop.f32.mrb[38].mxu0  ;;  %v2939_v46 = vpop.eup %2938  ;;  %v2458_v47 = vpack.c.bf16 %v1796_v58, %v1796_v58  ;;  %v1797_v5 = vmul.f32 %v2937_v40, %v3518_v19  ;;  %2956 = vpow2.f32 %v2342_v17 }
 0x181   :  { %v2341_v13 = vmul.f32 -1.442695, %v3594_v30  ;;  %v1211_v49 = vpop.f32.mrb[39].mxu0  ;;  %v2941_v50 = vpop.eup %2940  ;;  %v2456_v51 = vpack.c.bf16 %v1794_v42, %v1794_v42  ;;  %v1795_v52 = vmul.f32 %v2939_v46, %v3522_v11  ;;  %2958 = vpow2.f32 %v2340_v38 }
 0x182   :  { %v3602_v60 = vadd.f32 %v3411_v7, %v1217_v34  ;;  %v2943_v53 = vpop.eup %2942  ;;  %2117 = vst.msk [vmem:[#allocation11 + $0x58] sm:$0xf] %vm2094_vm3, %v2458_v47  ;;  %v2459_v39 = vpack.c.bf16 %v1797_v5, %v1797_v5  ;;  %v1612_v55 = vadd.f32 1.0, %v2941_v50  ;;  %2960 = vpow2.f32 %v2343_v44  ;;  %v2610_v11 = vpop.f32.mrb[40].mxu1 }
 0x183   :  { %v3606_v19 = vadd.f32 %v3411_v7, %v1209_v3  ;;  %v2945_v56 = vpop.eup %2944  ;;  %2115 = vst.msk [vmem:[#allocation11 + $0x50] sm:$0xf] %vm2094_vm3, %v2456_v51  ;;  %v2457_v57 = vpack.c.bf16 %v1795_v52, %v1795_v52  ;;  %v1610_v59 = vadd.f32 1.0, %v2943_v53  ;;  %2962 = vpow2.f32 %v2341_v13  ;;  %v672_v16 = vpop.f32.mrb[41].mxu1 }
 0x184   :  { %v2947_v61 = vpop.eup %2946  ;;  %2118 = vst.msk [vmem:[#allocation11 + $0x5c] sm:$0xf] %vm2094_vm3, %v2459_v39  ;;  %2964 = vrcp.f32 %v1612_v55  ;;  %v1613_v6 = vadd.f32 1.0, %v2945_v56  ;;  %v2346_v62 = vmul.f32 -1.442695, %v3602_v60  ;;  %v1220_v0 = vadd.f32 %v2673_v45, %v2607_v26  ;;  %v2611_v8 = vpop.f32.mrb[42].mxu1 }
 0x185   :  { %2116 = vst.msk [vmem:[#allocation11 + $0x54] sm:$0xf] %vm2094_vm3, %v2457_v57  ;;  %2966 = vrcp.f32 %v1610_v59  ;;  %v1611_v1 = vadd.f32 1.0, %v2947_v61  ;;  %v2344_v2 = vmul.f32 -1.442695, %v3606_v19  ;;  %v1212_v4 = vadd.f32 %v1211_v49, %v659_v35  ;;  %v2676_v9 = vpop.f32.mrb[40].mxu0 }
 0x186   :  { %v2949_v27 = vpop.eup %2948  ;;  %2968 = vrcp.f32 %v1613_v6  ;;  %v3614_v10 = vadd.f32 %v3411_v7, %v1220_v0  ;;  %v1233_v12 = vadd.f32 %v2676_v9, %v2610_v11  ;;  %v675_v28 = vpop.f32.mrb[43].mxu1 }
 0x187   :  { %v1224_v14 = vpop.f32.mrb[41].mxu0  ;;  %v2951_v15 = vpop.eup %2950  ;;  %v1800_v17 = vmul.f32 %v2949_v27, %v3530_v63  ;;  %2970 = vrcp.f32 %v1611_v1  ;;  %v3618_v18 = vadd.f32 %v3411_v7, %v1212_v4 }
 0x188   :  { %v1225_v20 = vadd.f32 %v1224_v14, %v672_v16  ;;  %v2677_v22 = vpop.f32.mrb[42].mxu0  ;;  %v2953_v24 = vpop.eup %2952  ;;  %v1798_v38 = vmul.f32 %v2951_v15, %v3537_v36  ;;  %2972 = vpow2.f32 %v2346_v62  ;;  %v2347_v26 = vmul.f32 -1.442695, %v3614_v10 }
 0x189   :  { %v3623_v29 = vadd.f32 %v3411_v7, %v1233_v12  ;;  %v1227_v43 = vpop.f32.mrb[43].mxu0  ;;  %v2955_v58 = vpop.eup %2954  ;;  %v2462_v34 = vpack.c.bf16 %v1800_v17, %v1800_v17  ;;  %v1801_v63 = vmul.f32 %v2953_v24, %v3541_v54  ;;  %2974 = vpow2.f32 %v2344_v2 }
 0x18a   :  { %v2345_v35 = vmul.f32 -1.442695, %v3618_v18  ;;  %v2957_v37 = vpop.eup %2956  ;;  %v2460_v40 = vpack.c.bf16 %v1798_v38, %v1798_v38  ;;  %v1799_v42 = vmul.f32 %v2955_v58, %v3546_v41  ;;  %2976 = vpow2.f32 %v2347_v26  ;;  %v2614_v54 = vpop.f32.mrb[44].mxu1 }
 0x18b   :  { %v2350_v36 = vmul.f32 -1.442695, %v3623_v29  ;;  %v2959_v44 = vpop.eup %2958  ;;  %2121 = vst.msk [vmem:[#allocation11 + $0x68] sm:$0xf] %vm2094_vm3, %v2462_v34  ;;  %v2463_v3 = vpack.c.bf16 %v1801_v63, %v1801_v63  ;;  %v1616_v45 = vadd.f32 1.0, %v2957_v37  ;;  %v3631_v46 = vadd.f32 %v3411_v7, %v1225_v20  ;;  %v688_v49 = vpop.f32.mrb[45].mxu1 }
 0x18c   :  { %2978 = vpow2.f32 %v2345_v35  ;;  %v2961_v47 = vpop.eup %2960  ;;  %2119 = vst.msk [vmem:[#allocation11 + $0x60] sm:$0xf] %vm2094_vm3, %v2460_v40  ;;  %v2461_v5 = vpack.c.bf16 %v1799_v42, %v1799_v42  ;;  %v1614_v13 = vadd.f32 1.0, %v2959_v44  ;;  %v1236_v41 = vadd.f32 %v2677_v22, %v2611_v8  ;;  %v2615_v39 = vpop.f32.mrb[46].mxu1 }
 0x18d   :  { %2980 = vpow2.f32 %v2350_v36  ;;  %v2963_v50 = vpop.eup %2962  ;;  %2122 = vst.msk [vmem:[#allocation11 + $0x6c] sm:$0xf] %vm2094_vm3, %v2463_v3  ;;  %v1617_v51 = vadd.f32 1.0, %v2961_v47  ;;  %v2348_v52 = vmul.f32 -1.442695, %v3631_v46  ;;  %v1228_v53 = vadd.f32 %v1227_v43, %v675_v28  ;;  %v2680_v55 = vpop.f32.mrb[44].mxu0 }
 0x18e   :  { %2982 = vrcp.f32 %v1616_v45  ;;  %v2965_v56 = vpop.eup %2964  ;;  %2120 = vst.msk [vmem:[#allocation11 + $0x64] sm:$0xf] %vm2094_vm3, %v2461_v5  ;;  %v1615_v57 = vadd.f32 1.0, %v2963_v50  ;;  %v3638_v59 = vadd.f32 %v3411_v7, %v1236_v41  ;;  %v1249_v11 = vadd.f32 %v2680_v55, %v2614_v54  ;;  %v691_v61 = vpop.f32.mrb[47].mxu1  ;;  %v3661_v54 = vld [vmem:[#allocation10] ss:$0 sm:$0xff] }
 0x18f   :  { %2984 = vrcp.f32 %v1614_v13  ;;  %v1240_v6 = vpop.f32.mrb[45].mxu0  ;;  %v2967_v62 = vpop.eup %2966  ;;  %v1804_v0 = vmul.f32 %v2965_v56, %v3554_v32  ;;  %v3642_v16 = vadd.f32 %v3411_v7, %v1228_v53 }
 0x190   :  { %2986 = vrcp.f32 %v1617_v51  ;;  %v1241_v1 = vadd.f32 %v1240_v6, %v688_v49  ;;  %v2681_v2 = vpop.f32.mrb[46].mxu0  ;;  %v2969_v4 = vpop.eup %2968  ;;  %v1802_v8 = vmul.f32 %v2967_v62, %v3561_v31  ;;  %v2351_v9 = vmul.f32 -1.442695, %v3638_v59 }
 0x191   :  { %2988 = vrcp.f32 %v1615_v57  ;;  %v3647_v27 = vadd.f32 %v3411_v7, %v1249_v11  ;;  %v1243_v12 = vpop.f32.mrb[47].mxu0  ;;  %v2971_v28 = vpop.eup %2970  ;;  %v2466_v14 = vpack.c.bf16 %v1804_v0, %v1804_v0  ;;  %v1805_v32 = vmul.f32 %v2969_v4, %v3566_v33 }
 0x192   :  { %2990 = vpow2.f32 %v2348_v52  ;;  %v2349_v15 = vmul.f32 -1.442695, %v3642_v16  ;;  %v2973_v17 = vpop.eup %2972  ;;  %v2464_v20 = vpack.c.bf16 %v1802_v8, %v1802_v8  ;;  %v1803_v22 = vmul.f32 %v2971_v28, %v3570_v48  ;;  %v2618_v33 = vpop.f32.mrb[48].mxu1 }
 0x193   :  { %2992 = vpow2.f32 %v2351_v9  ;;  %v2354_v31 = vmul.f32 -1.442695, %v3647_v27  ;;  %v2975_v24 = vpop.eup %2974  ;;  %2125 = vst.msk [vmem:[#allocation11 + $0x78] sm:$0xf] %vm2094_vm3, %v2466_v14  ;;  %v2467_v38 = vpack.c.bf16 %v1805_v32, %v1805_v32  ;;  %v1620_v26 = vadd.f32 1.0, %v2973_v17  ;;  %v704_v35 = vpop.f32.mrb[49].mxu1 }
 0x194   :  { %2994 = vpow2.f32 %v2349_v15  ;;  %v3655_v43 = vadd.f32 %v3411_v7, %v1241_v1  ;;  %v2977_v58 = vpop.eup %2976  ;;  %2123 = vst.msk [vmem:[#allocation11 + $0x70] sm:$0xf] %vm2094_vm3, %v2464_v20  ;;  %v2465_v34 = vpack.c.bf16 %v1803_v22, %v1803_v22  ;;  %v1618_v63 = vadd.f32 1.0, %v2975_v24  ;;  %v2619_v44 = vpop.f32.mrb[50].mxu1 }
 0x195   :  { %2996 = vpow2.f32 %v2354_v31  ;;  %v1252_v48 = vadd.f32 %v2681_v2, %v2615_v39  ;;  %2126 = vst.msk [vmem:[#allocation11 + $0x7c] sm:$0xf] %vm2094_vm3, %v2467_v38  ;;  %v1621_v40 = vadd.f32 1.0, %v2977_v58  ;;  %v1244_v36 = vadd.f32 %v1243_v12, %v691_v61  ;;  %v2684_v7 = vpop.f32.mrb[48].mxu0  ;;  %v707_v13 = vpop.f32.mrb[51].mxu1 }
 0x196   :  { %v2979_v37 = vpop.eup %2978  ;;  %2998 = vrcp.f32 %v1620_v26  ;;  %v2352_v42 = vmul.f32 -1.442695, %v3655_v43  ;;  %2124 = vst.msk [vmem:[#allocation11 + $0x74] sm:$0xf] %vm2094_vm3, %v2465_v34  ;;  %v1265_v5 = vadd.f32 %v2684_v7, %v2618_v33  ;;  %v1256_v41 = vpop.f32.mrb[49].mxu0 }
 0x197   :  { %v2981_v3 = vpop.eup %2980  ;;  %3000 = vrcp.f32 %v1618_v63  ;;  %v1619_v45 = vadd.f32 1.0, %v2979_v37  ;;  %v3664_v47 = vadd.f32 %v3661_v54, %v1252_v48  ;;  %v3667_v51 = vadd.f32 %v3661_v54, %v1244_v36  ;;  %v2685_v53 = vpop.f32.mrb[50].mxu0 }
 0x198   :  { %v2983_v49 = vpop.eup %2982  ;;  %3002 = vrcp.f32 %v1621_v40  ;;  %v1624_v50 = vadd.f32 1.0, %v2981_v3  ;;  %v1257_v52 = vadd.f32 %v1256_v41, %v704_v35  ;;  %v3672_v57 = vadd.f32 %v3661_v54, %v1265_v5  ;;  %v1259_v11 = vpop.f32.mrb[51].mxu0 }
 0x199   :  { %v2985_v39 = vpop.eup %2984  ;;  %v1808_v55 = vmul.f32 %v2983_v49, %v3578_v21  ;;  %3004 = vrcp.f32 %v1619_v45  ;;  %v2355_v56 = vmul.f32 -1.442695, %v3664_v47  ;;  %v2353_v62 = vmul.f32 -1.442695, %v3667_v51 }
 0x19a   :  { %v2987_v61 = vpop.eup %2986  ;;  %v1806_v6 = vmul.f32 %v2985_v39, %v3582_v23  ;;  %3006 = vrcp.f32 %v1624_v50  ;;  %v3677_v0 = vadd.f32 %v3661_v54, %v1257_v52  ;;  %v2358_v4 = vmul.f32 -1.442695, %v3672_v57  ;;  %v2622_v28 = vpop.f32.mrb[52].mxu1 }
 0x19b   :  { %v2989_v1 = vpop.eup %2988  ;;  %v2470_v2 = vpack.c.bf16 %v1808_v55, %v1808_v55  ;;  %v1809_v21 = vmul.f32 %v2987_v61, %v3590_v25  ;;  %3008 = vpow2.f32 %v2352_v42  ;;  %v1268_v17 = vadd.f32 %v2685_v53, %v2619_v44  ;;  %v720_v20 = vpop.f32.mrb[53].mxu1 }
 0x19c   :  { %v2991_v8 = vpop.eup %2990  ;;  %v2468_v9 = vpack.c.bf16 %v1806_v6, %v1806_v6  ;;  %v1807_v12 = vmul.f32 %v2989_v1, %v3594_v30  ;;  %3010 = vpow2.f32 %v2355_v56  ;;  %v2356_v23 = vmul.f32 -1.442695, %v3677_v0  ;;  %v2623_v30 = vpop.f32.mrb[54].mxu1 }
 0x19d   :  { %v2993_v14 = vpop.eup %2992  ;;  %2129 = vst.msk [vmem:[#allocation11 + $0x88] sm:$0xf] %vm2094_vm3, %v2470_v2  ;;  %v2471_v32 = vpack.c.bf16 %v1809_v21, %v1809_v21  ;;  %v1622_v15 = vadd.f32 1.0, %v2991_v8  ;;  %3012 = vpow2.f32 %v2353_v62  ;;  %v1260_v24 = vadd.f32 %v1259_v11, %v707_v13  ;;  %v2688_v38 = vpop.f32.mrb[52].mxu0 }
 0x19e   :  { %v2995_v25 = vpop.eup %2994  ;;  %2127 = vst.msk [vmem:[#allocation11 + $0x80] sm:$0xf] %vm2094_vm3, %v2468_v9  ;;  %v2469_v22 = vpack.c.bf16 %v1807_v12, %v1807_v12  ;;  %v1625_v31 = vadd.f32 1.0, %v2993_v14  ;;  %3014 = vpow2.f32 %v2358_v4  ;;  %v3687_v58 = vadd.f32 %v3661_v54, %v1268_v17  ;;  %v723_v63 = vpop.f32.mrb[55].mxu1 }
 0x19f   :  { %v2997_v26 = vpop.eup %2996  ;;  %2130 = vst.msk [vmem:[#allocation11 + $0x8c] sm:$0xf] %vm2094_vm3, %v2471_v32  ;;  %3016 = vrcp.f32 %v1622_v15  ;;  %v1623_v33 = vadd.f32 1.0, %v2995_v25  ;;  %v1281_v34 = vadd.f32 %v2688_v38, %v2622_v28  ;;  %v1272_v48 = vpop.f32.mrb[53].mxu0  ;;  %v3691_v40 = vadd.f32 %v3661_v54, %v1260_v24 }
 0x1a0   :  { %v2999_v35 = vpop.eup %2998  ;;  %2128 = vst.msk [vmem:[#allocation11 + $0x84] sm:$0xf] %vm2094_vm3, %v2469_v22  ;;  %3018 = vrcp.f32 %v1625_v31  ;;  %v1628_v37 = vadd.f32 1.0, %v2997_v26  ;;  %v1273_v42 = vadd.f32 %v1272_v48, %v720_v20  ;;  %v2689_v36 = vpop.f32.mrb[54].mxu0  ;;  %v2359_v3 = vmul.f32 -1.442695, %v3687_v58 }
 0x1a1   :  { %v3001_v44 = vpop.eup %3000  ;;  %v1812_v7 = vmul.f32 %v2999_v35, %v3602_v60  ;;  %3020 = vrcp.f32 %v1623_v33  ;;  %v3696_v45 = vadd.f32 %v3661_v54, %v1281_v34  ;;  %v1275_v5 = vpop.f32.mrb[55].mxu0  ;;  %v2357_v49 = vmul.f32 -1.442695, %v3691_v40 }
 0x1a2   :  { %v3003_v13 = vpop.eup %3002  ;;  %v1810_v41 = vmul.f32 %v3001_v44, %v3606_v19  ;;  %3022 = vrcp.f32 %v1628_v37  ;;  %v3701_v50 = vadd.f32 %v3661_v54, %v1273_v42  ;;  %v2626_v61 = vpop.f32.mrb[56].mxu1  ;;  %v1284_v2 = vadd.f32 %v2689_v36, %v2623_v30 }
 0x1a3   :  { %v3005_v52 = vpop.eup %3004  ;;  %v2474_v53 = vpack.c.bf16 %v1812_v7, %v1812_v7  ;;  %v1813_v60 = vmul.f32 %v3003_v13, %v3614_v10  ;;  %3024 = vpow2.f32 %v2356_v23  ;;  %v2362_v39 = vmul.f32 -1.442695, %v3696_v45  ;;  %v736_v10 = vpop.f32.mrb[57].mxu1 }
 0x1a4   :  { %v3007_v55 = vpop.eup %3006  ;;  %v2472_v56 = vpack.c.bf16 %v1810_v41, %v1810_v41  ;;  %v1811_v11 = vmul.f32 %v3005_v52, %v3618_v18  ;;  %3026 = vpow2.f32 %v2359_v3  ;;  %v2360_v19 = vmul.f32 -1.442695, %v3701_v50  ;;  %v2627_v9 = vpop.f32.mrb[58].mxu1 }
 0x1a5   :  { %v3009_v6 = vpop.eup %3008  ;;  %2133 = vst.msk [vmem:[#allocation11 + $0x98] sm:$0xf] %vm2094_vm3, %v2474_v53  ;;  %v2475_v62 = vpack.c.bf16 %v1813_v60, %v1813_v60  ;;  %v1816_v1 = vmul.f32 %v3007_v55, %v3623_v29  ;;  %3028 = vpow2.f32 %v2357_v49  ;;  %v1276_v18 = vadd.f32 %v1275_v5, %v723_v63  ;;  %v2692_v12 = vpop.f32.mrb[56].mxu0 }
 0x1a6   :  { %v3011_v21 = vpop.eup %3010  ;;  %2131 = vst.msk [vmem:[#allocation11 + $0x90] sm:$0xf] %vm2094_vm3, %v2472_v56  ;;  %v2473_v4 = vpack.c.bf16 %v1811_v11, %v1811_v11  ;;  %v1626_v8 = vadd.f32 1.0, %v3009_v6  ;;  %3030 = vpow2.f32 %v2362_v39  ;;  %v3712_v29 = vadd.f32 %v3661_v54, %v1284_v2  ;;  %v739_v32 = vpop.f32.mrb[59].mxu1 }
 0x1a7   :  { %v3013_v23 = vpop.eup %3012  ;;  %2134 = vst.msk [vmem:[#allocation11 + $0x9c] sm:$0xf] %vm2094_vm3, %v2475_v62  ;;  %v2478_v28 = vpack.c.bf16 %v1816_v1, %v1816_v1  ;;  %v1629_v14 = vadd.f32 1.0, %v3011_v21  ;;  %3032 = vpow2.f32 %v2360_v19  ;;  %v1288_v15 = vpop.f32.mrb[57].mxu0  ;;  %v3716_v25 = vadd.f32 %v3661_v54, %v1276_v18 }
 0x1a8   :  { %v3015_v17 = vpop.eup %3014  ;;  %2132 = vst.msk [vmem:[#allocation11 + $0x94] sm:$0xf] %vm2094_vm3, %v2473_v4  ;;  %3034 = vrcp.f32 %v1626_v8  ;;  %v1627_v20 = vadd.f32 1.0, %v3013_v23  ;;  %v1297_v22 = vadd.f32 %v2692_v12, %v2626_v61  ;;  %v2693_v31 = vpop.f32.mrb[58].mxu0  ;;  %v2363_v38 = vmul.f32 -1.442695, %v3712_v29 }
 0x1a9   :  { %v3017_v24 = vpop.eup %3016  ;;  %2137 = vst.msk [vmem:[#allocation11 + $0xa8] sm:$0xf] %vm2094_vm3, %v2478_v28  ;;  %3036 = vrcp.f32 %v1629_v14  ;;  %v1632_v30 = vadd.f32 1.0, %v3015_v17  ;;  %v1289_v26 = vadd.f32 %v1288_v15, %v736_v10  ;;  %v1291_v33 = vpop.f32.mrb[59].mxu0  ;;  %v2361_v48 = vmul.f32 -1.442695, %v3716_v25 }
 0x1aa   :  { %v3019_v34 = vpop.eup %3018  ;;  %v1814_v63 = vmul.f32 %v3017_v24, %v3631_v46  ;;  %3038 = vrcp.f32 %v1627_v20  ;;  %v3723_v35 = vadd.f32 %v3661_v54, %v1297_v22  ;;  %v1300_v44 = vadd.f32 %v2693_v31, %v2627_v9  ;;  %v2630_v13 = vpop.f32.mrb[60].mxu1 }
 0x1ab   :  { %v3021_v37 = vpop.eup %3020  ;;  %v1817_v42 = vmul.f32 %v3019_v34, %v3638_v59  ;;  %3040 = vrcp.f32 %v1632_v30  ;;  %v3727_v36 = vadd.f32 %v3661_v54, %v1289_v26  ;;  %v752_v53 = vpop.f32.mrb[61].mxu1  ;;  %v1292_v6 = vadd.f32 %v1291_v33, %v739_v32 }
 0x1ac   :  { %v3023_v7 = vpop.eup %3022  ;;  %v2476_v3 = vpack.c.bf16 %v1814_v63, %v1814_v63  ;;  %v1815_v5 = vmul.f32 %v3021_v37, %v3642_v16  ;;  %3042 = vpow2.f32 %v2363_v38  ;;  %v2366_v46 = vmul.f32 -1.442695, %v3723_v35  ;;  %v2631_v56 = vpop.f32.mrb[62].mxu1 }
 0x1ad   :  { %v3025_v41 = vpop.eup %3024  ;;  %v2479_v49 = vpack.c.bf16 %v1817_v42, %v1817_v42  ;;  %v1820_v52 = vmul.f32 %v3023_v7, %v3647_v27  ;;  %3044 = vpow2.f32 %v2361_v48  ;;  %v2364_v59 = vmul.f32 -1.442695, %v3727_v36  ;;  %v2696_v11 = vpop.f32.mrb[60].mxu0 }
 0x1ae   :  { %v3027_v60 = vpop.eup %3026  ;;  %2135 = vst.msk [vmem:[#allocation11 + $0xa0] sm:$0xf] %vm2094_vm3, %v2476_v3  ;;  %v2477_v39 = vpack.c.bf16 %v1815_v5, %v1815_v5  ;;  %v1630_v55 = vadd.f32 1.0, %v3025_v41  ;;  %3046 = vpow2.f32 %v2366_v46  ;;  %v3735_v16 = vadd.f32 %v3661_v54, %v1300_v44  ;;  %v755_v62 = vpop.f32.mrb[63].mxu1 }
 0x1af   :  { %v3029_v19 = vpop.eup %3028  ;;  %2138 = vst.msk [vmem:[#allocation11 + $0xac] sm:$0xf] %vm2094_vm3, %v2479_v49  ;;  %v2482_v61 = vpack.c.bf16 %v1820_v52, %v1820_v52  ;;  %v1633_v27 = vadd.f32 1.0, %v3027_v60  ;;  %3048 = vpow2.f32 %v2364_v59  ;;  %v1304_v1 = vpop.f32.mrb[61].mxu0  ;;  %v1313_v4 = vadd.f32 %v2696_v11, %v2630_v13 }
 0x1b0   :  { %v3031_v2 = vpop.eup %3030  ;;  %2136 = vst.msk [vmem:[#allocation11 + $0xa4] sm:$0xf] %vm2094_vm3, %v2477_v39  ;;  %3050 = vrcp.f32 %v1630_v55  ;;  %v1631_v10 = vadd.f32 1.0, %v3029_v19  ;;  %v2367_v21 = vmul.f32 -1.442695, %v3735_v16  ;;  %v2697_v8 = vpop.f32.mrb[62].mxu0  ;;  %v3742_v12 = vadd.f32 %v3661_v54, %v1292_v6 }
 0x1b1   :  { %v3033_v18 = vpop.eup %3032  ;;  %2141 = vst.msk [vmem:[#allocation11 + $0xb8] sm:$0xf] %vm2094_vm3, %v2482_v61  ;;  %3052 = vrcp.f32 %v1633_v27  ;;  %v1636_v9 = vadd.f32 1.0, %v3031_v2  ;;  %v1305_v23 = vadd.f32 %v1304_v1, %v752_v53  ;;  %v1307_v28 = vpop.f32.mrb[63].mxu0  ;;  %v3745_v15 = vadd.f32 %v3661_v54, %v1313_v4 }
 0x1b2   :  { %v3035_v14 = vpop.eup %3034  ;;  %3054 = vrcp.f32 %v1631_v10  ;;  %v1634_v32 = vadd.f32 1.0, %v3033_v18  ;;  %v1316_v17 = vadd.f32 %v2697_v8, %v2631_v56  ;;  %v2365_v31 = vmul.f32 -1.442695, %v3742_v12 }
 0x1b3   :  { %v3037_v20 = vpop.eup %3036  ;;  %v1818_v22 = vmul.f32 %v3035_v14, %v3655_v43  ;;  %3056 = vrcp.f32 %v1636_v9  ;;  %v3750_v24 = vadd.f32 %v3661_v54, %v1305_v23  ;;  %v2370_v26 = vmul.f32 -1.442695, %v3745_v15 }
 0x1b4   :  { %v3039_v30 = vpop.eup %3038  ;;  %v1821_v38 = vmul.f32 %v3037_v20, %v3664_v47  ;;  %3058 = vrcp.f32 %v1634_v32  ;;  %v3755_v33 = vadd.f32 %v3661_v54, %v1316_v17  ;;  %v1308_v5 = vadd.f32 %v1307_v28, %v755_v62 }
 0x1b5   :  { %v3041_v34 = vpop.eup %3040  ;;  %v2480_v63 = vpack.c.bf16 %v1818_v22, %v1818_v22  ;;  %v1819_v48 = vmul.f32 %v3039_v30, %v3667_v51  ;;  %3060 = vpow2.f32 %v2367_v21  ;;  %v2368_v43 = vmul.f32 -1.442695, %v3750_v24 }
 0x1b6   :  { %v3043_v37 = vpop.eup %3042  ;;  %v2483_v42 = vpack.c.bf16 %v1821_v38, %v1821_v38  ;;  %v1824_v44 = vmul.f32 %v3041_v34, %v3672_v57  ;;  %3062 = vpow2.f32 %v2365_v31  ;;  %v2371_v57 = vmul.f32 -1.442695, %v3755_v33 }
 0x1b7   :  { %v3045_v7 = vpop.eup %3044  ;;  %2139 = vst.msk [vmem:[#allocation11 + $0xb0] sm:$0xf] %vm2094_vm3, %v2480_v63  ;;  %v2481_v47 = vpack.c.bf16 %v1819_v48, %v1819_v48  ;;  %v1637_v3 = vadd.f32 1.0, %v3043_v37  ;;  %3064 = vpow2.f32 %v2370_v26  ;;  %v3765_v52 = vadd.f32 %v3661_v54, %v1308_v5 }
 0x1b8   :  { %v3047_v46 = vpop.eup %3046  ;;  %2142 = vst.msk [vmem:[#allocation11 + $0xbc] sm:$0xf] %vm2094_vm3, %v2483_v42  ;;  %v2486_v13 = vpack.c.bf16 %v1824_v44, %v1824_v44  ;;  %v1635_v51 = vadd.f32 1.0, %v3045_v7  ;;  %3066 = vpow2.f32 %v2368_v43 }
 0x1b9   :  { %v3049_v41 = vpop.eup %3048  ;;  %2140 = vst.msk [vmem:[#allocation11 + $0xb4] sm:$0xf] %vm2094_vm3, %v2481_v47  ;;  %3068 = vrcp.f32 %v1637_v3  ;;  %v1640_v49 = vadd.f32 1.0, %v3047_v46  ;;  %v2369_v55 = vmul.f32 -1.442695, %v3765_v52 }
 0x1ba   :  { %v3051_v59 = vpop.eup %3050  ;;  %2145 = vst.msk [vmem:[#allocation11 + $0xc8] sm:$0xf] %vm2094_vm3, %v2486_v13  ;;  %3070 = vrcp.f32 %v1635_v51  ;;  %v1638_v53 = vadd.f32 1.0, %v3049_v41 }
 0x1bb   :  { %v3053_v60 = vpop.eup %3052  ;;  %v1822_v39 = vmul.f32 %v3051_v59, %v3677_v0  ;;  %3072 = vrcp.f32 %v1640_v49 }
 0x1bc   :  { %v3055_v56 = vpop.eup %3054  ;;  %v1825_v11 = vmul.f32 %v3053_v60, %v3687_v58  ;;  %3074 = vrcp.f32 %v1638_v53 }
 0x1bd   :  { %v3057_v19 = vpop.eup %3056  ;;  %v2484_v61 = vpack.c.bf16 %v1822_v39, %v1822_v39  ;;  %v1823_v54 = vmul.f32 %v3055_v56, %v3691_v40  ;;  %3076 = vpow2.f32 %v2371_v57 }
 0x1be   :  { %v3059_v27 = vpop.eup %3058  ;;  %v2487_v6 = vpack.c.bf16 %v1825_v11, %v1825_v11  ;;  %v1828_v62 = vmul.f32 %v3057_v19, %v3696_v45  ;;  %3078 = vpow2.f32 %v2369_v55 }
 0x1bf   :  { %v3061_v1 = vpop.eup %3060  ;;  %2143 = vst.msk [vmem:[#allocation11 + $0xc0] sm:$0xf] %vm2094_vm3, %v2484_v61  ;;  %v2485_v0 = vpack.c.bf16 %v1823_v54, %v1823_v54  ;;  %v1826_v2 = vmul.f32 %v3059_v27, %v3701_v50 }
 0x1c0   :  { %v3063_v10 = vpop.eup %3062  ;;  %2146 = vst.msk [vmem:[#allocation11 + $0xcc] sm:$0xf] %vm2094_vm3, %v2487_v6  ;;  %v2490_v58 = vpack.c.bf16 %v1828_v62, %v1828_v62  ;;  %v1641_v21 = vadd.f32 1.0, %v3061_v1 }
 0x1c1   :  { %v3065_v4 = vpop.eup %3064  ;;  %2144 = vst.msk [vmem:[#allocation11 + $0xc4] sm:$0xf] %vm2094_vm3, %v2485_v0  ;;  %v2488_v40 = vpack.c.bf16 %v1826_v2, %v1826_v2  ;;  %v1639_v8 = vadd.f32 1.0, %v3063_v10 }
 0x1c2   :  { %v3067_v18 = vpop.eup %3066  ;;  %2149 = vst.msk [vmem:[#allocation11 + $0xd8] sm:$0xf] %vm2094_vm3, %v2490_v58  ;;  %3080 = vrcp.f32 %v1641_v21  ;;  %v1644_v45 = vadd.f32 1.0, %v3065_v4 }
 0x1c3   :  { %v3069_v9 = vpop.eup %3068  ;;  %2147 = vst.msk [vmem:[#allocation11 + $0xd0] sm:$0xf] %vm2094_vm3, %v2488_v40  ;;  %3082 = vrcp.f32 %v1639_v8  ;;  %v1642_v50 = vadd.f32 1.0, %v3067_v18 }
 0x1c4   :  { %v3071_v23 = vpop.eup %3070  ;;  %v1829_v28 = vmul.f32 %v3069_v9, %v3712_v29  ;;  %3084 = vrcp.f32 %v1644_v45 }
 0x1c5   :  { %v3073_v14 = vpop.eup %3072  ;;  %v1827_v32 = vmul.f32 %v3071_v23, %v3716_v25  ;;  %3086 = vrcp.f32 %v1642_v50 }
 0x1c6   :  { %v3075_v17 = vpop.eup %3074  ;;  %v2491_v20 = vpack.c.bf16 %v1829_v28, %v1829_v28  ;;  %v1832_v22 = vmul.f32 %v3073_v14, %v3723_v35 }
 0x1c7   :  { %v3077_v31 = vpop.eup %3076  ;;  %v2489_v30 = vpack.c.bf16 %v1827_v32, %v1827_v32  ;;  %v1830_v38 = vmul.f32 %v3075_v17, %v3727_v36 }
 0x1c8   :  { %v3079_v26 = vpop.eup %3078  ;;  %2150 = vst.msk [vmem:[#allocation11 + $0xdc] sm:$0xf] %vm2094_vm3, %v2491_v20  ;;  %v2494_v34 = vpack.c.bf16 %v1832_v22, %v1832_v22  ;;  %v1645_v63 = vadd.f32 1.0, %v3077_v31 }
 0x1c9   :  { %2148 = vst.msk [vmem:[#allocation11 + $0xd4] sm:$0xf] %vm2094_vm3, %v2489_v30  ;;  %v2492_v29 = vpack.c.bf16 %v1830_v38, %v1830_v38  ;;  %v1643_v48 = vadd.f32 1.0, %v3079_v26 }
 0x1ca   :  { %2153 = vst.msk [vmem:[#allocation11 + $0xe8] sm:$0xf] %vm2094_vm3, %v2494_v34  ;;  %3088 = vrcp.f32 %v1645_v63 }
 0x1cb   :  { %2151 = vst.msk [vmem:[#allocation11 + $0xe0] sm:$0xf] %vm2094_vm3, %v2492_v29  ;;  %3090 = vrcp.f32 %v1643_v48 }
 0x1cc   :  { %v3081_v25 = vpop.eup %3080 }
 0x1cd   :  { %v3083_v35 = vpop.eup %3082  ;;  %v1833_v43 = vmul.f32 %v3081_v25, %v3735_v16 }
 0x1ce   :  { %v3085_v36 = vpop.eup %3084  ;;  %v1831_v37 = vmul.f32 %v3083_v35, %v3742_v12 }
 0x1cf   :  { %v3087_v42 = vpop.eup %3086  ;;  %v2495_v44 = vpack.c.bf16 %v1833_v43, %v1833_v43  ;;  %v1836_v7 = vmul.f32 %v3085_v36, %v3745_v15 }
 0x1d0   :  { %v2493_v47 = vpack.c.bf16 %v1831_v37, %v1831_v37  ;;  %v1834_v3 = vmul.f32 %v3087_v42, %v3750_v24 }
 0x1d1   :  { %2154 = vst.msk [vmem:[#allocation11 + $0xec] sm:$0xf] %vm2094_vm3, %v2495_v44  ;;  %v2498_v5 = vpack.c.bf16 %v1836_v7, %v1836_v7 }
 0x1d2   :  { %2152 = vst.msk [vmem:[#allocation11 + $0xe4] sm:$0xf] %vm2094_vm3, %v2493_v47  ;;  %v2496_v46 = vpack.c.bf16 %v1834_v3, %v1834_v3 }
 0x1d3   :  { %2157 = vst.msk [vmem:[#allocation11 + $0xf8] sm:$0xf] %vm2094_vm3, %v2498_v5 }
 0x1d4   :  { %v3089_v13 = vpop.eup %3088  ;;  %2155 = vst.msk [vmem:[#allocation11 + $0xf0] sm:$0xf] %vm2094_vm3, %v2496_v46 }
 0x1d5   :  { %v3091_v16 = vpop.eup %3090  ;;  %v1837_v12 = vmul.f32 %v3089_v13, %v3755_v33 }
 0x1d6   :  { %v1835_v15 = vmul.f32 %v3091_v16, %v3765_v52 }
 0x1d7   :  { %v2499_v51 = vpack.c.bf16 %v1837_v12, %v1837_v12 }
 0x1d8   :  { %v2497_v24 = vpack.c.bf16 %v1835_v15, %v1835_v15 }
 0x1d9   :  { %2158 = vst.msk [vmem:[#allocation11 + $0xfc] sm:$0xf] %vm2094_vm3, %v2499_v51 }
 0x1da   :  { %2156 = vst.msk [vmem:[#allocation11 + $0xf4] sm:$0xf] %vm2094_vm3, %v2497_v24 }
 0x1db   :  { %3214 = shalt.err (!%p3211_p2)
}
 0x1dc   :  { %s3215_s8 = scalar_lea.hbm %s3819_s5, 4096 }
 0x1dd   :  { %p3216_p3 = scmp.ne.s32.totalorder %s3819_s5, %s3215_s8  ;;  %p3219_p4 = scmp.lt.u32.totalorder %s3215_s8, %s3819_s5 }
 0x1df   :  { %p3221_p5 = pnand %p3219_p4, %p3216_p3 }
 0x1e1   :  { %3224 = shalt.err (!%p3221_p5)
}
 0x1e2   :  { %2170 = dma.vmem_to_hbm [thread:$0]  %s2165_s29, 4096, %s3819_s5, [#allocation4], %s3235_s30, %s3235_s30, %s3236_s6  }
 0x1e3   :  { %3231 = dma.done.wait [#allocation4], 4096  }
 0x1e4   :  { %3232 = vsyncadd [#allocation4], 4294963200 }
 0x1e5   :  { %2174 = vsyncpa [#allocation3], 1 }
 0x1e6   :  { %2175 = vsyncpa [#allocation6], 1 }
 0x1e7   :  { %2176 = vsyncpa [#allocation9], 1 }
 0x1e8   :  { %2177 = vsyncpa [#allocation4], 1 }

// kernel: darkfpn_apply.27
= control target key start
LH: loop header
LB: loop body
LE: loop exit
PB: predicated region body
PF: predicated region fallthrough
CT: control target
= control target key end

     0   :  { %10 = vsyncpa [#allocation3], 0  ;;  %s1344_s0 = inlined_call_operand.hbm [shape: bf16[128,16], index: 0, kind: input, shape index: {}]   ;;  %s1345_s1 = inlined_call_operand.hbm [shape: bf16[128,32], index: 1, kind: input, shape index: {}]   ;;  %s1346_s2 = inlined_call_operand.hbm [shape: bf16[16,32], index: 2, kind: input, shape index: {}]   ;;  %s1347_s3 = inlined_call_operand.hbm [shape: bf16[32,32], index: 3, kind: input, shape index: {}]   ;;  %s1348_s4 = inlined_call_operand.hbm [shape: f32[1,32], index: 4, kind: input, shape index: {}]   ;;  %s1349_s5 = inlined_call_operand.hbm [shape: bf16[128,32], index: 5, kind: output, shape index: {}]  }
   0x1   :  { %11 = vsyncpa [#allocation6], 0 }
   0x2   :  { %12 = vsyncpa [#allocation9], 0 }
   0x3   :  { %13 = vsyncpa [#allocation4], 0  ;;  %s1091_s18 = smov [#allocation5]   ;;  %s1092_s20 = smov [#allocation8]  }
   0x4   :  { %s31_s19 = sshll.u32 %s1091_s18, 4  ;;  %s55_s21 = sshll.u32 %s1092_s20, 4  ;;  %s32_s19 = int_to_ptr.vmem [resolvable:$true] %s31_s19  ;;  %s1129_s21 = int_to_ptr.vmem [resolvable:$true] %s55_s21 }
   0x5   :  { %s951_s24 = scalar_lea.hbm %s1345_s1, 1024 }
   0x6   :  { %p952_p0 = scmp.ne.s32.totalorder %s1345_s1, %s951_s24  ;;  %p955_p1 = scmp.lt.u32.totalorder %s951_s24, %s1345_s1 }
   0x8   :  { %p957_p2 = pnand %p955_p1, %p952_p0 }
   0xa   :  { %960 = shalt.err (!%p957_p2)
}
   0xb   :  { %s961_s29 = scalar_lea.vmem %s32_s19, 1024  ;;  %p966_p4 = scmp.lt.s32.totalorder %s32_s19, %s32_s19 }
   0xc   :  { %p962_p3 = scmp.ne.s32.totalorder %s32_s19, %s961_s29  ;;  %p967_p5 = scmp.lt.s32.totalorder %s961_s29, %s961_s29 }
   0xe   :  { %p968_p6 = por %p967_p5, %p966_p4 }
  0x10   :  { %p969_p7 = pnand %p968_p6, %p962_p3 }
  0x12   :  { %972 = shalt.err (!%p969_p7)
}
  0x13   :  { %s1093_s30 = smov 64   ;;  %s1094_s6 = smov 4  }
  0x14   :  { %37 = dma.hbm_to_vmem [thread:$0]  %s1345_s1, 1024, %s32_s19, [#allocation6], %s1093_s30, %s1093_s30, %s1094_s6  }
  0x15   :  { %s973_s11 = scalar_lea.hbm %s1347_s3, 256 }
  0x16   :  { %p974_p8 = scmp.ne.s32.totalorder %s1347_s3, %s973_s11  ;;  %p977_p9 = scmp.lt.u32.totalorder %s973_s11, %s1347_s3 }
  0x18   :  { %p979_p10 = pnand %p977_p9, %p974_p8 }
  0x1a   :  { %982 = shalt.err (!%p979_p10)
}
  0x1b   :  { %s983_s16 = scalar_lea.vmem %s1129_s21, 256  ;;  %p988_p12 = scmp.lt.s32.totalorder %s1129_s21, %s1129_s21 }
  0x1c   :  { %p984_p11 = scmp.ne.s32.totalorder %s1129_s21, %s983_s16  ;;  %p989_p13 = scmp.lt.s32.totalorder %s983_s16, %s983_s16 }
  0x1e   :  { %p990_p0 = por %p989_p13, %p988_p12 }
  0x20   :  { %p991_p1 = pnand %p990_p0, %p984_p11 }
  0x22   :  { %994 = shalt.err (!%p991_p1)
}
  0x23   :  { %61 = dma.hbm_to_vmem [thread:$0]  %s1347_s3, 256, %s1129_s21, [#allocation9], %s1093_s30, %s1093_s30, %s1094_s6  }
  0x24   :  { %s1095_s18 = smov [#allocation2]   ;;  %s1096_s20 = smov [#allocation7]  }
  0x25   :  { %s19_s19 = sshll.u32 %s1095_s18, 4  ;;  %s43_s22 = sshll.u32 %s1096_s20, 4  ;;  %s20_s19 = int_to_ptr.vmem [resolvable:$true] %s19_s19  ;;  %s1166_s22 = int_to_ptr.vmem [resolvable:$true] %s43_s22 }
  0x26   :  { %s995_s25 = scalar_lea.hbm %s1344_s0, 1024 }
  0x27   :  { %p996_p2 = scmp.ne.s32.totalorder %s1344_s0, %s995_s25  ;;  %p999_p3 = scmp.lt.u32.totalorder %s995_s25, %s1344_s0 }
  0x29   :  { %p1001_p4 = pnand %p999_p3, %p996_p2 }
  0x2b   :  { %1004 = shalt.err (!%p1001_p4)
}
  0x2c   :  { %s1005_s3 = scalar_lea.vmem %s20_s19, 1024  ;;  %p1010_p6 = scmp.lt.s32.totalorder %s20_s19, %s20_s19 }
  0x2d   :  { %p1006_p5 = scmp.ne.s32.totalorder %s20_s19, %s1005_s3  ;;  %p1011_p7 = scmp.lt.s32.totalorder %s1005_s3, %s1005_s3 }
  0x2f   :  { %p1012_p8 = por %p1011_p7, %p1010_p6 }
  0x31   :  { %p1013_p9 = pnand %p1012_p8, %p1006_p5 }
  0x33   :  { %1016 = shalt.err (!%p1013_p9)
}
  0x34   :  { %25 = dma.hbm_to_vmem [thread:$0]  %s1344_s0, 1024, %s20_s19, [#allocation3], %s1093_s30, %s1093_s30, %s1094_s6  }
  0x35   :  { %s1017_s10 = scalar_lea.hbm %s1346_s2, 128 }
  0x36   :  { %p1018_p10 = scmp.ne.s32.totalorder %s1346_s2, %s1017_s10  ;;  %p1021_p11 = scmp.lt.u32.totalorder %s1017_s10, %s1346_s2 }
  0x38   :  { %p1023_p12 = pnand %p1021_p11, %p1018_p10 }
  0x3a   :  { %1026 = shalt.err (!%p1023_p12)
}
  0x3b   :  { %s1027_s15 = scalar_lea.vmem %s1166_s22, 128  ;;  %p1032_p0 = scmp.lt.s32.totalorder %s1166_s22, %s1166_s22 }
  0x3c   :  { %p1028_p13 = scmp.ne.s32.totalorder %s1166_s22, %s1027_s15  ;;  %p1033_p1 = scmp.lt.s32.totalorder %s1027_s15, %s1027_s15 }
  0x3e   :  { %p1034_p2 = por %p1033_p1, %p1032_p0 }
  0x40   :  { %p1035_p3 = pnand %p1034_p2, %p1028_p13 }
  0x42   :  { %1038 = shalt.err (!%p1035_p3)
}
  0x43   :  { %49 = dma.hbm_to_vmem [thread:$0]  %s1346_s2, 128, %s1166_s22, [#allocation6], %s1093_s30, %s1093_s30, %s1094_s6  }
  0x44   :  { %s1097_s1 = smov [#allocation10]   ;;  %s1039_s20 = scalar_lea.hbm %s1348_s4, 16 }
  0x45   :  { %s68_s17 = sshll.u32 %s1097_s1, 4  ;;  %p1040_p4 = scmp.ne.s32.totalorder %s1348_s4, %s1039_s20  ;;  %s69_s17 = int_to_ptr.vmem [resolvable:$true] %s68_s17 }
  0x46   :  { %p1043_p5 = scmp.lt.u32.totalorder %s1039_s20, %s1348_s4 }
  0x48   :  { %p1045_p6 = pnand %p1043_p5, %p1040_p4 }
  0x4a   :  { %1048 = shalt.err (!%p1045_p6)
}
  0x4b   :  { %s1049_s27 = scalar_lea.vmem %s69_s17, 16  ;;  %s1053_s2 = scalar_lea.vmem %s69_s17, 32 }
  0x4c   :  { %p1050_p7 = scmp.ne.s32.totalorder %s69_s17, %s1049_s27  ;;  %p1054_p8 = scmp.lt.s32.totalorder %s69_s17, %s69_s17 }
  0x4d   :  { %p1055_p9 = scmp.lt.s32.totalorder %s1053_s2, %s1049_s27 }
  0x4f   :  { %p1056_p10 = por %p1055_p9, %p1054_p8 }
  0x51   :  { %p1057_p11 = pnand %p1056_p10, %p1050_p7 }
  0x53   :  { %1060 = shalt.err (!%p1057_p11)
}
  0x54   :  { %71 = dma.hbm_to_vmem [thread:$0]  %s1348_s4, 16, %s69_s17, [#allocation9]  }
  0x55   :  { %1083 = dma.done.wait [#allocation3], 1024  }
  0x56   :  { %1084 = vsyncadd [#allocation3], 4294966272 }
  0x57   :  { %1085 = dma.done.wait [#allocation6], 1152  }
  0x58   :  { %1086 = vsyncadd [#allocation6], 4294966144 }
  0x59   :  { %1087 = dma.done.wait [#allocation9], 272  }
  0x5a   :  { %1088 = vsyncadd [#allocation9], 4294967024  ;;  %v868_v0 = vld [vmem:[#allocation8] sm:$0xff]   ;;  %v869_v1 = vld [vmem:[#allocation7] sm:$0xff]   ;;  %vm346_vm0 = vcmask 130048   ;;  %vm178_vm1 = vcmask 261120  }
  0x5b   :  { %806 = vmatprep.subr.bf16.mxu1 %v868_v0  ;;  %v870_v2 = vld [vmem:[#allocation8 + $0x8] sm:$0xff]   ;;  %826 = vmatprep.subr.bf16.mxu0 %v869_v1  ;;  %v871_v3 = vld [vmem:[#allocation2] sm:$0xff]   ;;  %v872_v4 = vld [vmem:[#allocation2 + $0x8] sm:$0xff]   ;;  %vm667_vm2 = vcmask 257024   ;;  %s1098_s4 = smov [#allocation11]  }
  0x5c   :  { %807 = vmatpush3.bf16.msra.mxu1 %v868_v0  ;;  %827 = vmatpush3.bf16.msra.mxu0 %v869_v1  ;;  %v873_v5 = vld [vmem:[#allocation5] sm:$0xff]   ;;  %v874_v6 = vld [vmem:[#allocation5 + $0x8] sm:$0xff]   ;;  %v875_v7 = vld [vmem:[#allocation2 + $0x10] sm:$0xff]   ;;  %s689_s29 = sshll.u32 %s1098_s4, 4  ;;  %s690_s29 = int_to_ptr.vmem [resolvable:$true] %s689_s29 }
  0x5d   :  { %808 = vmatprep.subr.bf16.mxu1 %v870_v2  ;;  %828 = vmatprep.mubr.msk.bf16.mxu0 %vm346_vm0, %v871_v3  ;;  %v877_v8 = vld [vmem:[#allocation5 + $0x10] sm:$0xff]   ;;  %v876_v9 = vld [vmem:[#allocation2 + $0x18] sm:$0xff]   ;;  %v879_v10 = vld [vmem:[#allocation2 + $0x20] sm:$0xff]   ;;  %s1061_s3 = scalar_lea.vmem %s690_s29, 1024  ;;  %p1066_p13 = scmp.lt.s32.totalorder %s690_s29, %s690_s29 }
  0x5e   :  { %810 = vmatprep.mubr.msk.bf16.mxu1 %vm178_vm1, %v873_v5  ;;  %v878_v11 = vld [vmem:[#allocation5 + $0x18] sm:$0xff]   ;;  %v881_v12 = vld [vmem:[#allocation5 + $0x20] sm:$0xff]   ;;  %v880_v13 = vld [vmem:[#allocation2 + $0x28] sm:$0xff]   ;;  %p1062_p12 = scmp.ne.s32.totalorder %s690_s29, %s1061_s3  ;;  %p1067_p0 = scmp.lt.s32.totalorder %s1061_s3, %s1061_s3 }
  0x5f   :  { %829 = vmatmul.mubr.msk.bf16.vlgmr.msra.gmra.mrb[0].mxu0 %vm346_vm0, %v872_v4  ;;  %v883_v14 = vld [vmem:[#allocation2 + $0x30] sm:$0xff]   ;;  %v882_v15 = vld [vmem:[#allocation5 + $0x28] sm:$0xff]   ;;  %v884_v17 = vld [vmem:[#allocation2 + $0x38] sm:$0xff]  }
  0x60   :  { %809 = vmatpush3.bf16.msra.mxu1 %v870_v2  ;;  %832 = vmatprep.mubr.msk.bf16.mxu0 %vm346_vm0, %v875_v7  ;;  %v885_v16 = vld [vmem:[#allocation5 + $0x30] sm:$0xff]   ;;  %v886_v18 = vld [vmem:[#allocation5 + $0x38] sm:$0xff]   ;;  %p1068_p1 = por %p1067_p0, %p1066_p13 }
  0x61   :  { %v1231_v23 = vld [vmem:[#allocation10] ss:$0 sm:$0xff] }
  0x62   :  { %p1069_p2 = pnand %p1068_p1, %p1062_p12 }
  0x63   :  { %811 = vmatmul.mubr.msk.bf16.vlgmr.msra.gmra.mrb[0].mxu1 %vm178_vm1, %v874_v6 }
  0x64   :  { %814 = vmatprep.mubr.msk.bf16.mxu1 %vm178_vm1, %v877_v8 }
  0x67   :  { %833 = vmatmul.mubr.msk.bf16.gmra.mrb[4].mxu0 %vm346_vm0, %v876_v9 }
  0x68   :  { %836 = vmatprep.mubr.msk.bf16.mxu0 %vm346_vm0, %v879_v10 }
  0x6b   :  { %815 = vmatmul.mubr.msk.bf16.gmra.mrb[4].mxu1 %vm178_vm1, %v878_v11 }
  0x6c   :  { %818 = vmatprep.mubr.msk.bf16.mxu1 %vm178_vm1, %v881_v12 }
  0x6f   :  { %837 = vmatmul.mubr.msk.bf16.gmra.mrb[8].mxu0 %vm346_vm0, %v880_v13 }
  0x70   :  { %840 = vmatprep.mubr.msk.bf16.mxu0 %vm346_vm0, %v883_v14 }
  0x73   :  { %819 = vmatmul.mubr.msk.bf16.gmra.mrb[8].mxu1 %vm178_vm1, %v882_v15 }
  0x74   :  { %822 = vmatprep.mubr.msk.bf16.mxu1 %vm178_vm1, %v885_v16 }
  0x77   :  { %841 = vmatmul.mubr.msk.bf16.gmra.mrb[12].mxu0 %vm346_vm0, %v884_v17 }
  0x7b   :  { %823 = vmatmul.mubr.msk.bf16.gmra.mrb[12].mxu1 %vm178_vm1, %v886_v18 }
 0x132   :  { %v830_v19 = vpop.f32.mrb[0].mxu0 }
 0x133   :  { %v405_v20 = vpop.f32.mrb[1].mxu0 }
 0x134   :  { %v831_v21 = vpop.f32.mrb[2].mxu0 }
 0x135   :  { %v408_v24 = vpop.f32.mrb[3].mxu0 }
 0x136   :  { %v812_v22 = vpop.f32.mrb[0].mxu1 }
 0x137   :  { %v414_v25 = vadd.f32 %v830_v19, %v812_v22  ;;  %v237_v26 = vpop.f32.mrb[1].mxu1 }
 0x138   :  { %v406_v27 = vadd.f32 %v405_v20, %v237_v26  ;;  %v813_v28 = vpop.f32.mrb[2].mxu1 }
 0x139   :  { %v1234_v29 = vadd.f32 %v1231_v23, %v414_v25  ;;  %v417_v30 = vadd.f32 %v831_v21, %v813_v28  ;;  %v240_v31 = vpop.f32.mrb[3].mxu1 }
 0x13a   :  { %v1237_v32 = vadd.f32 %v1231_v23, %v406_v27  ;;  %v409_v33 = vadd.f32 %v408_v24, %v240_v31  ;;  %v834_v36 = vpop.f32.mrb[4].mxu0 }
 0x13b   :  { %v741_v34 = vmul.f32 -1.442695, %v1234_v29  ;;  %v1241_v35 = vadd.f32 %v1231_v23, %v417_v30  ;;  %v421_v39 = vpop.f32.mrb[5].mxu0 }
 0x13c   :  { %v739_v37 = vmul.f32 -1.442695, %v1237_v32  ;;  %v1245_v38 = vadd.f32 %v1231_v23, %v409_v33  ;;  %v835_v41 = vpop.f32.mrb[6].mxu0 }
 0x13d   :  { %887 = vpow2.f32 %v741_v34  ;;  %v742_v40 = vmul.f32 -1.442695, %v1241_v35  ;;  %v424_v44 = vpop.f32.mrb[7].mxu0 }
 0x13e   :  { %889 = vpow2.f32 %v739_v37  ;;  %v740_v42 = vmul.f32 -1.442695, %v1245_v38  ;;  %v816_v43 = vpop.f32.mrb[4].mxu1 }
 0x13f   :  { %891 = vpow2.f32 %v742_v40  ;;  %v430_v45 = vadd.f32 %v834_v36, %v816_v43  ;;  %v253_v46 = vpop.f32.mrb[5].mxu1 }
 0x140   :  { %893 = vpow2.f32 %v740_v42  ;;  %v422_v47 = vadd.f32 %v421_v39, %v253_v46  ;;  %v817_v48 = vpop.f32.mrb[6].mxu1 }
 0x141   :  { %v1250_v49 = vadd.f32 %v1231_v23, %v430_v45  ;;  %v433_v50 = vadd.f32 %v835_v41, %v817_v48  ;;  %v256_v51 = vpop.f32.mrb[7].mxu1 }
 0x142   :  { %v1253_v52 = vadd.f32 %v1231_v23, %v422_v47  ;;  %v425_v53 = vadd.f32 %v424_v44, %v256_v51  ;;  %v838_v56 = vpop.f32.mrb[8].mxu0 }
 0x143   :  { %v745_v54 = vmul.f32 -1.442695, %v1250_v49  ;;  %v1257_v55 = vadd.f32 %v1231_v23, %v433_v50  ;;  %v437_v59 = vpop.f32.mrb[9].mxu0 }
 0x144   :  { %v743_v57 = vmul.f32 -1.442695, %v1253_v52  ;;  %v1261_v58 = vadd.f32 %v1231_v23, %v425_v53  ;;  %v839_v61 = vpop.f32.mrb[10].mxu0 }
 0x145   :  { %895 = vpow2.f32 %v745_v54  ;;  %v746_v60 = vmul.f32 -1.442695, %v1257_v55  ;;  %v440_v0 = vpop.f32.mrb[11].mxu0 }
 0x146   :  { %897 = vpow2.f32 %v743_v57  ;;  %v744_v62 = vmul.f32 -1.442695, %v1261_v58  ;;  %v820_v63 = vpop.f32.mrb[8].mxu1 }
 0x147   :  { %v888_v1 = vpop.eup %887  ;;  %899 = vpow2.f32 %v746_v60  ;;  %v446_v2 = vadd.f32 %v838_v56, %v820_v63  ;;  %v269_v3 = vpop.f32.mrb[9].mxu1 }
 0x148   :  { %v890_v4 = vpop.eup %889  ;;  %v541_v5 = vadd.f32 1.0, %v888_v1  ;;  %901 = vpow2.f32 %v744_v62  ;;  %v438_v6 = vadd.f32 %v437_v59, %v269_v3  ;;  %v821_v7 = vpop.f32.mrb[10].mxu1 }
 0x149   :  { %v892_v8 = vpop.eup %891  ;;  %v539_v9 = vadd.f32 1.0, %v890_v4  ;;  %v1266_v10 = vadd.f32 %v1231_v23, %v446_v2  ;;  %v449_v11 = vadd.f32 %v839_v61, %v821_v7  ;;  %v272_v12 = vpop.f32.mrb[11].mxu1 }
 0x14a   :  { %v894_v13 = vpop.eup %893  ;;  %903 = vrcp.f32 %v541_v5  ;;  %v542_v14 = vadd.f32 1.0, %v892_v8  ;;  %v1269_v15 = vadd.f32 %v1231_v23, %v438_v6  ;;  %v441_v16 = vadd.f32 %v440_v0, %v272_v12  ;;  %v842_v20 = vpop.f32.mrb[12].mxu0 }
 0x14b   :  { %905 = vrcp.f32 %v539_v9  ;;  %v540_v17 = vadd.f32 1.0, %v894_v13  ;;  %v749_v18 = vmul.f32 -1.442695, %v1266_v10  ;;  %v1273_v19 = vadd.f32 %v1231_v23, %v449_v11  ;;  %v453_v24 = vpop.f32.mrb[13].mxu0 }
 0x14c   :  { %907 = vrcp.f32 %v542_v14  ;;  %v747_v21 = vmul.f32 -1.442695, %v1269_v15  ;;  %v1277_v22 = vadd.f32 %v1231_v23, %v441_v16  ;;  %v843_v26 = vpop.f32.mrb[14].mxu0 }
 0x14d   :  { %909 = vrcp.f32 %v540_v17  ;;  %v750_v25 = vmul.f32 -1.442695, %v1273_v19  ;;  %v456_v30 = vpop.f32.mrb[15].mxu0 }
 0x14e   :  { %911 = vpow2.f32 %v749_v18  ;;  %v748_v27 = vmul.f32 -1.442695, %v1277_v22  ;;  %v824_v28 = vpop.f32.mrb[12].mxu1 }
 0x14f   :  { %v896_v31 = vpop.eup %895  ;;  %913 = vpow2.f32 %v747_v21  ;;  %v462_v33 = vadd.f32 %v842_v20, %v824_v28  ;;  %v285_v34 = vpop.f32.mrb[13].mxu1 }
 0x150   :  { %v898_v36 = vpop.eup %897  ;;  %v545_v37 = vadd.f32 1.0, %v896_v31  ;;  %915 = vpow2.f32 %v750_v25  ;;  %v454_v39 = vadd.f32 %v453_v24, %v285_v34  ;;  %v825_v40 = vpop.f32.mrb[14].mxu1 }
 0x151   :  { %v900_v41 = vpop.eup %899  ;;  %v543_v42 = vadd.f32 1.0, %v898_v36  ;;  %917 = vpow2.f32 %v748_v27  ;;  %v1282_v43 = vadd.f32 %v1231_v23, %v462_v33  ;;  %v465_v44 = vadd.f32 %v843_v26, %v825_v40  ;;  %v288_v45 = vpop.f32.mrb[15].mxu1 }
 0x152   :  { %v902_v46 = vpop.eup %901  ;;  %919 = vrcp.f32 %v545_v37  ;;  %v546_v47 = vadd.f32 1.0, %v900_v41  ;;  %v1285_v48 = vadd.f32 %v1231_v23, %v454_v39  ;;  %v457_v50 = vadd.f32 %v456_v30, %v288_v45 }
 0x153   :  { %921 = vrcp.f32 %v543_v42  ;;  %v544_v51 = vadd.f32 1.0, %v902_v46  ;;  %v753_v53 = vmul.f32 -1.442695, %v1282_v43  ;;  %v1289_v54 = vadd.f32 %v1231_v23, %v465_v44 }
 0x154   :  { %v904_v56 = vpop.eup %903  ;;  %923 = vrcp.f32 %v546_v47  ;;  %v751_v57 = vmul.f32 -1.442695, %v1285_v48  ;;  %v1293_v59 = vadd.f32 %v1231_v23, %v457_v50 }
 0x155   :  { %v906_v60 = vpop.eup %905  ;;  %v589_v61 = vmul.f32 %v904_v56, %v1234_v29  ;;  %925 = vrcp.f32 %v544_v51  ;;  %v754_v62 = vmul.f32 -1.442695, %v1289_v54 }
 0x156   :  { %v908_v63 = vpop.eup %907  ;;  %v587_v0 = vmul.f32 %v906_v60, %v1237_v32  ;;  %927 = vpow2.f32 %v753_v53  ;;  %v752_v1 = vmul.f32 -1.442695, %v1293_v59 }
 0x157   :  { %v910_v2 = vpop.eup %909  ;;  %v773_v3 = vpack.c.bf16 %v589_v61, %v589_v61  ;;  %v590_v4 = vmul.f32 %v908_v63, %v1241_v35  ;;  %929 = vpow2.f32 %v751_v57 }
 0x158   :  { %v912_v23 = vpop.eup %911  ;;  %v771_v5 = vpack.c.bf16 %v587_v0, %v587_v0  ;;  %v588_v6 = vmul.f32 %v910_v2, %v1245_v38  ;;  %931 = vpow2.f32 %v754_v62 }
 0x159   :  { %v914_v29 = vpop.eup %913  ;;  %670 = vst.msk [vmem:[#allocation11 + $0x8] sm:$0xf] %vm667_vm2, %v773_v3  ;;  %v774_v7 = vpack.c.bf16 %v590_v4, %v590_v4  ;;  %v549_v8 = vadd.f32 1.0, %v912_v23  ;;  %933 = vpow2.f32 %v752_v1 }
 0x15a   :  { %v916_v32 = vpop.eup %915  ;;  %668 = vst.msk [vmem:[#allocation11] sm:$0xf] %vm667_vm2, %v771_v5  ;;  %v772_v9 = vpack.c.bf16 %v588_v6, %v588_v6  ;;  %v547_v11 = vadd.f32 1.0, %v914_v29 }
 0x15b   :  { %v918_v12 = vpop.eup %917  ;;  %671 = vst.msk [vmem:[#allocation11 + $0xc] sm:$0xf] %vm667_vm2, %v774_v7  ;;  %935 = vrcp.f32 %v549_v8  ;;  %v550_v35 = vadd.f32 1.0, %v916_v32 }
 0x15c   :  { %v920_v13 = vpop.eup %919  ;;  %669 = vst.msk [vmem:[#allocation11 + $0x4] sm:$0xf] %vm667_vm2, %v772_v9  ;;  %937 = vrcp.f32 %v547_v11  ;;  %v548_v38 = vadd.f32 1.0, %v918_v12 }
 0x15d   :  { %v922_v14 = vpop.eup %921  ;;  %v593_v16 = vmul.f32 %v920_v13, %v1250_v49  ;;  %939 = vrcp.f32 %v550_v35 }
 0x15e   :  { %v924_v17 = vpop.eup %923  ;;  %v591_v18 = vmul.f32 %v922_v14, %v1253_v52  ;;  %941 = vrcp.f32 %v548_v38 }
 0x15f   :  { %v926_v20 = vpop.eup %925  ;;  %v777_v21 = vpack.c.bf16 %v593_v16, %v593_v16  ;;  %v594_v24 = vmul.f32 %v924_v17, %v1257_v55 }
 0x160   :  { %v928_v25 = vpop.eup %927  ;;  %v775_v26 = vpack.c.bf16 %v591_v18, %v591_v18  ;;  %v592_v27 = vmul.f32 %v926_v20, %v1261_v58 }
 0x161   :  { %v930_v28 = vpop.eup %929  ;;  %674 = vst.msk [vmem:[#allocation11 + $0x18] sm:$0xf] %vm667_vm2, %v777_v21  ;;  %v778_v30 = vpack.c.bf16 %v594_v24, %v594_v24  ;;  %v553_v31 = vadd.f32 1.0, %v928_v25 }
 0x162   :  { %v932_v33 = vpop.eup %931  ;;  %672 = vst.msk [vmem:[#allocation11 + $0x10] sm:$0xf] %vm667_vm2, %v775_v26  ;;  %v776_v49 = vpack.c.bf16 %v592_v27, %v592_v27  ;;  %v551_v34 = vadd.f32 1.0, %v930_v28 }
 0x163   :  { %v934_v52 = vpop.eup %933  ;;  %675 = vst.msk [vmem:[#allocation11 + $0x1c] sm:$0xf] %vm667_vm2, %v778_v30  ;;  %943 = vrcp.f32 %v553_v31  ;;  %v554_v36 = vadd.f32 1.0, %v932_v33 }
 0x164   :  { %673 = vst.msk [vmem:[#allocation11 + $0x14] sm:$0xf] %vm667_vm2, %v776_v49  ;;  %945 = vrcp.f32 %v551_v34  ;;  %v552_v55 = vadd.f32 1.0, %v934_v52 }
 0x165   :  { %v936_v58 = vpop.eup %935  ;;  %947 = vrcp.f32 %v554_v36 }
 0x166   :  { %v938_v37 = vpop.eup %937  ;;  %v597_v39 = vmul.f32 %v936_v58, %v1266_v10  ;;  %949 = vrcp.f32 %v552_v55 }
 0x167   :  { %v940_v40 = vpop.eup %939  ;;  %v595_v41 = vmul.f32 %v938_v37, %v1269_v15 }
 0x168   :  { %v942_v42 = vpop.eup %941  ;;  %v781_v44 = vpack.c.bf16 %v597_v39, %v597_v39  ;;  %v598_v45 = vmul.f32 %v940_v40, %v1273_v19 }
 0x169   :  { %v779_v46 = vpack.c.bf16 %v595_v41, %v595_v41  ;;  %v596_v47 = vmul.f32 %v942_v42, %v1277_v22 }
 0x16a   :  { %678 = vst.msk [vmem:[#allocation11 + $0x28] sm:$0xf] %vm667_vm2, %v781_v44  ;;  %v782_v50 = vpack.c.bf16 %v598_v45, %v598_v45 }
 0x16b   :  { %676 = vst.msk [vmem:[#allocation11 + $0x20] sm:$0xf] %vm667_vm2, %v779_v46  ;;  %v780_v51 = vpack.c.bf16 %v596_v47, %v596_v47 }
 0x16c   :  { %679 = vst.msk [vmem:[#allocation11 + $0x2c] sm:$0xf] %vm667_vm2, %v782_v50 }
 0x16d   :  { %v944_v10 = vpop.eup %943  ;;  %677 = vst.msk [vmem:[#allocation11 + $0x24] sm:$0xf] %vm667_vm2, %v780_v51 }
 0x16e   :  { %v946_v53 = vpop.eup %945  ;;  %v601_v15 = vmul.f32 %v944_v10, %v1282_v43 }
 0x16f   :  { %v948_v56 = vpop.eup %947  ;;  %v599_v19 = vmul.f32 %v946_v53, %v1285_v48 }
 0x170   :  { %v950_v57 = vpop.eup %949  ;;  %v785_v60 = vpack.c.bf16 %v601_v15, %v601_v15  ;;  %v602_v22 = vmul.f32 %v948_v56, %v1289_v54 }
 0x171   :  { %v783_v61 = vpack.c.bf16 %v599_v19, %v599_v19  ;;  %v600_v62 = vmul.f32 %v950_v57, %v1293_v59 }
 0x172   :  { %682 = vst.msk [vmem:[#allocation11 + $0x38] sm:$0xf] %vm667_vm2, %v785_v60  ;;  %v786_v63 = vpack.c.bf16 %v602_v22, %v602_v22 }
 0x173   :  { %680 = vst.msk [vmem:[#allocation11 + $0x30] sm:$0xf] %vm667_vm2, %v783_v61  ;;  %v784_v0 = vpack.c.bf16 %v600_v62, %v600_v62 }
 0x174   :  { %683 = vst.msk [vmem:[#allocation11 + $0x3c] sm:$0xf] %vm667_vm2, %v786_v63 }
 0x175   :  { %681 = vst.msk [vmem:[#allocation11 + $0x34] sm:$0xf] %vm667_vm2, %v784_v0 }
 0x176   :  { %1072 = shalt.err (!%p1069_p2)
}
 0x177   :  { %s1073_s8 = scalar_lea.hbm %s1349_s5, 1024 }
 0x178   :  { %p1074_p3 = scmp.ne.s32.totalorder %s1349_s5, %s1073_s8  ;;  %p1077_p4 = scmp.lt.u32.totalorder %s1073_s8, %s1349_s5 }
 0x17a   :  { %p1079_p5 = pnand %p1077_p4, %p1074_p3 }
 0x17c   :  { %1082 = shalt.err (!%p1079_p5)
}
 0x17d   :  { %695 = dma.vmem_to_hbm [thread:$0]  %s690_s29, 1024, %s1349_s5, [#allocation4], %s1093_s30, %s1093_s30, %s1094_s6  }
 0x17e   :  { %1089 = dma.done.wait [#allocation4], 1024  }
 0x17f   :  { %1090 = vsyncadd [#allocation4], 4294966272 }
 0x180   :  { %699 = vsyncpa [#allocation3], 1 }
 0x181   :  { %700 = vsyncpa [#allocation6], 1 }
 0x182   :  { %701 = vsyncpa [#allocation9], 1 }
 0x183   :  { %702 = vsyncpa [#allocation4], 1 }

// kernel: darkfpn_apply.32
= control target key start
LH: loop header
LB: loop body
LE: loop exit
PB: predicated region body
PF: predicated region fallthrough
CT: control target
= control target key end

     0   :  { %10 = vsyncpa [#allocation3], 0  ;;  %s729_s0 = inlined_call_operand.hbm [shape: bf16[32,32], index: 0, kind: input, shape index: {}]   ;;  %s730_s1 = inlined_call_operand.hbm [shape: bf16[32,64], index: 1, kind: input, shape index: {}]   ;;  %s731_s2 = inlined_call_operand.hbm [shape: bf16[32,64], index: 2, kind: input, shape index: {}]   ;;  %s732_s3 = inlined_call_operand.hbm [shape: bf16[64,64], index: 3, kind: input, shape index: {}]   ;;  %s733_s4 = inlined_call_operand.hbm [shape: f32[1,64], index: 4, kind: input, shape index: {}]   ;;  %s734_s5 = inlined_call_operand.hbm [shape: bf16[32,64], index: 5, kind: output, shape index: {}]  }
   0x1   :  { %11 = vsyncpa [#allocation6], 0 }
   0x2   :  { %12 = vsyncpa [#allocation9], 0 }
   0x3   :  { %13 = vsyncpa [#allocation4], 0  ;;  %s590_s18 = smov [#allocation5]   ;;  %s591_s20 = smov [#allocation8]  }
   0x4   :  { %s31_s19 = sshll.u32 %s590_s18, 4  ;;  %s55_s21 = sshll.u32 %s591_s20, 4  ;;  %s32_s19 = int_to_ptr.vmem [resolvable:$true] %s31_s19  ;;  %s628_s21 = int_to_ptr.vmem [resolvable:$true] %s55_s21 }
   0x5   :  { %s450_s24 = scalar_lea.hbm %s730_s1, 256 }
   0x6   :  { %p451_p0 = scmp.ne.s32.totalorder %s730_s1, %s450_s24  ;;  %p454_p1 = scmp.lt.u32.totalorder %s450_s24, %s730_s1 }
   0x8   :  { %p456_p2 = pnand %p454_p1, %p451_p0 }
   0xa   :  { %459 = shalt.err (!%p456_p2)
}
   0xb   :  { %s460_s29 = scalar_lea.vmem %s32_s19, 256  ;;  %p465_p4 = scmp.lt.s32.totalorder %s32_s19, %s32_s19 }
   0xc   :  { %p461_p3 = scmp.ne.s32.totalorder %s32_s19, %s460_s29  ;;  %p466_p5 = scmp.lt.s32.totalorder %s460_s29, %s460_s29 }
   0xe   :  { %p467_p6 = por %p466_p5, %p465_p4 }
  0x10   :  { %p468_p7 = pnand %p467_p6, %p461_p3 }
  0x12   :  { %471 = shalt.err (!%p468_p7)
}
  0x13   :  { %s592_s30 = smov 64   ;;  %s593_s6 = smov 4  }
  0x14   :  { %37 = dma.hbm_to_vmem [thread:$0]  %s730_s1, 256, %s32_s19, [#allocation6], %s592_s30, %s592_s30, %s593_s6  }
  0x15   :  { %s472_s11 = scalar_lea.hbm %s732_s3, 512 }
  0x16   :  { %p473_p8 = scmp.ne.s32.totalorder %s732_s3, %s472_s11  ;;  %p476_p9 = scmp.lt.u32.totalorder %s472_s11, %s732_s3 }
  0x18   :  { %p478_p10 = pnand %p476_p9, %p473_p8 }
  0x1a   :  { %481 = shalt.err (!%p478_p10)
}
  0x1b   :  { %s482_s16 = scalar_lea.vmem %s628_s21, 512  ;;  %p487_p12 = scmp.lt.s32.totalorder %s628_s21, %s628_s21 }
  0x1c   :  { %p483_p11 = scmp.ne.s32.totalorder %s628_s21, %s482_s16  ;;  %p488_p13 = scmp.lt.s32.totalorder %s482_s16, %s482_s16 }
  0x1e   :  { %p489_p0 = por %p488_p13, %p487_p12 }
  0x20   :  { %p490_p1 = pnand %p489_p0, %p483_p11 }
  0x22   :  { %493 = shalt.err (!%p490_p1)
}
  0x23   :  { %61 = dma.hbm_to_vmem [thread:$0]  %s732_s3, 512, %s628_s21, [#allocation9], %s592_s30, %s592_s30, %s593_s6  }
  0x24   :  { %s594_s18 = smov [#allocation2]   ;;  %s595_s20 = smov [#allocation7]  }
  0x25   :  { %s19_s19 = sshll.u32 %s594_s18, 4  ;;  %s43_s22 = sshll.u32 %s595_s20, 4  ;;  %s20_s19 = int_to_ptr.vmem [resolvable:$true] %s19_s19  ;;  %s665_s22 = int_to_ptr.vmem [resolvable:$true] %s43_s22 }
  0x26   :  { %s494_s25 = scalar_lea.hbm %s729_s0, 256 }
  0x27   :  { %p495_p2 = scmp.ne.s32.totalorder %s729_s0, %s494_s25  ;;  %p498_p3 = scmp.lt.u32.totalorder %s494_s25, %s729_s0 }
  0x29   :  { %p500_p4 = pnand %p498_p3, %p495_p2 }
  0x2b   :  { %503 = shalt.err (!%p500_p4)
}
  0x2c   :  { %s504_s3 = scalar_lea.vmem %s20_s19, 256  ;;  %p509_p6 = scmp.lt.s32.totalorder %s20_s19, %s20_s19 }
  0x2d   :  { %p505_p5 = scmp.ne.s32.totalorder %s20_s19, %s504_s3  ;;  %p510_p7 = scmp.lt.s32.totalorder %s504_s3, %s504_s3 }
  0x2f   :  { %p511_p8 = por %p510_p7, %p509_p6 }
  0x31   :  { %p512_p9 = pnand %p511_p8, %p505_p5 }
  0x33   :  { %515 = shalt.err (!%p512_p9)
}
  0x34   :  { %25 = dma.hbm_to_vmem [thread:$0]  %s729_s0, 256, %s20_s19, [#allocation3], %s592_s30, %s592_s30, %s593_s6  }
  0x35   :  { %s516_s10 = scalar_lea.hbm %s731_s2, 256 }
  0x36   :  { %p517_p10 = scmp.ne.s32.totalorder %s731_s2, %s516_s10  ;;  %p520_p11 = scmp.lt.u32.totalorder %s516_s10, %s731_s2 }
  0x38   :  { %p522_p12 = pnand %p520_p11, %p517_p10 }
  0x3a   :  { %525 = shalt.err (!%p522_p12)
}
  0x3b   :  { %s526_s15 = scalar_lea.vmem %s665_s22, 256  ;;  %p531_p0 = scmp.lt.s32.totalorder %s665_s22, %s665_s22 }
  0x3c   :  { %p527_p13 = scmp.ne.s32.totalorder %s665_s22, %s526_s15  ;;  %p532_p1 = scmp.lt.s32.totalorder %s526_s15, %s526_s15 }
  0x3e   :  { %p533_p2 = por %p532_p1, %p531_p0 }
  0x40   :  { %p534_p3 = pnand %p533_p2, %p527_p13 }
  0x42   :  { %537 = shalt.err (!%p534_p3)
}
  0x43   :  { %49 = dma.hbm_to_vmem [thread:$0]  %s731_s2, 256, %s665_s22, [#allocation6], %s592_s30, %s592_s30, %s593_s6  }
  0x44   :  { %s596_s1 = smov [#allocation10]   ;;  %s538_s20 = scalar_lea.hbm %s733_s4, 16 }
  0x45   :  { %s68_s17 = sshll.u32 %s596_s1, 4  ;;  %p539_p4 = scmp.ne.s32.totalorder %s733_s4, %s538_s20  ;;  %s69_s17 = int_to_ptr.vmem [resolvable:$true] %s68_s17 }
  0x46   :  { %p542_p5 = scmp.lt.u32.totalorder %s538_s20, %s733_s4 }
  0x48   :  { %p544_p6 = pnand %p542_p5, %p539_p4 }
  0x4a   :  { %547 = shalt.err (!%p544_p6)
}
  0x4b   :  { %s548_s27 = scalar_lea.vmem %s69_s17, 16  ;;  %s552_s2 = scalar_lea.vmem %s69_s17, 32 }
  0x4c   :  { %p549_p7 = scmp.ne.s32.totalorder %s69_s17, %s548_s27  ;;  %p553_p8 = scmp.lt.s32.totalorder %s69_s17, %s69_s17 }
  0x4d   :  { %p554_p9 = scmp.lt.s32.totalorder %s552_s2, %s548_s27 }
  0x4f   :  { %p555_p10 = por %p554_p9, %p553_p8 }
  0x51   :  { %p556_p11 = pnand %p555_p10, %p549_p7 }
  0x53   :  { %559 = shalt.err (!%p556_p11)
}
  0x54   :  { %71 = dma.hbm_to_vmem [thread:$0]  %s733_s4, 16, %s69_s17, [#allocation9]  }
  0x55   :  { %582 = dma.done.wait [#allocation3], 256  }
  0x56   :  { %583 = vsyncadd [#allocation3], 4294967040 }
  0x57   :  { %584 = dma.done.wait [#allocation6], 512  }
  0x58   :  { %585 = vsyncadd [#allocation6], 4294966784 }
  0x59   :  { %586 = dma.done.wait [#allocation9], 528  }
  0x5a   :  { %587 = vsyncadd [#allocation9], 4294966768  ;;  %v424_v0 = vld [vmem:[#allocation8] sm:$0xff]   ;;  %v425_v1 = vld [vmem:[#allocation8 + $0x8] sm:$0xff]   ;;  %vm220_vm0 = vcmask 261120   ;;  %vm142_vm1 = vcmask 523264  }
  0x5b   :  { %392 = vmatprep.subr.bf16.mxu1 %v424_v0  ;;  %v426_v2 = vld [vmem:[#allocation7] sm:$0xff]   ;;  %v428_v4 = vld [vmem:[#allocation7 + $0x8] sm:$0xff]   ;;  %v432_v8 = vld [vmem:[#allocation5] sm:$0xff]   ;;  %vm331_vm2 = vcmask 519168   ;;  %s597_s4 = smov [#allocation11]  }
  0x5c   :  { %393 = vmatpush3.bf16.msra.mxu1 %v424_v0  ;;  %v427_v3 = vld [vmem:[#allocation8 + $0x10] sm:$0xff]   ;;  %404 = vmatprep.subr.bf16.mxu0 %v426_v2  ;;  %v429_v5 = vld [vmem:[#allocation8 + $0x18] sm:$0xff]   ;;  %v433_v9 = vld [vmem:[#allocation5 + $0x8] sm:$0xff]   ;;  %s341_s29 = sshll.u32 %s597_s4, 4  ;;  %s342_s29 = int_to_ptr.vmem [resolvable:$true] %s341_s29 }
  0x5d   :  { %394 = vmatprep.subr.bf16.mxu1 %v425_v1  ;;  %405 = vmatpush3.bf16.msra.mxu0 %v426_v2  ;;  %v430_v6 = vld [vmem:[#allocation2] sm:$0xff]   ;;  %v431_v7 = vld [vmem:[#allocation2 + $0x8] sm:$0xff]   ;;  %v369_v15 = vld [vmem:[#allocation10] ss:$0 sm:$0xff]  ;;  %s560_s3 = scalar_lea.vmem %s342_s29, 256  ;;  %p565_p13 = scmp.lt.s32.totalorder %s342_s29, %s342_s29 }
  0x5e   :  { %406 = vmatprep.subr.bf16.mxu0 %v428_v4  ;;  %408 = vmatprep.mubr.msk.bf16.mxu0 %vm220_vm0, %v430_v6  ;;  %p561_p12 = scmp.ne.s32.totalorder %s342_s29, %s560_s3  ;;  %p566_p0 = scmp.lt.s32.totalorder %s560_s3, %s560_s3 }
  0x5f   :  { %400 = vmatprep.mubr.msk.bf16.mxu1 %vm142_vm1, %v432_v8 }
  0x60   :  { %395 = vmatpush3.bf16.msra.mxu1 %v425_v1  ;;  %p567_p1 = por %p566_p0, %p565_p13 }
  0x61   :  { %396 = vmatprep.subr.bf16.mxu1 %v427_v3  ;;  %407 = vmatpush3.bf16.msra.mxu0 %v428_v4 }
  0x62   :  { %p568_p2 = pnand %p567_p1, %p561_p12 }
  0x64   :  { %397 = vmatpush3.bf16.msra.mxu1 %v427_v3  ;;  %409 = vmatmul.mubr.msk.bf16.vlgmr.msra.gmra.mrb[0].mxu0 %vm220_vm0, %v431_v7 }
  0x65   :  { %398 = vmatprep.subr.bf16.mxu1 %v429_v5 }
  0x68   :  { %399 = vmatpush3.bf16.msra.mxu1 %v429_v5 }
  0x6b   :  { %401 = vmatmul.mubr.msk.bf16.vlgmr.msra.gmra.mrb[0].mxu1 %vm142_vm1, %v433_v9 }
 0x137   :  { %v410_v10 = vpop.f32.mrb[0].mxu0 }
 0x138   :  { %v261_v11 = vpop.f32.mrb[1].mxu0 }
 0x139   :  { %v411_v12 = vpop.f32.mrb[2].mxu0 }
 0x13a   :  { %v264_v13 = vpop.f32.mrb[3].mxu0 }
 0x13e   :  { %v402_v14 = vpop.f32.mrb[0].mxu1 }
 0x13f   :  { %v270_v16 = vadd.f32 %v410_v10, %v402_v14  ;;  %v183_v17 = vpop.f32.mrb[1].mxu1 }
 0x140   :  { %v262_v18 = vadd.f32 %v261_v11, %v183_v17  ;;  %v403_v19 = vpop.f32.mrb[2].mxu1 }
 0x141   :  { %v285_v20 = vadd.f32 %v369_v15, %v270_v16  ;;  %v273_v21 = vadd.f32 %v411_v12, %v403_v19  ;;  %v186_v22 = vpop.f32.mrb[3].mxu1 }
 0x142   :  { %v283_v23 = vadd.f32 %v369_v15, %v262_v18  ;;  %v265_v24 = vadd.f32 %v264_v13, %v186_v22 }
 0x143   :  { %v372_v25 = vmul.f32 -1.442695, %v285_v20  ;;  %v286_v26 = vadd.f32 %v369_v15, %v273_v21 }
 0x144   :  { %v370_v27 = vmul.f32 -1.442695, %v283_v23  ;;  %v284_v28 = vadd.f32 %v369_v15, %v265_v24 }
 0x145   :  { %434 = vpow2.f32 %v372_v25  ;;  %v373_v29 = vmul.f32 -1.442695, %v286_v26 }
 0x146   :  { %436 = vpow2.f32 %v370_v27  ;;  %v371_v30 = vmul.f32 -1.442695, %v284_v28 }
 0x147   :  { %438 = vpow2.f32 %v373_v29 }
 0x148   :  { %440 = vpow2.f32 %v371_v30 }
 0x14f   :  { %v435_v31 = vpop.eup %434 }
 0x150   :  { %v437_v32 = vpop.eup %436  ;;  %v301_v33 = vadd.f32 1.0, %v435_v31 }
 0x151   :  { %v439_v34 = vpop.eup %438  ;;  %v299_v35 = vadd.f32 1.0, %v437_v32 }
 0x152   :  { %v441_v36 = vpop.eup %440  ;;  %442 = vrcp.f32 %v301_v33  ;;  %v302_v37 = vadd.f32 1.0, %v439_v34 }
 0x153   :  { %444 = vrcp.f32 %v299_v35  ;;  %v300_v38 = vadd.f32 1.0, %v441_v36 }
 0x154   :  { %446 = vrcp.f32 %v302_v37 }
 0x155   :  { %448 = vrcp.f32 %v300_v38 }
 0x15c   :  { %v443_v39 = vpop.eup %442 }
 0x15d   :  { %v445_v40 = vpop.eup %444  ;;  %v313_v41 = vmul.f32 %v443_v39, %v285_v20 }
 0x15e   :  { %v447_v42 = vpop.eup %446  ;;  %v311_v43 = vmul.f32 %v445_v40, %v283_v23 }
 0x15f   :  { %v449_v44 = vpop.eup %448  ;;  %v380_v45 = vpack.c.bf16 %v313_v41, %v313_v41  ;;  %v314_v46 = vmul.f32 %v447_v42, %v286_v26 }
 0x160   :  { %v378_v47 = vpack.c.bf16 %v311_v43, %v311_v43  ;;  %v312_v48 = vmul.f32 %v449_v44, %v284_v28 }
 0x161   :  { %v381_v49 = vpack.c.bf16 %v314_v46, %v314_v46  ;;  %334 = vst.msk [vmem:[#allocation11 + $0x8] sm:$0xf] %vm331_vm2, %v380_v45 }
 0x162   :  { %v379_v50 = vpack.c.bf16 %v312_v48, %v312_v48  ;;  %332 = vst.msk [vmem:[#allocation11] sm:$0xf] %vm331_vm2, %v378_v47 }
 0x163   :  { %335 = vst.msk [vmem:[#allocation11 + $0xc] sm:$0xf] %vm331_vm2, %v381_v49 }
 0x164   :  { %333 = vst.msk [vmem:[#allocation11 + $0x4] sm:$0xf] %vm331_vm2, %v379_v50 }
 0x165   :  { %571 = shalt.err (!%p568_p2)
}
 0x166   :  { %s572_s8 = scalar_lea.hbm %s734_s5, 256 }
 0x167   :  { %p573_p3 = scmp.ne.s32.totalorder %s734_s5, %s572_s8  ;;  %p576_p4 = scmp.lt.u32.totalorder %s572_s8, %s734_s5 }
 0x169   :  { %p578_p5 = pnand %p576_p4, %p573_p3 }
 0x16b   :  { %581 = shalt.err (!%p578_p5)
}
 0x16c   :  { %347 = dma.vmem_to_hbm [thread:$0]  %s342_s29, 256, %s734_s5, [#allocation4], %s592_s30, %s592_s30, %s593_s6  }
 0x16d   :  { %588 = dma.done.wait [#allocation4], 256  }
 0x16e   :  { %589 = vsyncadd [#allocation4], 4294967040 }
 0x16f   :  { %351 = vsyncpa [#allocation3], 1 }
 0x170   :  { %352 = vsyncpa [#allocation6], 1 }
 0x171   :  { %353 = vsyncpa [#allocation9], 1 }
 0x172   :  { %354 = vsyncpa [#allocation4], 1 }

// kernel: darkfpn_apply.31
= control target key start
LH: loop header
LB: loop body
LE: loop exit
PB: predicated region body
PF: predicated region fallthrough
CT: control target
= control target key end

     0   :  { %8 = vsyncpa [#allocation3], 0  ;;  %s1427_s0 = inlined_call_operand.hbm [shape: bf16[2,2,20,96], index: 0, kind: input, shape index: {}]   ;;  %s1428_s1 = inlined_call_operand.hbm [shape: bf16[3,96,32], index: 1, kind: input, shape index: {}]   ;;  %s1429_s2 = inlined_call_operand.hbm [shape: f32[1,32], index: 2, kind: input, shape index: {}]   ;;  %s1430_s3 = inlined_call_operand.hbm [shape: bf16[2,16,32], index: 3, kind: output, shape index: {}]  }
   0x1   :  { %10 = vsyncpa [#allocation3 + $0x1], 0 }
   0x2   :  { %11 = vsyncpa [#allocation6], 0 }
   0x3   :  { %12 = vsyncpa [#allocation4], 0 }
   0x4   :  { %14 = vsyncpa [#allocation4 + $0x1], 0  ;;  %s1167_s12 = smov 0   ;;  %s1169_s13 = smov 0  }
   0x5   :  { %s1171_s14 = smov 0   ;;  %s1173_s15 = smov 0  }
   0x6   :  { %s1175_s16 = smov 0   ;;  %s1177_s17 = smov 0  }
   0x7 LB: > { %s736_s18 = sadd.s32 4294967295, %s1130_s17   ;;  %s737_s19 = sadd.s32 4294967294, %s1130_s17   ;;  %s1130_s17 = sphi %s1177_s17, %s20_s17   ;;  %s1126_s16 = sphi %s1175_s16, %s1457_s16   ;;  %s1122_s15 = sphi %s1173_s15, %s1456_s15   ;;  %s1118_s14 = sphi %s1171_s14, %s1455_s14   ;;  %s1114_s13 = sphi %s1169_s13, %s1454_s13   ;;  %s1110_s12 = sphi %s1167_s12, %s1453_s12  }
   0x8   : > { %s32_s20 = sadd.s32 1, %s1126_s16  ;;  %s39_s21 = sadd.s32 1, %s1118_s14 }
   0x9   : > { %p34_p0 = scmp.ge.s32.totalorder %s32_s20, 2  ;;  %p46_p1 = scmp.ne.s32.totalorder %s1118_s14, %s1114_s13 }
   0xa   : > { %p47_p2 = scmp.eq.s32.totalorder %s1130_s17, 0  ;;  %p52_p3 = scmp.ne.s32.totalorder %s1114_s13, %s1110_s12 }
   0xb   : > { %s1459_s20 = smov (%p34_p0, %s32_s20), 0  ;;  %p1212_p5 = scmp.eq.s32.totalorder %s736_s18, 0 }
   0xc   : > { %1438 = sst [smem:[#allocation15_spill]] %s1459_s20  ;;  %p1208_p4 = por %p47_p2, %p46_p1 }
   0xd   : > { %s1440_s23 = scalar_select %p1212_p5, 1, 0 }
   0xe   : > { %s1439_s22 = scalar_select %p1208_p4, 1, 0 }
   0xf   : > { %s36_s24 = ssub.s32 %s1126_s16, %s1459_s20  ;;  %p130_p6 = scmp.eq.s32.totalorder %s736_s18, 1 }
  0x10   : > { %p37_p7 = scmp.eq.s32.totalorder %s36_s24, 0  ;;  %p1220_p8 = por %p1212_p5, %p52_p3 }
  0x11   : > { %p1224_p9 = por %p130_p6, %p46_p1  ;;  %p136_p10 = scmp.eq.s32.totalorder %s737_s19, 1 }
  0x12   : > { %s1441_s25 = scalar_select %p1220_p8, 1, 0 }
  0x13   : > { %s1442_s26 = scalar_select %p1224_p9, 1, 0 }
  0x14   : > { %s1229_s27 = scalar_select %p37_p7, %s1118_s14, %s39_s21  }
  0x15   : > { %p1231_p11 = por %p136_p10, %p52_p3  ;;  %p738_p12 = scmp.ge.s32.totalorder %s1130_s17, 1 }
  0x16   : > { %p143_p13 = scmp.lt.s32.totalorder %s1130_s17, 3  ;;  %s1132_s30 = smov [#allocation5]  }
  0x17   : > { %s1443_s28 = scalar_select %p1231_p11, 1, 0 }
  0x18   : > { %p1237_p0 = pnand %p738_p12, %p143_p13  ;;  %s157_s4 = sshll.u32 %s1132_s30, 4  ;;  %s158_s4 = int_to_ptr.vmem [resolvable:$true] %s157_s4 }
  0x19   : > { %s1133_s5 = smov [#allocation7]   ;;  %s988_s10 = scalar_lea.hbm %s1428_s1, 2304 }
  0x1a   : > { %s1444_s29 = scalar_select %p1237_p0, 1, 0 }
  0x1b   : > { %p880_p1 = pneg %p1237_p0  ;;  %s173_s6 = sshll.u32 %s1133_s5, 4  ;;  %s1249_s6 = int_to_ptr.vmem [resolvable:$true] %s173_s6 }
  0x1c   : > { %p989_p3 = scmp.ne.s32.totalorder %s1428_s1, %s988_s10  ;;  %p995_p12 = scmp.lt.u32.totalorder %s988_s10, %s1428_s1 }
  0x1d   : > { %p1245_p2 = pnand %p880_p1, %p1212_p5 }
  0x1f   : > { %p990_p6 = pneg %p1245_p2 }
  0x21   : > { %p991_p7 = pnand %p990_p6, %p989_p3 }
  0x23   : > { %p992_p10 = pneg %p991_p7 }
  0x25   : > { %p997_p13 = pnand %p995_p12, %p992_p10 }
  0x27   : > { %1000 = shalt.err (!%p997_p13)
}
  0x28   : > { %s1001_s24 = scalar_lea.vmem %s158_s4, 2304  ;;  %p1009_p5 = scmp.lt.s32.totalorder %s158_s4, %s158_s4 }
  0x29   : > { %p1002_p1 = scmp.ne.s32.totalorder %s158_s4, %s1001_s24  ;;  %p1010_p8 = scmp.lt.s32.totalorder %s1001_s24, %s1001_s24 }
  0x2b   : > { %p1004_p11 = pnand %p1002_p1, %p990_p6  ;;  %p1011_p0 = por %p1010_p8, %p1009_p5 }
  0x2d   : > { %p1005_p9 = pneg %p1004_p11 }
  0x2f   : > { %p1012_p4 = pnand %p1011_p0, %p1005_p9 }
  0x31   : > { %1015 = shalt.err (!%p1012_p4)
}
  0x32   : > { %s1134_s30 = smov 64   ;;  %s1135_s5 = smov 4  }
  0x33   : > { %883 = dma.hbm_to_vmem [thread:$0]  (!%p1245_p2), %s1428_s1, 2304, %s158_s4, [#allocation6], %s1134_s30, %s1134_s30, %s1135_s5  }
  0x34   : > { %s1016_s18 = scalar_lea.hbm %s1429_s2, 16 }
  0x35   : > { %p1017_p11 = scmp.ne.s32.totalorder %s1429_s2, %s1016_s18  ;;  %p1023_p8 = scmp.lt.u32.totalorder %s1016_s18, %s1429_s2 }
  0x37   : > { %p1019_p4 = pnand %p1017_p11, %p990_p6 }
  0x39   : > { %p1020_p5 = pneg %p1019_p4 }
  0x3b   : > { %p1025_p9 = pnand %p1023_p8, %p1020_p5 }
  0x3d   : > { %1028 = shalt.err (!%p1025_p9)
}
  0x3e   : > { %s1029_s4 = scalar_lea.vmem %s1249_s6, 16  ;;  %s1036_s30 = scalar_lea.vmem %s1249_s6, 32 }
  0x3f   : > { %p1030_p0 = scmp.ne.s32.totalorder %s1249_s6, %s1029_s4  ;;  %p1037_p10 = scmp.lt.s32.totalorder %s1249_s6, %s1249_s6 }
  0x40   : > { %p1038_p12 = scmp.lt.s32.totalorder %s1036_s30, %s1029_s4 }
  0x41   : > { %p1032_p3 = pnand %p1030_p0, %p990_p6 }
  0x42   : > { %p1039_p13 = por %p1038_p12, %p1037_p10 }
  0x43   : > { %p1033_p7 = pneg %p1032_p3 }
  0x45   : > { %p1040_p1 = pnand %p1039_p13, %p1033_p7 }
  0x47   : > { %1043 = shalt.err (!%p1040_p1)
}
  0x48   : > { %886 = dma.hbm_to_vmem [thread:$0]  (!%p1245_p2), %s1429_s2, 16, %s1249_s6, [#allocation6]  }
  0x49   : > { %p741_p11 = scmp.ge.s32.totalorder %s1130_s17, 2 }
  0x4b   : > { %180 = sbr.rel (%p741_p11) target bundleno = 98 (0x62), region = 24 }
  0x52   : > { %s184_s8 = sand.u32 1, %s1118_s14   ;;  %s859_s9 = smul.u32 192, %s1126_s16 }
  0x53   : > { %s858_s7 = smul.u32 24, %s184_s8  ;;  %s1136_s10 = smov 384  }
  0x54   : > { %p1446_p6 = scmp.ne.s32.totalorder %s1439_s22, 0  ;;  %s194_s19 = scalar_lea.hbm %s1427_s0, %s859_s9 }
  0x55   : > { %s188_s24 = scalar_lea.vmem [#allocation2], %s858_s7  ;;  %s1137_s30 = smov 192  }
  0x56   : > { %866 = sst [smem:[#allocation10]] (%p1446_p6), %s1136_s10  ;;  %s207_s4 = sshll.u32 %s188_s24, 4  ;;  %s208_s4 = int_to_ptr.vmem [resolvable:$true] %s207_s4 }
  0x57   : > { %s865_s6 = scalar_select %p1446_p6, [#allocation0], [#allocation11] }
  0x58   : > { %867 = sst [smem:[#allocation10 + $0x1]] (%p1446_p6), %s1137_s30  ;;  %s1138_s20 = smov 3  }
  0x59   : > { %s199_s21 = sld [smem:[%s865_s6]]   ;;  %s1139_s5 = smov 64  }
  0x5a   : > { %868 = sst [smem:[#allocation10 + $0x2]] (%p1446_p6), %s1138_s20  ;;  %s1140_s10 = smov 4  }
  0x5b   : > { %869 = sst [smem:[#allocation10 + $0x3]] (%p1446_p6), %s1139_s5  ;;  %s185_s7 = scalar_lea.sflag [#allocation3], %s184_s8 }
  0x5c   : > { %870 = sst [smem:[#allocation10 + $0x4]] (%p1446_p6), %s1139_s5  ;;  %s1141_s11 = smov [#allocation9]  }
  0x5d   : > { %871 = sst [smem:[#allocation10 + $0x5]] (%p1446_p6), %s1140_s10 }
  0x5f   : > { %s743_s9 = sshll.u32 %s199_s21, 26 }
  0x60   : > { %s744_s6 = sadd.s32 134217728, %s743_s9 }
  0x61   : > { %872 = dma.general (%p1446_p6), %s194_s19, 384, %s208_s4, %s185_s7, %s1141_s11, [#allocation10], %s744_s6, 0  }
  0x62 PF: > { %p1447_p2 = scmp.ne.s32.totalorder %s1444_s29, 0 }
  0x63   : > { %s1326_s18 = sand.u32 (!%p1447_p2), 1, %s1114_s13   ;;  %p1448_p4 = scmp.ne.s32.totalorder (!%p1447_p2), %s1441_s25, 0 }
  0x64   : > { %232 = sbr.rel (%p1447_p2) target bundleno = 424 (0x1a8), region = 32  ;;  %s235_s30 = scalar_lea.sflag (!%p1447_p2), [#allocation3], %s1326_s18 }
  0x65   : > { %s860_s24 = smul.u32 (!%p1447_p2), 24, %s1326_s18 }
  0x67   : > { %s1330_s20 = scalar_lea.vmem (!%p1447_p2), [#allocation2], %s860_s24 }
  0x6b   : > { %1097 = dma.done.wait (%p1448_p4), %s235_s30, 384  }
  0x6c   : > { %1099 = vsyncadd (%p1448_p4), %s235_s30, 4294966912  ;;  %p1449_p5 = scmp.ne.s32.totalorder %s1440_s23, 0 }
  0x6e   : > { %1101 = dma.done.wait (%p1449_p5), [#allocation6], 2320  }
  0x6f   : > { %1103 = vsyncadd (%p1449_p5), [#allocation6], 4294964976  ;;  %v1142_v0 = vmov 0.0   ;;  %vm1143_vm0 = vmmov 0   ;;  %v958_v1 = vld [vmem:[#allocation5 + $0x30] sm:$0xff]   ;;  %v959_v2 = vld [vmem:[#allocation5] sm:$0xff]  }
  0x70   : > { %810 = vmatprep.subr.bf16.mxu0 %v1142_v0  ;;  %826 = vmatprep.subr.bf16.mxu1 %v1142_v0  ;;  %v960_v3 = vld [vmem:[#allocation5 + $0x38] sm:$0xff]   ;;  %v961_v4 = vld [vmem:[#allocation5 + $0x8] sm:$0xff]   ;;  %v962_v5 = vld [vmem:[#allocation5 + $0x40] sm:$0xff]   ;;  %vm341_vm1 = vcmask 785408   ;;  %vm495_vm2 = vcmask 1045504   ;;  %s748_s22 = sshll.u32 %s1326_s18, 3 }
  0x71   : > { %822 = vmatprep.mubr.msk.bf16.mxu0 %vm1143_vm0, %v1142_v0  ;;  %838 = vmatprep.mubr.msk.bf16.mxu1 %vm1143_vm0, %v1142_v0  ;;  %v963_v6 = vld [vmem:[#allocation5 + $0x10] sm:$0xff]   ;;  %v964_v7 = vld [vmem:[#allocation5 + $0x48] sm:$0xff]   ;;  %v965_v8 = vld [vmem:[#allocation5 + $0x18] sm:$0xff]   ;;  %s788_s23 = sshll.u32 %s1122_s15, 7  ;;  %s268_s25 = scalar_lea.vmem [#allocation8], %s748_s22  ;;  %vm612_vm3 = vcmask 257024  }
  0x72   : > { %811 = vmatpush3.bf16.msra.mxu0 %v958_v1  ;;  %827 = vmatpush3.bf16.msra.mxu1 %v959_v2  ;;  %v966_v9 = vld [vmem:[#allocation5 + $0x50] sm:$0xff]   ;;  %v967_v10 = vld [vmem:[#allocation5 + $0x20] sm:$0xff]   ;;  %v968_v11 = vld [vmem:[#allocation5 + $0x58] sm:$0xff]   ;;  %s630_s29 = sshll.u32 %s268_s25, 4  ;;  %s1376_s21 = scalar_lea.hbm %s1430_s3, %s788_s23  ;;  %s1378_s29 = int_to_ptr.vmem [resolvable:$true] %s630_s29 }
  0x73   : > { %812 = vmatprep.subr.bf16.mxu0 %v1142_v0  ;;  %828 = vmatprep.subr.bf16.mxu1 %v1142_v0  ;;  %v969_v12 = vld [vmem:[#allocation5 + $0x28] sm:$0xff]   ;;  %v970_v13 = vld [vmem:[%s1330_s20 + $0xc] sm:$0xff]   ;;  %v979_v21 = vld [vmem:[%s1330_s20 + $0x8] ss:$0 sps:$4 sm:$0x33]   ;;  %s616_s15 = scalar_lea.sflag [#allocation4], %s1326_s18 }
  0x74   : > { %v971_v14 = vld [vmem:[%s1330_s20] sm:$0xff]   ;;  %v972_v15 = vld [vmem:[#allocation5 + $0x60] sm:$0xff]   ;;  %v975_v18 = vld [vmem:[#allocation5 + $0x78] sm:$0xff]   ;;  %v497_v24 = vrot.slane %v979_v21, 2  ;;  %s1044_s4 = scalar_lea.vmem %s1378_s29, 128  ;;  %p1450_p9 = scmp.ne.s32.totalorder %s1442_s26, 0 }
  0x75   : > { %v973_v16 = vld [vmem:[#allocation5 + $0x68] sm:$0xff]   ;;  %v974_v17 = vld [vmem:[#allocation5 + $0x70] sm:$0xff]   ;;  %v976_v19 = vld [vmem:[#allocation5 + $0x80] sm:$0xff]   ;;  %p1045_p8 = scmp.ne.s32.totalorder %s1378_s29, %s1044_s4  ;;  %s1144_s5 = smov [#allocation8]  }
  0x76   : > { %813 = vmatpush3.bf16.msra.mxu0 %v960_v3  ;;  %829 = vmatpush3.bf16.msra.mxu1 %v961_v4  ;;  %v978_v20 = vld [vmem:[%s1330_s20] sm:$0xfc]   ;;  %v776_v37 = vld [vmem:[#allocation7] ss:$0 sm:$0xff]  ;;  %s1048_s10 = sshll.u32 %s1144_s5, 4  ;;  %s1049_s10 = int_to_ptr.vmem [resolvable:$false] %s1048_s10 }
  0x77   : > { %814 = vmatprep.subr.bf16.mxu0 %v1142_v0  ;;  %830 = vmatprep.subr.bf16.mxu1 %v1142_v0  ;;  %v977_v22 = vld [vmem:[#allocation5 + $0x88] sm:$0xff]   ;;  %v496_v23 = vrot.slane %v978_v20, 2  ;;  %p1046_p0 = pnand %p1045_p8, %p1450_p9  ;;  %s1050_s9 = scalar_lea.vmem %s1049_s10, 256 }
  0x78   : > { %p1051_p7 = scmp.lt.s32.totalorder %s1378_s29, %s1049_s10  ;;  %p1052_p10 = scmp.lt.s32.totalorder %s1050_s9, %s1044_s4 }
  0x79   : > { %v498_v25 = vsel %vm495_vm2, %v496_v23, %v497_v24  ;;  %p1047_p3 = pneg %p1046_p0 }
  0x7a   : > { %815 = vmatpush3.bf16.msra.mxu0 %v962_v5  ;;  %831 = vmatpush3.bf16.msra.mxu1 %v963_v6  ;;  %p1053_p12 = por %p1052_p10, %p1051_p7 }
  0x7b   : > { %816 = vmatprep.subr.bf16.mxu0 %v1142_v0  ;;  %832 = vmatprep.subr.bf16.mxu1 %v1142_v0 }
  0x7c   : > { %p1054_p13 = pnand %p1053_p12, %p1047_p3 }
  0x7e   : > { %817 = vmatpush3.bf16.msra.mxu0 %v964_v7  ;;  %833 = vmatpush3.bf16.msra.mxu1 %v965_v8 }
  0x7f   : > { %818 = vmatprep.subr.bf16.mxu0 %v1142_v0  ;;  %834 = vmatprep.subr.bf16.mxu1 %v1142_v0 }
  0x82   : > { %819 = vmatpush3.bf16.msra.mxu0 %v966_v9  ;;  %835 = vmatpush3.bf16.msra.mxu1 %v967_v10 }
  0x83   : > { %820 = vmatprep.subr.bf16.mxu0 %v1142_v0  ;;  %836 = vmatprep.subr.bf16.mxu1 %v1142_v0 }
  0x86   : > { %821 = vmatpush3.bf16.msra.mxu0 %v968_v11  ;;  %837 = vmatpush3.bf16.msra.mxu1 %v969_v12 }
  0x87   : > { %842 = vmatprep.subr.bf16.mxu0 %v1142_v0 }
  0x89   : > { %823 = vmatmul.mubr.msk.bf16.vlgmr.msra.gmra.mrb[0].mxu0 %vm341_vm1, %v970_v13  ;;  %839 = vmatmul.mubr.msk.bf16.vlgmr.msra.gmra.mrb[0].mxu1 %vm341_vm1, %v971_v14 }
  0x8a   : > { %843 = vmatpush3.bf16.msra.mxu0 %v972_v15  ;;  %854 = vmatprep.mubr.msk.bf16.mxu0 %vm1143_vm0, %v1142_v0 }
  0x8b   : > { %844 = vmatprep.subr.bf16.mxu0 %v1142_v0 }
  0x8e   : > { %845 = vmatpush3.bf16.msra.mxu0 %v973_v16 }
  0x8f   : > { %846 = vmatprep.subr.bf16.mxu0 %v1142_v0 }
  0x92   : > { %847 = vmatpush3.bf16.msra.mxu0 %v974_v17 }
  0x93   : > { %848 = vmatprep.subr.bf16.mxu0 %v1142_v0 }
  0x96   : > { %849 = vmatpush3.bf16.msra.mxu0 %v975_v18 }
  0x97   : > { %850 = vmatprep.subr.bf16.mxu0 %v1142_v0 }
  0x9a   : > { %851 = vmatpush3.bf16.msra.mxu0 %v976_v19 }
  0x9b   : > { %852 = vmatprep.subr.bf16.mxu0 %v1142_v0 }
  0x9e   : > { %853 = vmatpush3.bf16.msra.mxu0 %v977_v22 }
  0xa1   : > { %855 = vmatmul.mubr.msk.bf16.vlgmr.msra.gmra.mrb[4].mxu0 %vm341_vm1, %v498_v25 }
 0x15c   : > { %v379_v26 = vpop.f32.mrb[0].mxu0  ;;  %v464_v27 = vpop.f32.mrb[0].mxu1 }
 0x15d   : > { %v824_v28 = vpop.f32.mrb[1].mxu0  ;;  %v465_v29 = vadd.f32 %v464_v27, %v379_v26  ;;  %v840_v30 = vpop.f32.mrb[1].mxu1 }
 0x15e   : > { %v382_v31 = vpop.f32.mrb[2].mxu0  ;;  %v467_v32 = vpop.f32.mrb[2].mxu1 }
 0x15f   : > { %v825_v33 = vpop.f32.mrb[3].mxu0  ;;  %v468_v34 = vadd.f32 %v467_v32, %v382_v31  ;;  %v841_v35 = vpop.f32.mrb[3].mxu1 }
 0x174   : > { %v572_v36 = vpop.f32.mrb[4].mxu0 }
 0x175   : > { %v579_v38 = vadd.f32 %v572_v36, %v465_v29  ;;  %v856_v39 = vpop.f32.mrb[5].mxu0 }
 0x176   : > { %v575_v40 = vpop.f32.mrb[6].mxu0 }
 0x177   : > { %v588_v41 = vadd.f32 %v776_v37, %v579_v38  ;;  %v580_v42 = vadd.f32 %v575_v40, %v468_v34  ;;  %v857_v43 = vpop.f32.mrb[7].mxu0 }
 0x179   : > { %v777_v44 = vmul.f32 -1.442695, %v588_v41  ;;  %v589_v45 = vadd.f32 %v776_v37, %v580_v42 }
 0x17b   : > { %980 = vpow2.f32 %v777_v44  ;;  %v778_v46 = vmul.f32 -1.442695, %v589_v45 }
 0x17d   : > { %982 = vpow2.f32 %v778_v46 }
 0x185   : > { %v981_v47 = vpop.eup %980 }
 0x186   : > { %v596_v48 = vadd.f32 1.0, %v981_v47 }
 0x187   : > { %v983_v49 = vpop.eup %982 }
 0x188   : > { %984 = vrcp.f32 %v596_v48  ;;  %v597_v50 = vadd.f32 1.0, %v983_v49 }
 0x18a   : > { %986 = vrcp.f32 %v597_v50 }
 0x192   : > { %v985_v51 = vpop.eup %984 }
 0x193   : > { %v602_v52 = vmul.f32 %v985_v51, %v588_v41 }
 0x194   : > { %v987_v53 = vpop.eup %986 }
 0x195   : > { %v786_v54 = vpack.c.bf16 %v602_v52, %v602_v52  ;;  %v603_v55 = vmul.f32 %v987_v53, %v589_v45 }
 0x197   : > { %613 = vst.msk [vmem:[%s268_s25] sm:$0xf] %vm612_vm3, %v786_v54  ;;  %v787_v56 = vpack.c.bf16 %v603_v55, %v603_v55 }
 0x199   : > { %614 = vst.msk [vmem:[%s268_s25 + $0x4] sm:$0xf] %vm612_vm3, %v787_v56 }
 0x19a   : > { %1057 = shalt.err (!%p1054_p13)
}
 0x19b   : > { %s1058_s6 = scalar_lea.hbm %s1376_s21, 128  ;;  %s1062_s24 = scalar_lea.hbm %s1430_s3, 256 }
 0x19c   : > { %p1059_p1 = scmp.ne.s32.totalorder %s1376_s21, %s1058_s6  ;;  %p1063_p4 = scmp.lt.u32.totalorder %s1376_s21, %s1430_s3 }
 0x19d   : > { %p1064_p5 = scmp.lt.u32.totalorder %s1062_s24, %s1058_s6  ;;  %p1066_p0 = scmp.lt.u32.totalorder %s1058_s6, %s1376_s21 }
 0x19e   : > { %p1060_p6 = pnand %p1059_p1, %p1450_p9 }
 0x19f   : > { %p1065_p8 = por %p1064_p5, %p1063_p4 }
 0x1a0   : > { %p1061_p2 = pneg %p1060_p6 }
 0x1a1   : > { %p1067_p3 = por %p1066_p0, %p1065_p8 }
 0x1a3   : > { %p1068_p7 = pnand %p1067_p3, %p1061_p2 }
 0x1a5   : > { %1071 = shalt.err (!%p1068_p7)
}
 0x1a6   : > { %s1145_s22 = smov 64   ;;  %s1146_s23 = smov 4  }
 0x1a7   : > { %878 = dma.vmem_to_hbm [thread:$0]  (%p1450_p9), %s1378_s29, 128, %s1376_s21, %s616_s15, %s1145_s22, %s1145_s22, %s1146_s23  }
 0x1a8 PF: > { %s645_s25 = sand.u32 1, %s1110_s12   ;;  %p1451_p10 = scmp.ne.s32.totalorder %s1443_s28, 0 }
 0x1a9   : > { %s646_s8 = scalar_lea.sflag [#allocation4], %s645_s25 }
 0x1aa   : > { %p888_p12 = pnand %p741_p11, %p1451_p10 }
 0x1ac   : > { %1105 = dma.done.wait (!%p888_p12), %s646_s8, 128  }
 0x1ad   : > { %1107 = vsyncadd (!%p888_p12), %s646_s8, 4294967168  ;;  %s20_s17 = sadd.s32 1, %s1130_s17   ;;  %s1452_s26 = sld [smem:[#allocation15_spill]] }
 0x1ae   : > { %p17_p13 = scmp.ge.s32.totalorder %s20_s17, 4   ;;  %s1453_s12 = smov %s1114_s13 }
 0x1af   : > { %s1454_s13 = smov %s1118_s14  ;;  %s1455_s14 = smov %s1229_s27 }
 0x1b0   : > { %s1456_s15 = smov %s1126_s16  ;;  %19 = sbr.rel (!%p17_p13) target bundleno = 7 (0x7), region = 95 }
 0x1b3   : > { %s1457_s16 = smov %s1452_s26 }
 0x1b7   :  { %651 = vsyncpa [#allocation3], 1 }
 0x1b8   :  { %653 = vsyncpa [#allocation3 + $0x1], 1 }
 0x1b9   :  { %654 = vsyncpa [#allocation6], 1 }
 0x1ba   :  { %655 = vsyncpa [#allocation4], 1 }
 0x1bb   :  { %657 = vsyncpa [#allocation4 + $0x1], 1 }

// kernel: darkfpn_apply.33
= control target key start
LH: loop header
LB: loop body
LE: loop exit
PB: predicated region body
PF: predicated region fallthrough
CT: control target
= control target key end

     0   :  { %8 = vsyncpa [#allocation3], 0  ;;  %s1443_s0 = inlined_call_operand.hbm [shape: bf16[1,2,24,96], index: 0, kind: input, shape index: {}]   ;;  %s1444_s1 = inlined_call_operand.hbm [shape: bf16[3,96,32], index: 1, kind: input, shape index: {}]   ;;  %s1445_s2 = inlined_call_operand.hbm [shape: f32[1,32], index: 2, kind: input, shape index: {}]   ;;  %s1446_s3 = inlined_call_operand.hbm [shape: bf16[2,16,32], index: 3, kind: output, shape index: {}]  }
   0x1   :  { %10 = vsyncpa [#allocation3 + $0x1], 0 }
   0x2   :  { %11 = vsyncpa [#allocation6], 0 }
   0x3   :  { %12 = vsyncpa [#allocation4], 0 }
   0x4   :  { %14 = vsyncpa [#allocation4 + $0x1], 0  ;;  %s1148_s12 = smov 0   ;;  %s1150_s13 = smov 0  }
   0x5   :  { %s1152_s14 = smov 0   ;;  %s1154_s15 = smov 0  }
   0x6   :  { %s1156_s16 = smov 0   ;;  %s1158_s17 = smov 0  }
   0x7 LB: > { %s704_s18 = sadd.s32 4294967295, %s1116_s17   ;;  %s705_s19 = sadd.s32 4294967294, %s1116_s17   ;;  %s1116_s17 = sphi %s1158_s17, %s20_s17   ;;  %s1112_s16 = sphi %s1156_s16, %s1468_s16   ;;  %s1108_s15 = sphi %s1154_s15, %s1467_s15   ;;  %s1104_s14 = sphi %s1152_s14, %s1466_s14   ;;  %s1100_s13 = sphi %s1150_s13, %s1465_s13   ;;  %s1096_s12 = sphi %s1148_s12, %s1464_s12  }
   0x8   : > { %p52_p0 = scmp.ne.s32.totalorder %s1100_s13, %s1096_s12  ;;  %p1182_p1 = scmp.eq.s32.totalorder %s704_s18, 0 }
   0x9   : > { %p1186_p2 = scmp.eq.s32.totalorder %s704_s18, 1  ;;  %p136_p3 = scmp.eq.s32.totalorder %s705_s19, 1 }
   0xa   : > { %s1451_s20 = scalar_select %p1182_p1, 1, 0 }
   0xb   : > { %p1192_p4 = por %p1182_p1, %p52_p0  ;;  %p706_p5 = scmp.ge.s32.totalorder %s1116_s17, 1 }
   0xc   : > { %p1197_p6 = por %p136_p3, %p52_p0  ;;  %p143_p7 = scmp.lt.s32.totalorder %s1116_s17, 3 }
   0xd   : > { %s1453_s22 = scalar_select %p1192_p4, 1, 0 }
   0xe   : > { %s1454_s23 = scalar_select %p1197_p6, 1, 0 }
   0xf   : > { %p1202_p8 = pnand %p706_p5, %p143_p7  ;;  %s1118_s25 = smov [#allocation5]  }
  0x10   : > { %s157_s26 = sshll.u32 %s1118_s25, 4  ;;  %s1119_s28 = smov [#allocation7]   ;;  %s1206_s26 = int_to_ptr.vmem [resolvable:$true] %s157_s26 }
  0x11   : > { %p837_p9 = pneg %p1202_p8  ;;  %s173_s29 = sshll.u32 %s1119_s28, 4  ;;  %s1217_s29 = int_to_ptr.vmem [resolvable:$true] %s173_s29 }
  0x12   : > { %s944_s5 = scalar_lea.hbm %s1444_s1, 2304 }
  0x13   : > { %p1213_p11 = pnand %p837_p9, %p1182_p1  ;;  %p945_p12 = scmp.ne.s32.totalorder %s1444_s1, %s944_s5 }
  0x14   : > { %p951_p5 = scmp.lt.u32.totalorder %s944_s5, %s1444_s1 }
  0x15   : > { %p946_p13 = pneg %p1213_p11 }
  0x17   : > { %p947_p0 = pnand %p946_p13, %p945_p12 }
  0x19   : > { %p948_p3 = pneg %p947_p0 }
  0x1b   : > { %p953_p7 = pnand %p951_p5, %p948_p3 }
  0x1d   : > { %956 = shalt.err (!%p953_p7)
}
  0x1e   : > { %s957_s10 = scalar_lea.vmem %s1206_s26, 2304  ;;  %p965_p1 = scmp.lt.s32.totalorder %s1206_s26, %s1206_s26 }
  0x1f   : > { %p958_p9 = scmp.ne.s32.totalorder %s1206_s26, %s957_s10  ;;  %p966_p12 = scmp.lt.s32.totalorder %s957_s10, %s957_s10 }
  0x21   : > { %p960_p10 = pnand %p958_p9, %p946_p13  ;;  %p967_p0 = por %p966_p12, %p965_p1 }
  0x23   : > { %p961_p6 = pneg %p960_p10 }
  0x25   : > { %p968_p4 = pnand %p967_p0, %p961_p6 }
  0x27   : > { %971 = shalt.err (!%p968_p4)
}
  0x28   : > { %s1120_s11 = smov 64   ;;  %s1121_s18 = smov 4  }
  0x29   : > { %840 = dma.hbm_to_vmem [thread:$0]  (!%p1213_p11), %s1444_s1, 2304, %s1206_s26, [#allocation6], %s1120_s11, %s1120_s11, %s1121_s18  }
  0x2a   : > { %s972_s4 = scalar_lea.hbm %s1445_s2, 16 }
  0x2b   : > { %p973_p1 = scmp.ne.s32.totalorder %s1445_s2, %s972_s4  ;;  %p979_p10 = scmp.lt.u32.totalorder %s972_s4, %s1445_s2 }
  0x2d   : > { %p975_p4 = pnand %p973_p1, %p946_p13 }
  0x2f   : > { %p976_p6 = pneg %p975_p4 }
  0x31   : > { %p981_p3 = pnand %p979_p10, %p976_p6 }
  0x33   : > { %984 = shalt.err (!%p981_p3)
}
  0x34   : > { %s985_s26 = scalar_lea.vmem %s1217_s29, 16  ;;  %s992_s9 = scalar_lea.vmem %s1217_s29, 32 }
  0x35   : > { %p986_p5 = scmp.ne.s32.totalorder %s1217_s29, %s985_s26  ;;  %p993_p12 = scmp.lt.s32.totalorder %s1217_s29, %s1217_s29 }
  0x36   : > { %p994_p0 = scmp.lt.s32.totalorder %s992_s9, %s985_s26 }
  0x37   : > { %p988_p7 = pnand %p986_p5, %p946_p13 }
  0x38   : > { %p995_p1 = por %p994_p0, %p993_p12 }
  0x39   : > { %p989_p9 = pneg %p988_p7 }
  0x3b   : > { %p996_p4 = pnand %p995_p1, %p989_p9 }
  0x3d   : > { %999 = shalt.err (!%p996_p4)
}
  0x3e   : > { %843 = dma.hbm_to_vmem [thread:$0]  (!%p1213_p11), %s1445_s2, 16, %s1217_s29, [#allocation6]  }
  0x3f   : > { %s32_s25 = sadd.s32 1, %s1112_s16  ;;  %s39_s28 = sadd.s32 1, %s1104_s14 }
  0x40   : > { %p34_p13 = scmp.ge.s32.totalorder %s32_s25, 2  ;;  %p46_p6 = scmp.ne.s32.totalorder %s1104_s14, %s1100_s13 }
  0x41   : > { %p47_p10 = scmp.eq.s32.totalorder %s1116_s17, 0  ;;  %p854_p3 = scmp.lt.s32.totalorder %s1116_s17, 2 }
  0x42   : > { %s1470_s25 = smov (%p34_p13, %s32_s25), 0  ;;  %p1285_p7 = por %p1186_p2, %p46_p6 }
  0x43   : > { %p48_p5 = por %p47_p10, %p46_p6  ;;  %s36_s30 = ssub.s32 %s1112_s16, %s1470_s25 }
  0x44   : > { %s1457_s27 = scalar_select %p1285_p7, 1, 0 }
  0x45   : > { %s184_s4 = sand.u32 1, %s1104_s14   ;;  %p37_p9 = scmp.eq.s32.totalorder %s36_s30, 0 }
  0x46   : > { %s822_s29 = smul.u32 12, %s184_s4  ;;  %p1292_p11 = pnand %p854_p3, %p48_p5 }
  0x47   : > { %s1297_s6 = scalar_select %p37_p9, %s1104_s14, %s39_s28  }
  0x48   : > { %s823_s7 = smul.u32 192, %s1112_s16  ;;  %s188_s8 = scalar_lea.vmem [#allocation2], %s822_s29 }
  0x49   : > { %s195_s26 = sshll.u32 %s188_s8, 4  ;;  %s1307_s19 = scalar_lea.sflag [#allocation3], %s184_s4  ;;  %s1305_s26 = int_to_ptr.vmem [resolvable:$true] %s195_s26 }
  0x4a   : > { %s1303_s10 = scalar_lea.hbm %s1443_s0, %s823_s7  ;;  %p1002_p12 = pneg %p1292_p11 }
  0x4b   : > { %s1000_s30 = scalar_lea.hbm %s1303_s10, 192  ;;  %s1005_s7 = scalar_lea.hbm %s1443_s0, 384 }
  0x4c   : > { %p1001_p2 = scmp.ne.s32.totalorder %s1303_s10, %s1000_s30  ;;  %p1006_p4 = scmp.lt.u32.totalorder %s1303_s10, %s1443_s0 }
  0x4d   : > { %p1007_p13 = scmp.lt.u32.totalorder %s1005_s7, %s1000_s30  ;;  %p1009_p10 = scmp.lt.u32.totalorder %s1000_s30, %s1303_s10 }
  0x4e   : > { %p1003_p0 = pnand %p1002_p12, %p1001_p2 }
  0x4f   : > { %p1008_p6 = por %p1007_p13, %p1006_p4 }
  0x50   : > { %p1004_p1 = pneg %p1003_p0 }
  0x51   : > { %p1010_p3 = por %p1009_p10, %p1008_p6 }
  0x53   : > { %p1011_p5 = pnand %p1010_p3, %p1004_p1 }
  0x55   : > { %1014 = shalt.err (!%p1011_p5)
}
  0x56   : > { %s1015_s4 = scalar_lea.vmem %s1305_s26, 192  ;;  %s1122_s9 = smov [#allocation2]  }
  0x57   : > { %p1016_p9 = scmp.ne.s32.totalorder %s1305_s26, %s1015_s4  ;;  %s1020_s28 = sshll.u32 %s1122_s9, 4  ;;  %s1021_s28 = int_to_ptr.vmem [resolvable:$false] %s1020_s28 }
  0x58   : > { %s1022_s29 = scalar_lea.vmem %s1021_s28, 384  ;;  %p1023_p7 = scmp.lt.s32.totalorder %s1305_s26, %s1021_s28 }
  0x59   : > { %p1018_p2 = pnand %p1016_p9, %p1002_p12  ;;  %p1024_p4 = scmp.lt.s32.totalorder %s1022_s29, %s1015_s4 }
  0x5b   : > { %p1019_p0 = pneg %p1018_p2  ;;  %p1025_p13 = por %p1024_p4, %p1023_p7 }
  0x5d   : > { %p1026_p6 = pnand %p1025_p13, %p1019_p0 }
  0x5f   : > { %1029 = shalt.err (!%p1026_p6)
}
  0x60   : > { %847 = dma.hbm_to_vmem [thread:$0]  (!%p1292_p11), %s1303_s10, 192, %s1305_s26, %s1307_s19, %s1120_s11, %s1120_s11, %s1121_s18  }
  0x61   : > { %207 = sbr.rel (%p1202_p8) target bundleno = 421 (0x1a5), region = 32  ;;  %s1341_s30 = sand.u32 (!%p1202_p8), 1, %s1100_s13  }
  0x62   : > { %s824_s7 = smul.u32 (!%p1202_p8), 12, %s1341_s30  ;;  %s210_s8 = scalar_lea.sflag (!%p1202_p8), [#allocation3], %s1341_s30 }
  0x63   : > { %p1459_p7 = scmp.ne.s32.totalorder (!%p1202_p8), %s1453_s22, 0 }
  0x64   : > { %s1345_s21 = scalar_lea.vmem (!%p1202_p8), [#allocation2], %s824_s7 }
  0x68   : > { %1083 = dma.done.wait (%p1459_p7), %s210_s8, 192  }
  0x69   : > { %1085 = vsyncadd (%p1459_p7), %s210_s8, 4294967104  ;;  %p1460_p11 = scmp.ne.s32.totalorder %s1451_s20, 0 }
  0x6b   : > { %1087 = dma.done.wait (%p1460_p11), [#allocation6], 2320  }
  0x6c   : > { %1089 = vsyncadd (%p1460_p11), [#allocation6], 4294964976  ;;  %v1123_v0 = vmov 0.0   ;;  %vm1124_vm0 = vmmov 0   ;;  %v914_v1 = vld [vmem:[#allocation5 + $0x30] sm:$0xff]   ;;  %v915_v2 = vld [vmem:[#allocation5] sm:$0xff]  }
  0x6d   : > { %774 = vmatprep.subr.bf16.mxu0 %v1123_v0  ;;  %790 = vmatprep.subr.bf16.mxu1 %v1123_v0  ;;  %v916_v3 = vld [vmem:[#allocation5 + $0x38] sm:$0xff]   ;;  %v917_v4 = vld [vmem:[#allocation5 + $0x8] sm:$0xff]   ;;  %v918_v5 = vld [vmem:[#allocation5 + $0x40] sm:$0xff]   ;;  %vm282_vm1 = vcmask 1045504   ;;  %vm322_vm2 = vcmask 785408   ;;  %s714_s20 = sshll.u32 %s1341_s30, 3 }
  0x6e   : > { %786 = vmatprep.mubr.msk.bf16.mxu0 %vm1124_vm0, %v1123_v0  ;;  %802 = vmatprep.mubr.msk.bf16.mxu1 %vm1124_vm0, %v1123_v0  ;;  %v919_v6 = vld [vmem:[#allocation5 + $0x10] sm:$0xff]   ;;  %v920_v7 = vld [vmem:[#allocation5 + $0x48] sm:$0xff]   ;;  %v921_v8 = vld [vmem:[#allocation5 + $0x18] sm:$0xff]   ;;  %s752_s22 = sshll.u32 %s1108_s15, 7  ;;  %s243_s24 = scalar_lea.vmem [#allocation8], %s714_s20  ;;  %vm580_vm3 = vcmask 257024  }
  0x6f   : > { %775 = vmatpush3.bf16.msra.mxu0 %v914_v1  ;;  %791 = vmatpush3.bf16.msra.mxu1 %v915_v2  ;;  %v246_v9 = vld [vmem:[%s1345_s21 + $0x4] sm:$0xf]  ;;  %v259_v10 = vld [vmem:[%s1345_s21] sm:$0xc]  ;;  %v923_v14 = vld [vmem:[#allocation5 + $0x20] sm:$0xff]   ;;  %s598_s11 = sshll.u32 %s243_s24, 4  ;;  %s1392_s26 = scalar_lea.hbm %s1446_s3, %s752_s22  ;;  %s1394_s11 = int_to_ptr.vmem [resolvable:$true] %s598_s11 }
  0x70   : > { %776 = vmatprep.subr.bf16.mxu0 %v1123_v0  ;;  %792 = vmatprep.subr.bf16.mxu1 %v1123_v0  ;;  %v922_v11 = vld [vmem:[#allocation5 + $0x50] sm:$0xff]   ;;  %v715_v13 = vcombine.low %v259_v10, %v246_v9  ;;  %v924_v15 = vld [vmem:[#allocation5 + $0x58] sm:$0xff]   ;;  %v925_v18 = vld [vmem:[#allocation5 + $0x28] sm:$0xff]   ;;  %s584_s15 = scalar_lea.sflag [#allocation4], %s1341_s30  ;;  %s1030_s10 = scalar_lea.vmem %s1394_s11, 128 }
  0x71   : > { %v927_v12 = vld [vmem:[%s1345_s21 + $0x8] ss:$0 sps:$4 sm:$0x33]   ;;  %v245_v19 = vld [vmem:[%s1345_s21] sm:$0xf]  ;;  %v929_v22 = vld [vmem:[#allocation5 + $0x60] sm:$0xff]   ;;  %p1031_p8 = scmp.ne.s32.totalorder %s1394_s11, %s1030_s10 }
  0x72   : > { %v283_v16 = vrot.slane %v715_v13, 2  ;;  %v284_v17 = vrot.slane %v927_v12, 2  ;;  %v724_v21 = vcombine.low %v245_v19, %v246_v9  ;;  %v930_v23 = vld [vmem:[#allocation5 + $0x68] sm:$0xff]   ;;  %v931_v24 = vld [vmem:[#allocation5 + $0x70] sm:$0xff]   ;;  %v932_v25 = vld [vmem:[#allocation5 + $0x78] sm:$0xff]   ;;  %p1461_p12 = scmp.ne.s32.totalorder %s1457_s27, 0 }
  0x73   : > { %777 = vmatpush3.bf16.msra.mxu0 %v916_v3  ;;  %793 = vmatpush3.bf16.msra.mxu1 %v917_v4  ;;  %v933_v26 = vld [vmem:[#allocation5 + $0x80] sm:$0xff]   ;;  %v934_v27 = vld [vmem:[#allocation5 + $0x88] sm:$0xff]   ;;  %v450_v28 = vld [vmem:[%s1345_s21 + $0x8] sm:$0xf]  ;;  %s1125_s19 = smov [#allocation8]  }
  0x74   : > { %778 = vmatprep.subr.bf16.mxu0 %v1123_v0  ;;  %794 = vmatprep.subr.bf16.mxu1 %v1123_v0  ;;  %v285_v20 = vsel %vm282_vm1, %v283_v16, %v284_v17  ;;  %v732_v29 = vcombine.low %v246_v9, %v450_v28  ;;  %v740_v41 = vld [vmem:[#allocation7] ss:$0 sm:$0xff]  ;;  %p1032_p1 = pnand %p1031_p8, %p1461_p12  ;;  %s1034_s4 = sshll.u32 %s1125_s19, 4  ;;  %s1035_s4 = int_to_ptr.vmem [resolvable:$false] %s1034_s4 }
  0x75   : > { %s1036_s9 = scalar_lea.vmem %s1035_s4, 256  ;;  %p1037_p3 = scmp.lt.s32.totalorder %s1394_s11, %s1035_s4 }
  0x76   : > { %p1033_p10 = pneg %p1032_p1  ;;  %p1038_p5 = scmp.lt.s32.totalorder %s1036_s9, %s1030_s10 }
  0x77   : > { %779 = vmatpush3.bf16.msra.mxu0 %v918_v5  ;;  %795 = vmatpush3.bf16.msra.mxu1 %v919_v6 }
  0x78   : > { %780 = vmatprep.subr.bf16.mxu0 %v1123_v0  ;;  %796 = vmatprep.subr.bf16.mxu1 %v1123_v0  ;;  %p1039_p9 = por %p1038_p5, %p1037_p3 }
  0x7a   : > { %p1040_p2 = pnand %p1039_p9, %p1033_p10 }
  0x7b   : > { %781 = vmatpush3.bf16.msra.mxu0 %v920_v7  ;;  %797 = vmatpush3.bf16.msra.mxu1 %v921_v8 }
  0x7c   : > { %782 = vmatprep.subr.bf16.mxu0 %v1123_v0  ;;  %798 = vmatprep.subr.bf16.mxu1 %v1123_v0 }
  0x7f   : > { %783 = vmatpush3.bf16.msra.mxu0 %v922_v11  ;;  %799 = vmatpush3.bf16.msra.mxu1 %v923_v14 }
  0x80   : > { %784 = vmatprep.subr.bf16.mxu0 %v1123_v0  ;;  %800 = vmatprep.subr.bf16.mxu1 %v1123_v0 }
  0x83   : > { %785 = vmatpush3.bf16.msra.mxu0 %v924_v15  ;;  %801 = vmatpush3.bf16.msra.mxu1 %v925_v18 }
  0x84   : > { %806 = vmatprep.subr.bf16.mxu0 %v1123_v0 }
  0x86   : > { %787 = vmatmul.mubr.msk.bf16.vlgmr.msra.gmra.mrb[0].mxu0 %vm322_vm2, %v285_v20  ;;  %803 = vmatmul.mubr.msk.bf16.vlgmr.msra.gmra.mrb[0].mxu1 %vm322_vm2, %v724_v21 }
  0x87   : > { %807 = vmatpush3.bf16.msra.mxu0 %v929_v22  ;;  %818 = vmatprep.mubr.msk.bf16.mxu0 %vm1124_vm0, %v1123_v0 }
  0x88   : > { %808 = vmatprep.subr.bf16.mxu0 %v1123_v0 }
  0x8b   : > { %809 = vmatpush3.bf16.msra.mxu0 %v930_v23 }
  0x8c   : > { %810 = vmatprep.subr.bf16.mxu0 %v1123_v0 }
  0x8f   : > { %811 = vmatpush3.bf16.msra.mxu0 %v931_v24 }
  0x90   : > { %812 = vmatprep.subr.bf16.mxu0 %v1123_v0 }
  0x93   : > { %813 = vmatpush3.bf16.msra.mxu0 %v932_v25 }
  0x94   : > { %814 = vmatprep.subr.bf16.mxu0 %v1123_v0 }
  0x97   : > { %815 = vmatpush3.bf16.msra.mxu0 %v933_v26 }
  0x98   : > { %816 = vmatprep.subr.bf16.mxu0 %v1123_v0 }
  0x9b   : > { %817 = vmatpush3.bf16.msra.mxu0 %v934_v27 }
  0x9e   : > { %819 = vmatmul.mubr.msk.bf16.vlgmr.msra.gmra.mrb[4].mxu0 %vm322_vm2, %v732_v29 }
 0x159   : > { %v360_v30 = vpop.f32.mrb[0].mxu0  ;;  %v443_v31 = vpop.f32.mrb[0].mxu1 }
 0x15a   : > { %v788_v32 = vpop.f32.mrb[1].mxu0  ;;  %v444_v33 = vadd.f32 %v443_v31, %v360_v30  ;;  %v804_v34 = vpop.f32.mrb[1].mxu1 }
 0x15b   : > { %v363_v35 = vpop.f32.mrb[2].mxu0  ;;  %v446_v36 = vpop.f32.mrb[2].mxu1 }
 0x15c   : > { %v789_v37 = vpop.f32.mrb[3].mxu0  ;;  %v447_v38 = vadd.f32 %v446_v36, %v363_v35  ;;  %v805_v39 = vpop.f32.mrb[3].mxu1 }
 0x171   : > { %v540_v40 = vpop.f32.mrb[4].mxu0 }
 0x172   : > { %v547_v42 = vadd.f32 %v540_v40, %v444_v33  ;;  %v820_v43 = vpop.f32.mrb[5].mxu0 }
 0x173   : > { %v543_v44 = vpop.f32.mrb[6].mxu0 }
 0x174   : > { %v556_v45 = vadd.f32 %v740_v41, %v547_v42  ;;  %v548_v46 = vadd.f32 %v543_v44, %v447_v38  ;;  %v821_v47 = vpop.f32.mrb[7].mxu0 }
 0x176   : > { %v741_v48 = vmul.f32 -1.442695, %v556_v45  ;;  %v557_v49 = vadd.f32 %v740_v41, %v548_v46 }
 0x178   : > { %936 = vpow2.f32 %v741_v48  ;;  %v742_v50 = vmul.f32 -1.442695, %v557_v49 }
 0x17a   : > { %938 = vpow2.f32 %v742_v50 }
 0x182   : > { %v937_v51 = vpop.eup %936 }
 0x183   : > { %v564_v52 = vadd.f32 1.0, %v937_v51 }
 0x184   : > { %v939_v53 = vpop.eup %938 }
 0x185   : > { %940 = vrcp.f32 %v564_v52  ;;  %v565_v54 = vadd.f32 1.0, %v939_v53 }
 0x187   : > { %942 = vrcp.f32 %v565_v54 }
 0x18f   : > { %v941_v55 = vpop.eup %940 }
 0x190   : > { %v570_v56 = vmul.f32 %v941_v55, %v556_v45 }
 0x191   : > { %v943_v57 = vpop.eup %942 }
 0x192   : > { %v750_v58 = vpack.c.bf16 %v570_v56, %v570_v56  ;;  %v571_v59 = vmul.f32 %v943_v57, %v557_v49 }
 0x194   : > { %581 = vst.msk [vmem:[%s243_s24] sm:$0xf] %vm580_vm3, %v750_v58  ;;  %v751_v60 = vpack.c.bf16 %v571_v59, %v571_v59 }
 0x196   : > { %582 = vst.msk [vmem:[%s243_s24 + $0x4] sm:$0xf] %vm580_vm3, %v751_v60 }
 0x197   : > { %1043 = shalt.err (!%p1040_p2)
}
 0x198   : > { %s1044_s28 = scalar_lea.hbm %s1392_s26, 128  ;;  %s1048_s8 = scalar_lea.hbm %s1446_s3, 256 }
 0x199   : > { %p1045_p0 = scmp.ne.s32.totalorder %s1392_s26, %s1044_s28  ;;  %p1049_p6 = scmp.lt.u32.totalorder %s1392_s26, %s1446_s3 }
 0x19a   : > { %p1050_p7 = scmp.lt.u32.totalorder %s1048_s8, %s1044_s28  ;;  %p1052_p8 = scmp.lt.u32.totalorder %s1044_s28, %s1392_s26 }
 0x19b   : > { %p1046_p4 = pnand %p1045_p0, %p1461_p12 }
 0x19c   : > { %p1051_p11 = por %p1050_p7, %p1049_p6 }
 0x19d   : > { %p1047_p13 = pneg %p1046_p4 }
 0x19e   : > { %p1053_p1 = por %p1052_p8, %p1051_p11 }
 0x1a0   : > { %p1054_p10 = pnand %p1053_p1, %p1047_p13 }
 0x1a2   : > { %1057 = shalt.err (!%p1054_p10)
}
 0x1a3   : > { %s1126_s22 = smov 64   ;;  %s1127_s24 = smov 4  }
 0x1a4   : > { %835 = dma.vmem_to_hbm [thread:$0]  (%p1461_p12), %s1394_s11, 128, %s1392_s26, %s584_s15, %s1126_s22, %s1126_s22, %s1127_s24  }
 0x1a5 PF: > { %s613_s18 = sand.u32 1, %s1096_s12   ;;  %p1462_p3 = scmp.ne.s32.totalorder %s1454_s23, 0 }
 0x1a6   : > { %p1463_p5 = scmp.ge.s32.totalorder %s1116_s17, 2  ;;  %s614_s5 = scalar_lea.sflag [#allocation4], %s613_s18 }
 0x1a8   : > { %p849_p9 = pnand %p1463_p5, %p1462_p3 }
 0x1aa   : > { %1091 = dma.done.wait (!%p849_p9), %s614_s5, 128  }
 0x1ab   : > { %1093 = vsyncadd (!%p849_p9), %s614_s5, 4294967168  ;;  %s20_s17 = sadd.s32 1, %s1116_s17   ;;  %s1464_s12 = smov %s1100_s13 }
 0x1ac   : > { %p17_p2 = scmp.ge.s32.totalorder %s20_s17, 4   ;;  %s1465_s13 = smov %s1104_s14 }
 0x1ad   : > { %s1466_s14 = smov %s1297_s6  ;;  %s1467_s15 = smov %s1112_s16 }
 0x1ae   : > { %s1468_s16 = smov %s1470_s25  ;;  %19 = sbr.rel (!%p17_p2) target bundleno = 7 (0x7), region = 89 }
 0x1b5   :  { %619 = vsyncpa [#allocation3], 1 }
 0x1b6   :  { %621 = vsyncpa [#allocation3 + $0x1], 1 }
 0x1b7   :  { %622 = vsyncpa [#allocation6], 1 }
 0x1b8   :  { %623 = vsyncpa [#allocation4], 1 }
 0x1b9   :  { %625 = vsyncpa [#allocation4 + $0x1], 1 }

// kernel: darkfpn_apply.35
= control target key start
LH: loop header
LB: loop body
LE: loop exit
PB: predicated region body
PF: predicated region fallthrough
CT: control target
= control target key end

     0   :  { %10 = vsyncpa [#allocation3], 0  ;;  %s729_s0 = inlined_call_operand.hbm [shape: bf16[32,64], index: 0, kind: input, shape index: {}]   ;;  %s730_s1 = inlined_call_operand.hbm [shape: bf16[32,32], index: 1, kind: input, shape index: {}]   ;;  %s731_s2 = inlined_call_operand.hbm [shape: bf16[64,64], index: 2, kind: input, shape index: {}]   ;;  %s732_s3 = inlined_call_operand.hbm [shape: bf16[32,64], index: 3, kind: input, shape index: {}]   ;;  %s733_s4 = inlined_call_operand.hbm [shape: f32[1,64], index: 4, kind: input, shape index: {}]   ;;  %s734_s5 = inlined_call_operand.hbm [shape: bf16[32,64], index: 5, kind: output, shape index: {}]  }
   0x1   :  { %11 = vsyncpa [#allocation6], 0 }
   0x2   :  { %12 = vsyncpa [#allocation9], 0 }
   0x3   :  { %13 = vsyncpa [#allocation4], 0  ;;  %s590_s18 = smov [#allocation5]   ;;  %s591_s20 = smov [#allocation8]  }
   0x4   :  { %s31_s19 = sshll.u32 %s590_s18, 4  ;;  %s55_s21 = sshll.u32 %s591_s20, 4  ;;  %s32_s19 = int_to_ptr.vmem [resolvable:$true] %s31_s19  ;;  %s628_s21 = int_to_ptr.vmem [resolvable:$true] %s55_s21 }
   0x5   :  { %s450_s24 = scalar_lea.hbm %s730_s1, 256 }
   0x6   :  { %p451_p0 = scmp.ne.s32.totalorder %s730_s1, %s450_s24  ;;  %p454_p1 = scmp.lt.u32.totalorder %s450_s24, %s730_s1 }
   0x8   :  { %p456_p2 = pnand %p454_p1, %p451_p0 }
   0xa   :  { %459 = shalt.err (!%p456_p2)
}
   0xb   :  { %s460_s29 = scalar_lea.vmem %s32_s19, 256  ;;  %p465_p4 = scmp.lt.s32.totalorder %s32_s19, %s32_s19 }
   0xc   :  { %p461_p3 = scmp.ne.s32.totalorder %s32_s19, %s460_s29  ;;  %p466_p5 = scmp.lt.s32.totalorder %s460_s29, %s460_s29 }
   0xe   :  { %p467_p6 = por %p466_p5, %p465_p4 }
  0x10   :  { %p468_p7 = pnand %p467_p6, %p461_p3 }
  0x12   :  { %471 = shalt.err (!%p468_p7)
}
  0x13   :  { %s592_s30 = smov 64   ;;  %s593_s6 = smov 4  }
  0x14   :  { %37 = dma.hbm_to_vmem [thread:$0]  %s730_s1, 256, %s32_s19, [#allocation6], %s592_s30, %s592_s30, %s593_s6  }
  0x15   :  { %s472_s11 = scalar_lea.hbm %s732_s3, 256 }
  0x16   :  { %p473_p8 = scmp.ne.s32.totalorder %s732_s3, %s472_s11  ;;  %p476_p9 = scmp.lt.u32.totalorder %s472_s11, %s732_s3 }
  0x18   :  { %p478_p10 = pnand %p476_p9, %p473_p8 }
  0x1a   :  { %481 = shalt.err (!%p478_p10)
}
  0x1b   :  { %s482_s16 = scalar_lea.vmem %s628_s21, 256  ;;  %p487_p12 = scmp.lt.s32.totalorder %s628_s21, %s628_s21 }
  0x1c   :  { %p483_p11 = scmp.ne.s32.totalorder %s628_s21, %s482_s16  ;;  %p488_p13 = scmp.lt.s32.totalorder %s482_s16, %s482_s16 }
  0x1e   :  { %p489_p0 = por %p488_p13, %p487_p12 }
  0x20   :  { %p490_p1 = pnand %p489_p0, %p483_p11 }
  0x22   :  { %493 = shalt.err (!%p490_p1)
}
  0x23   :  { %61 = dma.hbm_to_vmem [thread:$0]  %s732_s3, 256, %s628_s21, [#allocation9], %s592_s30, %s592_s30, %s593_s6  }
  0x24   :  { %s594_s18 = smov [#allocation2]   ;;  %s595_s20 = smov [#allocation7]  }
  0x25   :  { %s19_s19 = sshll.u32 %s594_s18, 4  ;;  %s43_s22 = sshll.u32 %s595_s20, 4  ;;  %s20_s19 = int_to_ptr.vmem [resolvable:$true] %s19_s19  ;;  %s665_s22 = int_to_ptr.vmem [resolvable:$true] %s43_s22 }
  0x26   :  { %s494_s25 = scalar_lea.hbm %s729_s0, 256 }
  0x27   :  { %p495_p2 = scmp.ne.s32.totalorder %s729_s0, %s494_s25  ;;  %p498_p3 = scmp.lt.u32.totalorder %s494_s25, %s729_s0 }
  0x29   :  { %p500_p4 = pnand %p498_p3, %p495_p2 }
  0x2b   :  { %503 = shalt.err (!%p500_p4)
}
  0x2c   :  { %s504_s3 = scalar_lea.vmem %s20_s19, 256  ;;  %p509_p6 = scmp.lt.s32.totalorder %s20_s19, %s20_s19 }
  0x2d   :  { %p505_p5 = scmp.ne.s32.totalorder %s20_s19, %s504_s3  ;;  %p510_p7 = scmp.lt.s32.totalorder %s504_s3, %s504_s3 }
  0x2f   :  { %p511_p8 = por %p510_p7, %p509_p6 }
  0x31   :  { %p512_p9 = pnand %p511_p8, %p505_p5 }
  0x33   :  { %515 = shalt.err (!%p512_p9)
}
  0x34   :  { %25 = dma.hbm_to_vmem [thread:$0]  %s729_s0, 256, %s20_s19, [#allocation3], %s592_s30, %s592_s30, %s593_s6  }
  0x35   :  { %s516_s10 = scalar_lea.hbm %s731_s2, 512 }
  0x36   :  { %p517_p10 = scmp.ne.s32.totalorder %s731_s2, %s516_s10  ;;  %p520_p11 = scmp.lt.u32.totalorder %s516_s10, %s731_s2 }
  0x38   :  { %p522_p12 = pnand %p520_p11, %p517_p10 }
  0x3a   :  { %525 = shalt.err (!%p522_p12)
}
  0x3b   :  { %s526_s15 = scalar_lea.vmem %s665_s22, 512  ;;  %p531_p0 = scmp.lt.s32.totalorder %s665_s22, %s665_s22 }
  0x3c   :  { %p527_p13 = scmp.ne.s32.totalorder %s665_s22, %s526_s15  ;;  %p532_p1 = scmp.lt.s32.totalorder %s526_s15, %s526_s15 }
  0x3e   :  { %p533_p2 = por %p532_p1, %p531_p0 }
  0x40   :  { %p534_p3 = pnand %p533_p2, %p527_p13 }
  0x42   :  { %537 = shalt.err (!%p534_p3)
}
  0x43   :  { %49 = dma.hbm_to_vmem [thread:$0]  %s731_s2, 512, %s665_s22, [#allocation6], %s592_s30, %s592_s30, %s593_s6  }
  0x44   :  { %s596_s1 = smov [#allocation10]   ;;  %s538_s20 = scalar_lea.hbm %s733_s4, 16 }
  0x45   :  { %s68_s17 = sshll.u32 %s596_s1, 4  ;;  %p539_p4 = scmp.ne.s32.totalorder %s733_s4, %s538_s20  ;;  %s69_s17 = int_to_ptr.vmem [resolvable:$true] %s68_s17 }
  0x46   :  { %p542_p5 = scmp.lt.u32.totalorder %s538_s20, %s733_s4 }
  0x48   :  { %p544_p6 = pnand %p542_p5, %p539_p4 }
  0x4a   :  { %547 = shalt.err (!%p544_p6)
}
  0x4b   :  { %s548_s27 = scalar_lea.vmem %s69_s17, 16  ;;  %s552_s2 = scalar_lea.vmem %s69_s17, 32 }
  0x4c   :  { %p549_p7 = scmp.ne.s32.totalorder %s69_s17, %s548_s27  ;;  %p553_p8 = scmp.lt.s32.totalorder %s69_s17, %s69_s17 }
  0x4d   :  { %p554_p9 = scmp.lt.s32.totalorder %s552_s2, %s548_s27 }
  0x4f   :  { %p555_p10 = por %p554_p9, %p553_p8 }
  0x51   :  { %p556_p11 = pnand %p555_p10, %p549_p7 }
  0x53   :  { %559 = shalt.err (!%p556_p11)
}
  0x54   :  { %71 = dma.hbm_to_vmem [thread:$0]  %s733_s4, 16, %s69_s17, [#allocation9]  }
  0x55   :  { %582 = dma.done.wait [#allocation3], 256  }
  0x56   :  { %583 = vsyncadd [#allocation3], 4294967040 }
  0x57   :  { %584 = dma.done.wait [#allocation6], 768  }
  0x58   :  { %585 = vsyncadd [#allocation6], 4294966528 }
  0x59   :  { %586 = dma.done.wait [#allocation9], 272  }
  0x5a   :  { %587 = vsyncadd [#allocation9], 4294967024  ;;  %v424_v0 = vld [vmem:[#allocation7] sm:$0xff]   ;;  %v425_v1 = vld [vmem:[#allocation7 + $0x8] sm:$0xff]   ;;  %vm130_vm0 = vcmask 261120   ;;  %vm220_vm1 = vcmask 523264  }
  0x5b   :  { %400 = vmatprep.subr.bf16.mxu0 %v424_v0  ;;  %v426_v2 = vld [vmem:[#allocation8] sm:$0xff]   ;;  %v427_v3 = vld [vmem:[#allocation7 + $0x10] sm:$0xff]   ;;  %v428_v4 = vld [vmem:[#allocation8 + $0x8] sm:$0xff]   ;;  %vm331_vm2 = vcmask 519168   ;;  %s597_s4 = smov [#allocation11]  }
  0x5c   :  { %401 = vmatpush3.bf16.msra.mxu0 %v424_v0  ;;  %392 = vmatprep.subr.bf16.mxu1 %v426_v2  ;;  %v429_v5 = vld [vmem:[#allocation5] sm:$0xff]   ;;  %v430_v6 = vld [vmem:[#allocation7 + $0x18] sm:$0xff]   ;;  %v432_v8 = vld [vmem:[#allocation2] sm:$0xff]   ;;  %s341_s29 = sshll.u32 %s597_s4, 4  ;;  %s342_s29 = int_to_ptr.vmem [resolvable:$true] %s341_s29 }
  0x5d   :  { %402 = vmatprep.subr.bf16.mxu0 %v425_v1  ;;  %393 = vmatpush3.bf16.msra.mxu1 %v426_v2  ;;  %v431_v7 = vld [vmem:[#allocation5 + $0x8] sm:$0xff]   ;;  %v433_v9 = vld [vmem:[#allocation2 + $0x8] sm:$0xff]   ;;  %v369_v15 = vld [vmem:[#allocation10] ss:$0 sm:$0xff]  ;;  %s560_s3 = scalar_lea.vmem %s342_s29, 256  ;;  %p565_p13 = scmp.lt.s32.totalorder %s342_s29, %s342_s29 }
  0x5e   :  { %394 = vmatprep.subr.bf16.mxu1 %v428_v4  ;;  %396 = vmatprep.mubr.msk.bf16.mxu1 %vm130_vm0, %v429_v5  ;;  %p561_p12 = scmp.ne.s32.totalorder %s342_s29, %s560_s3  ;;  %p566_p0 = scmp.lt.s32.totalorder %s560_s3, %s560_s3 }
  0x5f   :  { %408 = vmatprep.mubr.msk.bf16.mxu0 %vm220_vm1, %v432_v8 }
  0x60   :  { %403 = vmatpush3.bf16.msra.mxu0 %v425_v1  ;;  %p567_p1 = por %p566_p0, %p565_p13 }
  0x61   :  { %404 = vmatprep.subr.bf16.mxu0 %v427_v3  ;;  %395 = vmatpush3.bf16.msra.mxu1 %v428_v4 }
  0x62   :  { %p568_p2 = pnand %p567_p1, %p561_p12 }
  0x64   :  { %405 = vmatpush3.bf16.msra.mxu0 %v427_v3  ;;  %397 = vmatmul.mubr.msk.bf16.vlgmr.msra.gmra.mrb[0].mxu1 %vm130_vm0, %v431_v7 }
  0x65   :  { %406 = vmatprep.subr.bf16.mxu0 %v430_v6 }
  0x68   :  { %407 = vmatpush3.bf16.msra.mxu0 %v430_v6 }
  0x6b   :  { %409 = vmatmul.mubr.msk.bf16.vlgmr.msra.gmra.mrb[0].mxu0 %vm220_vm1, %v433_v9 }
 0x137   :  { %v398_v10 = vpop.f32.mrb[0].mxu1 }
 0x138   :  { %v171_v11 = vpop.f32.mrb[1].mxu1 }
 0x139   :  { %v399_v12 = vpop.f32.mrb[2].mxu1 }
 0x13a   :  { %v174_v13 = vpop.f32.mrb[3].mxu1 }
 0x13e   :  { %v410_v14 = vpop.f32.mrb[0].mxu0 }
 0x13f   :  { %v270_v16 = vadd.f32 %v410_v14, %v398_v10  ;;  %v261_v17 = vpop.f32.mrb[1].mxu0 }
 0x140   :  { %v262_v18 = vadd.f32 %v261_v17, %v171_v11  ;;  %v411_v19 = vpop.f32.mrb[2].mxu0 }
 0x141   :  { %v285_v20 = vadd.f32 %v369_v15, %v270_v16  ;;  %v273_v21 = vadd.f32 %v411_v19, %v399_v12  ;;  %v264_v22 = vpop.f32.mrb[3].mxu0 }
 0x142   :  { %v283_v23 = vadd.f32 %v369_v15, %v262_v18  ;;  %v265_v24 = vadd.f32 %v264_v22, %v174_v13 }
 0x143   :  { %v372_v25 = vmul.f32 -1.442695, %v285_v20  ;;  %v286_v26 = vadd.f32 %v369_v15, %v273_v21 }
 0x144   :  { %v370_v27 = vmul.f32 -1.442695, %v283_v23  ;;  %v284_v28 = vadd.f32 %v369_v15, %v265_v24 }
 0x145   :  { %434 = vpow2.f32 %v372_v25  ;;  %v373_v29 = vmul.f32 -1.442695, %v286_v26 }
 0x146   :  { %436 = vpow2.f32 %v370_v27  ;;  %v371_v30 = vmul.f32 -1.442695, %v284_v28 }
 0x147   :  { %438 = vpow2.f32 %v373_v29 }
 0x148   :  { %440 = vpow2.f32 %v371_v30 }
 0x14f   :  { %v435_v31 = vpop.eup %434 }
 0x150   :  { %v437_v32 = vpop.eup %436  ;;  %v301_v33 = vadd.f32 1.0, %v435_v31 }
 0x151   :  { %v439_v34 = vpop.eup %438  ;;  %v299_v35 = vadd.f32 1.0, %v437_v32 }
 0x152   :  { %v441_v36 = vpop.eup %440  ;;  %442 = vrcp.f32 %v301_v33  ;;  %v302_v37 = vadd.f32 1.0, %v439_v34 }
 0x153   :  { %444 = vrcp.f32 %v299_v35  ;;  %v300_v38 = vadd.f32 1.0, %v441_v36 }
 0x154   :  { %446 = vrcp.f32 %v302_v37 }
 0x155   :  { %448 = vrcp.f32 %v300_v38 }
 0x15c   :  { %v443_v39 = vpop.eup %442 }
 0x15d   :  { %v445_v40 = vpop.eup %444  ;;  %v313_v41 = vmul.f32 %v443_v39, %v285_v20 }
 0x15e   :  { %v447_v42 = vpop.eup %446  ;;  %v311_v43 = vmul.f32 %v445_v40, %v283_v23 }
 0x15f   :  { %v449_v44 = vpop.eup %448  ;;  %v380_v45 = vpack.c.bf16 %v313_v41, %v313_v41  ;;  %v314_v46 = vmul.f32 %v447_v42, %v286_v26 }
 0x160   :  { %v378_v47 = vpack.c.bf16 %v311_v43, %v311_v43  ;;  %v312_v48 = vmul.f32 %v449_v44, %v284_v28 }
 0x161   :  { %v381_v49 = vpack.c.bf16 %v314_v46, %v314_v46  ;;  %334 = vst.msk [vmem:[#allocation11 + $0x8] sm:$0xf] %vm331_vm2, %v380_v45 }
 0x162   :  { %v379_v50 = vpack.c.bf16 %v312_v48, %v312_v48  ;;  %332 = vst.msk [vmem:[#allocation11] sm:$0xf] %vm331_vm2, %v378_v47 }
 0x163   :  { %335 = vst.msk [vmem:[#allocation11 + $0xc] sm:$0xf] %vm331_vm2, %v381_v49 }
 0x164   :  { %333 = vst.msk [vmem:[#allocation11 + $0x4] sm:$0xf] %vm331_vm2, %v379_v50 }
 0x165   :  { %571 = shalt.err (!%p568_p2)
}
 0x166   :  { %s572_s8 = scalar_lea.hbm %s734_s5, 256 }
 0x167   :  { %p573_p3 = scmp.ne.s32.totalorder %s734_s5, %s572_s8  ;;  %p576_p4 = scmp.lt.u32.totalorder %s572_s8, %s734_s5 }
 0x169   :  { %p578_p5 = pnand %p576_p4, %p573_p3 }
 0x16b   :  { %581 = shalt.err (!%p578_p5)
}
 0x16c   :  { %347 = dma.vmem_to_hbm [thread:$0]  %s342_s29, 256, %s734_s5, [#allocation4], %s592_s30, %s592_s30, %s593_s6  }
 0x16d   :  { %588 = dma.done.wait [#allocation4], 256  }
 0x16e   :  { %589 = vsyncadd [#allocation4], 4294967040 }
 0x16f   :  { %351 = vsyncpa [#allocation3], 1 }
 0x170   :  { %352 = vsyncpa [#allocation6], 1 }
 0x171   :  { %353 = vsyncpa [#allocation9], 1 }
 0x172   :  { %354 = vsyncpa [#allocation4], 1 }

</bundles_post_ra>
